<compile_context>
chip_gen: v7x
topology: tpu7x:2x2x1
jax: 0.10.0
libtpu: 0.0.40
codegen_flags: <defaults>
</compile_context>

<pallas_src>
import functools

import jax
import jax.numpy as jnp
from jax.experimental import pallas as pl
from jax.experimental.pallas import tpu as pltpu

D_IN = 784   # 28*28
D_H = 200
D_Z = 10


def vae_forward_kernel(
    x_ref, eps_ref,
    w_enc_ref, b_enc_ref,
    w_heads_ref, b_heads_ref,
    w_dec1_ref, b_dec1_ref,
    w_dec2_ref, b_dec2_ref,
    moments_ref, y_ref,
):
    # h1 = relu(enc_fc(x)) -- x cast to bf16 in-kernel (VPU, hidden under DMA),
    # f32 MXU accumulation, f32 bias/relu.
    x_bf = x_ref[...].astype(jnp.bfloat16)
    h1 = jnp.dot(x_bf, w_enc_ref[...],
                 preferred_element_type=jnp.float32) + b_enc_ref[...]
    h1 = jnp.maximum(h1, 0.0)

    # Fused heads: [mean | logvar] = h1 @ [w_mean | w_var] + [b_mean | b_var].
    heads = jnp.dot(h1.astype(jnp.bfloat16), w_heads_ref[...],
                    preferred_element_type=jnp.float32) + b_heads_ref[...]
    mean = heads[:, :D_Z]
    logvar = heads[:, D_Z:]

    # Reparameterization: var = exp(logvar) = std^2, z = mean + std * eps.
    std = jnp.exp(0.5 * logvar)
    var = std * std
    z = mean + std * eps_ref[...]

    # h2 = relu(dec_fc1(z))
    h2 = jnp.dot(z.astype(jnp.bfloat16), w_dec1_ref[...],
                 preferred_element_type=jnp.float32) + b_dec1_ref[...]
    h2 = jnp.maximum(h2, 0.0)

    # y = sigmoid(dec_fc2(h2)) = 1 / (1 + exp(-logits)); exp and approx
    # reciprocal both land on the EUP slot (free under MXU/DMA).
    logits = jnp.dot(h2.astype(jnp.bfloat16), w_dec2_ref[...],
                     preferred_element_type=jnp.float32) + b_dec2_ref[...]
    y = pl.reciprocal(1.0 + jnp.exp(-logits), approx=True)

    # Two sliced stores into one lane-packed (tb, 2*D_Z) slab: no lane concat.
    moments_ref[:, :D_Z] = mean
    moments_ref[:, D_Z:] = var
    y_ref[...] = y.astype(y_ref.dtype)


@functools.partial(jax.jit, static_argnames=("tb",))
def _vae_forward(x, eps, prepared, tb):
    batch = x.shape[0]
    num_tiles = pl.cdiv(batch, tb)
    padded = num_tiles * tb
    if padded != batch:
        x = jnp.pad(x, ((0, padded - batch), (0, 0)))
        eps = jnp.pad(eps, ((0, padded - batch), (0, 0)))

    def batch_spec(feat):
        return pl.BlockSpec((tb, feat), lambda i: (i, 0))

    def resident_spec(shape):
        # Constant index map -> weights stay VMEM-resident across grid steps.
        return pl.BlockSpec(shape, lambda i: (0, 0))

    matmul_terms = D_IN * D_H + D_H * 2 * D_Z + D_Z * D_H + D_H * D_IN
    cost = pl.CostEstimate(
        flops=2 * padded * matmul_terms,
        transcendentals=padded * (D_Z + D_IN),           # exp(logvar) + sigmoid
        bytes_accessed=(
            padded * D_IN * 4 + padded * D_Z * 4         # x (f32), eps (f32)
            + 2 * matmul_terms                           # bf16 weights
            + 4 * (D_H + 2 * D_Z + D_H + D_IN)           # f32 biases
            + padded * 2 * D_Z * 4                       # moments (f32)
            + padded * D_IN * 2                          # y (bf16)
        ),
    )

    moments, y = pl.pallas_call(
        vae_forward_kernel,
        out_shape=(
            jax.ShapeDtypeStruct((padded, 2 * D_Z), jnp.float32),  # [mean|var]
            jax.ShapeDtypeStruct((padded, D_IN), jnp.bfloat16),    # y
        ),
        grid=(num_tiles,),
        in_specs=[
            batch_spec(D_IN),                  # x (f32, cast in-kernel)
            batch_spec(D_Z),                   # eps
            resident_spec((D_IN, D_H)),        # w_enc (bf16)
            resident_spec((1, D_H)),           # b_enc
            resident_spec((D_H, 2 * D_Z)),     # w_heads (fused mean|var, bf16)
            resident_spec((1, 2 * D_Z)),       # b_heads
            resident_spec((D_Z, D_H)),         # w_dec1 (bf16)
            resident_spec((1, D_H)),           # b_dec1
            resident_spec((D_H, D_IN)),        # w_dec2 (bf16)
            resident_spec((1, D_IN)),          # b_dec2
        ],
        out_specs=(batch_spec(2 * D_Z), batch_spec(D_IN)),
        compiler_params=pltpu.CompilerParams(
            dimension_semantics=("parallel",),
            vmem_limit_bytes=32 << 20,
        ),
        cost_estimate=cost,
    )(
        x, eps,
        prepared["w_enc"], prepared["b_enc"],
        prepared["w_heads"], prepared["b_heads"],
        prepared["w_dec1"], prepared["b_dec1"],
        prepared["w_dec2"], prepared["b_dec2"],
    )

    mean = moments[:batch, :D_Z]
    var = moments[:batch, D_Z:]
    return mean, var, y[:batch]


def pick_tb(batch, tb_max=512):
    # tb must be a multiple of 8 (sublane tiling).  Cap it so the grid has at
    # least 2 steps whenever the batch allows (both v7x TensorCores active).
    padded8 = -(-batch // 8) * 8
    if padded8 < 16:
        return padded8
    half = max(8, (padded8 // 2) // 8 * 8)
    return min(tb_max, half)


def vae_forward(x, eps, prepared, tb=None):
    if tb is None:
        tb = pick_tb(x.shape[0])
    return _vae_forward(x, eps, prepared, tb)


def init_linear(key, fan_in, fan_out):
    # Mimic PyTorch nn.Linear default init: U(-1/sqrt(fan_in), 1/sqrt(fan_in)).
    kw, kb = jax.random.split(key)
    bound = 1.0 / jnp.sqrt(fan_in)
    # Stored as (in, out) so the kernel does x @ W directly (== x @ W_pt.T).
    w = jax.random.uniform(kw, (fan_in, fan_out), jnp.float32, -bound, bound)
    b = jax.random.uniform(kb, (1, fan_out), jnp.float32, -bound, bound)
    return w, b


def init_params(key):
    ks = jax.random.split(key, 5)
    w_enc, b_enc = init_linear(ks[0], D_IN, D_H)
    w_mean, b_mean = init_linear(ks[1], D_H, D_Z)
    w_var, b_var = init_linear(ks[2], D_H, D_Z)
    w_dec1, b_dec1 = init_linear(ks[3], D_Z, D_H)
    w_dec2, b_dec2 = init_linear(ks[4], D_H, D_IN)
    return {
        "w_enc": w_enc, "b_enc": b_enc,
        "w_mean": w_mean, "b_mean": b_mean,
        "w_var": w_var, "b_var": b_var,
        "w_dec1": w_dec1, "b_dec1": b_dec1,
        "w_dec2": w_dec2, "b_dec2": b_dec2,
    }


def prepare_params(params):
    # One-time weight prep (outside the per-call path): fuse mean/var heads
    # and cast matmul weights to bf16 so the pallas_call is the only HBM pass.
    return {
        "w_enc": params["w_enc"].astype(jnp.bfloat16),
        "b_enc": params["b_enc"],
        "w_heads": jnp.concatenate(
            [params["w_mean"], params["w_var"]], axis=1).astype(jnp.bfloat16),
        "b_heads": jnp.concatenate([params["b_mean"], params["b_var"]], axis=1),
        "w_dec1": params["w_dec1"].astype(jnp.bfloat16),
        "b_dec1": params["b_dec1"],
        "w_dec2": params["w_dec2"].astype(jnp.bfloat16),
        "b_dec2": params["b_dec2"],
    }


def reference_forward(x, eps, params):
    # Pure-JAX reference mirroring the kernel's precision policy
    # (bf16 matmul operands, f32 accumulation / elementwise).
    def mm(a, w):
        return jnp.dot(a.astype(jnp.bfloat16), w.astype(jnp.bfloat16),
                       preferred_element_type=jnp.float32)

    h1 = jnp.maximum(mm(x, params["w_enc"]) + params["b_enc"], 0.0)
    mean = mm(h1, params["w_mean"]) + params["b_mean"]
    logvar = mm(h1, params["w_var"]) + params["b_var"]
    std = jnp.exp(0.5 * logvar)
    var = std * std
    z = mean + std * eps
    h2 = jnp.maximum(mm(z, params["w_dec1"]) + params["b_dec1"], 0.0)
    y = jax.nn.sigmoid(mm(h2, params["w_dec2"]) + params["b_dec2"])
    return mean, var, y


if __name__ == "__main__":
    key = jax.random.PRNGKey(0)
    k_params, k_x, k_eps = jax.random.split(key, 3)

    # batch=512 -> tb=256, 2 grid steps: exercises batch-tiled pipelining and
    # both TCs on v7x while staying tiny (~1.6 MiB of input data).
    batch = 512
    params = init_params(k_params)
    prepared = prepare_params(params)
    x = jax.random.uniform(k_x, (batch, D_IN), jnp.float32)   # MNIST-like pixels
    # torch.randn inside forward() -> precomputed deterministic noise.
    eps = jax.random.normal(k_eps, (batch, D_Z), jnp.float32)

    mean, var, y = vae_forward(x, eps, prepared)
    jax.block_until_ready((mean, var, y))

    mean_r, var_r, y_r = reference_forward(x, eps, params)
    assert mean.shape == (batch, D_Z) and var.shape == (batch, D_Z)
    assert y.shape == (batch, D_IN) and y.dtype == jnp.bfloat16
    assert jnp.allclose(mean, mean_r, atol=2e-3, rtol=2e-3)
    assert jnp.allclose(var, var_r, atol=3e-3, rtol=3e-3)
    assert jnp.allclose(y.astype(jnp.float32), y_r, atol=1e-2, rtol=1e-2)

    print("KERNEL_OK")
</pallas_src>

<mosaic_0001>
module attributes {stable_mosaic.version = 11 : i64} {
  func.func @vae_forward_kernel(%arg0: i32, %arg1: memref<256x784xf32, #tpu.memory_space<vmem>>, %arg2: memref<256x10xf32, #tpu.memory_space<vmem>>, %arg3: memref<784x200xbf16, #tpu.memory_space<vmem>>, %arg4: memref<1x200xf32, #tpu.memory_space<vmem>>, %arg5: memref<200x20xbf16, #tpu.memory_space<vmem>>, %arg6: memref<1x20xf32, #tpu.memory_space<vmem>>, %arg7: memref<10x200xbf16, #tpu.memory_space<vmem>>, %arg8: memref<1x200xf32, #tpu.memory_space<vmem>>, %arg9: memref<200x784xbf16, #tpu.memory_space<vmem>>, %arg10: memref<1x784xf32, #tpu.memory_space<vmem>>, %arg11: memref<256x20xf32, #tpu.memory_space<vmem>>, %arg12: memref<256x784xbf16, #tpu.memory_space<vmem>>) attributes {dimension_semantics = [#tpu.dimension_semantics<parallel>], iteration_bounds = array<i64: 2>, scalar_prefetch = 0 : i64, scratch_operands = 0 : i64, tpu.core_type = #tpu.core_type<tc>, window_params = [{transform_indices = @transform_0, window_bounds = array<i64: 256, 784>}, {transform_indices = @transform_1, window_bounds = array<i64: 256, 10>}, {pipeline_mode = #tpu.pipeline_mode<synchronous>, transform_indices = @transform_2, window_bounds = array<i64: 784, 200>}, {pipeline_mode = #tpu.pipeline_mode<synchronous>, transform_indices = @transform_3, window_bounds = array<i64: 1, 200>}, {pipeline_mode = #tpu.pipeline_mode<synchronous>, transform_indices = @transform_4, window_bounds = array<i64: 200, 20>}, {pipeline_mode = #tpu.pipeline_mode<synchronous>, transform_indices = @transform_5, window_bounds = array<i64: 1, 20>}, {pipeline_mode = #tpu.pipeline_mode<synchronous>, transform_indices = @transform_6, window_bounds = array<i64: 10, 200>}, {pipeline_mode = #tpu.pipeline_mode<synchronous>, transform_indices = @transform_7, window_bounds = array<i64: 1, 200>}, {pipeline_mode = #tpu.pipeline_mode<synchronous>, transform_indices = @transform_8, window_bounds = array<i64: 200, 784>}, {pipeline_mode = #tpu.pipeline_mode<synchronous>, transform_indices = @transform_9, window_bounds = array<i64: 1, 784>}, {transform_indices = @transform_10, window_bounds = array<i64: 256, 20>}, {transform_indices = @transform_11, window_bounds = array<i64: 256, 784>}]} {
    %c0 = arith.constant 0 : index
    %c0_0 = arith.constant 0 : index
    %0 = vector.load %arg1[%c0, %c0_0] : memref<256x784xf32, #tpu.memory_space<vmem>>, vector<256x784xf32>
    %1 = arith.truncf %0 : vector<256x784xf32> to vector<256x784xbf16>
    %c0_1 = arith.constant 0 : index
    %c0_2 = arith.constant 0 : index
    %2 = vector.load %arg3[%c0_1, %c0_2] : memref<784x200xbf16, #tpu.memory_space<vmem>>, vector<784x200xbf16>
    %cst = arith.constant dense<0.000000e+00> : vector<256x200xf32>
    %3 = tpu.matmul %1, %2, %cst {dimension_numbers = #tpu.dot_dimension_numbers<[1], [0], [0], [1], [0, 0, 1, 1], [], []>} : vector<256x784xbf16>, vector<784x200xbf16>, vector<256x200xf32> -> vector<256x200xf32>
    %c0_3 = arith.constant 0 : index
    %c0_4 = arith.constant 0 : index
    %4 = vector.load %arg4[%c0_3, %c0_4] : memref<1x200xf32, #tpu.memory_space<vmem>>, vector<1x200xf32>
    %5 = vector.broadcast %4 : vector<1x200xf32> to vector<256x200xf32>
    %6 = arith.addf %3, %5 : vector<256x200xf32>
    %cst_5 = arith.constant 0.000000e+00 : f32
    %7 = vector.broadcast %cst_5 : f32 to vector<256x200xf32>
    %8 = arith.maximumf %6, %7 : vector<256x200xf32>
    %9 = arith.truncf %8 : vector<256x200xf32> to vector<256x200xbf16>
    %c0_6 = arith.constant 0 : index
    %c0_7 = arith.constant 0 : index
    %10 = vector.load %arg5[%c0_6, %c0_7] : memref<200x20xbf16, #tpu.memory_space<vmem>>, vector<200x20xbf16>
    %cst_8 = arith.constant dense<0.000000e+00> : vector<256x20xf32>
    %11 = tpu.matmul %9, %10, %cst_8 {dimension_numbers = #tpu.dot_dimension_numbers<[1], [0], [0], [1], [0, 0, 1, 1], [], []>} : vector<256x200xbf16>, vector<200x20xbf16>, vector<256x20xf32> -> vector<256x20xf32>
    %c0_9 = arith.constant 0 : index
    %c0_10 = arith.constant 0 : index
    %12 = vector.load %arg6[%c0_9, %c0_10] : memref<1x20xf32, #tpu.memory_space<vmem>>, vector<1x20xf32>
    %13 = vector.broadcast %12 : vector<1x20xf32> to vector<256x20xf32>
    %14 = arith.addf %11, %13 : vector<256x20xf32>
    %15 = vector.extract_strided_slice %14 {offsets = [0, 0], sizes = [256, 10], strides = [1, 1]} : vector<256x20xf32> to vector<256x10xf32>
    %16 = vector.extract_strided_slice %14 {offsets = [0, 10], sizes = [256, 10], strides = [1, 1]} : vector<256x20xf32> to vector<256x10xf32>
    %cst_11 = arith.constant 5.000000e-01 : f32
    %17 = vector.broadcast %cst_11 : f32 to vector<256x10xf32>
    %18 = arith.mulf %17, %16 : vector<256x10xf32>
    %19 = math.exp %18 : vector<256x10xf32>
    %20 = arith.mulf %19, %19 : vector<256x10xf32>
    %c0_12 = arith.constant 0 : index
    %c0_13 = arith.constant 0 : index
    %21 = vector.load %arg2[%c0_12, %c0_13] : memref<256x10xf32, #tpu.memory_space<vmem>>, vector<256x10xf32>
    %22 = arith.mulf %19, %21 : vector<256x10xf32>
    %23 = arith.addf %15, %22 : vector<256x10xf32>
    %24 = arith.truncf %23 : vector<256x10xf32> to vector<256x10xbf16>
    %c0_14 = arith.constant 0 : index
    %c0_15 = arith.constant 0 : index
    %25 = vector.load %arg7[%c0_14, %c0_15] : memref<10x200xbf16, #tpu.memory_space<vmem>>, vector<10x200xbf16>
    %cst_16 = arith.constant dense<0.000000e+00> : vector<256x200xf32>
    %26 = tpu.matmul %24, %25, %cst_16 {dimension_numbers = #tpu.dot_dimension_numbers<[1], [0], [0], [1], [0, 0, 1, 1], [], []>} : vector<256x10xbf16>, vector<10x200xbf16>, vector<256x200xf32> -> vector<256x200xf32>
    %c0_17 = arith.constant 0 : index
    %c0_18 = arith.constant 0 : index
    %27 = vector.load %arg8[%c0_17, %c0_18] : memref<1x200xf32, #tpu.memory_space<vmem>>, vector<1x200xf32>
    %28 = vector.broadcast %27 : vector<1x200xf32> to vector<256x200xf32>
    %29 = arith.addf %26, %28 : vector<256x200xf32>
    %cst_19 = arith.constant 0.000000e+00 : f32
    %30 = vector.broadcast %cst_19 : f32 to vector<256x200xf32>
    %31 = arith.maximumf %29, %30 : vector<256x200xf32>
    %32 = arith.truncf %31 : vector<256x200xf32> to vector<256x200xbf16>
    %c0_20 = arith.constant 0 : index
    %c0_21 = arith.constant 0 : index
    %33 = vector.load %arg9[%c0_20, %c0_21] : memref<200x784xbf16, #tpu.memory_space<vmem>>, vector<200x784xbf16>
    %cst_22 = arith.constant dense<0.000000e+00> : vector<256x784xf32>
    %34 = tpu.matmul %32, %33, %cst_22 {dimension_numbers = #tpu.dot_dimension_numbers<[1], [0], [0], [1], [0, 0, 1, 1], [], []>} : vector<256x200xbf16>, vector<200x784xbf16>, vector<256x784xf32> -> vector<256x784xf32>
    %c0_23 = arith.constant 0 : index
    %c0_24 = arith.constant 0 : index
    %35 = vector.load %arg10[%c0_23, %c0_24] : memref<1x784xf32, #tpu.memory_space<vmem>>, vector<1x784xf32>
    %36 = vector.broadcast %35 : vector<1x784xf32> to vector<256x784xf32>
    %37 = arith.addf %34, %36 : vector<256x784xf32>
    %cst_25 = arith.constant 0.000000e+00 : f32
    %38 = vector.broadcast %cst_25 : f32 to vector<256x784xf32>
    %39 = arith.subf %38, %37 : vector<256x784xf32>
    %40 = math.exp %39 : vector<256x784xf32>
    %cst_26 = arith.constant 1.000000e+00 : f32
    %41 = vector.broadcast %cst_26 : f32 to vector<256x784xf32>
    %42 = arith.addf %41, %40 : vector<256x784xf32>
    %43 = tpu.reciprocal %42 {approx = true} : vector<256x784xf32> -> vector<256x784xf32>
    %c0_27 = arith.constant 0 : index
    %c0_28 = arith.constant 0 : index
    %44 = vector.load %arg11[%c0_27, %c0_28] : memref<256x20xf32, #tpu.memory_space<vmem>>, vector<256x10xf32>
    tpu.vector_store %arg11[%c0_27, %c0_28], %15 {strides = array<i32>} : memref<256x20xf32, #tpu.memory_space<vmem>>, vector<256x10xf32>,
    %c0_29 = arith.constant 0 : index
    %c10 = arith.constant 10 : index
    %45 = vector.load %arg11[%c0_29, %c10] : memref<256x20xf32, #tpu.memory_space<vmem>>, vector<256x10xf32>
    tpu.vector_store %arg11[%c0_29, %c10], %20 {strides = array<i32>} : memref<256x20xf32, #tpu.memory_space<vmem>>, vector<256x10xf32>,
    %46 = arith.truncf %43 : vector<256x784xf32> to vector<256x784xbf16>
    %c0_30 = arith.constant 0 : index
    %c0_31 = arith.constant 0 : index
    %47 = vector.load %arg12[%c0_30, %c0_31] : memref<256x784xbf16, #tpu.memory_space<vmem>>, vector<256x784xbf16>
    tpu.vector_store %arg12[%c0_30, %c0_31], %46 {strides = array<i32>} : memref<256x784xbf16, #tpu.memory_space<vmem>>, vector<256x784xbf16>,
    return
  }
  func.func @transform_0(%arg0: i32) -> (i32, i32) {
    %c0_i32 = arith.constant 0 : i32
    %c0_i32_0 = arith.constant 0 : i32
    return %arg0, %c0_i32 : i32, i32
  }
  func.func @transform_1(%arg0: i32) -> (i32, i32) {
    %c0_i32 = arith.constant 0 : i32
    %c0_i32_0 = arith.constant 0 : i32
    return %arg0, %c0_i32 : i32, i32
  }
  func.func @transform_2(%arg0: i32) -> (i32, i32) {
    %c0_i32 = arith.constant 0 : i32
    %c0_i32_0 = arith.constant 0 : i32
    %c0_i32_1 = arith.constant 0 : i32
    return %c0_i32, %c0_i32_0 : i32, i32
  }
  func.func @transform_3(%arg0: i32) -> (i32, i32) {
    %c0_i32 = arith.constant 0 : i32
    %c0_i32_0 = arith.constant 0 : i32
    %c0_i32_1 = arith.constant 0 : i32
    return %c0_i32, %c0_i32_0 : i32, i32
  }
  func.func @transform_4(%arg0: i32) -> (i32, i32) {
    %c0_i32 = arith.constant 0 : i32
    %c0_i32_0 = arith.constant 0 : i32
    %c0_i32_1 = arith.constant 0 : i32
    return %c0_i32, %c0_i32_0 : i32, i32
  }
  func.func @transform_5(%arg0: i32) -> (i32, i32) {
    %c0_i32 = arith.constant 0 : i32
    %c0_i32_0 = arith.constant 0 : i32
    %c0_i32_1 = arith.constant 0 : i32
    return %c0_i32, %c0_i32_0 : i32, i32
  }
  func.func @transform_6(%arg0: i32) -> (i32, i32) {
    %c0_i32 = arith.constant 0 : i32
    %c0_i32_0 = arith.constant 0 : i32
    %c0_i32_1 = arith.constant 0 : i32
    return %c0_i32, %c0_i32_0 : i32, i32
  }
  func.func @transform_7(%arg0: i32) -> (i32, i32) {
    %c0_i32 = arith.constant 0 : i32
    %c0_i32_0 = arith.constant 0 : i32
    %c0_i32_1 = arith.constant 0 : i32
    return %c0_i32, %c0_i32_0 : i32, i32
  }
  func.func @transform_8(%arg0: i32) -> (i32, i32) {
    %c0_i32 = arith.constant 0 : i32
    %c0_i32_0 = arith.constant 0 : i32
    %c0_i32_1 = arith.constant 0 : i32
    return %c0_i32, %c0_i32_0 : i32, i32
  }
  func.func @transform_9(%arg0: i32) -> (i32, i32) {
    %c0_i32 = arith.constant 0 : i32
    %c0_i32_0 = arith.constant 0 : i32
    %c0_i32_1 = arith.constant 0 : i32
    return %c0_i32, %c0_i32_0 : i32, i32
  }
  func.func @transform_10(%arg0: i32) -> (i32, i32) {
    %c0_i32 = arith.constant 0 : i32
    %c0_i32_0 = arith.constant 0 : i32
    return %arg0, %c0_i32 : i32, i32
  }
  func.func @transform_11(%arg0: i32) -> (i32, i32) {
    %c0_i32 = arith.constant 0 : i32
    %c0_i32_0 = arith.constant 0 : i32
    return %arg0, %c0_i32 : i32, i32
  }
}

</mosaic_0001>

<bundles_post_ra>
// kernel: _vae_forward.1
= control target key start
LH: loop header
LB: loop body
LE: loop exit
PB: predicated region body
PF: predicated region fallthrough
CT: control target
= control target key end

     0   :  { %s9171_s17 = smov 0   ;;  %s11999_s0 = inlined_call_operand.vmem [shape: f32[512,784], index: 0, kind: input, shape index: {}]   ;;  %s12000_s1 = inlined_call_operand.vmem [shape: f32[512,10], index: 1, kind: input, shape index: {}]   ;;  %s12001_s2 = inlined_call_operand.vmem [shape: bf16[784,200], index: 2, kind: input, shape index: {}]   ;;  %s12002_s3 = inlined_call_operand.vmem [shape: f32[1,200], index: 3, kind: input, shape index: {}]   ;;  %s12003_s4 = inlined_call_operand.vmem [shape: bf16[200,20], index: 4, kind: input, shape index: {}]   ;;  %s12004_s5 = inlined_call_operand.vmem [shape: f32[1,20], index: 5, kind: input, shape index: {}]   ;;  %s12005_s6 = inlined_call_operand.vmem [shape: bf16[10,200], index: 6, kind: input, shape index: {}]   ;;  %s12006_s7 = inlined_call_operand.vmem [shape: f32[1,200], index: 7, kind: input, shape index: {}]   ;;  %s12007_s8 = inlined_call_operand.vmem [shape: bf16[200,784], index: 8, kind: input, shape index: {}]   ;;  %s12008_s9 = inlined_call_operand.vmem [shape: f32[1,784], index: 9, kind: input, shape index: {}]   ;;  %s12009_s10 = inlined_call_operand.vmem [shape: f32[512,20], index: 10, kind: output, shape index: {0}]   ;;  %s12010_s11 = inlined_call_operand.vmem [shape: bf16[512,784], index: 11, kind: output, shape index: {1}]  }
   0x1 LB: > { %s6987_s18 = sadd.s32 4294967295, %s9106_s17   ;;  %p6991_p0 = scmp.ge.s32.totalorder %s9106_s17, 1  ;;  %s9106_s17 = sphi %s9171_s17, %s22_s17  }
   0x2   : > { %p353_p1 = scmp.lt.s32.totalorder %s9106_s17, 3 }
   0x4   : > { %p354_p2 = pnand %p6991_p0, %p353_p1 }
   0x6   : > { %357 = sbr.rel (%p354_p2) target bundleno = 1972 (0x7b4), region = 60 }
   0xd   : > { %v7848_v0 = vld [vmem:[%s12001_s2 + $0x4] ss:$8 sps:$4 sm:$0xff]   ;;  %v7850_v1 = vld [vmem:[%s12001_s2] ss:$8 sps:$4 sm:$0xff]   ;;  %v7851_v2 = vld [vmem:[%s12001_s2 + $0x14] ss:$8 sps:$4 sm:$0xff]  }
   0xe   : > { %1417 = vmatprep.subr.bf16.mxu0 %v7848_v0  ;;  %v7853_v3 = vld [vmem:[%s12001_s2 + $0x10] ss:$8 sps:$4 sm:$0xff]   ;;  %s6992_s27 = sshll.u32 %s6987_s18, 5  ;;  %v7854_v4 = vld [vmem:[%s12001_s2 + $0x24] ss:$8 sps:$4 sm:$0xff]   ;;  %vm1368_vm0 = vcmask 130048  }
   0xf   : > { %1418 = vmatpush1.bf16.msra.mxu0 %v7850_v1  ;;  %p406_p3 = scmp.lt.s32.totalorder %s6992_s27, 63  ;;  %v7856_v5 = vld [vmem:[%s12001_s2 + $0x20] ss:$8 sps:$4 sm:$0xff]   ;;  %v7857_v6 = vld [vmem:[%s12001_s2 + $0x34] ss:$8 sps:$4 sm:$0xff]   ;;  %vm2441_vm1 = vcmask 1043456  }
  0x10   : > { %1419 = vmatprep.subr.bf16.mxu0 %v7851_v2  ;;  %v7859_v7 = vld [vmem:[%s12001_s2 + $0x30] ss:$8 sps:$4 sm:$0xff]   ;;  %v7860_v8 = vld [vmem:[%s12001_s2 + $0x44] ss:$8 sps:$4 sm:$0xff]   ;;  %v7862_v9 = vld [vmem:[%s12001_s2 + $0x40] ss:$8 sps:$4 sm:$0xff]  }
  0x11   : > { %s12037_s27 = smov (!%p406_p3, %s6992_s27), 63  ;;  %v7863_v10 = vld [vmem:[%s12001_s2 + $0x54] ss:$8 sps:$4 sm:$0xff]   ;;  %v7865_v11 = vld [vmem:[%s12001_s2 + $0x50] ss:$8 sps:$4 sm:$0xff]   ;;  %vm2392_vm2 = vcmask 588800  }
  0x12   : > { %s7835_s20 = smul.u32 56, %s12037_s27  ;;  %v7866_v12 = vld [vmem:[%s12001_s2 + $0x64] ss:$8 sps:$4 sm:$0xff]   ;;  %v7868_v16 = vld [vmem:[%s12001_s2 + $0x60] ss:$8 sps:$4 sm:$0xff]   ;;  %s6995_s19 = sshll.u32 %s12037_s27, 3 }
  0x13   : > { %1420 = vmatpush1.bf16.msra.mxu0 %v7853_v3  ;;  %v7869_v17 = vld [vmem:[%s12001_s2 + $0x74] ss:$8 sps:$4 sm:$0xff]   ;;  %v7871_v18 = vld [vmem:[%s12001_s2 + $0x70] ss:$8 sps:$4 sm:$0xff]   ;;  %v7872_v19 = vld [vmem:[%s12001_s2 + $0x84] ss:$8 sps:$4 sm:$0xff]   ;;  %s9802_s22 = scalar_lea.vmem %s12000_s1, %s6995_s19  ;;  %s9945_s16 = scalar_lea.vmem %s12009_s10, %s6995_s19 }
  0x14   : > { %1421 = vmatprep.subr.bf16.mxu0 %v7854_v4  ;;  %s9218_s28 = scalar_lea.vmem %s11999_s0, %s7835_s20  ;;  %v7874_v20 = vld [vmem:[%s12001_s2 + $0x80] ss:$8 sps:$4 sm:$0xff]   ;;  %v7875_v21 = vld [vmem:[%s12001_s2 + $0x94] ss:$8 sps:$4 sm:$0xff]   ;;  %v7877_v22 = vld [vmem:[%s12001_s2 + $0x90] ss:$8 sps:$4 sm:$0xff]  }
  0x15   : > { %v433_v13 = vld [vmem:[%s9218_s28 + $0x8] sm:$0xff]  ;;  %v440_v14 = vld [vmem:[%s9218_s28 + $0x40] sm:$0xff]  ;;  %v7881_v25 = vld [vmem:[%s12001_s2 + $0xb4] ss:$8 sps:$4 sm:$0xff]   ;;  %vm3173_vm3 = vcmask 1044480   ;;  %vm3124_vm4 = vcmask 80896  }
  0x16   : > { %v657_v15 = vpack.c.bf16 %v440_v14, %v433_v13  ;;  %v7878_v23 = vld [vmem:[%s12001_s2 + $0xa4] ss:$8 sps:$4 sm:$0xff]   ;;  %v7880_v24 = vld [vmem:[%s12001_s2 + $0xa0] ss:$8 sps:$4 sm:$0xff]   ;;  %v7883_v26 = vld [vmem:[%s12001_s2 + $0xb0] ss:$8 sps:$4 sm:$0xff]  }
  0x17   : > { %1422 = vmatpush1.bf16.msra.mxu0 %v7856_v5  ;;  %v7884_v27 = vld [vmem:[%s12001_s2 + $0xc4] ss:$8 sps:$4 sm:$0xff]   ;;  %v7886_v28 = vld [vmem:[%s12001_s2 + $0xc0] ss:$8 sps:$4 sm:$0xff]   ;;  %v7887_v29 = vld [vmem:[%s12001_s2 + $0xd4] ss:$8 sps:$4 sm:$0xff]  }
  0x18   : > { %1423 = vmatprep.subr.bf16.mxu0 %v7857_v6  ;;  %1449 = vmatprep.mubr.bf16.mxu0 %v657_v15  ;;  %v7889_v30 = vld [vmem:[%s12001_s2 + $0xd0] ss:$8 sps:$4 sm:$0xff]   ;;  %v7890_v31 = vld [vmem:[%s12001_s2 + $0xe4] ss:$8 sps:$4 sm:$0xff]   ;;  %v7892_v32 = vld [vmem:[%s12001_s2 + $0xe0] ss:$8 sps:$4 sm:$0xff]  }
  0x19   : > { %v7893_v33 = vld [vmem:[%s12001_s2 + $0xf4] ss:$8 sps:$4 sm:$0xff]   ;;  %v7895_v34 = vld [vmem:[%s12001_s2 + $0xf0] ss:$8 sps:$4 sm:$0xff]   ;;  %v432_v35 = vld [vmem:[%s9218_s28] sm:$0xff]  ;;  %vm6017_vm5 = vcmask 162896  }
  0x1a   : > { %v439_v36 = vld [vmem:[%s9218_s28 + $0x38] sm:$0xff]  ;;  %v7898_v37 = vld [vmem:[%s12001_s2 + $0x104] ss:$8 sps:$4 sm:$0xff]   ;;  %v454_v39 = vld [vmem:[%s9218_s28 + $0xb0] sm:$0xff]  ;;  %s9110_s18 = smov 118   ;;  %vm6757_vm6 = vcmask 125952  }
  0x1b   : > { %1424 = vmatpush1.bf16.msra.mxu0 %v7859_v7  ;;  %v447_v38 = vld [vmem:[%s9218_s28 + $0x78] sm:$0xff]  ;;  %v656_v40 = vpack.c.bf16 %v439_v36, %v432_v35  ;;  %v7896_v41 = vld [vmem:[%s12001_s2 + $0x100] ss:$8 sps:$4 sm:$0xff]   ;;  %v446_v44 = vld [vmem:[%s9218_s28 + $0x70] sm:$0xff]  ;;  %s7836_s12 = smul.u32 28, %s12037_s27 }
  0x1c   : > { %1425 = vmatprep.subr.bf16.mxu0 %v7860_v8  ;;  %v664_v42 = vpack.c.bf16 %v454_v39, %v447_v38  ;;  %v7901_v43 = vld [vmem:[%s12001_s2 + $0x114] ss:$8 sps:$4 sm:$0xff]   ;;  %v453_v45 = vld [vmem:[%s9218_s28 + $0xa8] sm:$0xff]  ;;  %v7899_v46 = vld [vmem:[%s12001_s2 + $0x110] ss:$8 sps:$4 sm:$0xff]  }
  0x1d   : > { %v461_v47 = vld [vmem:[%s9218_s28 + $0xe8] sm:$0xff]  ;;  %v468_v48 = vld [vmem:[%s9218_s28 + $0x120] sm:$0xff]  ;;  %v663_v51 = vpack.c.bf16 %v453_v45, %v446_v44  ;;  %v7907_v52 = vld [vmem:[%s12001_s2 + $0x134] ss:$8 sps:$4 sm:$0xff]   ;;  %s11019_s14 = scalar_lea.vmem %s12010_s11, %s7836_s12 }
  0x1e   : > { %v7904_v49 = vld [vmem:[%s12001_s2 + $0x124] ss:$8 sps:$4 sm:$0xff]   ;;  %v7902_v50 = vld [vmem:[%s12001_s2 + $0x120] ss:$8 sps:$4 sm:$0xff]   ;;  %v671_v53 = vpack.c.bf16 %v468_v48, %v461_v47  ;;  %v467_v55 = vld [vmem:[%s9218_s28 + $0x118] sm:$0xff] }
  0x1f   : > { %1426 = vmatpush1.bf16.msra.mxu0 %v7862_v9  ;;  %v460_v54 = vld [vmem:[%s9218_s28 + $0xe0] sm:$0xff]  ;;  %v475_v56 = vld [vmem:[%s9218_s28 + $0x158] sm:$0xff]  ;;  %v482_v57 = vld [vmem:[%s9218_s28 + $0x190] sm:$0xff] }
  0x20   : > { %1427 = vmatprep.subr.bf16.mxu0 %v7863_v10  ;;  %v7905_v58 = vld [vmem:[%s12001_s2 + $0x130] ss:$8 sps:$4 sm:$0xff]   ;;  %v7910_v59 = vld [vmem:[%s12001_s2 + $0x144] ss:$8 sps:$4 sm:$0xff]   ;;  %v7908_v60 = vld [vmem:[%s12001_s2 + $0x140] ss:$8 sps:$4 sm:$0xff]   ;;  %v670_v61 = vpack.c.bf16 %v467_v55, %v460_v54  ;;  %v678_v63 = vpack.c.bf16 %v482_v57, %v475_v56 }
  0x21   : > { %v7913_v62 = vld [vmem:[%s12001_s2 + $0x154] ss:$8 sps:$4 sm:$0xff]   ;;  %v481_v1 = vld [vmem:[%s9218_s28 + $0x188] sm:$0xff]  ;;  %v496_v3 = vld [vmem:[%s9218_s28 + $0x200] sm:$0xff] }
  0x22   : > { %v474_v0 = vld [vmem:[%s9218_s28 + $0x150] sm:$0xff]  ;;  %v489_v2 = vld [vmem:[%s9218_s28 + $0x1c8] sm:$0xff]  ;;  %v488_v10 = vld [vmem:[%s9218_s28 + $0x1c0] sm:$0xff] }
  0x23   : > { %1428 = vmatpush1.bf16.msra.mxu0 %v7865_v11  ;;  %v7911_v4 = vld [vmem:[%s12001_s2 + $0x150] ss:$8 sps:$4 sm:$0xff]   ;;  %v7916_v5 = vld [vmem:[%s12001_s2 + $0x164] ss:$8 sps:$4 sm:$0xff]   ;;  %v7914_v6 = vld [vmem:[%s12001_s2 + $0x160] ss:$8 sps:$4 sm:$0xff]   ;;  %v677_v7 = vpack.c.bf16 %v481_v1, %v474_v0  ;;  %v685_v9 = vpack.c.bf16 %v496_v3, %v489_v2 }
  0x24   : > { %1429 = vmatprep.subr.bf16.mxu0 %v7866_v12  ;;  %v7919_v8 = vld [vmem:[%s12001_s2 + $0x174] ss:$8 sps:$4 sm:$0xff]   ;;  %v7917_v14 = vld [vmem:[%s12001_s2 + $0x170] ss:$8 sps:$4 sm:$0xff]   ;;  %v7922_v15 = vld [vmem:[%s12001_s2 + $0x184] ss:$8 sps:$4 sm:$0xff]  }
  0x25   : > { %v495_v11 = vld [vmem:[%s9218_s28 + $0x1f8] sm:$0xff]  ;;  %v510_v13 = vld [vmem:[%s9218_s28 + $0x270] sm:$0xff]  ;;  %v7934_v35 = vld [vmem:[%s12001_s2 + $0x1c4] ss:$8 sps:$4 sm:$0xff]  }
  0x26   : > { %v503_v12 = vld [vmem:[%s9218_s28 + $0x238] sm:$0xff]  ;;  %v7932_v36 = vld [vmem:[%s12001_s2 + $0x1c0] ss:$8 sps:$4 sm:$0xff]   ;;  %v7940_v45 = vld [vmem:[%s12001_s2 + $0x1e4] ss:$8 sps:$4 sm:$0xff]  }
  0x27   : > { %1430 = vmatpush1.bf16.msra.mxu0 %v7868_v16  ;;  %v7920_v16 = vld [vmem:[%s12001_s2 + $0x180] ss:$8 sps:$4 sm:$0xff]   ;;  %v7937_v38 = vld [vmem:[%s12001_s2 + $0x1d4] ss:$8 sps:$4 sm:$0xff]   ;;  %v7935_v44 = vld [vmem:[%s12001_s2 + $0x1d0] ss:$8 sps:$4 sm:$0xff]  }
  0x28   : > { %1431 = vmatprep.subr.bf16.mxu0 %v7869_v17  ;;  %v684_v17 = vpack.c.bf16 %v495_v11, %v488_v10  ;;  %v7943_v48 = vld [vmem:[%s12001_s2 + $0x1f4] ss:$8 sps:$4 sm:$0xff]   ;;  %v7941_v54 = vld [vmem:[%s12001_s2 + $0x1f0] ss:$8 sps:$4 sm:$0xff]   ;;  %v7946_v55 = vld [vmem:[%s12001_s2 + $0x204] ss:$8 sps:$4 sm:$0xff]  }
  0x29   : > { %v572_v0 = vld [vmem:[%s9218_s28 + $0x460] sm:$0xff]  ;;  %v579_v1 = vld [vmem:[%s9218_s28 + $0x498] sm:$0xff]  ;;  %v594_v3 = vld [vmem:[%s9218_s28 + $0x510] sm:$0xff] }
  0x2a   : > { %v587_v2 = vld [vmem:[%s9218_s28 + $0x4d8] sm:$0xff] }
  0x2b   : > { %1432 = vmatpush1.bf16.msra.mxu0 %v7871_v18  ;;  %v7925_v18 = vld [vmem:[%s12001_s2 + $0x194] ss:$8 sps:$4 sm:$0xff]  }
  0x2c   : > { %1433 = vmatprep.subr.bf16.mxu0 %v7872_v19  ;;  %v692_v19 = vpack.c.bf16 %v510_v13, %v503_v12  ;;  %v600_v12 = vld [vmem:[%s9218_s28 + $0x540] sm:$0xff]  ;;  %v607_v13 = vld [vmem:[%s9218_s28 + $0x578] sm:$0xff] }
  0x2f   : > { %1434 = vmatpush1.bf16.msra.mxu0 %v7874_v20  ;;  %v502_v20 = vld [vmem:[%s9218_s28 + $0x230] sm:$0xff] }
  0x30   : > { %1435 = vmatprep.subr.bf16.mxu0 %v7875_v21  ;;  %v509_v21 = vld [vmem:[%s9218_s28 + $0x268] sm:$0xff] }
  0x33   : > { %1436 = vmatpush1.bf16.msra.mxu0 %v7877_v22  ;;  %v517_v22 = vld [vmem:[%s9218_s28 + $0x2a8] sm:$0xff] }
  0x34   : > { %1437 = vmatprep.subr.bf16.mxu0 %v7878_v23  ;;  %v524_v23 = vld [vmem:[%s9218_s28 + $0x2e0] sm:$0xff] }
  0x37   : > { %1438 = vmatpush1.bf16.msra.mxu0 %v7880_v24  ;;  %v7923_v24 = vld [vmem:[%s12001_s2 + $0x190] ss:$8 sps:$4 sm:$0xff]  }
  0x38   : > { %1439 = vmatprep.subr.bf16.mxu0 %v7881_v25  ;;  %v7928_v25 = vld [vmem:[%s12001_s2 + $0x1a4] ss:$8 sps:$4 sm:$0xff]  }
  0x3b   : > { %1440 = vmatpush1.bf16.msra.mxu0 %v7883_v26  ;;  %v7926_v26 = vld [vmem:[%s12001_s2 + $0x1a0] ss:$8 sps:$4 sm:$0xff]  }
  0x3c   : > { %1441 = vmatprep.subr.bf16.mxu0 %v7884_v27  ;;  %v691_v27 = vpack.c.bf16 %v509_v21, %v502_v20  ;;  %v629_v20 = vld [vmem:[%s9218_s28 + $0x628] sm:$0xff]  ;;  %v636_v21 = vld [vmem:[%s9218_s28 + $0x660] sm:$0xff] }
  0x3f   : > { %1442 = vmatpush1.bf16.msra.mxu0 %v7886_v28  ;;  %v7931_v28 = vld [vmem:[%s12001_s2 + $0x1b4] ss:$8 sps:$4 sm:$0xff]  }
  0x40   : > { %1443 = vmatprep.subr.bf16.mxu0 %v7887_v29  ;;  %v699_v29 = vpack.c.bf16 %v524_v23, %v517_v22  ;;  %v755_v23 = vpack.c.bf16 %v636_v21, %v629_v20  ;;  %v504_v20 = vld [vmem:[%s9218_s28 + $0x240] sm:$0xff]  ;;  %v511_v21 = vld [vmem:[%s9218_s28 + $0x278] sm:$0xff] }
  0x43   : > { %1444 = vmatpush1.bf16.msra.mxu0 %v7889_v30  ;;  %v516_v30 = vld [vmem:[%s9218_s28 + $0x2a0] sm:$0xff] }
  0x44   : > { %1445 = vmatprep.subr.bf16.mxu0 %v7890_v31  ;;  %v523_v31 = vld [vmem:[%s9218_s28 + $0x2d8] sm:$0xff] }
  0x47   : > { %1446 = vmatpush1.bf16.msra.mxu0 %v7892_v32  ;;  %v531_v32 = vld [vmem:[%s9218_s28 + $0x318] sm:$0xff] }
  0x48   : > { %1447 = vmatprep.subr.bf16.mxu0 %v7893_v33  ;;  %v538_v33 = vld [vmem:[%s9218_s28 + $0x350] sm:$0xff] }
  0x49   : > { %v706_v39 = vpack.c.bf16 %v538_v33, %v531_v32  ;;  %v435_v32 = vld [vmem:[%s9218_s28 + $0x18] sm:$0xff]  ;;  %v442_v33 = vld [vmem:[%s9218_s28 + $0x50] sm:$0xff] }
  0x4b   : > { %1448 = vmatpush1.bf16.msra.mxu0 %v7895_v34  ;;  %v7929_v34 = vld [vmem:[%s12001_s2 + $0x1b0] ss:$8 sps:$4 sm:$0xff]  }
  0x4c   : > { %1610 = vmatprep.subr.bf16.mxu0 %v7898_v37  ;;  %v698_v37 = vpack.c.bf16 %v523_v31, %v516_v30  ;;  %v642_v30 = vld [vmem:[%s9218_s28 + $0x690] sm:$0xff]  ;;  %v649_v31 = vld [vmem:[%s9218_s28 + $0x6c8] sm:$0xff] }
  0x4e   : > { %1450 = vmatmul.mubr.bf16.vlgmr.msra.gmra.mrb[0].mxu0 %v656_v40  ;;  %v530_v40 = vld [vmem:[%s9218_s28 + $0x310] sm:$0xff] }
  0x4f   : > { %1611 = vmatpush1.bf16.msra.mxu0 %v7896_v41  ;;  %1459 = vmatprep.mubr.bf16.mxu0 %v664_v42  ;;  %v537_v41 = vld [vmem:[%s9218_s28 + $0x348] sm:$0xff] }
  0x50   : > { %1612 = vmatprep.subr.bf16.mxu0 %v7901_v43  ;;  %v545_v42 = vld [vmem:[%s9218_s28 + $0x388] sm:$0xff]  ;;  %v552_v43 = vld [vmem:[%s9218_s28 + $0x3c0] sm:$0xff]  ;;  %v705_v47 = vpack.c.bf16 %v537_v41, %v530_v40 }
  0x51   : > { %v7944_v41 = vld [vmem:[%s12001_s2 + $0x200] ss:$8 sps:$4 sm:$0xff]  }
  0x53   : > { %1613 = vmatpush1.bf16.msra.mxu0 %v7899_v46  ;;  %v7938_v46 = vld [vmem:[%s12001_s2 + $0x1e0] ss:$8 sps:$4 sm:$0xff]  }
  0x54   : > { %1614 = vmatprep.subr.bf16.mxu0 %v7904_v49  ;;  %v713_v49 = vpack.c.bf16 %v552_v43, %v545_v42  ;;  %v7949_v43 = vld [vmem:[%s12001_s2 + $0x214] ss:$8 sps:$4 sm:$0xff]  }
  0x56   : > { %1460 = vmatmul.mubr.bf16.gmra.mrb[4].mxu0 %v663_v51  ;;  %v551_v51 = vld [vmem:[%s9218_s28 + $0x3b8] sm:$0xff] }
  0x57   : > { %1469 = vmatprep.mubr.bf16.mxu0 %v671_v53  ;;  %1615 = vmatpush1.bf16.msra.mxu0 %v7902_v50  ;;  %v544_v50 = vld [vmem:[%s9218_s28 + $0x380] sm:$0xff]  ;;  %v566_v53 = vld [vmem:[%s9218_s28 + $0x430] sm:$0xff] }
  0x58   : > { %1616 = vmatprep.subr.bf16.mxu0 %v7907_v52  ;;  %v559_v52 = vld [vmem:[%s9218_s28 + $0x3f8] sm:$0xff]  ;;  %v712_v56 = vpack.c.bf16 %v551_v51, %v544_v50 }
  0x59   : > { %v720_v57 = vpack.c.bf16 %v566_v53, %v559_v52  ;;  %v7950_v52 = vld [vmem:[%s12001_s2 + $0x220] ss:$8 sps:$4 sm:$0xff]   ;;  %v7955_v53 = vld [vmem:[%s12001_s2 + $0x234] ss:$8 sps:$4 sm:$0xff]  }
  0x5b   : > { %1617 = vmatpush1.bf16.msra.mxu0 %v7905_v58  ;;  %v558_v58 = vld [vmem:[%s9218_s28 + $0x3f0] sm:$0xff] }
  0x5c   : > { %1618 = vmatprep.subr.bf16.mxu0 %v7910_v59  ;;  %v565_v59 = vld [vmem:[%s9218_s28 + $0x428] sm:$0xff] }
  0x5e   : > { %1470 = vmatmul.mubr.bf16.gmra.mrb[8].mxu0 %v670_v61  ;;  %v580_v61 = vld [vmem:[%s9218_s28 + $0x4a0] sm:$0xff] }
  0x5f   : > { %1479 = vmatprep.mubr.bf16.mxu0 %v678_v63  ;;  %1619 = vmatpush1.bf16.msra.mxu0 %v7908_v60  ;;  %v573_v60 = vld [vmem:[%s9218_s28 + $0x468] sm:$0xff] }
  0x60   : > { %1620 = vmatprep.subr.bf16.mxu0 %v7913_v62  ;;  %v719_v62 = vpack.c.bf16 %v565_v59, %v558_v58  ;;  %v727_v63 = vpack.c.bf16 %v580_v61, %v573_v60  ;;  %v484_v58 = vld [vmem:[%s9218_s28 + $0x1a0] sm:$0xff] }
  0x61   : > { %v7958_v59 = vld [vmem:[%s12001_s2 + $0x244] ss:$8 sps:$4 sm:$0xff]  }
  0x63   : > { %1621 = vmatpush1.bf16.msra.mxu0 %v7911_v4  ;;  %v726_v4 = vpack.c.bf16 %v579_v1, %v572_v0  ;;  %v476_v0 = vld [vmem:[%s9218_s28 + $0x160] sm:$0xff]  ;;  %v483_v1 = vld [vmem:[%s9218_s28 + $0x198] sm:$0xff] }
  0x64   : > { %1622 = vmatprep.subr.bf16.mxu0 %v7916_v5  ;;  %v734_v5 = vpack.c.bf16 %v594_v3, %v587_v2  ;;  %v7959_v2 = vld [vmem:[%s12001_s2 + $0x250] ss:$8 sps:$4 sm:$0xff]  }
  0x65   : > { %v491_v3 = vld [vmem:[%s9218_s28 + $0x1d8] sm:$0xff] }
  0x66   : > { %1480 = vmatmul.mubr.bf16.gmra.mrb[12].mxu0 %v677_v7  ;;  %v593_v7 = vld [vmem:[%s9218_s28 + $0x508] sm:$0xff] }
  0x67   : > { %1489 = vmatprep.mubr.bf16.mxu0 %v685_v9  ;;  %1623 = vmatpush1.bf16.msra.mxu0 %v7914_v6  ;;  %v586_v6 = vld [vmem:[%s9218_s28 + $0x4d0] sm:$0xff]  ;;  %v608_v9 = vld [vmem:[%s9218_s28 + $0x580] sm:$0xff] }
  0x68   : > { %1624 = vmatprep.subr.bf16.mxu0 %v7919_v8  ;;  %v601_v8 = vld [vmem:[%s9218_s28 + $0x548] sm:$0xff]  ;;  %v733_v10 = vpack.c.bf16 %v593_v7, %v586_v6  ;;  %v679_v6 = vpack.c.bf16 %v483_v1, %v476_v0  ;;  %v574_v0 = vld [vmem:[%s9218_s28 + $0x470] sm:$0xff] }
  0x69   : > { %v741_v11 = vpack.c.bf16 %v608_v9, %v601_v8  ;;  %v7962_v8 = vld [vmem:[%s12001_s2 + $0x260] ss:$8 sps:$4 sm:$0xff]   ;;  %v7967_v9 = vld [vmem:[%s12001_s2 + $0x274] ss:$8 sps:$4 sm:$0xff]  }
  0x6a   : > { %v581_v1 = vld [vmem:[%s9218_s28 + $0x4a8] sm:$0xff] }
  0x6b   : > { %1625 = vmatpush1.bf16.msra.mxu0 %v7917_v14  ;;  %v615_v14 = vld [vmem:[%s9218_s28 + $0x5b8] sm:$0xff] }
  0x6c   : > { %1626 = vmatprep.subr.bf16.mxu0 %v7922_v15  ;;  %v622_v15 = vld [vmem:[%s9218_s28 + $0x5f0] sm:$0xff] }
  0x6e   : > { %1490 = vmatmul.mubr.bf16.gmra.mrb[16].mxu0 %v684_v17  ;;  %v748_v17 = vpack.c.bf16 %v622_v15, %v615_v14  ;;  %v512_v14 = vld [vmem:[%s9218_s28 + $0x280] sm:$0xff] }
  0x6f   : > { %1499 = vmatprep.mubr.bf16.mxu0 %v692_v19  ;;  %1627 = vmatpush1.bf16.msra.mxu0 %v7920_v16  ;;  %v740_v16 = vpack.c.bf16 %v607_v13, %v600_v12  ;;  %v621_v19 = vld [vmem:[%s9218_s28 + $0x5e8] sm:$0xff]  ;;  %v7965_v12 = vld [vmem:[%s12001_s2 + $0x270] ss:$8 sps:$4 sm:$0xff]  }
  0x70   : > { %1628 = vmatprep.subr.bf16.mxu0 %v7925_v18  ;;  %v614_v18 = vld [vmem:[%s9218_s28 + $0x5b0] sm:$0xff]  ;;  %v505_v13 = vld [vmem:[%s9218_s28 + $0x248] sm:$0xff] }
  0x71   : > { %v747_v22 = vpack.c.bf16 %v621_v19, %v614_v18  ;;  %v7970_v15 = vld [vmem:[%s12001_s2 + $0x284] ss:$8 sps:$4 sm:$0xff]   ;;  %v7968_v18 = vld [vmem:[%s12001_s2 + $0x280] ss:$8 sps:$4 sm:$0xff]   ;;  %v7973_v19 = vld [vmem:[%s12001_s2 + $0x294] ss:$8 sps:$4 sm:$0xff]  }
  0x73   : > { %1629 = vmatpush1.bf16.msra.mxu0 %v7923_v24  ;;  %v628_v24 = vld [vmem:[%s9218_s28 + $0x620] sm:$0xff] }
  0x74   : > { %1630 = vmatprep.subr.bf16.mxu0 %v7928_v25  ;;  %v635_v25 = vld [vmem:[%s9218_s28 + $0x658] sm:$0xff] }
  0x76   : > { %1500 = vmatmul.mubr.bf16.gmra.mrb[20].mxu0 %v691_v27  ;;  %v650_v27 = vld [vmem:[%s9218_s28 + $0x6d0] sm:$0xff] }
  0x77   : > { %1509 = vmatprep.mubr.bf16.mxu0 %v699_v29  ;;  %1631 = vmatpush1.bf16.msra.mxu0 %v7926_v26  ;;  %v643_v26 = vld [vmem:[%s9218_s28 + $0x698] sm:$0xff] }
  0x78   : > { %1632 = vmatprep.subr.bf16.mxu0 %v7931_v28  ;;  %v754_v28 = vpack.c.bf16 %v635_v25, %v628_v24  ;;  %v762_v29 = vpack.c.bf16 %v650_v27, %v643_v26  ;;  %v526_v24 = vld [vmem:[%s9218_s28 + $0x2f0] sm:$0xff]  ;;  %v7976_v25 = vld [vmem:[%s12001_s2 + $0x2a4] ss:$8 sps:$4 sm:$0xff]   ;;  %v693_v26 = vpack.c.bf16 %v511_v21, %v504_v20  ;;  %v631_v20 = vld [vmem:[%s9218_s28 + $0x638] sm:$0xff] }
  0x79   : > { %v638_v21 = vld [vmem:[%s9218_s28 + $0x670] sm:$0xff] }
  0x7b   : > { %1633 = vmatpush1.bf16.msra.mxu0 %v7929_v34  ;;  %v761_v34 = vpack.c.bf16 %v649_v31, %v642_v30  ;;  %v518_v30 = vld [vmem:[%s9218_s28 + $0x2b0] sm:$0xff]  ;;  %v525_v31 = vld [vmem:[%s9218_s28 + $0x2e8] sm:$0xff] }
  0x7c   : > { %1634 = vmatprep.subr.bf16.mxu0 %v7934_v35  ;;  %v659_v35 = vpack.c.bf16 %v442_v33, %v435_v32  ;;  %v7977_v32 = vld [vmem:[%s12001_s2 + $0x2b0] ss:$8 sps:$4 sm:$0xff]   ;;  %v533_v33 = vld [vmem:[%s9218_s28 + $0x328] sm:$0xff] }
  0x7e   : > { %1510 = vmatmul.mubr.bf16.gmra.mrb[24].mxu0 %v698_v37  ;;  %v441_v37 = vld [vmem:[%s9218_s28 + $0x48] sm:$0xff] }
  0x7f   : > { %1519 = vmatprep.mubr.bf16.mxu0 %v706_v39  ;;  %1635 = vmatpush1.bf16.msra.mxu0 %v7932_v36  ;;  %v434_v36 = vld [vmem:[%s9218_s28 + $0x10] sm:$0xff]  ;;  %v456_v39 = vld [vmem:[%s9218_s28 + $0xc0] sm:$0xff] }
  0x80   : > { %1636 = vmatprep.subr.bf16.mxu0 %v7937_v38  ;;  %v449_v38 = vld [vmem:[%s9218_s28 + $0x88] sm:$0xff]  ;;  %v658_v40 = vpack.c.bf16 %v441_v37, %v434_v36  ;;  %v700_v36 = vpack.c.bf16 %v525_v31, %v518_v30  ;;  %v644_v30 = vld [vmem:[%s9218_s28 + $0x6a0] sm:$0xff]  ;;  %v651_v31 = vld [vmem:[%s9218_s28 + $0x6d8] sm:$0xff] }
  0x81   : > { %v666_v42 = vpack.c.bf16 %v456_v39, %v449_v38  ;;  %v7980_v38 = vld [vmem:[%s12001_s2 + $0x2c0] ss:$8 sps:$4 sm:$0xff]   ;;  %v7985_v39 = vld [vmem:[%s12001_s2 + $0x2d4] ss:$8 sps:$4 sm:$0xff]  }
  0x83   : > { %1637 = vmatpush1.bf16.msra.mxu0 %v7935_v44  ;;  %v448_v44 = vld [vmem:[%s9218_s28 + $0x80] sm:$0xff] }
  0x84   : > { %1638 = vmatprep.subr.bf16.mxu0 %v7940_v45  ;;  %v455_v45 = vld [vmem:[%s9218_s28 + $0xb8] sm:$0xff] }
  0x85   : > { %v665_v50 = vpack.c.bf16 %v455_v45, %v448_v44  ;;  %v554_v44 = vld [vmem:[%s9218_s28 + $0x3d0] sm:$0xff]  ;;  %v7988_v45 = vld [vmem:[%s12001_s2 + $0x2e4] ss:$8 sps:$4 sm:$0xff]  }
  0x86   : > { %1520 = vmatmul.mubr.bf16.gmra.mrb[28].mxu0 %v705_v47  ;;  %v463_v47 = vld [vmem:[%s9218_s28 + $0xf8] sm:$0xff] }
  0x87   : > { %1529 = vmatprep.mubr.bf16.mxu0 %v713_v49  ;;  %1639 = vmatpush1.bf16.msra.mxu0 %v7938_v46  ;;  %v7947_v46 = vld [vmem:[%s12001_s2 + $0x210] ss:$8 sps:$4 sm:$0xff]   ;;  %v7952_v49 = vld [vmem:[%s12001_s2 + $0x224] ss:$8 sps:$4 sm:$0xff]  }
  0x88   : > { %1640 = vmatprep.subr.bf16.mxu0 %v7943_v48  ;;  %v470_v48 = vld [vmem:[%s9218_s28 + $0x130] sm:$0xff] }
  0x89   : > { %v673_v51 = vpack.c.bf16 %v470_v48, %v463_v47  ;;  %v7986_v48 = vld [vmem:[%s12001_s2 + $0x2e0] ss:$8 sps:$4 sm:$0xff]  }
  0x8b   : > { %1641 = vmatpush1.bf16.msra.mxu0 %v7941_v54  ;;  %v462_v54 = vld [vmem:[%s9218_s28 + $0xf0] sm:$0xff] }
  0x8c   : > { %1803 = vmatprep.subr.bf16.mxu0 %v7946_v55  ;;  %v469_v55 = vld [vmem:[%s9218_s28 + $0x128] sm:$0xff] }
  0x8d   : > { %v672_v60 = vpack.c.bf16 %v469_v55, %v462_v54  ;;  %v568_v54 = vld [vmem:[%s9218_s28 + $0x440] sm:$0xff] }
  0x8e   : > { %1530 = vmatmul.mubr.bf16.gmra.mrb[32].mxu0 %v712_v56  ;;  %v7953_v56 = vld [vmem:[%s12001_s2 + $0x230] ss:$8 sps:$4 sm:$0xff]   ;;  %v7994_v55 = vld [vmem:[%s12001_s2 + $0x304] ss:$8 sps:$4 sm:$0xff]  }
  0x8f   : > { %1539 = vmatprep.mubr.bf16.mxu0 %v720_v57  ;;  %v477_v57 = vld [vmem:[%s9218_s28 + $0x168] sm:$0xff] }
  0x90   : > { %v680_v61 = vpack.c.bf16 %v484_v58, %v477_v57  ;;  %v560_v58 = vld [vmem:[%s9218_s28 + $0x400] sm:$0xff] }
  0x96   : > { %1540 = vmatmul.mubr.bf16.gmra.mrb[36].mxu0 %v719_v62  ;;  %v7956_v62 = vld [vmem:[%s12001_s2 + $0x240] ss:$8 sps:$4 sm:$0xff]  }
  0x97   : > { %1549 = vmatprep.mubr.bf16.mxu0 %v727_v63  ;;  %v7961_v63 = vld [vmem:[%s12001_s2 + $0x254] ss:$8 sps:$4 sm:$0xff]  }
  0x9e   : > { %1550 = vmatmul.mubr.bf16.gmra.mrb[40].mxu0 %v726_v4  ;;  %v498_v4 = vld [vmem:[%s9218_s28 + $0x210] sm:$0xff] }
  0x9f   : > { %1559 = vmatprep.mubr.bf16.mxu0 %v734_v5  ;;  %v7964_v5 = vld [vmem:[%s12001_s2 + $0x264] ss:$8 sps:$4 sm:$0xff]   ;;  %v687_v7 = vpack.c.bf16 %v498_v4, %v491_v3  ;;  %v728_v4 = vpack.c.bf16 %v581_v1, %v574_v0  ;;  %v507_v0 = vld [vmem:[%s9218_s28 + $0x258] sm:$0xff]  ;;  %v514_v1 = vld [vmem:[%s9218_s28 + $0x290] sm:$0xff] }
  0xa0   : > { %v596_v3 = vld [vmem:[%s9218_s28 + $0x520] sm:$0xff] }
  0xa6   : > { %1560 = vmatmul.mubr.bf16.gmra.mrb[44].mxu0 %v733_v10  ;;  %v490_v10 = vld [vmem:[%s9218_s28 + $0x1d0] sm:$0xff] }
  0xa7   : > { %1569 = vmatprep.mubr.bf16.mxu0 %v741_v11  ;;  %v497_v11 = vld [vmem:[%s9218_s28 + $0x208] sm:$0xff] }
  0xae   : > { %1570 = vmatmul.mubr.bf16.gmra.mrb[48].mxu0 %v740_v16  ;;  %v686_v16 = vpack.c.bf16 %v497_v11, %v490_v10 }
  0xaf   : > { %1579 = vmatprep.mubr.bf16.mxu0 %v748_v17  ;;  %v694_v17 = vpack.c.bf16 %v512_v14, %v505_v13  ;;  %v609_v13 = vld [vmem:[%s9218_s28 + $0x588] sm:$0xff] }
  0xb0   : > { %v617_v14 = vld [vmem:[%s9218_s28 + $0x5c8] sm:$0xff] }
  0xb6   : > { %1580 = vmatmul.mubr.bf16.gmra.mrb[52].mxu0 %v747_v22  ;;  %v7971_v22 = vld [vmem:[%s12001_s2 + $0x290] ss:$8 sps:$4 sm:$0xff]  }
  0xb7   : > { %1589 = vmatprep.mubr.bf16.mxu0 %v755_v23  ;;  %v519_v23 = vld [vmem:[%s9218_s28 + $0x2b8] sm:$0xff] }
  0xb8   : > { %v701_v27 = vpack.c.bf16 %v526_v24, %v519_v23  ;;  %v757_v23 = vpack.c.bf16 %v638_v21, %v631_v20  ;;  %v630_v24 = vld [vmem:[%s9218_s28 + $0x630] sm:$0xff] }
  0xbe   : > { %1590 = vmatmul.mubr.bf16.gmra.mrb[56].mxu0 %v754_v28  ;;  %v7974_v28 = vld [vmem:[%s12001_s2 + $0x2a0] ss:$8 sps:$4 sm:$0xff]  }
  0xbf   : > { %1599 = vmatprep.mubr.bf16.mxu0 %v762_v29  ;;  %v7979_v29 = vld [vmem:[%s12001_s2 + $0x2b4] ss:$8 sps:$4 sm:$0xff]  }
  0xc6   : > { %1600 = vmatmul.mubr.bf16.gmra.mrb[60].mxu0 %v761_v34  ;;  %v540_v34 = vld [vmem:[%s9218_s28 + $0x360] sm:$0xff] }
  0xc7   : > { %1642 = vmatprep.mubr.bf16.mxu0 %v659_v35  ;;  %v7982_v35 = vld [vmem:[%s12001_s2 + $0x2c4] ss:$8 sps:$4 sm:$0xff]   ;;  %v708_v37 = vpack.c.bf16 %v540_v34, %v533_v33  ;;  %v763_v34 = vpack.c.bf16 %v651_v31, %v644_v30 }
  0xc8   : > { %v444_v33 = vld [vmem:[%s9218_s28 + $0x60] sm:$0xff]  ;;  %v577_v30 = vld [vmem:[%s9218_s28 + $0x488] sm:$0xff] }
  0xc9   : > { %v584_v31 = vld [vmem:[%s9218_s28 + $0x4c0] sm:$0xff] }
  0xce   : > { %1643 = vmatmul.mubr.bf16.vlgmr.msra.gmra.mrb[0].mxu0 %v658_v40  ;;  %v532_v40 = vld [vmem:[%s9218_s28 + $0x320] sm:$0xff] }
  0xcf   : > { %1804 = vmatpush1.bf16.msra.mxu0 %v7944_v41  ;;  %1652 = vmatprep.mubr.bf16.mxu0 %v666_v42  ;;  %v539_v41 = vld [vmem:[%s9218_s28 + $0x358] sm:$0xff] }
  0xd0   : > { %1805 = vmatprep.subr.bf16.mxu0 %v7949_v43  ;;  %v7983_v42 = vld [vmem:[%s12001_s2 + $0x2d0] ss:$8 sps:$4 sm:$0xff]  }
  0xd1   : > { %v547_v43 = vld [vmem:[%s9218_s28 + $0x398] sm:$0xff] }
  0xd2   : > { %v715_v47 = vpack.c.bf16 %v554_v44, %v547_v43  ;;  %v450_v44 = vld [vmem:[%s9218_s28 + $0x90] sm:$0xff] }
  0xd3   : > { %1806 = vmatpush1.bf16.msra.mxu0 %v7947_v46  ;;  %v707_v46 = vpack.c.bf16 %v539_v41, %v532_v40  ;;  %v458_v40 = vld [vmem:[%s9218_s28 + $0xd0] sm:$0xff] }
  0xd4   : > { %1807 = vmatprep.subr.bf16.mxu0 %v7952_v49  ;;  %v7991_v49 = vld [vmem:[%s12001_s2 + $0x2f4] ss:$8 sps:$4 sm:$0xff]  }
  0xd6   : > { %1653 = vmatmul.mubr.bf16.gmra.mrb[4].mxu0 %v665_v50  ;;  %v546_v50 = vld [vmem:[%s9218_s28 + $0x390] sm:$0xff] }
  0xd7   : > { %1662 = vmatprep.mubr.bf16.mxu0 %v673_v51  ;;  %1808 = vmatpush1.bf16.msra.mxu0 %v7950_v52  ;;  %v553_v51 = vld [vmem:[%s9218_s28 + $0x3c8] sm:$0xff]  ;;  %v7989_v52 = vld [vmem:[%s12001_s2 + $0x2f0] ss:$8 sps:$4 sm:$0xff]  }
  0xd8   : > { %1809 = vmatprep.subr.bf16.mxu0 %v7955_v53  ;;  %v561_v53 = vld [vmem:[%s9218_s28 + $0x408] sm:$0xff] }
  0xd9   : > { %v722_v57 = vpack.c.bf16 %v568_v54, %v561_v53  ;;  %v486_v53 = vld [vmem:[%s9218_s28 + $0x1b0] sm:$0xff] }
  0xdb   : > { %1810 = vmatpush1.bf16.msra.mxu0 %v7953_v56  ;;  %v714_v56 = vpack.c.bf16 %v553_v51, %v546_v50  ;;  %v464_v50 = vld [vmem:[%s9218_s28 + $0x100] sm:$0xff]  ;;  %v471_v51 = vld [vmem:[%s9218_s28 + $0x138] sm:$0xff] }
  0xdc   : > { %1811 = vmatprep.subr.bf16.mxu0 %v7958_v59  ;;  %v567_v59 = vld [vmem:[%s9218_s28 + $0x438] sm:$0xff]  ;;  %v674_v54 = vpack.c.bf16 %v471_v51, %v464_v50  ;;  %v626_v50 = vld [vmem:[%s9218_s28 + $0x610] sm:$0xff] }
  0xde   : > { %1663 = vmatmul.mubr.bf16.gmra.mrb[8].mxu0 %v672_v60  ;;  %v575_v60 = vld [vmem:[%s9218_s28 + $0x478] sm:$0xff] }
  0xdf   : > { %1672 = vmatprep.mubr.bf16.mxu0 %v680_v61  ;;  %1812 = vmatpush1.bf16.msra.mxu0 %v7956_v62  ;;  %v582_v61 = vld [vmem:[%s9218_s28 + $0x4b0] sm:$0xff]  ;;  %v721_v62 = vpack.c.bf16 %v567_v59, %v560_v58  ;;  %v493_v58 = vld [vmem:[%s9218_s28 + $0x1e8] sm:$0xff]  ;;  %v500_v59 = vld [vmem:[%s9218_s28 + $0x220] sm:$0xff] }
  0xe0   : > { %1813 = vmatprep.subr.bf16.mxu0 %v7961_v63  ;;  %v729_v63 = vpack.c.bf16 %v582_v61, %v575_v60  ;;  %v689_v61 = vpack.c.bf16 %v500_v59, %v493_v58  ;;  %v632_v59 = vld [vmem:[%s9218_s28 + $0x640] sm:$0xff] }
  0xe3   : > { %1814 = vmatpush1.bf16.msra.mxu0 %v7959_v2  ;;  %v589_v2 = vld [vmem:[%s9218_s28 + $0x4e8] sm:$0xff] }
  0xe4   : > { %1815 = vmatprep.subr.bf16.mxu0 %v7964_v5  ;;  %v736_v5 = vpack.c.bf16 %v596_v3, %v589_v2  ;;  %v696_v3 = vpack.c.bf16 %v514_v1, %v507_v0  ;;  %v646_v1 = vld [vmem:[%s9218_s28 + $0x6b0] sm:$0xff] }
  0xe6   : > { %1673 = vmatmul.mubr.bf16.gmra.mrb[12].mxu0 %v679_v6  ;;  %v588_v6 = vld [vmem:[%s9218_s28 + $0x4e0] sm:$0xff] }
  0xe7   : > { %1682 = vmatprep.mubr.bf16.mxu0 %v687_v7  ;;  %1816 = vmatpush1.bf16.msra.mxu0 %v7962_v8  ;;  %v595_v7 = vld [vmem:[%s9218_s28 + $0x518] sm:$0xff] }
  0xe8   : > { %1817 = vmatprep.subr.bf16.mxu0 %v7967_v9  ;;  %v603_v8 = vld [vmem:[%s9218_s28 + $0x558] sm:$0xff]  ;;  %v610_v9 = vld [vmem:[%s9218_s28 + $0x590] sm:$0xff]  ;;  %v735_v10 = vpack.c.bf16 %v595_v7, %v588_v6  ;;  %v521_v6 = vld [vmem:[%s9218_s28 + $0x2c8] sm:$0xff] }
  0xe9   : > { %v743_v11 = vpack.c.bf16 %v610_v9, %v603_v8  ;;  %v528_v7 = vld [vmem:[%s9218_s28 + $0x300] sm:$0xff] }
  0xea   : > { %v703_v9 = vpack.c.bf16 %v528_v7, %v521_v6  ;;  %v445_v6 = vld [vmem:[%s9218_s28 + $0x68] sm:$0xff] }
  0xeb   : > { %1818 = vmatpush1.bf16.msra.mxu0 %v7965_v12  ;;  %v602_v12 = vld [vmem:[%s9218_s28 + $0x550] sm:$0xff]  ;;  %v7996_v7 = vld [vmem:[%s12003_s4 + $0x8] sm:$0xff]  }
  0xec   : > { %1819 = vmatprep.subr.bf16.mxu0 %v7970_v15  ;;  %v624_v15 = vld [vmem:[%s9218_s28 + $0x600] sm:$0xff] }
  0xee   : > { %1683 = vmatmul.mubr.bf16.gmra.mrb[16].mxu0 %v686_v16  ;;  %v742_v16 = vpack.c.bf16 %v609_v13, %v602_v12  ;;  %v535_v12 = vld [vmem:[%s9218_s28 + $0x338] sm:$0xff]  ;;  %v542_v13 = vld [vmem:[%s9218_s28 + $0x370] sm:$0xff] }
  0xef   : > { %1692 = vmatprep.mubr.bf16.mxu0 %v694_v17  ;;  %1820 = vmatpush1.bf16.msra.mxu0 %v7968_v18  ;;  %v750_v17 = vpack.c.bf16 %v624_v15, %v617_v14  ;;  %v616_v18 = vld [vmem:[%s9218_s28 + $0x5c0] sm:$0xff]  ;;  %v710_v15 = vpack.c.bf16 %v542_v13, %v535_v12  ;;  %v7998_v12 = vld [vmem:[%s12003_s4 + $0x18] sm:$0xff]  }
  0xf0   : > { %1821 = vmatprep.subr.bf16.mxu0 %v7973_v19  ;;  %v623_v19 = vld [vmem:[%s9218_s28 + $0x5f8] sm:$0xff] }
  0xf3   : > { %1822 = vmatpush1.bf16.msra.mxu0 %v7971_v22  ;;  %v749_v22 = vpack.c.bf16 %v623_v19, %v616_v18  ;;  %v549_v18 = vld [vmem:[%s9218_s28 + $0x3a8] sm:$0xff]  ;;  %v556_v19 = vld [vmem:[%s9218_s28 + $0x3e0] sm:$0xff] }
  0xf4   : > { %1823 = vmatprep.subr.bf16.mxu0 %v7976_v25  ;;  %v637_v25 = vld [vmem:[%s9218_s28 + $0x668] sm:$0xff]  ;;  %v717_v21 = vpack.c.bf16 %v556_v19, %v549_v18  ;;  %v8001_v19 = vld [vmem:[%s12003_s4 + $0x30] sm:$0xff]  }
  0xf6   : > { %1693 = vmatmul.mubr.bf16.gmra.mrb[20].mxu0 %v693_v26  ;;  %v645_v26 = vld [vmem:[%s9218_s28 + $0x6a8] sm:$0xff] }
  0xf7   : > { %1702 = vmatprep.mubr.bf16.mxu0 %v701_v27  ;;  %1824 = vmatpush1.bf16.msra.mxu0 %v7974_v28  ;;  %v652_v27 = vld [vmem:[%s9218_s28 + $0x6e0] sm:$0xff]  ;;  %v756_v28 = vpack.c.bf16 %v637_v25, %v630_v24  ;;  %v563_v24 = vld [vmem:[%s9218_s28 + $0x418] sm:$0xff]  ;;  %v570_v25 = vld [vmem:[%s9218_s28 + $0x450] sm:$0xff] }
  0xf8   : > { %1825 = vmatprep.subr.bf16.mxu0 %v7979_v29  ;;  %v764_v29 = vpack.c.bf16 %v652_v27, %v645_v26  ;;  %v724_v27 = vpack.c.bf16 %v570_v25, %v563_v24  ;;  %v8003_v24 = vld [vmem:[%s12003_s4 + $0x40] sm:$0xff]   ;;  %v494_v25 = vld [vmem:[%s9218_s28 + $0x1f0] sm:$0xff] }
  0xfb   : > { %1826 = vmatpush1.bf16.msra.mxu0 %v7977_v32  ;;  %v437_v32 = vld [vmem:[%s9218_s28 + $0x28] sm:$0xff] }
  0xfc   : > { %1827 = vmatprep.subr.bf16.mxu0 %v7982_v35  ;;  %v661_v35 = vpack.c.bf16 %v444_v33, %v437_v32  ;;  %v731_v33 = vpack.c.bf16 %v584_v31, %v577_v30  ;;  %v515_v30 = vld [vmem:[%s9218_s28 + $0x298] sm:$0xff] }
  0xfe   : > { %1703 = vmatmul.mubr.bf16.gmra.mrb[24].mxu0 %v700_v36  ;;  %v436_v36 = vld [vmem:[%s9218_s28 + $0x20] sm:$0xff] }
  0xff   : > { %1712 = vmatprep.mubr.bf16.mxu0 %v708_v37  ;;  %1828 = vmatpush1.bf16.msra.mxu0 %v7980_v38  ;;  %v443_v37 = vld [vmem:[%s9218_s28 + $0x58] sm:$0xff]  ;;  %v9108_v38 = vmov 0  }
 0x100   : > { %1829 = vmatprep.subr.bf16.mxu0 %v7985_v39  ;;  %2445 = vmatprep.subr.bf16.mxu1 %v9108_v38  ;;  %v451_v39 = vld [vmem:[%s9218_s28 + $0x98] sm:$0xff]  ;;  %v660_v41 = vpack.c.bf16 %v443_v37, %v436_v36  ;;  %v598_v37 = vld [vmem:[%s9218_s28 + $0x530] sm:$0xff] }
 0x101   : > { %v668_v43 = vpack.c.bf16 %v458_v40, %v451_v39  ;;  %v591_v36 = vld [vmem:[%s9218_s28 + $0x4f8] sm:$0xff] }
 0x102   : > { %v738_v40 = vpack.c.bf16 %v598_v37, %v591_v36  ;;  %v543_v36 = vld [vmem:[%s9218_s28 + $0x378] sm:$0xff] }
 0x103   : > { %1830 = vmatpush1.bf16.msra.mxu0 %v7983_v42  ;;  %v7992_v42 = vld [vmem:[%s12001_s2 + $0x300] ss:$8 sps:$4 sm:$0xff]  }
 0x104   : > { %1831 = vmatprep.subr.bf16.mxu0 %v7988_v45  ;;  %v457_v45 = vld [vmem:[%s9218_s28 + $0xc8] sm:$0xff] }
 0x106   : > { %1713 = vmatmul.mubr.bf16.gmra.mrb[28].mxu0 %v707_v46  ;;  %v465_v46 = vld [vmem:[%s9218_s28 + $0x108] sm:$0xff] }
 0x107   : > { %1722 = vmatprep.mubr.bf16.mxu0 %v715_v47  ;;  %1832 = vmatpush1.bf16.msra.mxu0 %v7986_v48  ;;  %v472_v47 = vld [vmem:[%s9218_s28 + $0x140] sm:$0xff]  ;;  %v667_v48 = vpack.c.bf16 %v457_v45, %v450_v44 }
 0x108   : > { %1833 = vmatprep.subr.bf16.mxu0 %v7991_v49  ;;  %v675_v49 = vpack.c.bf16 %v472_v47, %v465_v46  ;;  %v612_v44 = vld [vmem:[%s9218_s28 + $0x5a0] sm:$0xff] }
 0x109   : > { %v604_v47 = vld [vmem:[%s9218_s28 + $0x560] sm:$0xff] }
 0x10b   : > { %1834 = vmatpush1.bf16.msra.mxu0 %v7989_v52  ;;  %v479_v52 = vld [vmem:[%s9218_s28 + $0x178] sm:$0xff] }
 0x10c   : > { %1996 = vmatprep.subr.bf16.mxu0 %v7994_v55  ;;  %v682_v55 = vpack.c.bf16 %v486_v53, %v479_v52  ;;  %v618_v53 = vld [vmem:[%s9218_s28 + $0x5d0] sm:$0xff] }
 0x10e   : > { %1723 = vmatmul.mubr.bf16.gmra.mrb[32].mxu0 %v714_v56  ;;  %v478_v56 = vld [vmem:[%s9218_s28 + $0x170] sm:$0xff] }
 0x10f   : > { %1732 = vmatprep.mubr.bf16.mxu0 %v722_v57  ;;  %v485_v57 = vld [vmem:[%s9218_s28 + $0x1a8] sm:$0xff] }
 0x110   : > { %v681_v60 = vpack.c.bf16 %v485_v57, %v478_v56  ;;  %v640_v56 = vld [vmem:[%s9218_s28 + $0x680] sm:$0xff] }
 0x116   : > { %1733 = vmatmul.mubr.bf16.gmra.mrb[36].mxu0 %v721_v62  ;;  %v492_v62 = vld [vmem:[%s9218_s28 + $0x1e0] sm:$0xff] }
 0x117   : > { %1742 = vmatprep.mubr.bf16.mxu0 %v729_v63  ;;  %v499_v63 = vld [vmem:[%s9218_s28 + $0x218] sm:$0xff] }
 0x118   : > { %v688_v2 = vpack.c.bf16 %v499_v63, %v492_v62  ;;  %v654_v62 = vld [vmem:[%s9218_s28 + $0x6f0] sm:$0xff] }
 0x11e   : > { %1743 = vmatmul.mubr.bf16.gmra.mrb[40].mxu0 %v728_v4  ;;  %v506_v4 = vld [vmem:[%s9218_s28 + $0x250] sm:$0xff] }
 0x11f   : > { %1752 = vmatprep.mubr.bf16.mxu0 %v736_v5  ;;  %v513_v5 = vld [vmem:[%s9218_s28 + $0x288] sm:$0xff] }
 0x120   : > { %v695_v8 = vpack.c.bf16 %v513_v5, %v506_v4  ;;  %v7995_v4 = vld [vmem:[%s12003_s4] sm:$0xff]   ;;  %v438_v5 = vld [vmem:[%s9218_s28 + $0x30] sm:$0xff] }
 0x121   : > { %2446 = vmatpush1.bf16.msra.mxu1 %v7995_v4 }
 0x122   : > { %2447 = vmatprep.subr.bf16.mxu1 %v9108_v38 }
 0x125   : > { %2448 = vmatpush1.bf16.msra.mxu1 %v7996_v7 }
 0x126   : > { %1753 = vmatmul.mubr.bf16.gmra.mrb[44].mxu0 %v735_v10  ;;  %v520_v10 = vld [vmem:[%s9218_s28 + $0x2c0] sm:$0xff]  ;;  %2449 = vmatprep.subr.bf16.mxu1 %v9108_v38 }
 0x127   : > { %1762 = vmatprep.mubr.bf16.mxu0 %v743_v11  ;;  %v527_v11 = vld [vmem:[%s9218_s28 + $0x2f8] sm:$0xff] }
 0x128   : > { %v702_v14 = vpack.c.bf16 %v527_v11, %v520_v10  ;;  %v452_v10 = vld [vmem:[%s9218_s28 + $0xa0] sm:$0xff]  ;;  %v459_v11 = vld [vmem:[%s9218_s28 + $0xd8] sm:$0xff] }
 0x129   : > { %v669_v13 = vpack.c.bf16 %v459_v11, %v452_v10  ;;  %v2735_v11 = vld [vmem:[%s9802_s22 + $0x8] sm:$0xff] }
 0x12e   : > { %1763 = vmatmul.mubr.bf16.gmra.mrb[48].mxu0 %v742_v16  ;;  %v534_v16 = vld [vmem:[%s9218_s28 + $0x330] sm:$0xff] }
 0x12f   : > { %1772 = vmatprep.mubr.bf16.mxu0 %v750_v17  ;;  %v541_v17 = vld [vmem:[%s9218_s28 + $0x368] sm:$0xff] }
 0x130   : > { %v709_v20 = vpack.c.bf16 %v541_v17, %v534_v16  ;;  %v473_v16 = vld [vmem:[%s9218_s28 + $0x148] sm:$0xff] }
 0x131   : > { %v8000_v17 = vld [vmem:[%s12003_s4 + $0x28] sm:$0xff]  }
 0x136   : > { %1773 = vmatmul.mubr.bf16.gmra.mrb[52].mxu0 %v749_v22  ;;  %v548_v22 = vld [vmem:[%s9218_s28 + $0x3a0] sm:$0xff] }
 0x137   : > { %1782 = vmatprep.mubr.bf16.mxu0 %v757_v23  ;;  %v555_v23 = vld [vmem:[%s9218_s28 + $0x3d8] sm:$0xff] }
 0x138   : > { %v716_v26 = vpack.c.bf16 %v555_v23, %v548_v22  ;;  %v8002_v22 = vld [vmem:[%s12003_s4 + $0x38] sm:$0xff]  }
 0x13e   : > { %1783 = vmatmul.mubr.bf16.gmra.mrb[56].mxu0 %v756_v28  ;;  %v562_v28 = vld [vmem:[%s9218_s28 + $0x410] sm:$0xff] }
 0x13f   : > { %1792 = vmatprep.mubr.bf16.mxu0 %v764_v29  ;;  %v569_v29 = vld [vmem:[%s9218_s28 + $0x448] sm:$0xff] }
 0x140   : > { %v723_v32 = vpack.c.bf16 %v569_v29, %v562_v28  ;;  %v508_v29 = vld [vmem:[%s9218_s28 + $0x260] sm:$0xff] }
 0x141   : > { %v697_v31 = vpack.c.bf16 %v515_v30, %v508_v29 }
 0x146   : > { %1793 = vmatmul.mubr.bf16.gmra.mrb[60].mxu0 %v763_v34  ;;  %v576_v34 = vld [vmem:[%s9218_s28 + $0x480] sm:$0xff] }
 0x147   : > { %1835 = vmatprep.mubr.bf16.mxu0 %v661_v35  ;;  %v583_v35 = vld [vmem:[%s9218_s28 + $0x4b8] sm:$0xff] }
 0x148   : > { %v730_v39 = vpack.c.bf16 %v583_v35, %v576_v34  ;;  %v536_v35 = vld [vmem:[%s9218_s28 + $0x340] sm:$0xff] }
 0x149   : > { %v711_v37 = vpack.c.bf16 %v543_v36, %v536_v35 }
 0x14e   : > { %1836 = vmatmul.mubr.bf16.vlgmr.msra.gmra.mrb[0].mxu0 %v660_v41  ;;  %v590_v41 = vld [vmem:[%s9218_s28 + $0x4f0] sm:$0xff] }
 0x14f   : > { %1997 = vmatpush1.bf16.msra.mxu0 %v7992_v42  ;;  %1845 = vmatprep.mubr.bf16.mxu0 %v668_v43  ;;  %v597_v42 = vld [vmem:[%s9218_s28 + $0x528] sm:$0xff] }
 0x150   : > { %4704 = vmatprep.subr.bf16.mxu0 %v9108_v38  ;;  %v605_v43 = vld [vmem:[%s9218_s28 + $0x568] sm:$0xff]  ;;  %v737_v45 = vpack.c.bf16 %v597_v42, %v590_v41  ;;  %v564_v42 = vld [vmem:[%s9218_s28 + $0x420] sm:$0xff] }
 0x151   : > { %v745_v46 = vpack.c.bf16 %v612_v44, %v605_v43  ;;  %v571_v43 = vld [vmem:[%s9218_s28 + $0x458] sm:$0xff] }
 0x152   : > { %v725_v44 = vpack.c.bf16 %v571_v43, %v564_v42 }
 0x156   : > { %1846 = vmatmul.mubr.bf16.gmra.mrb[4].mxu0 %v667_v48  ;;  %v611_v48 = vld [vmem:[%s9218_s28 + $0x598] sm:$0xff] }
 0x157   : > { %1855 = vmatprep.mubr.bf16.mxu0 %v675_v49  ;;  %v619_v49 = vld [vmem:[%s9218_s28 + $0x5d8] sm:$0xff]  ;;  %v744_v51 = vpack.c.bf16 %v611_v48, %v604_v47  ;;  %v592_v48 = vld [vmem:[%s9218_s28 + $0x500] sm:$0xff] }
 0x158   : > { %v752_v52 = vpack.c.bf16 %v626_v50, %v619_v49  ;;  %v599_v49 = vld [vmem:[%s9218_s28 + $0x538] sm:$0xff]  ;;  %v8005_v50 = vld [vmem:[%s12003_s4 + $0x50] sm:$0xff]  }
 0x15e   : > { %1856 = vmatmul.mubr.bf16.gmra.mrb[8].mxu0 %v674_v54  ;;  %v625_v54 = vld [vmem:[%s9218_s28 + $0x608] sm:$0xff] }
 0x15f   : > { %1865 = vmatprep.mubr.bf16.mxu0 %v682_v55  ;;  %v633_v55 = vld [vmem:[%s9218_s28 + $0x648] sm:$0xff]  ;;  %v751_v57 = vpack.c.bf16 %v625_v54, %v618_v53  ;;  %v8007_v53 = vld [vmem:[%s12003_s4 + $0x60] ss:$0 sps:$4 sm:$0xff]   ;;  %v606_v54 = vld [vmem:[%s9218_s28 + $0x570] sm:$0xff] }
 0x160   : > { %v759_v58 = vpack.c.bf16 %v640_v56, %v633_v55  ;;  %v613_v55 = vld [vmem:[%s9218_s28 + $0x5a8] sm:$0xff]  ;;  %v2443_v56 = vsel %vm2441_vm1, %v8007_v53, 0  ;;  %v2746_v53 = vld [vmem:[%s9802_s22 + $0x60] sm:$0xff] }
 0x166   : > { %1866 = vmatmul.mubr.bf16.gmra.mrb[12].mxu0 %v681_v60  ;;  %v639_v60 = vld [vmem:[%s9218_s28 + $0x678] sm:$0xff] }
 0x167   : > { %1875 = vmatprep.mubr.bf16.mxu0 %v689_v61  ;;  %v647_v61 = vld [vmem:[%s9218_s28 + $0x6b8] sm:$0xff]  ;;  %v758_v63 = vpack.c.bf16 %v639_v60, %v632_v59 }
 0x168   : > { %v766_v0 = vpack.c.bf16 %v654_v62, %v647_v61  ;;  %v627_v59 = vld [vmem:[%s9218_s28 + $0x618] sm:$0xff]  ;;  %v634_v61 = vld [vmem:[%s9218_s28 + $0x650] sm:$0xff]  ;;  %v641_v62 = vld [vmem:[%s9218_s28 + $0x688] sm:$0xff] }
 0x16e   : > { %1876 = vmatmul.mubr.bf16.gmra.mrb[16].mxu0 %v688_v2  ;;  %v653_v2 = vld [vmem:[%s9218_s28 + $0x6e8] sm:$0xff] }
 0x16f   : > { %1885 = vmatprep.mubr.bf16.mxu0 %v696_v3  ;;  %v765_v3 = vpack.c.bf16 %v653_v2, %v646_v1  ;;  %v655_v1 = vld [vmem:[%s9218_s28 + $0x6f8] sm:$0xff] }
 0x176   : > { %1886 = vmatmul.mubr.bf16.gmra.mrb[20].mxu0 %v695_v8  ;;  %v662_v8 = vpack.c.bf16 %v445_v6, %v438_v5  ;;  %v866_v6 = vld [vmem:[%s12002_s3] sm:$0x3] }
 0x177   : > { %1895 = vmatprep.mubr.bf16.mxu0 %v703_v9  ;;  %v7997_v9 = vld [vmem:[%s12003_s4 + $0x10] sm:$0xff]  }
 0x178   : > { %2450 = vmatpush1.bf16.msra.mxu1 %v7997_v9 }
 0x179   : > { %2451 = vmatprep.subr.bf16.mxu1 %v9108_v38 }
 0x17c   : > { %2452 = vmatpush1.bf16.msra.mxu1 %v7998_v12 }
 0x17d   : > { %2453 = vmatprep.subr.bf16.mxu1 %v9108_v38 }
 0x17e   : > { %1896 = vmatmul.mubr.bf16.gmra.mrb[24].mxu0 %v702_v14  ;;  %v7999_v14 = vld [vmem:[%s12003_s4 + $0x20] sm:$0xff]  }
 0x17f   : > { %1905 = vmatprep.mubr.bf16.mxu0 %v710_v15  ;;  %v466_v15 = vld [vmem:[%s9218_s28 + $0x110] sm:$0xff] }
 0x180   : > { %2454 = vmatpush1.bf16.msra.mxu1 %v7999_v14  ;;  %v676_v18 = vpack.c.bf16 %v473_v16, %v466_v15 }
 0x181   : > { %2455 = vmatprep.subr.bf16.mxu1 %v9108_v38 }
 0x184   : > { %2456 = vmatpush1.bf16.msra.mxu1 %v8000_v17  ;;  %v2736_v17 = vld [vmem:[%s9802_s22 + $0x10] sm:$0xff] }
 0x185   : > { %2457 = vmatprep.subr.bf16.mxu1 %v9108_v38 }
 0x186   : > { %1906 = vmatmul.mubr.bf16.gmra.mrb[28].mxu0 %v709_v20  ;;  %v480_v20 = vld [vmem:[%s9218_s28 + $0x180] sm:$0xff] }
 0x187   : > { %1915 = vmatprep.mubr.bf16.mxu0 %v717_v21  ;;  %v487_v21 = vld [vmem:[%s9218_s28 + $0x1b8] sm:$0xff] }
 0x188   : > { %2458 = vmatpush1.bf16.msra.mxu1 %v8001_v19  ;;  %v683_v23 = vpack.c.bf16 %v487_v21, %v480_v20  ;;  %v2738_v20 = vld [vmem:[%s9802_s22 + $0x20] sm:$0xff] }
 0x189   : > { %2459 = vmatprep.subr.bf16.mxu1 %v9108_v38 }
 0x18c   : > { %2460 = vmatpush1.bf16.msra.mxu1 %v8002_v22  ;;  %v2737_v22 = vld [vmem:[%s9802_s22 + $0x18] sm:$0xff] }
 0x18d   : > { %2461 = vmatprep.subr.bf16.mxu1 %v9108_v38 }
 0x18e   : > { %1916 = vmatmul.mubr.bf16.gmra.mrb[32].mxu0 %v716_v26  ;;  %v501_v26 = vld [vmem:[%s9218_s28 + $0x228] sm:$0xff] }
 0x18f   : > { %1925 = vmatprep.mubr.bf16.mxu0 %v724_v27  ;;  %v8004_v27 = vld [vmem:[%s12003_s4 + $0x48] sm:$0xff]   ;;  %v690_v28 = vpack.c.bf16 %v501_v26, %v494_v25  ;;  %v2740_v25 = vld [vmem:[%s9802_s22 + $0x30] sm:$0xff] }
 0x190   : > { %2462 = vmatpush1.bf16.msra.mxu1 %v8003_v24 }
 0x191   : > { %2463 = vmatprep.subr.bf16.mxu1 %v9108_v38 }
 0x194   : > { %2464 = vmatpush1.bf16.msra.mxu1 %v8004_v27 }
 0x195   : > { %2465 = vmatprep.subr.bf16.mxu1 %v9108_v38 }
 0x196   : > { %1926 = vmatmul.mubr.bf16.gmra.mrb[36].mxu0 %v723_v32  ;;  %v522_v32 = vld [vmem:[%s9218_s28 + $0x2d0] sm:$0xff] }
 0x197   : > { %1935 = vmatprep.mubr.bf16.mxu0 %v731_v33  ;;  %v529_v33 = vld [vmem:[%s9218_s28 + $0x308] sm:$0xff] }
 0x198   : > { %v704_v34 = vpack.c.bf16 %v529_v33, %v522_v32  ;;  %2466 = vmatpush1.bf16.msra.mxu1 %v8005_v50  ;;  %v2743_v50 = vld [vmem:[%s9802_s22 + $0x48] sm:$0xff] }
 0x199   : > { %2467 = vmatprep.subr.bf16.mxu1 %v9108_v38 }
 0x19e   : > { %1936 = vmatmul.mubr.bf16.gmra.mrb[40].mxu0 %v730_v39  ;;  %v550_v39 = vld [vmem:[%s9218_s28 + $0x3b0] sm:$0xff] }
 0x19f   : > { %1945 = vmatprep.mubr.bf16.mxu0 %v738_v40  ;;  %v557_v40 = vld [vmem:[%s9218_s28 + $0x3e8] sm:$0xff] }
 0x1a0   : > { %v718_v41 = vpack.c.bf16 %v557_v40, %v550_v39 }
 0x1a6   : > { %1946 = vmatmul.mubr.bf16.gmra.mrb[44].mxu0 %v737_v45  ;;  %v578_v45 = vld [vmem:[%s9218_s28 + $0x490] sm:$0xff] }
 0x1a7   : > { %1955 = vmatprep.mubr.bf16.mxu0 %v745_v46  ;;  %v585_v46 = vld [vmem:[%s9218_s28 + $0x4c8] sm:$0xff] }
 0x1a8   : > { %v732_v47 = vpack.c.bf16 %v585_v46, %v578_v45 }
 0x1ae   : > { %1956 = vmatmul.mubr.bf16.gmra.mrb[48].mxu0 %v744_v51  ;;  %v739_v51 = vpack.c.bf16 %v599_v49, %v592_v48 }
 0x1af   : > { %1965 = vmatprep.mubr.bf16.mxu0 %v752_v52  ;;  %v8006_v52 = vld [vmem:[%s12003_s4 + $0x58] sm:$0xff]  }
 0x1b0   : > { %2468 = vmatpush1.bf16.msra.mxu1 %v8006_v52 }
 0x1b1   : > { %2469 = vmatprep.subr.bf16.mxu1 %v9108_v38 }
 0x1b4   : > { %2470 = vmatpush1.bf16.msra.mxu1 %v2443_v56 }
 0x1b6   : > { %1966 = vmatmul.mubr.bf16.gmra.mrb[52].mxu0 %v751_v57  ;;  %v746_v57 = vpack.c.bf16 %v613_v55, %v606_v54 }
 0x1b7   : > { %1975 = vmatprep.mubr.bf16.mxu0 %v759_v58  ;;  %v620_v58 = vld [vmem:[%s9218_s28 + $0x5e0] sm:$0xff] }
 0x1b8   : > { %v753_v60 = vpack.c.bf16 %v627_v59, %v620_v58  ;;  %v2745_v59 = vld [vmem:[%s9802_s22 + $0x58] sm:$0xff] }
 0x1be   : > { %1976 = vmatmul.mubr.bf16.gmra.mrb[56].mxu0 %v758_v63  ;;  %v760_v63 = vpack.c.bf16 %v641_v62, %v634_v61  ;;  %v2748_v62 = vld [vmem:[%s9802_s22 + $0x70] sm:$0xff] }
 0x1bf   : > { %1985 = vmatprep.mubr.bf16.mxu0 %v766_v0  ;;  %v648_v0 = vld [vmem:[%s9218_s28 + $0x6c0] sm:$0xff]  ;;  %s9109_s28 = smov 10  }
 0x1c0   : > { %v767_v2 = vpack.c.bf16 %v655_v1, %v648_v0  ;;  %2802 = vrot.lane.b32.xlu1 %v2736_v17, %s9109_s28  ;;  %v2749_v17 = vld [vmem:[%s9802_s22 + $0x78] sm:$0xff] }
 0x1c4   : > { %2804 = vrot.lane.b32.xlu1 %v2737_v22, %s9109_s28 }
 0x1c6   : > { %1986 = vmatmul.mubr.bf16.gmra.mrb[60].mxu0 %v765_v3  ;;  %v868_v3 = vlaneseq }
 0x1c7   : > { %2028 = vmatprep.mubr.bf16.mxu0 %v9108_v38 }
 0x1c8   : > { %v9791_v4 = vshrl.u32 %v868_v3, 7 }
 0x1ca   : > { %12020 = vst [vmem:[#allocation2_spill] sm:$0xff] %v9791_v4  ;;  %v9795_v5 = vsub.s32 0, %v9791_v4  ;;  %v9808_v7 = vsub.s32 1, %v9791_v4 }
 0x1cc   : > { %v9813_v9 = vrot.slane %v866_v6, %v9795_v5  ;;  %v9816_v10 = vrot.slane %v866_v6, %v9808_v7  ;;  %v2747_v6 = vld [vmem:[%s9802_s22 + $0x68] sm:$0xff] }
 0x1ce   : > { %7098 = vmatmul.mubr.msk.bf16.vlgmr.msra.gmra.mrb[0].mxu0 %vm1368_vm0, %v662_v8  ;;  %v2734_v8 = vld [vmem:[%s9802_s22] sm:$0xff] }
 0x1cf   : > { %2038 = vmatprep.mubr.bf16.mxu0 %v9108_v38  ;;  %2798 = vrot.lane.b32.xlu0 %v2734_v8, %s9109_s28 }
 0x1d3   : > { %2800 = vrot.lane.b32.xlu0 %v2735_v11, %s9109_s28 }
 0x1d6   : > { %7099 = vmatmul.mubr.msk.bf16.gmra.mrb[4].mxu0 %vm1368_vm0, %v669_v13 }
 0x1d7   : > { %2048 = vmatprep.mubr.bf16.mxu0 %v9108_v38  ;;  %2806 = vrot.lane.b32.xlu0 %v2738_v20, %s9109_s28 }
 0x1db   : > { %2810 = vrot.lane.b32.xlu0 %v2740_v25, %s9109_s28 }
 0x1de   : > { %7100 = vmatmul.mubr.msk.bf16.gmra.mrb[8].mxu0 %vm1368_vm0, %v676_v18 }
 0x1df   : > { %2058 = vmatprep.mubr.bf16.mxu0 %v9108_v38 }
 0x1e6   : > { %7101 = vmatmul.mubr.msk.bf16.gmra.mrb[12].mxu0 %vm1368_vm0, %v683_v23 }
 0x1e7   : > { %2068 = vmatprep.mubr.bf16.mxu0 %v9108_v38 }
 0x1ee   : > { %7102 = vmatmul.mubr.msk.bf16.gmra.mrb[16].mxu0 %vm1368_vm0, %v690_v28 }
 0x1ef   : > { %2078 = vmatprep.mubr.bf16.mxu0 %v9108_v38 }
 0x1f6   : > { %7103 = vmatmul.mubr.msk.bf16.gmra.mrb[20].mxu0 %vm1368_vm0, %v697_v31  ;;  %v2739_v31 = vld [vmem:[%s9802_s22 + $0x28] sm:$0xff] }
 0x1f7   : > { %2088 = vmatprep.mubr.bf16.mxu0 %v9108_v38  ;;  %2808 = vrot.lane.b32.xlu1 %v2739_v31, %s9109_s28 }
 0x1fe   : > { %7104 = vmatmul.mubr.msk.bf16.gmra.mrb[24].mxu0 %vm1368_vm0, %v704_v34  ;;  %v2742_v34 = vld [vmem:[%s9802_s22 + $0x40] sm:$0xff] }
 0x1ff   : > { %2098 = vmatprep.mubr.bf16.mxu0 %v9108_v38  ;;  %2814 = vrot.lane.b32.xlu0 %v2742_v34, %s9109_s28 }
 0x206   : > { %7105 = vmatmul.mubr.msk.bf16.gmra.mrb[28].mxu0 %vm1368_vm0, %v711_v37 }
 0x207   : > { %2108 = vmatprep.mubr.bf16.mxu0 %v9108_v38 }
 0x20e   : > { %7106 = vmatmul.mubr.msk.bf16.gmra.mrb[32].mxu0 %vm1368_vm0, %v718_v41  ;;  %v2741_v41 = vld [vmem:[%s9802_s22 + $0x38] sm:$0xff] }
 0x20f   : > { %2118 = vmatprep.mubr.bf16.mxu0 %v9108_v38  ;;  %2812 = vrot.lane.b32.xlu1 %v2741_v41, %s9109_s28 }
 0x213   : > { %2816 = vrot.lane.b32.xlu1 %v2743_v50, %s9109_s28 }
 0x216   : > { %7107 = vmatmul.mubr.msk.bf16.gmra.mrb[36].mxu0 %vm1368_vm0, %v725_v44  ;;  %v2744_v44 = vld [vmem:[%s9802_s22 + $0x50] sm:$0xff] }
 0x217   : > { %2128 = vmatprep.mubr.bf16.mxu0 %v9108_v38  ;;  %2818 = vrot.lane.b32.xlu0 %v2744_v44, %s9109_s28 }
 0x218   : > { %2820 = vrot.lane.b32.xlu1 %v2745_v59, %s9109_s28 }
 0x21b   : > { %2822 = vrot.lane.b32.xlu0 %v2746_v53, %s9109_s28 }
 0x21c   : > { %2824 = vrot.lane.b32.xlu1 %v2747_v6, %s9109_s28 }
 0x21e   : > { %7108 = vmatmul.mubr.msk.bf16.gmra.mrb[40].mxu0 %vm1368_vm0, %v732_v47 }
 0x21f   : > { %2138 = vmatprep.mubr.bf16.mxu0 %v9108_v38  ;;  %2826 = vrot.lane.b32.xlu0 %v2748_v62, %s9109_s28 }
 0x220   : > { %2828 = vrot.lane.b32.xlu1 %v2749_v17, %s9109_s28 }
 0x226   : > { %7109 = vmatmul.mubr.msk.bf16.gmra.mrb[44].mxu0 %vm1368_vm0, %v739_v51 }
 0x227   : > { %2148 = vmatprep.mubr.bf16.mxu0 %v9108_v38 }
 0x22e   : > { %7110 = vmatmul.mubr.msk.bf16.gmra.mrb[48].mxu0 %vm1368_vm0, %v746_v57 }
 0x22f   : > { %2158 = vmatprep.mubr.bf16.mxu0 %v9108_v38 }
 0x236   : > { %7111 = vmatmul.mubr.msk.bf16.gmra.mrb[52].mxu0 %vm1368_vm0, %v753_v60 }
 0x237   : > { %2168 = vmatprep.mubr.bf16.mxu0 %v9108_v38 }
 0x23e   : > { %7112 = vmatmul.mubr.msk.bf16.gmra.mrb[56].mxu0 %vm1368_vm0, %v760_v63 }
 0x23f   : > { %2178 = vmatprep.mubr.bf16.mxu0 %v9108_v38 }
 0x246   : > { %7113 = vmatmul.mubr.msk.bf16.gmra.mrb[60].mxu0 %vm1368_vm0, %v767_v2 }
 0x2a1   : > { %v2030_v12 = vpop.f32.mrb[0].mxu0 }
 0x2a2   : > { %v7579_v13 = vadd.f32 %v2030_v12, %v9813_v9  ;;  %v2032_v14 = vpop.f32.mrb[1].mxu0 }
 0x2a3   : > { %v7580_v15 = vadd.f32 %v2032_v14, %v9816_v10  ;;  %v2034_v16 = vpop.f32.mrb[2].mxu0 }
 0x2a4   : > { %v7581_v18 = vadd.f32 %v2034_v16, %v9813_v9  ;;  %v2036_v19 = vpop.f32.mrb[3].mxu0  ;;  %v2189_v23 = vmax.f32 %v7579_v13, 0.0 }
 0x2a5   : > { %v7582_v21 = vadd.f32 %v2036_v19, %v9816_v10  ;;  %v2190_v26 = vmax.f32 %v7580_v15, 0.0 }
 0x2a6   : > { %v2191_v24 = vmax.f32 %v7581_v18, 0.0 }
 0x2a7   : > { %v2192_v27 = vmax.f32 %v7582_v21, 0.0 }
 0x2a8   : > { %v2253_v28 = vpack.c.bf16 %v2191_v24, %v2189_v23 }
 0x2a9   : > { %v2040_v29 = vpop.f32.mrb[4].mxu0  ;;  %v2254_v30 = vpack.c.bf16 %v2192_v27, %v2190_v26 }
 0x2aa   : > { %v7583_v32 = vadd.f32 %v2040_v29, %v9813_v9  ;;  %v2042_v33 = vpop.f32.mrb[5].mxu0 }
 0x2ab   : > { %v7584_v35 = vadd.f32 %v2042_v33, %v9816_v10  ;;  %v2044_v36 = vpop.f32.mrb[6].mxu0  ;;  %7128 = vmatprep.mubr.msk.bf16.mxu1 %vm2392_vm2, %v2254_v30 }
 0x2ac   : > { %v7585_v37 = vadd.f32 %v2044_v36, %v9813_v9  ;;  %v2046_v39 = vpop.f32.mrb[7].mxu0  ;;  %2478 = vmatmul.mubr.bf16.vlgmr.msra.gmra.mrb[0].mxu1 %v2253_v28  ;;  %v2193_v42 = vmax.f32 %v7583_v32, 0.0 }
 0x2ad   : > { %v7586_v40 = vadd.f32 %v2046_v39, %v9816_v10  ;;  %v2194_v45 = vmax.f32 %v7584_v35, 0.0 }
 0x2ae   : > { %v2195_v43 = vmax.f32 %v7585_v37, 0.0 }
 0x2af   : > { %v2196_v46 = vmax.f32 %v7586_v40, 0.0 }
 0x2b0   : > { %v2255_v47 = vpack.c.bf16 %v2195_v43, %v2193_v42 }
 0x2b1   : > { %v2256_v48 = vpack.c.bf16 %v2196_v46, %v2194_v45  ;;  %v2050_v49 = vpop.f32.mrb[8].mxu0 }
 0x2b2   : > { %v7587_v51 = vadd.f32 %v2050_v49, %v9813_v9  ;;  %v2052_v52 = vpop.f32.mrb[9].mxu0 }
 0x2b3   : > { %v7588_v54 = vadd.f32 %v2052_v52, %v9816_v10  ;;  %v2054_v55 = vpop.f32.mrb[10].mxu0  ;;  %7129 = vmatprep.mubr.msk.bf16.mxu1 %vm2392_vm2, %v2256_v48 }
 0x2b4   : > { %v7589_v56 = vadd.f32 %v2054_v55, %v9813_v9  ;;  %v2056_v57 = vpop.f32.mrb[11].mxu0  ;;  %2486 = vmatmul.mubr.bf16.gmra.mrb[4].mxu1 %v2255_v47  ;;  %v2197_v60 = vmax.f32 %v7587_v51, 0.0 }
 0x2b5   : > { %v7590_v58 = vadd.f32 %v2056_v57, %v9816_v10  ;;  %v2198_v63 = vmax.f32 %v7588_v54, 0.0 }
 0x2b6   : > { %v2199_v61 = vmax.f32 %v7589_v56, 0.0 }
 0x2b7   : > { %v2200_v0 = vmax.f32 %v7590_v58, 0.0 }
 0x2b8   : > { %v2257_v1 = vpack.c.bf16 %v2199_v61, %v2197_v60 }
 0x2b9   : > { %v2258_v2 = vpack.c.bf16 %v2200_v0, %v2198_v63  ;;  %v2060_v3 = vpop.f32.mrb[12].mxu0 }
 0x2ba   : > { %v7591_v8 = vadd.f32 %v2060_v3, %v9813_v9  ;;  %v2062_v11 = vpop.f32.mrb[13].mxu0 }
 0x2bb   : > { %v7592_v12 = vadd.f32 %v2062_v11, %v9816_v10  ;;  %v2064_v13 = vpop.f32.mrb[14].mxu0  ;;  %7130 = vmatprep.mubr.msk.bf16.mxu1 %vm2392_vm2, %v2258_v2 }
 0x2bc   : > { %v7593_v14 = vadd.f32 %v2064_v13, %v9813_v9  ;;  %v2066_v15 = vpop.f32.mrb[15].mxu0  ;;  %2494 = vmatmul.mubr.bf16.gmra.mrb[8].mxu1 %v2257_v1  ;;  %v2201_v18 = vmax.f32 %v7591_v8, 0.0 }
 0x2bd   : > { %v7594_v16 = vadd.f32 %v2066_v15, %v9816_v10  ;;  %v2202_v20 = vmax.f32 %v7592_v12, 0.0 }
 0x2be   : > { %v2203_v19 = vmax.f32 %v7593_v14, 0.0 }
 0x2bf   : > { %v2204_v21 = vmax.f32 %v7594_v16, 0.0 }
 0x2c0   : > { %v2259_v22 = vpack.c.bf16 %v2203_v19, %v2201_v18 }
 0x2c1   : > { %v2260_v23 = vpack.c.bf16 %v2204_v21, %v2202_v20  ;;  %v2070_v24 = vpop.f32.mrb[16].mxu0 }
 0x2c2   : > { %v7595_v25 = vadd.f32 %v2070_v24, %v9813_v9  ;;  %v2072_v26 = vpop.f32.mrb[17].mxu0 }
 0x2c3   : > { %v7596_v27 = vadd.f32 %v2072_v26, %v9816_v10  ;;  %v2074_v28 = vpop.f32.mrb[18].mxu0  ;;  %7131 = vmatprep.mubr.msk.bf16.mxu1 %vm2392_vm2, %v2260_v23 }
 0x2c4   : > { %v7597_v29 = vadd.f32 %v2074_v28, %v9813_v9  ;;  %v2076_v30 = vpop.f32.mrb[19].mxu0  ;;  %2502 = vmatmul.mubr.bf16.gmra.mrb[12].mxu1 %v2259_v22  ;;  %v2205_v32 = vmax.f32 %v7595_v25, 0.0 }
 0x2c5   : > { %v7598_v31 = vadd.f32 %v2076_v30, %v9816_v10  ;;  %v2206_v34 = vmax.f32 %v7596_v27, 0.0 }
 0x2c6   : > { %v2207_v33 = vmax.f32 %v7597_v29, 0.0 }
 0x2c7   : > { %v2208_v35 = vmax.f32 %v7598_v31, 0.0 }
 0x2c8   : > { %v2261_v36 = vpack.c.bf16 %v2207_v33, %v2205_v32 }
 0x2c9   : > { %v2262_v37 = vpack.c.bf16 %v2208_v35, %v2206_v34  ;;  %v2080_v39 = vpop.f32.mrb[20].mxu0 }
 0x2ca   : > { %v7599_v40 = vadd.f32 %v2080_v39, %v9813_v9  ;;  %v2082_v41 = vpop.f32.mrb[21].mxu0 }
 0x2cb   : > { %v7600_v42 = vadd.f32 %v2082_v41, %v9816_v10  ;;  %v2084_v43 = vpop.f32.mrb[22].mxu0  ;;  %7132 = vmatprep.mubr.msk.bf16.mxu1 %vm2392_vm2, %v2262_v37 }
 0x2cc   : > { %v7601_v44 = vadd.f32 %v2084_v43, %v9813_v9  ;;  %v2086_v45 = vpop.f32.mrb[23].mxu0  ;;  %2510 = vmatmul.mubr.bf16.gmra.mrb[16].mxu1 %v2261_v36  ;;  %v2209_v47 = vmax.f32 %v7599_v40, 0.0 }
 0x2cd   : > { %v7602_v46 = vadd.f32 %v2086_v45, %v9816_v10  ;;  %v2210_v49 = vmax.f32 %v7600_v42, 0.0 }
 0x2ce   : > { %v2211_v48 = vmax.f32 %v7601_v44, 0.0 }
 0x2cf   : > { %v2212_v50 = vmax.f32 %v7602_v46, 0.0 }
 0x2d0   : > { %v2263_v51 = vpack.c.bf16 %v2211_v48, %v2209_v47 }
 0x2d1   : > { %v2264_v52 = vpack.c.bf16 %v2212_v50, %v2210_v49  ;;  %v2090_v53 = vpop.f32.mrb[24].mxu0 }
 0x2d2   : > { %v7603_v54 = vadd.f32 %v2090_v53, %v9813_v9  ;;  %v2092_v55 = vpop.f32.mrb[25].mxu0 }
 0x2d3   : > { %v7604_v56 = vadd.f32 %v2092_v55, %v9816_v10  ;;  %v2094_v57 = vpop.f32.mrb[26].mxu0  ;;  %7133 = vmatprep.mubr.msk.bf16.mxu1 %vm2392_vm2, %v2264_v52 }
 0x2d4   : > { %v7605_v58 = vadd.f32 %v2094_v57, %v9813_v9  ;;  %v2096_v59 = vpop.f32.mrb[27].mxu0  ;;  %2518 = vmatmul.mubr.bf16.gmra.mrb[20].mxu1 %v2263_v51  ;;  %v2213_v61 = vmax.f32 %v7603_v54, 0.0 }
 0x2d5   : > { %v7606_v60 = vadd.f32 %v2096_v59, %v9816_v10  ;;  %v2214_v63 = vmax.f32 %v7604_v56, 0.0 }
 0x2d6   : > { %v2215_v62 = vmax.f32 %v7605_v58, 0.0 }
 0x2d7   : > { %v2216_v0 = vmax.f32 %v7606_v60, 0.0 }
 0x2d8   : > { %v2265_v1 = vpack.c.bf16 %v2215_v62, %v2213_v61 }
 0x2d9   : > { %v2266_v2 = vpack.c.bf16 %v2216_v0, %v2214_v63  ;;  %v2100_v3 = vpop.f32.mrb[28].mxu0 }
 0x2da   : > { %v7607_v6 = vadd.f32 %v2100_v3, %v9813_v9  ;;  %v2102_v8 = vpop.f32.mrb[29].mxu0 }
 0x2db   : > { %v7608_v11 = vadd.f32 %v2102_v8, %v9816_v10  ;;  %v2104_v12 = vpop.f32.mrb[30].mxu0  ;;  %7134 = vmatprep.mubr.msk.bf16.mxu1 %vm2392_vm2, %v2266_v2 }
 0x2dc   : > { %v7609_v13 = vadd.f32 %v2104_v12, %v9813_v9  ;;  %v2106_v14 = vpop.f32.mrb[31].mxu0  ;;  %2526 = vmatmul.mubr.bf16.gmra.mrb[24].mxu1 %v2265_v1  ;;  %v2217_v16 = vmax.f32 %v7607_v6, 0.0 }
 0x2dd   : > { %v7610_v15 = vadd.f32 %v2106_v14, %v9816_v10  ;;  %v2218_v18 = vmax.f32 %v7608_v11, 0.0 }
 0x2de   : > { %v2219_v17 = vmax.f32 %v7609_v13, 0.0 }
 0x2df   : > { %v2220_v19 = vmax.f32 %v7610_v15, 0.0 }
 0x2e0   : > { %v2267_v20 = vpack.c.bf16 %v2219_v17, %v2217_v16 }
 0x2e1   : > { %v2268_v21 = vpack.c.bf16 %v2220_v19, %v2218_v18  ;;  %v2110_v22 = vpop.f32.mrb[32].mxu0 }
 0x2e2   : > { %v7611_v23 = vadd.f32 %v2110_v22, %v9813_v9  ;;  %v2112_v24 = vpop.f32.mrb[33].mxu0 }
 0x2e3   : > { %v7612_v25 = vadd.f32 %v2112_v24, %v9816_v10  ;;  %v2114_v26 = vpop.f32.mrb[34].mxu0  ;;  %7135 = vmatprep.mubr.msk.bf16.mxu1 %vm2392_vm2, %v2268_v21 }
 0x2e4   : > { %v7613_v27 = vadd.f32 %v2114_v26, %v9813_v9  ;;  %v2116_v28 = vpop.f32.mrb[35].mxu0  ;;  %2534 = vmatmul.mubr.bf16.gmra.mrb[28].mxu1 %v2267_v20  ;;  %v2221_v30 = vmax.f32 %v7611_v23, 0.0 }
 0x2e5   : > { %v7614_v29 = vadd.f32 %v2116_v28, %v9816_v10  ;;  %v2222_v32 = vmax.f32 %v7612_v25, 0.0 }
 0x2e6   : > { %v2223_v31 = vmax.f32 %v7613_v27, 0.0 }
 0x2e7   : > { %v2224_v33 = vmax.f32 %v7614_v29, 0.0 }
 0x2e8   : > { %v2269_v34 = vpack.c.bf16 %v2223_v31, %v2221_v30 }
 0x2e9   : > { %v2270_v35 = vpack.c.bf16 %v2224_v33, %v2222_v32  ;;  %v2120_v36 = vpop.f32.mrb[36].mxu0 }
 0x2ea   : > { %v7615_v37 = vadd.f32 %v2120_v36, %v9813_v9  ;;  %v2122_v39 = vpop.f32.mrb[37].mxu0 }
 0x2eb   : > { %v7616_v40 = vadd.f32 %v2122_v39, %v9816_v10  ;;  %v2124_v41 = vpop.f32.mrb[38].mxu0  ;;  %7136 = vmatprep.mubr.msk.bf16.mxu1 %vm2392_vm2, %v2270_v35 }
 0x2ec   : > { %v7617_v42 = vadd.f32 %v2124_v41, %v9813_v9  ;;  %v2126_v43 = vpop.f32.mrb[39].mxu0  ;;  %2542 = vmatmul.mubr.bf16.gmra.mrb[32].mxu1 %v2269_v34  ;;  %v2225_v45 = vmax.f32 %v7615_v37, 0.0 }
 0x2ed   : > { %v7618_v44 = vadd.f32 %v2126_v43, %v9816_v10  ;;  %v2226_v47 = vmax.f32 %v7616_v40, 0.0 }
 0x2ee   : > { %v2227_v46 = vmax.f32 %v7617_v42, 0.0 }
 0x2ef   : > { %v2228_v48 = vmax.f32 %v7618_v44, 0.0 }
 0x2f0   : > { %v2271_v49 = vpack.c.bf16 %v2227_v46, %v2225_v45 }
 0x2f1   : > { %v2272_v50 = vpack.c.bf16 %v2228_v48, %v2226_v47  ;;  %v2130_v51 = vpop.f32.mrb[40].mxu0 }
 0x2f2   : > { %v7619_v52 = vadd.f32 %v2130_v51, %v9813_v9  ;;  %v2132_v53 = vpop.f32.mrb[41].mxu0 }
 0x2f3   : > { %v7620_v54 = vadd.f32 %v2132_v53, %v9816_v10  ;;  %v2134_v55 = vpop.f32.mrb[42].mxu0  ;;  %7137 = vmatprep.mubr.msk.bf16.mxu1 %vm2392_vm2, %v2272_v50 }
 0x2f4   : > { %v7621_v56 = vadd.f32 %v2134_v55, %v9813_v9  ;;  %v2136_v57 = vpop.f32.mrb[43].mxu0  ;;  %2550 = vmatmul.mubr.bf16.gmra.mrb[36].mxu1 %v2271_v49  ;;  %v2229_v59 = vmax.f32 %v7619_v52, 0.0 }
 0x2f5   : > { %v7622_v58 = vadd.f32 %v2136_v57, %v9816_v10  ;;  %v2230_v61 = vmax.f32 %v7620_v54, 0.0 }
 0x2f6   : > { %v2231_v60 = vmax.f32 %v7621_v56, 0.0 }
 0x2f7   : > { %v2232_v62 = vmax.f32 %v7622_v58, 0.0 }
 0x2f8   : > { %v2273_v63 = vpack.c.bf16 %v2231_v60, %v2229_v59 }
 0x2f9   : > { %v2274_v0 = vpack.c.bf16 %v2232_v62, %v2230_v61  ;;  %v2140_v1 = vpop.f32.mrb[44].mxu0 }
 0x2fa   : > { %v7623_v2 = vadd.f32 %v2140_v1, %v9813_v9  ;;  %v2142_v3 = vpop.f32.mrb[45].mxu0 }
 0x2fb   : > { %v7624_v6 = vadd.f32 %v2142_v3, %v9816_v10  ;;  %v2144_v8 = vpop.f32.mrb[46].mxu0  ;;  %7138 = vmatprep.mubr.msk.bf16.mxu1 %vm2392_vm2, %v2274_v0 }
 0x2fc   : > { %v7625_v11 = vadd.f32 %v2144_v8, %v9813_v9  ;;  %v2146_v12 = vpop.f32.mrb[47].mxu0  ;;  %2558 = vmatmul.mubr.bf16.gmra.mrb[40].mxu1 %v2273_v63  ;;  %v2233_v14 = vmax.f32 %v7623_v2, 0.0 }
 0x2fd   : > { %v7626_v13 = vadd.f32 %v2146_v12, %v9816_v10  ;;  %v2234_v16 = vmax.f32 %v7624_v6, 0.0 }
 0x2fe   : > { %v2235_v15 = vmax.f32 %v7625_v11, 0.0 }
 0x2ff   : > { %v2236_v17 = vmax.f32 %v7626_v13, 0.0 }
 0x300   : > { %v2275_v18 = vpack.c.bf16 %v2235_v15, %v2233_v14 }
 0x301   : > { %v2276_v19 = vpack.c.bf16 %v2236_v17, %v2234_v16  ;;  %v2150_v20 = vpop.f32.mrb[48].mxu0 }
 0x302   : > { %v7627_v21 = vadd.f32 %v2150_v20, %v9813_v9  ;;  %v2152_v22 = vpop.f32.mrb[49].mxu0 }
 0x303   : > { %v7628_v23 = vadd.f32 %v2152_v22, %v9816_v10  ;;  %v2154_v24 = vpop.f32.mrb[50].mxu0  ;;  %7139 = vmatprep.mubr.msk.bf16.mxu1 %vm2392_vm2, %v2276_v19  ;;  %v9938_v19 = vld [vmem:[%s12004_s5] ss:$0 sm:$0xff] }
 0x304   : > { %v7629_v25 = vadd.f32 %v2154_v24, %v9813_v9  ;;  %v2156_v26 = vpop.f32.mrb[51].mxu0  ;;  %2566 = vmatmul.mubr.bf16.gmra.mrb[44].mxu1 %v2275_v18  ;;  %v2237_v28 = vmax.f32 %v7627_v21, 0.0 }
 0x305   : > { %v7630_v27 = vadd.f32 %v2156_v26, %v9816_v10  ;;  %v2238_v30 = vmax.f32 %v7628_v23, 0.0 }
 0x306   : > { %v2239_v29 = vmax.f32 %v7629_v25, 0.0 }
 0x307   : > { %v2240_v31 = vmax.f32 %v7630_v27, 0.0 }
 0x308   : > { %v2277_v32 = vpack.c.bf16 %v2239_v29, %v2237_v28 }
 0x309   : > { %v2278_v33 = vpack.c.bf16 %v2240_v31, %v2238_v30  ;;  %v2160_v34 = vpop.f32.mrb[52].mxu0 }
 0x30a   : > { %v7631_v35 = vadd.f32 %v2160_v34, %v9813_v9  ;;  %v2162_v36 = vpop.f32.mrb[53].mxu0 }
 0x30b   : > { %v7632_v37 = vadd.f32 %v2162_v36, %v9816_v10  ;;  %v2164_v39 = vpop.f32.mrb[54].mxu0  ;;  %7140 = vmatprep.mubr.msk.bf16.mxu1 %vm2392_vm2, %v2278_v33 }
 0x30c   : > { %v7633_v40 = vadd.f32 %v2164_v39, %v9813_v9  ;;  %v2166_v41 = vpop.f32.mrb[55].mxu0  ;;  %2574 = vmatmul.mubr.bf16.gmra.mrb[48].mxu1 %v2277_v32  ;;  %v2241_v43 = vmax.f32 %v7631_v35, 0.0 }
 0x30d   : > { %v7634_v42 = vadd.f32 %v2166_v41, %v9816_v10  ;;  %v2242_v45 = vmax.f32 %v7632_v37, 0.0  ;;  %v2799_v37 = vpop.permute.xlu0 %2798 }
 0x30e   : > { %v2243_v44 = vmax.f32 %v7633_v40, 0.0 }
 0x30f   : > { %v2244_v46 = vmax.f32 %v7634_v42, 0.0 }
 0x310   : > { %v2279_v47 = vpack.c.bf16 %v2243_v44, %v2241_v43 }
 0x311   : > { %v2280_v48 = vpack.c.bf16 %v2244_v46, %v2242_v45  ;;  %v2170_v49 = vpop.f32.mrb[56].mxu0  ;;  %v2801_v46 = vpop.permute.xlu0 %2800 }
 0x312   : > { %v7635_v50 = vadd.f32 %v2170_v49, %v9813_v9  ;;  %v2172_v51 = vpop.f32.mrb[57].mxu0 }
 0x313   : > { %v7636_v52 = vadd.f32 %v2172_v51, %v9816_v10  ;;  %v2174_v53 = vpop.f32.mrb[58].mxu0  ;;  %7141 = vmatprep.mubr.msk.bf16.mxu1 %vm2392_vm2, %v2280_v48 }
 0x314   : > { %v7637_v54 = vadd.f32 %v2174_v53, %v9813_v9  ;;  %v2176_v55 = vpop.f32.mrb[59].mxu0  ;;  %2582 = vmatmul.mubr.bf16.gmra.mrb[52].mxu1 %v2279_v47  ;;  %v2245_v57 = vmax.f32 %v7635_v50, 0.0 }
 0x315   : > { %v7638_v56 = vadd.f32 %v2176_v55, %v9816_v10  ;;  %v2246_v59 = vmax.f32 %v7636_v52, 0.0 }
 0x316   : > { %v2247_v58 = vmax.f32 %v7637_v54, 0.0  ;;  %v2803_v54 = vpop.permute.xlu1 %2802 }
 0x317   : > { %v2248_v60 = vmax.f32 %v7638_v56, 0.0 }
 0x318   : > { %v2281_v61 = vpack.c.bf16 %v2247_v58, %v2245_v57 }
 0x319   : > { %v2282_v62 = vpack.c.bf16 %v2248_v60, %v2246_v59  ;;  %v2180_v63 = vpop.f32.mrb[60].mxu0  ;;  %v2750_v59 = vld [vmem:[%s9802_s22 + $0x80] sm:$0xff] }
 0x31a   : > { %v7639_v0 = vadd.f32 %v2180_v63, %v9813_v9  ;;  %v2182_v1 = vpop.f32.mrb[61].mxu0 }
 0x31b   : > { %v7640_v2 = vadd.f32 %v2182_v1, %v9816_v10  ;;  %v2184_v3 = vpop.f32.mrb[62].mxu0  ;;  %7142 = vmatprep.mubr.msk.bf16.mxu1 %vm2392_vm2, %v2282_v62 }
 0x31c   : > { %v7641_v6 = vadd.f32 %v2184_v3, %v9813_v9  ;;  %v2186_v8 = vpop.f32.mrb[63].mxu0  ;;  %2590 = vmatmul.mubr.bf16.gmra.mrb[56].mxu1 %v2281_v61  ;;  %v2249_v12 = vmax.f32 %v7639_v0, 0.0  ;;  %v8008_v9 = vld [vmem:[%s12005_s6 + $0x4] ss:$8 sps:$4 sm:$0x1f]  }
 0x31d   : > { %v7642_v11 = vadd.f32 %v2186_v8, %v9816_v10  ;;  %v2250_v14 = vmax.f32 %v7640_v2, 0.0  ;;  %v8010_v10 = vld [vmem:[%s12005_s6] ss:$8 sps:$4 sm:$0x1f]   ;;  %7146 = vmatprep.subr.msk.bf16.mxu1 %vm3173_vm3, %v8008_v9  ;;  %v2805_v2 = vpop.permute.xlu1 %2804 }
 0x31e   : > { %v2251_v13 = vmax.f32 %v7641_v6, 0.0  ;;  %v3175_v18 = vsel %vm3173_vm3, %v8010_v10, 0  ;;  %v2751_v61 = vld [vmem:[%s9802_s22 + $0x88] sm:$0xff]  ;;  %v2752_v10 = vld [vmem:[%s9802_s22 + $0x90] sm:$0xff] }
 0x31f   : > { %v2252_v15 = vmax.f32 %v7642_v11, 0.0  ;;  %3181 = vmatpush1.bf16.msra.mxu1 %v3175_v18 }
 0x320   : > { %v2283_v16 = vpack.c.bf16 %v2251_v13, %v2249_v12 }
 0x321   : > { %v2284_v17 = vpack.c.bf16 %v2252_v15, %v2250_v14 }
 0x323   : > { %7143 = vmatprep.mubr.msk.bf16.mxu1 %vm2392_vm2, %v2284_v17 }
 0x324   : > { %2598 = vmatmul.mubr.bf16.gmra.mrb[60].mxu1 %v2283_v16 }
 0x325   : > { %3212 = vmatprep.mubr.bf16.mxu1 %v9108_v38 }
 0x37f   : > { %v2479_v20 = vpop.f32.mrb[0].mxu1 }
 0x380   : > { %v9948_v21 = vadd.f32 %v9938_v19, %v2479_v20  ;;  %v2481_v22 = vpop.f32.mrb[1].mxu1  ;;  %v2807_v20 = vpop.permute.xlu0 %2806 }
 0x381   : > { %v2482_v23 = vpop.f32.mrb[2].mxu1  ;;  %v2753_v22 = vld [vmem:[%s9802_s22 + $0x98] sm:$0xff] }
 0x382   : > { %v2606_v24 = vmul.f32 0.5, %v9948_v21  ;;  %5985 = vst.msk [vmem:[%s9945_s16] sm:$0xff] %vm3124_vm4, %v9948_v21  ;;  %v9955_v25 = vadd.f32 %v9938_v19, %v2482_v23  ;;  %v2484_v26 = vpop.f32.mrb[3].mxu1 }
 0x384   : > { %v2638_v27 = vmul.f32 1.442695, %v2606_v24  ;;  %v2607_v28 = vmul.f32 0.5, %v9955_v25  ;;  %5986 = vst.msk [vmem:[%s9945_s16 + $0x8] sm:$0xff] %vm3124_vm4, %v9955_v25 }
 0x386   : > { %8138 = vpow2.f32 %v2638_v27  ;;  %v2640_v29 = vmul.f32 1.442695, %v2607_v28  ;;  %v2809_v28 = vpop.permute.xlu1 %2808 }
 0x387   : > { %v2487_v30 = vpop.f32.mrb[4].mxu1 }
 0x388   : > { %8140 = vpow2.f32 %v2640_v29  ;;  %v9962_v31 = vadd.f32 %v9938_v19, %v2487_v30  ;;  %v2489_v32 = vpop.f32.mrb[5].mxu1 }
 0x389   : > { %v2490_v33 = vpop.f32.mrb[6].mxu1 }
 0x38a   : > { %v2608_v34 = vmul.f32 0.5, %v9962_v31  ;;  %5987 = vst.msk [vmem:[%s9945_s16 + $0x10] sm:$0xff] %vm3124_vm4, %v9962_v31  ;;  %v9969_v35 = vadd.f32 %v9938_v19, %v2490_v33  ;;  %v2492_v36 = vpop.f32.mrb[7].mxu1 }
 0x38c   : > { %v2642_v39 = vmul.f32 1.442695, %v2608_v34  ;;  %v2609_v40 = vmul.f32 0.5, %v9969_v35  ;;  %5988 = vst.msk [vmem:[%s9945_s16 + $0x18] sm:$0xff] %vm3124_vm4, %v9969_v35 }
 0x38e   : > { %8142 = vpow2.f32 %v2642_v39  ;;  %v2644_v41 = vmul.f32 1.442695, %v2609_v40 }
 0x38f   : > { %v2495_v42 = vpop.f32.mrb[8].mxu1 }
 0x390   : > { %v8139_v43 = vpop.eup %8138  ;;  %8144 = vpow2.f32 %v2644_v41  ;;  %v9976_v44 = vadd.f32 %v9938_v19, %v2495_v42  ;;  %v2497_v45 = vpop.f32.mrb[9].mxu1 }
 0x391   : > { %v2702_v47 = vmul.f32 %v8139_v43, %v8139_v43  ;;  %v2894_v48 = vmul.f32 %v8139_v43, %v2799_v37  ;;  %v2498_v49 = vpop.f32.mrb[10].mxu1  ;;  %v2754_v43 = vld [vmem:[%s9802_s22 + $0xa0] sm:$0xff] }
 0x392   : > { %v8141_v50 = vpop.eup %8140  ;;  %v2610_v51 = vmul.f32 0.5, %v9976_v44  ;;  %5989 = vst.msk [vmem:[%s9945_s16 + $0x20] sm:$0xff] %vm3124_vm4, %v9976_v44  ;;  %v9983_v52 = vadd.f32 %v9938_v19, %v2498_v49  ;;  %v2500_v53 = vpop.f32.mrb[11].mxu1 }
 0x393   : > { %6018 = vst.msk [vmem:[%s9945_s16] sm:$0xff] %vm6017_vm5, %v2702_v47  ;;  %v2703_v55 = vmul.f32 %v8141_v50, %v8141_v50  ;;  %v2895_v56 = vmul.f32 %v8141_v50, %v2801_v46  ;;  %2958 = vrot.lane.b32.xlu0 %v2894_v48, %s9110_s18  ;;  %v2811_v46 = vpop.permute.xlu0 %2810  ;;  %v2755_v47 = vld [vmem:[%s9802_s22 + $0xa8] sm:$0xff]  ;;  %v2813_v53 = vpop.permute.xlu1 %2812 }
 0x394   : > { %v2646_v57 = vmul.f32 1.442695, %v2610_v51  ;;  %v2611_v58 = vmul.f32 0.5, %v9983_v52  ;;  %5990 = vst.msk [vmem:[%s9945_s16 + $0x28] sm:$0xff] %vm3124_vm4, %v9983_v52 }
 0x395   : > { %6019 = vst.msk [vmem:[%s9945_s16 + $0x8] sm:$0xff] %vm6017_vm5, %v2703_v55  ;;  %2960 = vrot.lane.b32.xlu1 %v2895_v56, %s9110_s18 }
 0x396   : > { %8146 = vpow2.f32 %v2646_v57  ;;  %v2648_v60 = vmul.f32 1.442695, %v2611_v58 }
 0x397   : > { %v2503_v62 = vpop.f32.mrb[12].mxu1  ;;  %2830 = vrot.lane.b32.xlu0 %v2750_v59, %s9109_s28 }
 0x398   : > { %v8143_v63 = vpop.eup %8142  ;;  %8148 = vpow2.f32 %v2648_v60  ;;  %v9999_v0 = vadd.f32 %v9938_v19, %v2503_v62  ;;  %v2505_v1 = vpop.f32.mrb[13].mxu1 }
 0x399   : > { %v2704_v3 = vmul.f32 %v8143_v63, %v8143_v63  ;;  %v2896_v6 = vmul.f32 %v8143_v63, %v2803_v54  ;;  %v2506_v8 = vpop.f32.mrb[14].mxu1  ;;  %2832 = vrot.lane.b32.xlu1 %v2751_v61, %s9109_s28 }
 0x39a   : > { %v8145_v11 = vpop.eup %8144  ;;  %v2612_v12 = vmul.f32 0.5, %v9999_v0  ;;  %5991 = vst.msk [vmem:[%s9945_s16 + $0x30] sm:$0xff] %vm3124_vm4, %v9999_v0  ;;  %v10007_v13 = vadd.f32 %v9938_v19, %v2506_v8  ;;  %v2508_v14 = vpop.f32.mrb[15].mxu1  ;;  %v2757_v8 = vld [vmem:[%s9802_s22 + $0xb8] sm:$0xff] }
 0x39b   : > { %6020 = vst.msk [vmem:[%s9945_s16 + $0x10] sm:$0xff] %vm6017_vm5, %v2704_v3  ;;  %v2705_v15 = vmul.f32 %v8145_v11, %v8145_v11  ;;  %v2897_v16 = vmul.f32 %v8145_v11, %v2805_v2  ;;  %2962 = vrot.lane.b32.xlu0 %v2896_v6, %s9110_s18  ;;  %v2756_v2 = vld [vmem:[%s9802_s22 + $0xb0] sm:$0xff]  ;;  %v2815_v6 = vpop.permute.xlu0 %2814 }
 0x39c   : > { %v2650_v17 = vmul.f32 1.442695, %v2612_v12  ;;  %v2613_v9 = vmul.f32 0.5, %v10007_v13  ;;  %5992 = vst.msk [vmem:[%s9945_s16 + $0x38] sm:$0xff] %vm3124_vm4, %v10007_v13 }
 0x39d   : > { %6021 = vst.msk [vmem:[%s9945_s16 + $0x18] sm:$0xff] %vm6017_vm5, %v2705_v15  ;;  %2964 = vrot.lane.b32.xlu1 %v2897_v16, %s9110_s18  ;;  %v2817_v16 = vpop.permute.xlu1 %2816 }
 0x39e   : > { %8150 = vpow2.f32 %v2650_v17  ;;  %v2652_v18 = vmul.f32 1.442695, %v2613_v9 }
 0x39f   : > { %v2511_v23 = vpop.f32.mrb[16].mxu1  ;;  %2834 = vrot.lane.b32.xlu0 %v2752_v10, %s9109_s28 }
 0x3a0   : > { %v8147_v24 = vpop.eup %8146  ;;  %8152 = vpow2.f32 %v2652_v18  ;;  %v10023_v26 = vadd.f32 %v9938_v19, %v2511_v23  ;;  %v2513_v27 = vpop.f32.mrb[17].mxu1 }
 0x3a1   : > { %v2706_v29 = vmul.f32 %v8147_v24, %v8147_v24  ;;  %v2898_v30 = vmul.f32 %v8147_v24, %v2807_v20  ;;  %v2514_v32 = vpop.f32.mrb[18].mxu1  ;;  %2836 = vrot.lane.b32.xlu1 %v2753_v22, %s9109_s28 }
 0x3a2   : > { %v8149_v33 = vpop.eup %8148  ;;  %v2614_v34 = vmul.f32 0.5, %v10023_v26  ;;  %5993 = vst.msk [vmem:[%s9945_s16 + $0x40] sm:$0xff] %vm3124_vm4, %v10023_v26  ;;  %v10031_v36 = vadd.f32 %v9938_v19, %v2514_v32  ;;  %v2516_v37 = vpop.f32.mrb[19].mxu1 }
 0x3a3   : > { %6022 = vst.msk [vmem:[%s9945_s16 + $0x20] sm:$0xff] %vm6017_vm5, %v2706_v29  ;;  %v2707_v39 = vmul.f32 %v8149_v33, %v8149_v33  ;;  %v2899_v40 = vmul.f32 %v8149_v33, %v2809_v28  ;;  %2966 = vrot.lane.b32.xlu0 %v2898_v30, %s9110_s18  ;;  %v2758_v30 = vld [vmem:[%s9802_s22 + $0xc0] sm:$0xff]  ;;  %v2819_v33 = vpop.permute.xlu0 %2818 }
 0x3a4   : > { %v2654_v41 = vmul.f32 1.442695, %v2614_v34  ;;  %v2615_v42 = vmul.f32 0.5, %v10031_v36  ;;  %5994 = vst.msk [vmem:[%s9945_s16 + $0x48] sm:$0xff] %vm3124_vm4, %v10031_v36  ;;  %v2759_v34 = vld [vmem:[%s9802_s22 + $0xc8] sm:$0xff] }
 0x3a5   : > { %6023 = vst.msk [vmem:[%s9945_s16 + $0x28] sm:$0xff] %vm6017_vm5, %v2707_v39  ;;  %2968 = vrot.lane.b32.xlu1 %v2899_v40, %s9110_s18 }
 0x3a6   : > { %8154 = vpow2.f32 %v2654_v41  ;;  %v2656_v45 = vmul.f32 1.442695, %v2615_v42  ;;  %v2821_v42 = vpop.permute.xlu1 %2820 }
 0x3a7   : > { %v2519_v48 = vpop.f32.mrb[20].mxu1  ;;  %2838 = vrot.lane.b32.xlu0 %v2754_v43, %s9109_s28 }
 0x3a8   : > { %v8151_v49 = vpop.eup %8150  ;;  %8156 = vpow2.f32 %v2656_v45  ;;  %v10047_v50 = vadd.f32 %v9938_v19, %v2519_v48  ;;  %v2521_v51 = vpop.f32.mrb[21].mxu1 }
 0x3a9   : > { %v2708_v54 = vmul.f32 %v8151_v49, %v8151_v49  ;;  %v2900_v55 = vmul.f32 %v8151_v49, %v2811_v46  ;;  %v2522_v56 = vpop.f32.mrb[22].mxu1  ;;  %2840 = vrot.lane.b32.xlu1 %v2755_v47, %s9109_s28 }
 0x3aa   : > { %v8153_v57 = vpop.eup %8152  ;;  %v2616_v58 = vmul.f32 0.5, %v10047_v50  ;;  %5995 = vst.msk [vmem:[%s9945_s16 + $0x50] sm:$0xff] %vm3124_vm4, %v10047_v50  ;;  %v10055_v59 = vadd.f32 %v9938_v19, %v2522_v56  ;;  %v2524_v60 = vpop.f32.mrb[23].mxu1 }
 0x3ab   : > { %6024 = vst.msk [vmem:[%s9945_s16 + $0x30] sm:$0xff] %vm6017_vm5, %v2708_v54  ;;  %v2709_v61 = vmul.f32 %v8153_v57, %v8153_v57  ;;  %v2901_v62 = vmul.f32 %v8153_v57, %v2813_v53  ;;  %2970 = vrot.lane.b32.xlu0 %v2900_v55, %s9110_s18  ;;  %v2760_v57 = vld [vmem:[%s9802_s22 + $0xd0] sm:$0xff]  ;;  %v2823_v60 = vpop.permute.xlu0 %2822 }
 0x3ac   : > { %v2658_v63 = vmul.f32 1.442695, %v2616_v58  ;;  %v2617_v1 = vmul.f32 0.5, %v10055_v59  ;;  %5996 = vst.msk [vmem:[%s9945_s16 + $0x58] sm:$0xff] %vm3124_vm4, %v10055_v59 }
 0x3ad   : > { %6025 = vst.msk [vmem:[%s9945_s16 + $0x38] sm:$0xff] %vm6017_vm5, %v2709_v61  ;;  %2972 = vrot.lane.b32.xlu1 %v2901_v62, %s9110_s18  ;;  %v2761_v61 = vld [vmem:[%s9802_s22 + $0xd8] sm:$0xff] }
 0x3ae   : > { %8158 = vpow2.f32 %v2658_v63  ;;  %v2660_v3 = vmul.f32 1.442695, %v2617_v1 }
 0x3af   : > { %v2527_v11 = vpop.f32.mrb[24].mxu1  ;;  %2842 = vrot.lane.b32.xlu0 %v2756_v2, %s9109_s28 }
 0x3b0   : > { %v8155_v12 = vpop.eup %8154  ;;  %8160 = vpow2.f32 %v2660_v3  ;;  %v10071_v14 = vadd.f32 %v9938_v19, %v2527_v11  ;;  %v2529_v15 = vpop.f32.mrb[25].mxu1 }
 0x3b1   : > { %v2710_v17 = vmul.f32 %v8155_v12, %v8155_v12  ;;  %v2902_v9 = vmul.f32 %v8155_v12, %v2815_v6  ;;  %v2530_v10 = vpop.f32.mrb[26].mxu1  ;;  %2844 = vrot.lane.b32.xlu1 %v2757_v8, %s9109_s28  ;;  %v2825_v3 = vpop.permute.xlu1 %2824 }
 0x3b2   : > { %v8157_v18 = vpop.eup %8156  ;;  %v2618_v20 = vmul.f32 0.5, %v10071_v14  ;;  %5997 = vst.msk [vmem:[%s9945_s16 + $0x60] sm:$0xff] %vm3124_vm4, %v10071_v14  ;;  %v10079_v22 = vadd.f32 %v9938_v19, %v2530_v10  ;;  %v2532_v23 = vpop.f32.mrb[27].mxu1 }
 0x3b3   : > { %6026 = vst.msk [vmem:[%s9945_s16 + $0x40] sm:$0xff] %vm6017_vm5, %v2710_v17  ;;  %v2711_v24 = vmul.f32 %v8157_v18, %v8157_v18  ;;  %v2903_v27 = vmul.f32 %v8157_v18, %v2817_v16  ;;  %2974 = vrot.lane.b32.xlu0 %v2902_v9, %s9110_s18  ;;  %v2762_v23 = vld [vmem:[%s9802_s22 + $0xe0] sm:$0xff] }
 0x3b4   : > { %v2662_v28 = vmul.f32 1.442695, %v2618_v20  ;;  %v2619_v29 = vmul.f32 0.5, %v10079_v22  ;;  %5998 = vst.msk [vmem:[%s9945_s16 + $0x68] sm:$0xff] %vm3124_vm4, %v10079_v22 }
 0x3b5   : > { %6027 = vst.msk [vmem:[%s9945_s16 + $0x48] sm:$0xff] %vm6017_vm5, %v2711_v24  ;;  %2976 = vrot.lane.b32.xlu1 %v2903_v27, %s9110_s18  ;;  %v2827_v27 = vpop.permute.xlu0 %2826 }
 0x3b6   : > { %8162 = vpow2.f32 %v2662_v28  ;;  %v2664_v32 = vmul.f32 1.442695, %v2619_v29  ;;  %v2763_v28 = vld [vmem:[%s9802_s22 + $0xe8] sm:$0xff] }
 0x3b7   : > { %v2535_v37 = vpop.f32.mrb[28].mxu1  ;;  %2846 = vrot.lane.b32.xlu0 %v2758_v30, %s9109_s28 }
 0x3b8   : > { %v8159_v39 = vpop.eup %8158  ;;  %8164 = vpow2.f32 %v2664_v32  ;;  %v10095_v40 = vadd.f32 %v9938_v19, %v2535_v37  ;;  %v2537_v41 = vpop.f32.mrb[29].mxu1 }
 0x3b9   : > { %v2712_v43 = vmul.f32 %v8159_v39, %v8159_v39  ;;  %v2904_v45 = vmul.f32 %v8159_v39, %v2819_v33  ;;  %v2538_v46 = vpop.f32.mrb[30].mxu1  ;;  %2848 = vrot.lane.b32.xlu1 %v2759_v34, %s9109_s28  ;;  %v2829_v34 = vpop.permute.xlu1 %2828 }
 0x3ba   : > { %v8161_v47 = vpop.eup %8160  ;;  %v2620_v48 = vmul.f32 0.5, %v10095_v40  ;;  %5999 = vst.msk [vmem:[%s9945_s16 + $0x70] sm:$0xff] %vm3124_vm4, %v10095_v40  ;;  %v10103_v49 = vadd.f32 %v9938_v19, %v2538_v46  ;;  %v2540_v51 = vpop.f32.mrb[31].mxu1 }
 0x3bb   : > { %6028 = vst.msk [vmem:[%s9945_s16 + $0x50] sm:$0xff] %vm6017_vm5, %v2712_v43  ;;  %v2713_v53 = vmul.f32 %v8161_v47, %v8161_v47  ;;  %v2905_v54 = vmul.f32 %v8161_v47, %v2821_v42  ;;  %2978 = vrot.lane.b32.xlu0 %v2904_v45, %s9110_s18 }
 0x3bc   : > { %v2666_v55 = vmul.f32 1.442695, %v2620_v48  ;;  %v2621_v56 = vmul.f32 0.5, %v10103_v49  ;;  %6000 = vst.msk [vmem:[%s9945_s16 + $0x78] sm:$0xff] %vm3124_vm4, %v10103_v49 }
 0x3bd   : > { %6029 = vst.msk [vmem:[%s9945_s16 + $0x58] sm:$0xff] %vm6017_vm5, %v2713_v53  ;;  %2980 = vrot.lane.b32.xlu1 %v2905_v54, %s9110_s18  ;;  %v2764_v54 = vld [vmem:[%s9802_s22 + $0xf0] sm:$0xff] }
 0x3be   : > { %8166 = vpow2.f32 %v2666_v55  ;;  %v2668_v58 = vmul.f32 1.442695, %v2621_v56  ;;  %v2765_v56 = vld [vmem:[%s9802_s22 + $0xf8] sm:$0xff] }
 0x3bf   : > { %v2543_v62 = vpop.f32.mrb[32].mxu1  ;;  %2850 = vrot.lane.b32.xlu0 %v2760_v57, %s9109_s28 }
 0x3c0   : > { %v8163_v63 = vpop.eup %8162  ;;  %8168 = vpow2.f32 %v2668_v58  ;;  %v10119_v1 = vadd.f32 %v9938_v19, %v2543_v62  ;;  %v2545_v2 = vpop.f32.mrb[33].mxu1 }
 0x3c1   : > { %v2714_v6 = vmul.f32 %v8163_v63, %v8163_v63  ;;  %v2906_v8 = vmul.f32 %v8163_v63, %v2823_v60  ;;  %v2546_v11 = vpop.f32.mrb[34].mxu1  ;;  %2852 = vrot.lane.b32.xlu1 %v2761_v61, %s9109_s28 }
 0x3c2   : > { %v8165_v12 = vpop.eup %8164  ;;  %v2622_v15 = vmul.f32 0.5, %v10119_v1  ;;  %6001 = vst.msk [vmem:[%s9945_s16 + $0x80] sm:$0xff] %vm3124_vm4, %v10119_v1  ;;  %v10127_v16 = vadd.f32 %v9938_v19, %v2546_v11  ;;  %v2548_v17 = vpop.f32.mrb[35].mxu1 }
 0x3c3   : > { %6030 = vst.msk [vmem:[%s9945_s16 + $0x60] sm:$0xff] %vm6017_vm5, %v2714_v6  ;;  %v2715_v9 = vmul.f32 %v8165_v12, %v8165_v12  ;;  %v2907_v10 = vmul.f32 %v8165_v12, %v2825_v3  ;;  %2982 = vrot.lane.b32.xlu0 %v2906_v8, %s9110_s18 }
 0x3c4   : > { %v2670_v18 = vmul.f32 1.442695, %v2622_v15  ;;  %v2623_v20 = vmul.f32 0.5, %v10127_v16  ;;  %6002 = vst.msk [vmem:[%s9945_s16 + $0x88] sm:$0xff] %vm3124_vm4, %v10127_v16 }
 0x3c5   : > { %6031 = vst.msk [vmem:[%s9945_s16 + $0x68] sm:$0xff] %vm6017_vm5, %v2715_v9  ;;  %2984 = vrot.lane.b32.xlu1 %v2907_v10, %s9110_s18 }
 0x3c6   : > { %8170 = vpow2.f32 %v2670_v18  ;;  %v2672_v24 = vmul.f32 1.442695, %v2623_v20 }
 0x3c7   : > { %v2551_v29 = vpop.f32.mrb[36].mxu1  ;;  %2854 = vrot.lane.b32.xlu0 %v2762_v23, %s9109_s28 }
 0x3c8   : > { %v8167_v30 = vpop.eup %8166  ;;  %8172 = vpow2.f32 %v2672_v24  ;;  %v10143_v32 = vadd.f32 %v9938_v19, %v2551_v29  ;;  %v2553_v33 = vpop.f32.mrb[37].mxu1 }
 0x3c9   : > { %v2716_v37 = vmul.f32 %v8167_v30, %v8167_v30  ;;  %v2908_v39 = vmul.f32 %v8167_v30, %v2827_v27  ;;  %v2554_v41 = vpop.f32.mrb[38].mxu1  ;;  %2856 = vrot.lane.b32.xlu1 %v2763_v28, %s9109_s28 }
 0x3ca   : > { %v8169_v42 = vpop.eup %8168  ;;  %v2624_v43 = vmul.f32 0.5, %v10143_v32  ;;  %6003 = vst.msk [vmem:[%s9945_s16 + $0x90] sm:$0xff] %vm3124_vm4, %v10143_v32  ;;  %v10151_v45 = vadd.f32 %v9938_v19, %v2554_v41  ;;  %v2556_v46 = vpop.f32.mrb[39].mxu1 }
 0x3cb   : > { %6032 = vst.msk [vmem:[%s9945_s16 + $0x70] sm:$0xff] %vm6017_vm5, %v2716_v37  ;;  %v2717_v47 = vmul.f32 %v8169_v42, %v8169_v42  ;;  %v2909_v48 = vmul.f32 %v8169_v42, %v2829_v34  ;;  %2986 = vrot.lane.b32.xlu0 %v2908_v39, %s9110_s18 }
 0x3cc   : > { %v2674_v51 = vmul.f32 1.442695, %v2624_v43  ;;  %v2625_v53 = vmul.f32 0.5, %v10151_v45  ;;  %6004 = vst.msk [vmem:[%s9945_s16 + $0x98] sm:$0xff] %vm3124_vm4, %v10151_v45 }
 0x3cd   : > { %6033 = vst.msk [vmem:[%s9945_s16 + $0x78] sm:$0xff] %vm6017_vm5, %v2717_v47  ;;  %2988 = vrot.lane.b32.xlu1 %v2909_v48, %s9110_s18 }
 0x3ce   : > { %8174 = vpow2.f32 %v2674_v51  ;;  %v2676_v55 = vmul.f32 1.442695, %v2625_v53 }
 0x3cf   : > { %v2559_v57 = vpop.f32.mrb[40].mxu1  ;;  %2858 = vrot.lane.b32.xlu0 %v2764_v54, %s9109_s28 }
 0x3d0   : > { %v10166_v58 = vpop.eup %8170  ;;  %8176 = vpow2.f32 %v2676_v55  ;;  %v10169_v60 = vadd.f32 %v9938_v19, %v2559_v57  ;;  %v2561_v61 = vpop.f32.mrb[41].mxu1 }
 0x3d1   : > { %v2718_v62 = vmul.f32 %v10166_v58, %v10166_v58  ;;  %v2562_v63 = vpop.f32.mrb[42].mxu1  ;;  %2860 = vrot.lane.b32.xlu1 %v2765_v56, %s9109_s28 }
 0x3d2   : > { %v10174_v2 = vpop.eup %8172  ;;  %v2626_v3 = vmul.f32 0.5, %v10169_v60  ;;  %6005 = vst.msk [vmem:[%s9945_s16 + $0xa0] sm:$0xff] %vm3124_vm4, %v10169_v60  ;;  %v10181_v6 = vadd.f32 %v9938_v19, %v2562_v63  ;;  %v2564_v8 = vpop.f32.mrb[43].mxu1 }
 0x3d3   : > { %6034 = vst.msk [vmem:[%s9945_s16 + $0x80] sm:$0xff] %vm6017_vm5, %v2718_v62  ;;  %v2719_v11 = vmul.f32 %v10174_v2, %v10174_v2 }
 0x3d4   : > { %v2678_v12 = vmul.f32 1.442695, %v2626_v3  ;;  %v2627_v15 = vmul.f32 0.5, %v10181_v6  ;;  %6006 = vst.msk [vmem:[%s9945_s16 + $0xa8] sm:$0xff] %vm3124_vm4, %v10181_v6 }
 0x3d5   : > { %6035 = vst.msk [vmem:[%s9945_s16 + $0x88] sm:$0xff] %vm6017_vm5, %v2719_v11 }
 0x3d6   : > { %8178 = vpow2.f32 %v2678_v12  ;;  %v2680_v17 = vmul.f32 1.442695, %v2627_v15 }
 0x3d7   : > { %v2567_v9 = vpop.f32.mrb[44].mxu1 }
 0x3d8   : > { %v10193_v10 = vpop.eup %8174  ;;  %8180 = vpow2.f32 %v2680_v17  ;;  %v10196_v18 = vadd.f32 %v9938_v19, %v2567_v9  ;;  %v2569_v20 = vpop.f32.mrb[45].mxu1 }
 0x3d9   : > { %v2720_v23 = vmul.f32 %v10193_v10, %v10193_v10  ;;  %v2570_v24 = vpop.f32.mrb[46].mxu1 }
 0x3da   : > { %v10200_v27 = vpop.eup %8176  ;;  %v2628_v28 = vmul.f32 0.5, %v10196_v18  ;;  %6007 = vst.msk [vmem:[%s9945_s16 + $0xb0] sm:$0xff] %vm3124_vm4, %v10196_v18  ;;  %v10207_v29 = vadd.f32 %v9938_v19, %v2570_v24  ;;  %v2572_v30 = vpop.f32.mrb[47].mxu1 }
 0x3db   : > { %6036 = vst.msk [vmem:[%s9945_s16 + $0x90] sm:$0xff] %vm6017_vm5, %v2720_v23  ;;  %v2721_v33 = vmul.f32 %v10200_v27, %v10200_v27 }
 0x3dc   : > { %v2682_v34 = vmul.f32 1.442695, %v2628_v28  ;;  %v2629_v37 = vmul.f32 0.5, %v10207_v29  ;;  %6008 = vst.msk [vmem:[%s9945_s16 + $0xb8] sm:$0xff] %vm3124_vm4, %v10207_v29 }
 0x3dd   : > { %6037 = vst.msk [vmem:[%s9945_s16 + $0x98] sm:$0xff] %vm6017_vm5, %v2721_v33 }
 0x3de   : > { %8182 = vpow2.f32 %v2682_v34  ;;  %v2684_v39 = vmul.f32 1.442695, %v2629_v37 }
 0x3df   : > { %v2575_v41 = vpop.f32.mrb[48].mxu1 }
 0x3e0   : > { %v10219_v42 = vpop.eup %8178  ;;  %8184 = vpow2.f32 %v2684_v39  ;;  %v10222_v43 = vadd.f32 %v9938_v19, %v2575_v41  ;;  %v2577_v46 = vpop.f32.mrb[49].mxu1 }
 0x3e1   : > { %v2722_v47 = vmul.f32 %v10219_v42, %v10219_v42  ;;  %v2578_v48 = vpop.f32.mrb[50].mxu1 }
 0x3e2   : > { %v10226_v51 = vpop.eup %8180  ;;  %v2630_v53 = vmul.f32 0.5, %v10222_v43  ;;  %6009 = vst.msk [vmem:[%s9945_s16 + $0xc0] sm:$0xff] %vm3124_vm4, %v10222_v43  ;;  %v10233_v54 = vadd.f32 %v9938_v19, %v2578_v48  ;;  %v2580_v55 = vpop.f32.mrb[51].mxu1 }
 0x3e3   : > { %6038 = vst.msk [vmem:[%s9945_s16 + $0xa0] sm:$0xff] %vm6017_vm5, %v2722_v47  ;;  %v2723_v56 = vmul.f32 %v10226_v51, %v10226_v51 }
 0x3e4   : > { %v2686_v57 = vmul.f32 1.442695, %v2630_v53  ;;  %v2631_v61 = vmul.f32 0.5, %v10233_v54  ;;  %6010 = vst.msk [vmem:[%s9945_s16 + $0xc8] sm:$0xff] %vm3124_vm4, %v10233_v54 }
 0x3e5   : > { %6039 = vst.msk [vmem:[%s9945_s16 + $0xa8] sm:$0xff] %vm6017_vm5, %v2723_v56 }
 0x3e6   : > { %8186 = vpow2.f32 %v2686_v57  ;;  %v2688_v62 = vmul.f32 1.442695, %v2631_v61 }
 0x3e7   : > { %v2583_v63 = vpop.f32.mrb[52].mxu1 }
 0x3e8   : > { %v10245_v3 = vpop.eup %8182  ;;  %8188 = vpow2.f32 %v2688_v62  ;;  %v10248_v8 = vadd.f32 %v9938_v19, %v2583_v63  ;;  %v2585_v11 = vpop.f32.mrb[53].mxu1 }
 0x3e9   : > { %v2724_v12 = vmul.f32 %v10245_v3, %v10245_v3  ;;  %v2586_v15 = vpop.f32.mrb[54].mxu1 }
 0x3ea   : > { %v10252_v17 = vpop.eup %8184  ;;  %v2632_v9 = vmul.f32 0.5, %v10248_v8  ;;  %6011 = vst.msk [vmem:[%s9945_s16 + $0xd0] sm:$0xff] %vm3124_vm4, %v10248_v8  ;;  %v10259_v20 = vadd.f32 %v9938_v19, %v2586_v15  ;;  %v2588_v23 = vpop.f32.mrb[55].mxu1 }
 0x3eb   : > { %6040 = vst.msk [vmem:[%s9945_s16 + $0xb0] sm:$0xff] %vm6017_vm5, %v2724_v12  ;;  %v2725_v24 = vmul.f32 %v10252_v17, %v10252_v17 }
 0x3ec   : > { %v2690_v28 = vmul.f32 1.442695, %v2632_v9  ;;  %v2633_v30 = vmul.f32 0.5, %v10259_v20  ;;  %6012 = vst.msk [vmem:[%s9945_s16 + $0xd8] sm:$0xff] %vm3124_vm4, %v10259_v20 }
 0x3ed   : > { %6041 = vst.msk [vmem:[%s9945_s16 + $0xb8] sm:$0xff] %vm6017_vm5, %v2725_v24 }
 0x3ee   : > { %8190 = vpow2.f32 %v2690_v28  ;;  %v2692_v33 = vmul.f32 1.442695, %v2633_v30 }
 0x3ef   : > { %v2591_v34 = vpop.f32.mrb[56].mxu1 }
 0x3f0   : > { %v10271_v37 = vpop.eup %8186  ;;  %8192 = vpow2.f32 %v2692_v33  ;;  %v10274_v39 = vadd.f32 %v9938_v19, %v2591_v34  ;;  %v2593_v41 = vpop.f32.mrb[57].mxu1 }
 0x3f1   : > { %v2726_v46 = vmul.f32 %v10271_v37, %v10271_v37  ;;  %v2594_v47 = vpop.f32.mrb[58].mxu1 }
 0x3f2   : > { %v10278_v48 = vpop.eup %8188  ;;  %v2634_v53 = vmul.f32 0.5, %v10274_v39  ;;  %6013 = vst.msk [vmem:[%s9945_s16 + $0xe0] sm:$0xff] %vm3124_vm4, %v10274_v39  ;;  %v10285_v55 = vadd.f32 %v9938_v19, %v2594_v47  ;;  %v2596_v56 = vpop.f32.mrb[59].mxu1 }
 0x3f3   : > { %6042 = vst.msk [vmem:[%s9945_s16 + $0xc0] sm:$0xff] %vm6017_vm5, %v2726_v46  ;;  %v2727_v57 = vmul.f32 %v10278_v48, %v10278_v48 }
 0x3f4   : > { %v2694_v61 = vmul.f32 1.442695, %v2634_v53  ;;  %v2635_v62 = vmul.f32 0.5, %v10285_v55  ;;  %6014 = vst.msk [vmem:[%s9945_s16 + $0xe8] sm:$0xff] %vm3124_vm4, %v10285_v55 }
 0x3f5   : > { %6043 = vst.msk [vmem:[%s9945_s16 + $0xc8] sm:$0xff] %vm6017_vm5, %v2727_v57 }
 0x3f6   : > { %8194 = vpow2.f32 %v2694_v61  ;;  %v2696_v63 = vmul.f32 1.442695, %v2635_v62 }
 0x3f7   : > { %v2599_v11 = vpop.f32.mrb[60].mxu1 }
 0x3f8   : > { %v10297_v12 = vpop.eup %8190  ;;  %8196 = vpow2.f32 %v2696_v63  ;;  %v10300_v15 = vadd.f32 %v9938_v19, %v2599_v11  ;;  %v2601_v9 = vpop.f32.mrb[61].mxu1 }
 0x3f9   : > { %v2728_v23 = vmul.f32 %v10297_v12, %v10297_v12  ;;  %v2602_v24 = vpop.f32.mrb[62].mxu1 }
 0x3fa   : > { %v10304_v28 = vpop.eup %8192  ;;  %v2636_v30 = vmul.f32 0.5, %v10300_v15  ;;  %6015 = vst.msk [vmem:[%s9945_s16 + $0xf0] sm:$0xff] %vm3124_vm4, %v10300_v15  ;;  %v10311_v33 = vadd.f32 %v9938_v19, %v2602_v24  ;;  %v2604_v34 = vpop.f32.mrb[63].mxu1 }
 0x3fb   : > { %6044 = vst.msk [vmem:[%s9945_s16 + $0xd0] sm:$0xff] %vm6017_vm5, %v2728_v23  ;;  %v2729_v41 = vmul.f32 %v10304_v28, %v10304_v28 }
 0x3fc   : > { %v2698_v46 = vmul.f32 1.442695, %v2636_v30  ;;  %v2637_v47 = vmul.f32 0.5, %v10311_v33  ;;  %6016 = vst.msk [vmem:[%s9945_s16 + $0xf8] sm:$0xff] %vm3124_vm4, %v10311_v33 }
 0x3fd   : > { %6045 = vst.msk [vmem:[%s9945_s16 + $0xd8] sm:$0xff] %vm6017_vm5, %v2729_v41 }
 0x3fe   : > { %8198 = vpow2.f32 %v2698_v46  ;;  %v2700_v53 = vmul.f32 1.442695, %v2637_v47 }
 0x400   : > { %v10323_v56 = vpop.eup %8194  ;;  %8200 = vpow2.f32 %v2700_v53 }
 0x401   : > { %v2730_v19 = vmul.f32 %v10323_v56, %v10323_v56 }
 0x402   : > { %v10327_v57 = vpop.eup %8196 }
 0x403   : > { %6046 = vst.msk [vmem:[%s9945_s16 + $0xe0] sm:$0xff] %vm6017_vm5, %v2730_v19  ;;  %v2731_v61 = vmul.f32 %v10327_v57, %v10327_v57 }
 0x405   : > { %6047 = vst.msk [vmem:[%s9945_s16 + $0xe8] sm:$0xff] %vm6017_vm5, %v2731_v61  ;;  %v2959_v62 = vpop.permute.xlu0 %2958 }
 0x406   : > { %v3054_v9 = vadd.f32 %v2959_v62, %v9948_v21 }
 0x407   : > { %v2961_v63 = vpop.permute.xlu1 %2960 }
 0x408   : > { %v10335_v11 = vpop.eup %8198  ;;  %v3055_v23 = vadd.f32 %v2961_v63, %v9955_v25 }
 0x409   : > { %v2732_v24 = vmul.f32 %v10335_v11, %v10335_v11  ;;  %v2831_v30 = vpop.permute.xlu0 %2830 }
 0x40a   : > { %v10341_v34 = vpop.eup %8200  ;;  %v3086_v41 = vpack.c.bf16 %v3055_v23, %v3054_v9  ;;  %v2910_v46 = vmul.f32 %v10166_v58, %v2831_v30 }
 0x40b   : > { %6048 = vst.msk [vmem:[%s9945_s16 + $0xf0] sm:$0xff] %vm6017_vm5, %v2732_v24  ;;  %v2733_v47 = vmul.f32 %v10341_v34, %v10341_v34  ;;  %v2833_v53 = vpop.permute.xlu1 %2832 }
 0x40c   : > { %v2911_v19 = vmul.f32 %v10174_v2, %v2833_v53  ;;  %7147 = vmatmul.mubr.msk.bf16.vlgmr.msra.gmra.mrb[64].mxu1 %vm3124_vm4, %v3086_v41  ;;  %2990 = vrot.lane.b32.xlu0 %v2910_v46, %s9110_s18 }
 0x40d   : > { %6049 = vst.msk [vmem:[%s9945_s16 + $0xf8] sm:$0xff] %vm6017_vm5, %v2733_v47  ;;  %v2963_v21 = vpop.permute.xlu0 %2962  ;;  %3222 = vmatprep.mubr.bf16.mxu1 %v9108_v38 }
 0x40e   : > { %2992 = vrot.lane.b32.xlu1 %v2911_v19, %s9110_s18  ;;  %v3056_v58 = vadd.f32 %v2963_v21, %v9962_v31 }
 0x40f   : > { %v2965_v25 = vpop.permute.xlu1 %2964 }
 0x410   : > { %v3057_v61 = vadd.f32 %v2965_v25, %v9969_v35 }
 0x411   : > { %v2835_v62 = vpop.permute.xlu0 %2834 }
 0x412   : > { %v3087_v63 = vpack.c.bf16 %v3057_v61, %v3056_v58  ;;  %v2912_v2 = vmul.f32 %v10193_v10, %v2835_v62  ;;  %v8013_v61 = vld [vmem:[%s12007_s8 + $0x4] ss:$28 sps:$4 sm:$0xff]  }
 0x413   : > { %v2837_v9 = vpop.permute.xlu1 %2836  ;;  %4125 = vmatprep.subr.bf16.mxu1 %v8013_v61 }
 0x414   : > { %v2913_v23 = vmul.f32 %v10200_v27, %v2837_v9  ;;  %7148 = vmatmul.mubr.msk.bf16.gmra.mrb[68].mxu1 %vm3124_vm4, %v3087_v63  ;;  %2994 = vrot.lane.b32.xlu0 %v2912_v2, %s9110_s18 }
 0x415   : > { %v2967_v24 = vpop.permute.xlu0 %2966  ;;  %3232 = vmatprep.mubr.bf16.mxu1 %v9108_v38 }
 0x416   : > { %2996 = vrot.lane.b32.xlu1 %v2913_v23, %s9110_s18  ;;  %v3058_v31 = vadd.f32 %v2967_v24, %v9976_v44 }
 0x417   : > { %v2969_v30 = vpop.permute.xlu1 %2968 }
 0x418   : > { %v3059_v35 = vadd.f32 %v2969_v30, %v9983_v52 }
 0x419   : > { %v2839_v41 = vpop.permute.xlu0 %2838 }
 0x41a   : > { %v3088_v46 = vpack.c.bf16 %v3059_v35, %v3058_v31  ;;  %v2914_v10 = vmul.f32 %v10219_v42, %v2839_v41 }
 0x41b   : > { %v2841_v47 = vpop.permute.xlu1 %2840 }
 0x41c   : > { %v2915_v27 = vmul.f32 %v10226_v51, %v2841_v47  ;;  %7149 = vmatmul.mubr.msk.bf16.gmra.mrb[72].mxu1 %vm3124_vm4, %v3088_v46  ;;  %2998 = vrot.lane.b32.xlu0 %v2914_v10, %s9110_s18  ;;  %v8011_v51 = vld [vmem:[%s12007_s8] ss:$28 sps:$4 sm:$0xff]  }
 0x41d   : > { %v2971_v53 = vpop.permute.xlu0 %2970  ;;  %3242 = vmatprep.mubr.bf16.mxu1 %v9108_v38  ;;  %4126 = vmatpush1.bf16.msra.mxu1 %v8011_v51  ;;  %v8029_v51 = vld [vmem:[%s12007_s8 + $0xe4] ss:$28 sps:$4 sm:$0xff]  }
 0x41e   : > { %3000 = vrot.lane.b32.xlu1 %v2915_v27, %s9110_s18  ;;  %v3060_v44 = vadd.f32 %v2971_v53, %v9999_v0 }
 0x41f   : > { %v2973_v19 = vpop.permute.xlu1 %2972 }
 0x420   : > { %v3061_v52 = vadd.f32 %v2973_v19, %v10007_v13 }
 0x421   : > { %v2843_v21 = vpop.permute.xlu0 %2842 }
 0x422   : > { %v3089_v25 = vpack.c.bf16 %v3061_v52, %v3060_v44  ;;  %v2916_v42 = vmul.f32 %v10245_v3, %v2843_v21  ;;  %v8021_v52 = vld [vmem:[%s12007_s8 + $0x50] ss:$28 sps:$4 sm:$0xff]  }
 0x423   : > { %v2845_v58 = vpop.permute.xlu1 %2844 }
 0x424   : > { %v2917_v62 = vmul.f32 %v10252_v17, %v2845_v58  ;;  %7150 = vmatmul.mubr.msk.bf16.gmra.mrb[76].mxu1 %vm3124_vm4, %v3089_v25  ;;  %3002 = vrot.lane.b32.xlu0 %v2916_v42, %s9110_s18 }
 0x425   : > { %v2975_v0 = vpop.permute.xlu0 %2974  ;;  %3252 = vmatprep.mubr.bf16.mxu1 %v9108_v38 }
 0x426   : > { %3004 = vrot.lane.b32.xlu1 %v2917_v62, %s9110_s18  ;;  %v3062_v3 = vadd.f32 %v2975_v0, %v10023_v26  ;;  %v8014_v26 = vld [vmem:[%s12007_s8 + $0x38] ss:$28 sps:$4 sm:$0xff]   ;;  %v8026_v62 = vld [vmem:[%s12007_s8 + $0xc0] ss:$28 sps:$4 sm:$0xff]  }
 0x427   : > { %v2977_v13 = vpop.permute.xlu1 %2976 }
 0x428   : > { %v3063_v63 = vadd.f32 %v2977_v13, %v10031_v36  ;;  %v8016_v36 = vld [vmem:[%s12007_s8 + $0x3c] ss:$28 sps:$4 sm:$0xff]  }
 0x429   : > { %v2847_v2 = vpop.permute.xlu0 %2846  ;;  %4127 = vmatprep.subr.bf16.mxu1 %v8016_v36  ;;  %v8041_v36 = vld [vmem:[%s12007_s8 + $0x18c] ss:$28 sps:$4 sm:$0xff]  }
 0x42a   : > { %v3090_v9 = vpack.c.bf16 %v3063_v63, %v3062_v3  ;;  %v2918_v17 = vmul.f32 %v10271_v37, %v2847_v2  ;;  %4128 = vmatpush1.bf16.msra.mxu1 %v8014_v26  ;;  %v8038_v26 = vld [vmem:[%s12007_s8 + $0x168] ss:$28 sps:$4 sm:$0xff]  }
 0x42b   : > { %v2849_v23 = vpop.permute.xlu1 %2848 }
 0x42c   : > { %v2919_v24 = vmul.f32 %v10278_v48, %v2849_v23  ;;  %7151 = vmatmul.mubr.msk.bf16.gmra.mrb[80].mxu1 %vm3124_vm4, %v3090_v9  ;;  %3006 = vrot.lane.b32.xlu0 %v2918_v17, %s9110_s18  ;;  %v8027_v9 = vld [vmem:[%s12007_s8 + $0xe0] ss:$28 sps:$4 sm:$0xff]  }
 0x42d   : > { %v2979_v30 = vpop.permute.xlu0 %2978  ;;  %3262 = vmatprep.mubr.bf16.mxu1 %v9108_v38 }
 0x42e   : > { %3008 = vrot.lane.b32.xlu1 %v2919_v24, %s9110_s18  ;;  %v3064_v48 = vadd.f32 %v2979_v30, %v10047_v50  ;;  %v8020_v50 = vld [vmem:[%s12007_s8 + $0x18] ss:$28 sps:$4 sm:$0xff]   ;;  %v8035_v30 = vld [vmem:[%s12007_s8 + $0x150] ss:$28 sps:$4 sm:$0xff]  }
 0x42f   : > { %v2981_v37 = vpop.permute.xlu1 %2980  ;;  %4705 = vmatpush1.bf16.msra.mxu0 %v8020_v50  ;;  %v8037_v24 = vld [vmem:[%s12007_s8 + $0x154] ss:$28 sps:$4 sm:$0xff]  }
 0x430   : > { %v3065_v31 = vadd.f32 %v2981_v37, %v10055_v59  ;;  %4706 = vmatprep.subr.bf16.mxu0 %v9108_v38  ;;  %v8039_v37 = vld [vmem:[%s12007_s8 + $0x188] ss:$28 sps:$4 sm:$0xff]   ;;  %v8051_v50 = vld [vmem:[%s12007_s8 + $0x230] ss:$28 sps:$4 sm:$0xff]  }
 0x431   : > { %v2851_v35 = vpop.permute.xlu0 %2850 }
 0x432   : > { %v3091_v41 = vpack.c.bf16 %v3065_v31, %v3064_v48  ;;  %v2920_v46 = vmul.f32 %v10297_v12, %v2851_v35  ;;  %v8017_v12 = vld [vmem:[%s12007_s8 + $0x70] ss:$28 sps:$4 sm:$0xff]   ;;  %v8042_v48 = vld [vmem:[%s12007_s8 + $0x1a0] ss:$28 sps:$4 sm:$0xff]  }
 0x433   : > { %v2853_v10 = vpop.permute.xlu1 %2852  ;;  %4707 = vmatpush1.bf16.msra.mxu0 %v8021_v52  ;;  %v8045_v31 = vld [vmem:[%s12007_s8 + $0x1c4] ss:$28 sps:$4 sm:$0xff]  }
 0x434   : > { %v2921_v47 = vmul.f32 %v10304_v28, %v2853_v10  ;;  %7152 = vmatmul.mubr.msk.bf16.gmra.mrb[84].mxu1 %vm3124_vm4, %v3091_v41  ;;  %3010 = vrot.lane.b32.xlu0 %v2920_v46, %s9110_s18  ;;  %v8019_v28 = vld [vmem:[%s12007_s8 + $0x74] ss:$28 sps:$4 sm:$0xff]   ;;  %v8043_v35 = vld [vmem:[%s12007_s8 + $0x1c0] ss:$28 sps:$4 sm:$0xff]  }
 0x435   : > { %v2983_v27 = vpop.permute.xlu0 %2982  ;;  %3272 = vmatprep.mubr.bf16.mxu1 %v9108_v38  ;;  %4129 = vmatprep.subr.bf16.mxu1 %v8019_v28  ;;  %v8046_v41 = vld [vmem:[%s12007_s8 + $0x1d8] ss:$28 sps:$4 sm:$0xff]   ;;  %v8055_v28 = vld [vmem:[%s12007_s8 + $0x268] ss:$28 sps:$4 sm:$0xff]  }
 0x436   : > { %3012 = vrot.lane.b32.xlu1 %v2921_v47, %s9110_s18  ;;  %v3066_v53 = vadd.f32 %v2983_v27, %v10071_v14  ;;  %4130 = vmatpush1.bf16.msra.mxu1 %v8017_v12  ;;  %v8049_v46 = vld [vmem:[%s12007_s8 + $0x1fc] ss:$28 sps:$4 sm:$0xff]   ;;  %v8050_v47 = vld [vmem:[%s12007_s8 + $0x210] ss:$28 sps:$4 sm:$0xff]  }
 0x437   : > { %v2985_v59 = vpop.permute.xlu1 %2984  ;;  %4708 = vmatprep.subr.bf16.mxu0 %v9108_v38  ;;  %v8047_v10 = vld [vmem:[%s12007_s8 + $0x1f8] ss:$28 sps:$4 sm:$0xff]   ;;  %v8057_v12 = vld [vmem:[%s12007_s8 + $0x26c] ss:$28 sps:$4 sm:$0xff]  }
 0x438   : > { %v3067_v19 = vadd.f32 %v2985_v59, %v10079_v22  ;;  %v8022_v22 = vld [vmem:[%s12007_s8 + $0x88] ss:$28 sps:$4 sm:$0xff]   ;;  %v8053_v27 = vld [vmem:[%s12007_s8 + $0x234] ss:$28 sps:$4 sm:$0xff]  }
 0x439   : > { %v2855_v44 = vpop.permute.xlu0 %2854  ;;  %4709 = vmatpush1.bf16.msra.mxu0 %v8022_v22  ;;  %v8054_v59 = vld [vmem:[%s12007_s8 + $0x248] ss:$28 sps:$4 sm:$0xff]  }
 0x43a   : > { %v3092_v21 = vpack.c.bf16 %v3067_v19, %v3066_v53  ;;  %v2922_v25 = vmul.f32 %v10323_v56, %v2855_v44  ;;  %v8023_v56 = vld [vmem:[%s12007_s8 + $0xa8] ss:$28 sps:$4 sm:$0xff]   ;;  %4710 = vmatprep.subr.bf16.mxu0 %v9108_v38  ;;  %v8058_v53 = vld [vmem:[%s12007_s8 + $0x280] ss:$28 sps:$4 sm:$0xff]  }
 0x43b   : > { %v2857_v42 = vpop.permute.xlu1 %2856  ;;  %v3565_v19 = vld [vmem:[%s12007_s8 + $0x2a0] sm:$0xff] }
 0x43c   : > { %v2923_v58 = vmul.f32 %v10327_v57, %v2857_v42  ;;  %7153 = vmatmul.mubr.msk.bf16.gmra.mrb[88].mxu1 %vm3124_vm4, %v3092_v21  ;;  %3014 = vrot.lane.b32.xlu0 %v2922_v25, %s9110_s18  ;;  %v8025_v57 = vld [vmem:[%s12007_s8 + $0xac] ss:$28 sps:$4 sm:$0xff]   ;;  %v7248_v44 = vcombine.high %v3565_v19, %v3565_v19  ;;  %v7247_v52 = vcombine.low %v3565_v19, %v3565_v19  ;;  %v8061_v21 = vld [vmem:[%s12007_s8 + $0x2b8] ss:$0 sps:$4 sm:$0xff]  }
 0x43d   : > { %v2987_v14 = vpop.permute.xlu0 %2986  ;;  %3282 = vmatprep.mubr.bf16.mxu1 %v9108_v38  ;;  %4131 = vmatprep.subr.bf16.mxu1 %v8025_v57  ;;  %v4123_v42 = vsel %vm2441_vm1, %v8061_v21, 0 }
 0x43e   : > { %3016 = vrot.lane.b32.xlu1 %v2923_v58, %s9110_s18  ;;  %v3068_v0 = vadd.f32 %v2987_v14, %v10095_v40  ;;  %4132 = vmatpush1.bf16.msra.mxu1 %v8023_v56  ;;  %v8030_v40 = vld [vmem:[%s12007_s8 + $0xf8] ss:$28 sps:$4 sm:$0xff]   ;;  %v4105_v25 = vsel %vm2441_vm1, %v7247_v52, 0 }
 0x43f   : > { %v2989_v61 = vpop.permute.xlu1 %2988  ;;  %4133 = vmatprep.subr.bf16.mxu1 %v8029_v51  ;;  %4711 = vmatpush1.bf16.msra.mxu0 %v8026_v62 }
 0x440   : > { %v3069_v13 = vadd.f32 %v2989_v61, %v10103_v49  ;;  %v8033_v49 = vld [vmem:[%s12007_s8 + $0x11c] ss:$28 sps:$4 sm:$0xff]   ;;  %4712 = vmatprep.subr.bf16.mxu0 %v9108_v38 }
 0x441   : > { %v2859_v3 = vpop.permute.xlu0 %2858 }
 0x442   : > { %v3093_v63 = vpack.c.bf16 %v3069_v13, %v3068_v0  ;;  %v2924_v2 = vmul.f32 %v10335_v11, %v2859_v3  ;;  %4134 = vmatpush1.bf16.msra.mxu1 %v8027_v9  ;;  %v8031_v11 = vld [vmem:[%s12007_s8 + $0x118] ss:$28 sps:$4 sm:$0xff]  }
 0x443   : > { %v2861_v17 = vpop.permute.xlu1 %2860  ;;  %4713 = vmatpush1.bf16.msra.mxu0 %v8030_v40  ;;  %4135 = vmatprep.subr.bf16.mxu1 %v8033_v49 }
 0x444   : > { %v2925_v23 = vmul.f32 %v10341_v34, %v2861_v17  ;;  %7154 = vmatmul.mubr.msk.bf16.gmra.mrb[92].mxu1 %vm3124_vm4, %v3093_v63  ;;  %3018 = vrot.lane.b32.xlu0 %v2924_v2, %s9110_s18  ;;  %v8034_v34 = vld [vmem:[%s12007_s8 + $0x130] ss:$28 sps:$4 sm:$0xff]  }
 0x445   : > { %3292 = vmatprep.mubr.bf16.mxu1 %v9108_v38  ;;  %4714 = vmatprep.subr.bf16.mxu0 %v9108_v38 }
 0x446   : > { %3020 = vrot.lane.b32.xlu1 %v2925_v23, %s9110_s18  ;;  %4136 = vmatpush1.bf16.msra.mxu1 %v8031_v11  ;;  %v8064_v11 = vld [vmem:[%s12007_s8 + $0xc] ss:$28 sps:$4 sm:$0xff]  }
 0x447   : > { %4715 = vmatpush1.bf16.msra.mxu0 %v8034_v34  ;;  %4137 = vmatprep.subr.bf16.mxu1 %v8037_v24 }
 0x448   : > { %4716 = vmatprep.subr.bf16.mxu0 %v9108_v38 }
 0x44a   : > { %4138 = vmatpush1.bf16.msra.mxu1 %v8035_v30 }
 0x44b   : > { %4717 = vmatpush1.bf16.msra.mxu0 %v8038_v26  ;;  %4139 = vmatprep.subr.bf16.mxu1 %v8041_v36 }
 0x44c   : > { %4718 = vmatprep.subr.bf16.mxu0 %v9108_v38 }
 0x44e   : > { %4140 = vmatpush1.bf16.msra.mxu1 %v8039_v37 }
 0x44f   : > { %4719 = vmatpush1.bf16.msra.mxu0 %v8042_v48  ;;  %4141 = vmatprep.subr.bf16.mxu1 %v8045_v31 }
 0x450   : > { %4720 = vmatprep.subr.bf16.mxu0 %v9108_v38 }
 0x452   : > { %4142 = vmatpush1.bf16.msra.mxu1 %v8043_v35 }
 0x453   : > { %4721 = vmatpush1.bf16.msra.mxu0 %v8046_v41  ;;  %4143 = vmatprep.subr.bf16.mxu1 %v8049_v46 }
 0x454   : > { %4722 = vmatprep.subr.bf16.mxu0 %v9108_v38 }
 0x456   : > { %4144 = vmatpush1.bf16.msra.mxu1 %v8047_v10 }
 0x457   : > { %4723 = vmatpush1.bf16.msra.mxu0 %v8050_v47  ;;  %4145 = vmatprep.subr.bf16.mxu1 %v8053_v27 }
 0x458   : > { %4724 = vmatprep.subr.bf16.mxu0 %v9108_v38 }
 0x45a   : > { %4146 = vmatpush1.bf16.msra.mxu1 %v8051_v50 }
 0x45b   : > { %4725 = vmatpush1.bf16.msra.mxu0 %v8054_v59  ;;  %4147 = vmatprep.subr.bf16.mxu1 %v8057_v12 }
 0x45c   : > { %4726 = vmatprep.subr.bf16.mxu0 %v9108_v38 }
 0x45e   : > { %4148 = vmatpush1.bf16.msra.mxu1 %v8055_v28 }
 0x45f   : > { %4727 = vmatpush1.bf16.msra.mxu0 %v8058_v53  ;;  %7254 = vmatprep.subr.msk.bf16.mxu1 %vm2441_vm1, %v7248_v44 }
 0x460   : > { %4728 = vmatprep.subr.bf16.mxu0 %v9108_v38 }
 0x462   : > { %4150 = vmatpush1.bf16.msra.mxu1 %v4105_v25  ;;  %v8062_v25 = vld [vmem:[%s12007_s8 + $0x8] ss:$28 sps:$4 sm:$0xff]  }
 0x463   : > { %4729 = vmatpush1.bf16.msra.mxu0 %v4123_v42  ;;  %4318 = vmatprep.subr.bf16.mxu1 %v8064_v11 }
 0x47e   : > { %v2991_v58 = vpop.permute.xlu0 %2990 }
 0x47f   : > { %v3070_v22 = vadd.f32 %v2991_v58, %v10119_v1 }
 0x480   : > { %v2993_v14 = vpop.permute.xlu1 %2992 }
 0x481   : > { %v3071_v56 = vadd.f32 %v2993_v14, %v10127_v16  ;;  %v8067_v14 = vld [vmem:[%s12007_s8 + $0x44] ss:$28 sps:$4 sm:$0xff]  }
 0x483   : > { %v3094_v57 = vpack.c.bf16 %v3071_v56, %v3070_v22 }
 0x485   : > { %7155 = vmatmul.mubr.msk.bf16.gmra.mrb[96].mxu1 %vm3124_vm4, %v3094_v57 }
 0x486   : > { %v2995_v51 = vpop.permute.xlu0 %2994  ;;  %3302 = vmatprep.mubr.bf16.mxu1 %v9108_v38 }
 0x487   : > { %v3072_v62 = vadd.f32 %v2995_v51, %v10143_v32 }
 0x488   : > { %v2997_v61 = vpop.permute.xlu1 %2996 }
 0x489   : > { %v3073_v0 = vadd.f32 %v2997_v61, %v10151_v45 }
 0x48b   : > { %v3095_v13 = vpack.c.bf16 %v3073_v0, %v3072_v62  ;;  %v8065_v62 = vld [vmem:[%s12007_s8 + $0x40] ss:$28 sps:$4 sm:$0xff]  }
 0x48d   : > { %7156 = vmatmul.mubr.msk.bf16.gmra.mrb[100].mxu1 %vm3124_vm4, %v3095_v13 }
 0x48e   : > { %v2999_v3 = vpop.permute.xlu0 %2998  ;;  %3312 = vmatprep.mubr.bf16.mxu1 %v9108_v38 }
 0x48f   : > { %v3074_v16 = vadd.f32 %v2999_v3, %v10169_v60  ;;  %v8070_v3 = vld [vmem:[%s12007_s8 + $0x7c] ss:$28 sps:$4 sm:$0xff]  }
 0x490   : > { %v3001_v1 = vpop.permute.xlu1 %3000 }
 0x491   : > { %v3075_v63 = vadd.f32 %v3001_v1, %v10181_v6 }
 0x493   : > { %v3096_v2 = vpack.c.bf16 %v3075_v63, %v3074_v16 }
 0x495   : > { %7157 = vmatmul.mubr.msk.bf16.gmra.mrb[104].mxu1 %vm3124_vm4, %v3096_v2 }
 0x496   : > { %v3003_v9 = vpop.permute.xlu0 %3002  ;;  %3322 = vmatprep.mubr.bf16.mxu1 %v9108_v38 }
 0x497   : > { %v3076_v45 = vadd.f32 %v3003_v9, %v10196_v18 }
 0x498   : > { %v3005_v32 = vpop.permute.xlu1 %3004 }
 0x499   : > { %v3077_v17 = vadd.f32 %v3005_v32, %v10207_v29  ;;  %v8068_v32 = vld [vmem:[%s12007_s8 + $0x78] ss:$28 sps:$4 sm:$0xff]  }
 0x49b   : > { %v3097_v40 = vpack.c.bf16 %v3077_v17, %v3076_v45 }
 0x49d   : > { %7158 = vmatmul.mubr.msk.bf16.gmra.mrb[108].mxu1 %vm3124_vm4, %v3097_v40  ;;  %v8073_v40 = vld [vmem:[%s12007_s8 + $0xb4] ss:$28 sps:$4 sm:$0xff]  }
 0x49e   : > { %v3007_v49 = vpop.permute.xlu0 %3006  ;;  %3332 = vmatprep.mubr.bf16.mxu1 %v9108_v38 }
 0x49f   : > { %v3078_v6 = vadd.f32 %v3007_v49, %v10222_v43 }
 0x4a0   : > { %v3009_v60 = vpop.permute.xlu1 %3008 }
 0x4a1   : > { %v3079_v23 = vadd.f32 %v3009_v60, %v10233_v54 }
 0x4a3   : > { %v3098_v34 = vpack.c.bf16 %v3079_v23, %v3078_v6 }
 0x4a5   : > { %7159 = vmatmul.mubr.msk.bf16.gmra.mrb[112].mxu1 %vm3124_vm4, %v3098_v34  ;;  %v8071_v34 = vld [vmem:[%s12007_s8 + $0xb0] ss:$28 sps:$4 sm:$0xff]  }
 0x4a6   : > { %v3011_v18 = vpop.permute.xlu0 %3010  ;;  %3342 = vmatprep.mubr.bf16.mxu1 %v9108_v38 }
 0x4a7   : > { %v3080_v24 = vadd.f32 %v3011_v18, %v10248_v8 }
 0x4a8   : > { %v3013_v29 = vpop.permute.xlu1 %3012 }
 0x4a9   : > { %v3081_v30 = vadd.f32 %v3013_v29, %v10259_v20 }
 0x4ab   : > { %v3099_v26 = vpack.c.bf16 %v3081_v30, %v3080_v24  ;;  %v8076_v24 = vld [vmem:[%s12007_s8 + $0xec] ss:$28 sps:$4 sm:$0xff]  }
 0x4ad   : > { %7160 = vmatmul.mubr.msk.bf16.gmra.mrb[116].mxu1 %vm3124_vm4, %v3099_v26 }
 0x4ae   : > { %v3015_v43 = vpop.permute.xlu0 %3014  ;;  %3352 = vmatprep.mubr.bf16.mxu1 %v9108_v38 }
 0x4af   : > { %v3082_v36 = vadd.f32 %v3015_v43, %v10274_v39  ;;  %v3104_v39 = vld [vmem:[%s12006_s7] sm:$0x3] }
 0x4b0   : > { %v3017_v54 = vpop.permute.xlu1 %3016  ;;  %v10581_v46 = vrot.slane %v3104_v39, %v9808_v7 }
 0x4b1   : > { %v3083_v37 = vadd.f32 %v3017_v54, %v10285_v55  ;;  %v10578_v55 = vrot.slane %v3104_v39, %v9795_v5 }
 0x4b3   : > { %v3100_v48 = vpack.c.bf16 %v3083_v37, %v3082_v36  ;;  %v8074_v37 = vld [vmem:[%s12007_s8 + $0xe8] ss:$28 sps:$4 sm:$0xff]  }
 0x4b5   : > { %7161 = vmatmul.mubr.msk.bf16.gmra.mrb[120].mxu1 %vm3124_vm4, %v3100_v48 }
 0x4b6   : > { %v3019_v31 = vpop.permute.xlu0 %3018  ;;  %3362 = vmatprep.mubr.bf16.mxu1 %v9108_v38 }
 0x4b7   : > { %v3084_v20 = vadd.f32 %v3019_v31, %v10300_v15 }
 0x4b8   : > { %v3021_v8 = vpop.permute.xlu1 %3020 }
 0x4b9   : > { %v3085_v35 = vadd.f32 %v3021_v8, %v10311_v33  ;;  %v8079_v8 = vld [vmem:[%s12007_s8 + $0x124] ss:$28 sps:$4 sm:$0xff]  }
 0x4bb   : > { %v3101_v41 = vpack.c.bf16 %v3085_v35, %v3084_v20 }
 0x4bd   : > { %7162 = vmatmul.mubr.msk.bf16.gmra.mrb[124].mxu1 %vm3124_vm4, %v3101_v41 }
 0x4df   : > { %v3214_v10 = vpop.f32.mrb[64].mxu1 }
 0x4e0   : > { %v3215_v38 = vadd.f32 %v3214_v10, %v10578_v55  ;;  %v3216_v47 = vpop.f32.mrb[65].mxu1 }
 0x4e1   : > { %v3217_v15 = vadd.f32 %v3216_v47, %v10581_v46  ;;  %v3218_v33 = vpop.f32.mrb[66].mxu1 }
 0x4e2   : > { %v3219_v27 = vadd.f32 %v3218_v33, %v10578_v55  ;;  %v3220_v50 = vpop.f32.mrb[67].mxu1  ;;  %v3373_v12 = vmax.f32 %v3215_v38, 0.0  ;;  %v8077_v38 = vld [vmem:[%s12007_s8 + $0x120] ss:$28 sps:$4 sm:$0xff]  }
 0x4e3   : > { %v3221_v59 = vadd.f32 %v3220_v50, %v10581_v46  ;;  %v3374_v53 = vmax.f32 %v3217_v15, 0.0  ;;  %v8082_v33 = vld [vmem:[%s12007_s8 + $0x15c] ss:$28 sps:$4 sm:$0xff]  }
 0x4e4   : > { %v3375_v28 = vmax.f32 %v3219_v27, 0.0 }
 0x4e5   : > { %v3376_v19 = vmax.f32 %v3221_v59, 0.0 }
 0x4e6   : > { %v10587_v44 = vpack.c.bf16 %v3375_v28, %v3373_v12 }
 0x4e7   : > { %v10589_v52 = vpack.c.bf16 %v3376_v19, %v3374_v53  ;;  %v3224_v21 = vpop.f32.mrb[68].mxu1  ;;  %v8080_v53 = vld [vmem:[%s12007_s8 + $0x158] ss:$28 sps:$4 sm:$0xff]  }
 0x4e8   : > { %v3225_v42 = vadd.f32 %v3224_v21, %v10578_v55  ;;  %v3226_v58 = vpop.f32.mrb[69].mxu1 }
 0x4e9   : > { %v3227_v22 = vadd.f32 %v3226_v58, %v10581_v46  ;;  %v3228_v56 = vpop.f32.mrb[70].mxu1  ;;  %7255 = vmatprep.mubr.msk.bf16.mxu1 %vm2392_vm2, %v10589_v52  ;;  %7305 = vmatprep.mubr.msk.bf16.mxu0 %vm2392_vm2, %v10589_v52 }
 0x4ea   : > { %v3229_v57 = vadd.f32 %v3228_v56, %v10578_v55  ;;  %v3230_v51 = vpop.f32.mrb[71].mxu1  ;;  %4158 = vmatmul.mubr.bf16.vlgmr.msra.gmra.mrb[128].mxu1 %v10587_v44  ;;  %4737 = vmatmul.mubr.bf16.vlgmr.msra.gmra.mrb[64].mxu0 %v10587_v44  ;;  %v3377_v0 = vmax.f32 %v3225_v42, 0.0 }
 0x4eb   : > { %v3231_v61 = vadd.f32 %v3230_v51, %v10581_v46  ;;  %4319 = vmatpush1.bf16.msra.mxu1 %v8062_v25  ;;  %v3378_v1 = vmax.f32 %v3227_v22, 0.0  ;;  %v8085_v25 = vld [vmem:[%s12007_s8 + $0x194] ss:$28 sps:$4 sm:$0xff]  }
 0x4ec   : > { %v3379_v13 = vmax.f32 %v3229_v57, 0.0  ;;  %4320 = vmatprep.subr.bf16.mxu1 %v8067_v14  ;;  %v8083_v57 = vld [vmem:[%s12007_s8 + $0x190] ss:$28 sps:$4 sm:$0xff]  }
 0x4ed   : > { %v3380_v16 = vmax.f32 %v3231_v61, 0.0 }
 0x4ee   : > { %v10613_v63 = vpack.c.bf16 %v3379_v13, %v3377_v0 }
 0x4ef   : > { %v10615_v2 = vpack.c.bf16 %v3380_v16, %v3378_v1  ;;  %v3234_v9 = vpop.f32.mrb[72].mxu1  ;;  %4321 = vmatpush1.bf16.msra.mxu1 %v8065_v62  ;;  %v8088_v62 = vld [vmem:[%s12007_s8 + $0x1cc] ss:$28 sps:$4 sm:$0xff]  }
 0x4f0   : > { %v3235_v45 = vadd.f32 %v3234_v9, %v10578_v55  ;;  %v3236_v17 = vpop.f32.mrb[73].mxu1  ;;  %4322 = vmatprep.subr.bf16.mxu1 %v8070_v3  ;;  %v8086_v9 = vld [vmem:[%s12007_s8 + $0x1c8] ss:$28 sps:$4 sm:$0xff]  }
 0x4f1   : > { %v3237_v49 = vadd.f32 %v3236_v17, %v10581_v46  ;;  %v3238_v60 = vpop.f32.mrb[74].mxu1  ;;  %7256 = vmatprep.mubr.msk.bf16.mxu1 %vm2392_vm2, %v10615_v2  ;;  %7306 = vmatprep.mubr.msk.bf16.mxu0 %vm2392_vm2, %v10615_v2  ;;  %v8091_v17 = vld [vmem:[%s12007_s8 + $0x204] ss:$28 sps:$4 sm:$0xff]  }
 0x4f2   : > { %v3239_v6 = vadd.f32 %v3238_v60, %v10578_v55  ;;  %v3240_v23 = vpop.f32.mrb[75].mxu1  ;;  %4168 = vmatmul.mubr.bf16.gmra.mrb[132].mxu1 %v10613_v63  ;;  %4745 = vmatmul.mubr.bf16.gmra.mrb[68].mxu0 %v10613_v63  ;;  %v3381_v18 = vmax.f32 %v3235_v45, 0.0 }
 0x4f3   : > { %v3241_v11 = vadd.f32 %v3240_v23, %v10581_v46  ;;  %4323 = vmatpush1.bf16.msra.mxu1 %v8068_v32  ;;  %v3382_v30 = vmax.f32 %v3237_v49, 0.0 }
 0x4f4   : > { %v3383_v29 = vmax.f32 %v3239_v6, 0.0  ;;  %4324 = vmatprep.subr.bf16.mxu1 %v8073_v40 }
 0x4f5   : > { %v3384_v26 = vmax.f32 %v3241_v11, 0.0  ;;  %v8089_v11 = vld [vmem:[%s12007_s8 + $0x200] ss:$28 sps:$4 sm:$0xff]  }
 0x4f6   : > { %v10639_v43 = vpack.c.bf16 %v3383_v29, %v3381_v18  ;;  %v8094_v29 = vld [vmem:[%s12007_s8 + $0x23c] ss:$28 sps:$4 sm:$0xff]  }
 0x4f7   : > { %v10641_v54 = vpack.c.bf16 %v3384_v26, %v3382_v30  ;;  %v3244_v36 = vpop.f32.mrb[76].mxu1  ;;  %4325 = vmatpush1.bf16.msra.mxu1 %v8071_v34 }
 0x4f8   : > { %v3245_v48 = vadd.f32 %v3244_v36, %v10578_v55  ;;  %v3246_v31 = vpop.f32.mrb[77].mxu1  ;;  %4326 = vmatprep.subr.bf16.mxu1 %v8076_v24 }
 0x4f9   : > { %v3247_v20 = vadd.f32 %v3246_v31, %v10581_v46  ;;  %v3248_v35 = vpop.f32.mrb[78].mxu1  ;;  %7257 = vmatprep.mubr.msk.bf16.mxu1 %vm2392_vm2, %v10641_v54  ;;  %7307 = vmatprep.mubr.msk.bf16.mxu0 %vm2392_vm2, %v10641_v54 }
 0x4fa   : > { %v3249_v41 = vadd.f32 %v3248_v35, %v10578_v55  ;;  %v3250_v39 = vpop.f32.mrb[79].mxu1  ;;  %4178 = vmatmul.mubr.bf16.gmra.mrb[136].mxu1 %v10639_v43  ;;  %4753 = vmatmul.mubr.bf16.gmra.mrb[72].mxu0 %v10639_v43  ;;  %v3385_v47 = vmax.f32 %v3245_v48, 0.0  ;;  %v8092_v48 = vld [vmem:[%s12007_s8 + $0x238] ss:$28 sps:$4 sm:$0xff]  }
 0x4fb   : > { %v3251_v10 = vadd.f32 %v3250_v39, %v10581_v46  ;;  %4327 = vmatpush1.bf16.msra.mxu1 %v8074_v37  ;;  %v3386_v27 = vmax.f32 %v3247_v20, 0.0 }
 0x4fc   : > { %v3387_v15 = vmax.f32 %v3249_v41, 0.0  ;;  %4328 = vmatprep.subr.bf16.mxu1 %v8079_v8 }
 0x4fd   : > { %v3388_v50 = vmax.f32 %v3251_v10, 0.0 }
 0x4fe   : > { %v10665_v59 = vpack.c.bf16 %v3387_v15, %v3385_v47  ;;  %v8097_v47 = vld [vmem:[%s12007_s8 + $0x274] ss:$28 sps:$4 sm:$0xff]  }
 0x4ff   : > { %v10667_v12 = vpack.c.bf16 %v3388_v50, %v3386_v27  ;;  %v3254_v28 = vpop.f32.mrb[80].mxu1  ;;  %4329 = vmatpush1.bf16.msra.mxu1 %v8077_v38  ;;  %v8095_v38 = vld [vmem:[%s12007_s8 + $0x270] ss:$28 sps:$4 sm:$0xff]  }
 0x500   : > { %v3255_v19 = vadd.f32 %v3254_v28, %v10578_v55  ;;  %v3256_v21 = vpop.f32.mrb[81].mxu1  ;;  %4330 = vmatprep.subr.bf16.mxu1 %v8082_v33 }
 0x501   : > { %v3257_v42 = vadd.f32 %v3256_v21, %v10581_v46  ;;  %v3258_v58 = vpop.f32.mrb[82].mxu1  ;;  %7258 = vmatprep.mubr.msk.bf16.mxu1 %vm2392_vm2, %v10667_v12  ;;  %7308 = vmatprep.mubr.msk.bf16.mxu0 %vm2392_vm2, %v10667_v12 }
 0x502   : > { %v3259_v14 = vadd.f32 %v3258_v58, %v10578_v55  ;;  %v3260_v22 = vpop.f32.mrb[83].mxu1  ;;  %4188 = vmatmul.mubr.bf16.gmra.mrb[140].mxu1 %v10665_v59  ;;  %4761 = vmatmul.mubr.bf16.gmra.mrb[76].mxu0 %v10665_v59  ;;  %v3389_v51 = vmax.f32 %v3255_v19, 0.0 }
 0x503   : > { %v3261_v56 = vadd.f32 %v3260_v22, %v10581_v46  ;;  %4331 = vmatpush1.bf16.msra.mxu1 %v8080_v53  ;;  %v3390_v0 = vmax.f32 %v3257_v42, 0.0 }
 0x504   : > { %v3391_v61 = vmax.f32 %v3259_v14, 0.0  ;;  %4332 = vmatprep.subr.bf16.mxu1 %v8085_v25 }
 0x505   : > { %v3392_v13 = vmax.f32 %v3261_v56, 0.0  ;;  %v3566_v56 = vld [vmem:[%s12007_s8 + $0x2a8] sm:$0xff] }
 0x506   : > { %v10691_v3 = vpack.c.bf16 %v3391_v61, %v3389_v51  ;;  %v7250_v51 = vcombine.high %v3566_v56, %v3566_v56  ;;  %v7249_v61 = vcombine.low %v3566_v56, %v3566_v56 }
 0x507   : > { %v10693_v1 = vpack.c.bf16 %v3392_v13, %v3390_v0  ;;  %v3264_v16 = vpop.f32.mrb[84].mxu1  ;;  %4333 = vmatpush1.bf16.msra.mxu1 %v8083_v57 }
 0x508   : > { %v3265_v32 = vadd.f32 %v3264_v16, %v10578_v55  ;;  %v3266_v45 = vpop.f32.mrb[85].mxu1  ;;  %4334 = vmatprep.subr.bf16.mxu1 %v8088_v62 }
 0x509   : > { %v3267_v40 = vadd.f32 %v3266_v45, %v10581_v46  ;;  %v3268_v49 = vpop.f32.mrb[86].mxu1  ;;  %7259 = vmatprep.mubr.msk.bf16.mxu1 %vm2392_vm2, %v10693_v1  ;;  %7309 = vmatprep.mubr.msk.bf16.mxu0 %vm2392_vm2, %v10693_v1 }
 0x50a   : > { %v3269_v60 = vadd.f32 %v3268_v49, %v10578_v55  ;;  %v3270_v6 = vpop.f32.mrb[87].mxu1  ;;  %4198 = vmatmul.mubr.bf16.gmra.mrb[144].mxu1 %v10691_v3  ;;  %4769 = vmatmul.mubr.bf16.gmra.mrb[80].mxu0 %v10691_v3  ;;  %v3393_v34 = vmax.f32 %v3265_v32, 0.0 }
 0x50b   : > { %v3271_v23 = vadd.f32 %v3270_v6, %v10581_v46  ;;  %4335 = vmatpush1.bf16.msra.mxu1 %v8086_v9  ;;  %v3394_v24 = vmax.f32 %v3267_v40, 0.0  ;;  %v4111_v9 = vsel %vm2441_vm1, %v7249_v61, 0 }
 0x50c   : > { %v3395_v18 = vmax.f32 %v3269_v60, 0.0  ;;  %4336 = vmatprep.subr.bf16.mxu1 %v8091_v17  ;;  %v8102_v17 = vld [vmem:[%s12007_s8 + $0x14] ss:$28 sps:$4 sm:$0xff]  }
 0x50d   : > { %v3396_v30 = vmax.f32 %v3271_v23, 0.0 }
 0x50e   : > { %v10717_v26 = vpack.c.bf16 %v3395_v18, %v3393_v34 }
 0x50f   : > { %v10719_v36 = vpack.c.bf16 %v3396_v30, %v3394_v24  ;;  %v3274_v37 = vpop.f32.mrb[88].mxu1  ;;  %4337 = vmatpush1.bf16.msra.mxu1 %v8089_v11 }
 0x510   : > { %v3275_v31 = vadd.f32 %v3274_v37, %v10578_v55  ;;  %v3276_v8 = vpop.f32.mrb[89].mxu1  ;;  %4338 = vmatprep.subr.bf16.mxu1 %v8094_v29 }
 0x511   : > { %v3277_v20 = vadd.f32 %v3276_v8, %v10581_v46  ;;  %v3278_v35 = vpop.f32.mrb[90].mxu1  ;;  %7260 = vmatprep.mubr.msk.bf16.mxu1 %vm2392_vm2, %v10719_v36  ;;  %7310 = vmatprep.mubr.msk.bf16.mxu0 %vm2392_vm2, %v10719_v36 }
 0x512   : > { %v3279_v41 = vadd.f32 %v3278_v35, %v10578_v55  ;;  %v3280_v39 = vpop.f32.mrb[91].mxu1  ;;  %4208 = vmatmul.mubr.bf16.gmra.mrb[148].mxu1 %v10717_v26  ;;  %4777 = vmatmul.mubr.bf16.gmra.mrb[84].mxu0 %v10717_v26  ;;  %v3397_v15 = vmax.f32 %v3275_v31, 0.0 }
 0x513   : > { %v3281_v10 = vadd.f32 %v3280_v39, %v10581_v46  ;;  %4339 = vmatpush1.bf16.msra.mxu1 %v8092_v48  ;;  %v3398_v27 = vmax.f32 %v3277_v20, 0.0 }
 0x514   : > { %v3399_v33 = vmax.f32 %v3279_v41, 0.0  ;;  %4340 = vmatprep.subr.bf16.mxu1 %v8097_v47 }
 0x515   : > { %v3400_v50 = vmax.f32 %v3281_v10, 0.0 }
 0x516   : > { %v10740_v28 = vpack.c.bf16 %v3399_v33, %v3397_v15 }
 0x517   : > { %v10742_v53 = vpack.c.bf16 %v3400_v50, %v3398_v27  ;;  %v3284_v19 = vpop.f32.mrb[92].mxu1  ;;  %4341 = vmatpush1.bf16.msra.mxu1 %v8095_v38 }
 0x518   : > { %v3285_v21 = vadd.f32 %v3284_v19, %v10578_v55  ;;  %v3286_v25 = vpop.f32.mrb[93].mxu1  ;;  %7271 = vmatprep.subr.msk.bf16.mxu1 %vm2441_vm1, %v7250_v51 }
 0x519   : > { %v3287_v42 = vadd.f32 %v3286_v25, %v10581_v46  ;;  %v3288_v58 = vpop.f32.mrb[94].mxu1  ;;  %7261 = vmatprep.mubr.msk.bf16.mxu1 %vm2392_vm2, %v10742_v53  ;;  %7311 = vmatprep.mubr.msk.bf16.mxu0 %vm2392_vm2, %v10742_v53 }
 0x51a   : > { %v3289_v14 = vadd.f32 %v3288_v58, %v10578_v55  ;;  %v3290_v22 = vpop.f32.mrb[95].mxu1  ;;  %4218 = vmatmul.mubr.bf16.gmra.mrb[152].mxu1 %v10740_v28  ;;  %4785 = vmatmul.mubr.bf16.gmra.mrb[88].mxu0 %v10740_v28  ;;  %v3401_v62 = vmax.f32 %v3285_v21, 0.0 }
 0x51b   : > { %v3291_v57 = vadd.f32 %v3290_v22, %v10581_v46  ;;  %v3402_v13 = vmax.f32 %v3287_v42, 0.0  ;;  %4343 = vmatpush1.bf16.msra.mxu1 %v4111_v9 }
 0x51c   : > { %v3403_v0 = vmax.f32 %v3289_v14, 0.0  ;;  %4511 = vmatprep.subr.bf16.mxu1 %v8102_v17 }
 0x51d   : > { %v3404_v16 = vmax.f32 %v3291_v57, 0.0 }
 0x51e   : > { %v10759_v32 = vpack.c.bf16 %v3403_v0, %v3401_v62 }
 0x51f   : > { %v10761_v45 = vpack.c.bf16 %v3404_v16, %v3402_v13 }
 0x521   : > { %7262 = vmatprep.mubr.msk.bf16.mxu1 %vm2392_vm2, %v10761_v45  ;;  %7312 = vmatprep.mubr.msk.bf16.mxu0 %vm2392_vm2, %v10761_v45 }
 0x522   : > { %4228 = vmatmul.mubr.bf16.gmra.mrb[156].mxu1 %v10759_v32  ;;  %4793 = vmatmul.mubr.bf16.gmra.mrb[92].mxu0 %v10759_v32 }
 0x558   : > { %v3294_v40 = vpop.f32.mrb[96].mxu1 }
 0x559   : > { %v3295_v49 = vadd.f32 %v3294_v40, %v10578_v55  ;;  %v3296_v60 = vpop.f32.mrb[97].mxu1 }
 0x55a   : > { %v3297_v6 = vadd.f32 %v3296_v60, %v10581_v46  ;;  %v3298_v23 = vpop.f32.mrb[98].mxu1 }
 0x55b   : > { %v3299_v11 = vadd.f32 %v3298_v23, %v10578_v55  ;;  %v3300_v34 = vpop.f32.mrb[99].mxu1  ;;  %v3405_v29 = vmax.f32 %v3295_v49, 0.0 }
 0x55c   : > { %v3301_v18 = vadd.f32 %v3300_v34, %v10581_v46  ;;  %v3406_v30 = vmax.f32 %v3297_v6, 0.0 }
 0x55d   : > { %v3407_v24 = vmax.f32 %v3299_v11, 0.0 }
 0x55e   : > { %v3408_v37 = vmax.f32 %v3301_v18, 0.0 }
 0x55f   : > { %v10776_v48 = vpack.c.bf16 %v3407_v24, %v3405_v29 }
 0x560   : > { %v10778_v31 = vpack.c.bf16 %v3408_v37, %v3406_v30  ;;  %v3304_v8 = vpop.f32.mrb[100].mxu1 }
 0x561   : > { %12021 = vst [vmem:[#allocation3_spill] sm:$0xff] %v10776_v48  ;;  %v3305_v20 = vadd.f32 %v3304_v8, %v10578_v55  ;;  %v3306_v35 = vpop.f32.mrb[101].mxu1 }
 0x562   : > { %12022 = vst [vmem:[#allocation4_spill] sm:$0xff] %v10778_v31  ;;  %v3307_v41 = vadd.f32 %v3306_v35, %v10581_v46  ;;  %v3308_v39 = vpop.f32.mrb[102].mxu1  ;;  %7263 = vmatprep.mubr.msk.bf16.mxu1 %vm2392_vm2, %v10778_v31  ;;  %7313 = vmatprep.mubr.msk.bf16.mxu0 %vm2392_vm2, %v10778_v31 }
 0x563   : > { %v3309_v10 = vadd.f32 %v3308_v39, %v10578_v55  ;;  %v3310_v38 = vpop.f32.mrb[103].mxu1  ;;  %4238 = vmatmul.mubr.bf16.gmra.mrb[160].mxu1 %v10776_v48  ;;  %4801 = vmatmul.mubr.bf16.gmra.mrb[96].mxu0 %v10776_v48  ;;  %v3409_v15 = vmax.f32 %v3305_v20, 0.0 }
 0x564   : > { %v3311_v47 = vadd.f32 %v3310_v38, %v10581_v46  ;;  %v3410_v27 = vmax.f32 %v3307_v41, 0.0 }
 0x565   : > { %v3411_v33 = vmax.f32 %v3309_v10, 0.0 }
 0x566   : > { %v3412_v50 = vmax.f32 %v3311_v47, 0.0 }
 0x567   : > { %v10790_v19 = vpack.c.bf16 %v3411_v33, %v3409_v15 }
 0x568   : > { %v10792_v21 = vpack.c.bf16 %v3412_v50, %v3410_v27  ;;  %v3314_v25 = vpop.f32.mrb[104].mxu1 }
 0x569   : > { %12023 = vst [vmem:[#allocation5_spill] sm:$0xff] %v10790_v19  ;;  %v3315_v42 = vadd.f32 %v3314_v25, %v10578_v55  ;;  %v3316_v58 = vpop.f32.mrb[105].mxu1 }
 0x56a   : > { %12024 = vst [vmem:[#allocation6_spill] sm:$0xff] %v10792_v21  ;;  %v3317_v14 = vadd.f32 %v3316_v58, %v10581_v46  ;;  %v3318_v22 = vpop.f32.mrb[106].mxu1  ;;  %7264 = vmatprep.mubr.msk.bf16.mxu1 %vm2392_vm2, %v10792_v21  ;;  %7314 = vmatprep.mubr.msk.bf16.mxu0 %vm2392_vm2, %v10792_v21 }
 0x56b   : > { %v3319_v56 = vadd.f32 %v3318_v22, %v10578_v55  ;;  %v3320_v57 = vpop.f32.mrb[107].mxu1  ;;  %4248 = vmatmul.mubr.bf16.gmra.mrb[164].mxu1 %v10790_v19  ;;  %4809 = vmatmul.mubr.bf16.gmra.mrb[100].mxu0 %v10790_v19  ;;  %v3413_v61 = vmax.f32 %v3315_v42, 0.0 }
 0x56c   : > { %v3321_v51 = vadd.f32 %v3320_v57, %v10581_v46  ;;  %v3414_v0 = vmax.f32 %v3317_v14, 0.0 }
 0x56d   : > { %v3415_v62 = vmax.f32 %v3319_v56, 0.0 }
 0x56e   : > { %v3416_v13 = vmax.f32 %v3321_v51, 0.0 }
 0x56f   : > { %v10804_v16 = vpack.c.bf16 %v3415_v62, %v3413_v61 }
 0x570   : > { %v10806_v9 = vpack.c.bf16 %v3416_v13, %v3414_v0  ;;  %v3324_v17 = vpop.f32.mrb[108].mxu1 }
 0x571   : > { %12025 = vst [vmem:[#allocation7_spill] sm:$0xff] %v10804_v16  ;;  %v3325_v40 = vadd.f32 %v3324_v17, %v10578_v55  ;;  %v3326_v49 = vpop.f32.mrb[109].mxu1 }
 0x572   : > { %12026 = vst [vmem:[#allocation8_spill] sm:$0xff] %v10806_v9  ;;  %v3327_v60 = vadd.f32 %v3326_v49, %v10581_v46  ;;  %v3328_v6 = vpop.f32.mrb[110].mxu1  ;;  %7265 = vmatprep.mubr.msk.bf16.mxu1 %vm2392_vm2, %v10806_v9  ;;  %7315 = vmatprep.mubr.msk.bf16.mxu0 %vm2392_vm2, %v10806_v9 }
 0x573   : > { %v3329_v23 = vadd.f32 %v3328_v6, %v10578_v55  ;;  %v3330_v11 = vpop.f32.mrb[111].mxu1  ;;  %4258 = vmatmul.mubr.bf16.gmra.mrb[168].mxu1 %v10804_v16  ;;  %4817 = vmatmul.mubr.bf16.gmra.mrb[104].mxu0 %v10804_v16  ;;  %v3417_v18 = vmax.f32 %v3325_v40, 0.0 }
 0x574   : > { %v3331_v34 = vadd.f32 %v3330_v11, %v10581_v46  ;;  %v3418_v24 = vmax.f32 %v3327_v60, 0.0 }
 0x575   : > { %v3419_v29 = vmax.f32 %v3329_v23, 0.0 }
 0x576   : > { %v3420_v30 = vmax.f32 %v3331_v34, 0.0 }
 0x577   : > { %v10818_v37 = vpack.c.bf16 %v3419_v29, %v3417_v18 }
 0x578   : > { %v10820_v8 = vpack.c.bf16 %v3420_v30, %v3418_v24  ;;  %v3334_v20 = vpop.f32.mrb[112].mxu1 }
 0x579   : > { %v3335_v35 = vadd.f32 %v3334_v20, %v10578_v55  ;;  %v3336_v41 = vpop.f32.mrb[113].mxu1 }
 0x57a   : > { %12027 = vst [vmem:[#allocation9_spill] sm:$0xff] %v10820_v8  ;;  %v3337_v39 = vadd.f32 %v3336_v41, %v10581_v46  ;;  %v3338_v10 = vpop.f32.mrb[114].mxu1  ;;  %7266 = vmatprep.mubr.msk.bf16.mxu1 %vm2392_vm2, %v10820_v8  ;;  %7316 = vmatprep.mubr.msk.bf16.mxu0 %vm2392_vm2, %v10820_v8 }
 0x57b   : > { %v3339_v38 = vadd.f32 %v3338_v10, %v10578_v55  ;;  %v3340_v47 = vpop.f32.mrb[115].mxu1  ;;  %4268 = vmatmul.mubr.bf16.gmra.mrb[172].mxu1 %v10818_v37  ;;  %4825 = vmatmul.mubr.bf16.gmra.mrb[108].mxu0 %v10818_v37  ;;  %v3421_v33 = vmax.f32 %v3335_v35, 0.0 }
 0x57c   : > { %v3341_v15 = vadd.f32 %v3340_v47, %v10581_v46  ;;  %v3422_v50 = vmax.f32 %v3337_v39, 0.0 }
 0x57d   : > { %v3423_v27 = vmax.f32 %v3339_v38, 0.0 }
 0x57e   : > { %v3424_v25 = vmax.f32 %v3341_v15, 0.0 }
 0x57f   : > { %v10832_v42 = vpack.c.bf16 %v3423_v27, %v3421_v33 }
 0x580   : > { %v10834_v58 = vpack.c.bf16 %v3424_v25, %v3422_v50  ;;  %v3344_v14 = vpop.f32.mrb[116].mxu1 }
 0x581   : > { %v3345_v22 = vadd.f32 %v3344_v14, %v10578_v55  ;;  %v3346_v56 = vpop.f32.mrb[117].mxu1 }
 0x582   : > { %v3347_v57 = vadd.f32 %v3346_v56, %v10581_v46  ;;  %v3348_v51 = vpop.f32.mrb[118].mxu1  ;;  %7267 = vmatprep.mubr.msk.bf16.mxu1 %vm2392_vm2, %v10834_v58  ;;  %7317 = vmatprep.mubr.msk.bf16.mxu0 %vm2392_vm2, %v10834_v58 }
 0x583   : > { %v3349_v61 = vadd.f32 %v3348_v51, %v10578_v55  ;;  %v3350_v62 = vpop.f32.mrb[119].mxu1  ;;  %4278 = vmatmul.mubr.bf16.gmra.mrb[176].mxu1 %v10832_v42  ;;  %4833 = vmatmul.mubr.bf16.gmra.mrb[112].mxu0 %v10832_v42  ;;  %v3425_v13 = vmax.f32 %v3345_v22, 0.0 }
 0x584   : > { %v3351_v0 = vadd.f32 %v3350_v62, %v10581_v46  ;;  %v3426_v40 = vmax.f32 %v3347_v57, 0.0 }
 0x585   : > { %v3427_v17 = vmax.f32 %v3349_v61, 0.0 }
 0x586   : > { %v3428_v49 = vmax.f32 %v3351_v0, 0.0 }
 0x587   : > { %v10846_v60 = vpack.c.bf16 %v3427_v17, %v3425_v13  ;;  %v8103_v17 = vld [vmem:[%s12007_s8 + $0x48] ss:$28 sps:$4 sm:$0xff]  }
 0x588   : > { %v10848_v6 = vpack.c.bf16 %v3428_v49, %v3426_v40  ;;  %v3354_v23 = vpop.f32.mrb[120].mxu1  ;;  %v8108_v40 = vld [vmem:[%s12007_s8 + $0x84] ss:$28 sps:$4 sm:$0xff]  }
 0x589   : > { %v3355_v11 = vadd.f32 %v3354_v23, %v10578_v55  ;;  %v3356_v34 = vpop.f32.mrb[121].mxu1  ;;  %v8106_v49 = vld [vmem:[%s12007_s8 + $0x80] ss:$28 sps:$4 sm:$0xff]  }
 0x58a   : > { %v3357_v18 = vadd.f32 %v3356_v34, %v10581_v46  ;;  %v3358_v29 = vpop.f32.mrb[122].mxu1  ;;  %7268 = vmatprep.mubr.msk.bf16.mxu1 %vm2392_vm2, %v10848_v6  ;;  %7318 = vmatprep.mubr.msk.bf16.mxu0 %vm2392_vm2, %v10848_v6  ;;  %v8111_v23 = vld [vmem:[%s12007_s8 + $0xbc] ss:$28 sps:$4 sm:$0xff]   ;;  %v8114_v34 = vld [vmem:[%s12007_s8 + $0xf4] ss:$28 sps:$4 sm:$0xff]  }
 0x58b   : > { %v3359_v24 = vadd.f32 %v3358_v29, %v10578_v55  ;;  %v3360_v30 = vpop.f32.mrb[123].mxu1  ;;  %4288 = vmatmul.mubr.bf16.gmra.mrb[180].mxu1 %v10846_v60  ;;  %4841 = vmatmul.mubr.bf16.gmra.mrb[116].mxu0 %v10846_v60  ;;  %v3429_v35 = vmax.f32 %v3355_v11, 0.0  ;;  %v8109_v11 = vld [vmem:[%s12007_s8 + $0xb8] ss:$28 sps:$4 sm:$0xff]   ;;  %v8117_v29 = vld [vmem:[%s12007_s8 + $0x12c] ss:$28 sps:$4 sm:$0xff]  }
 0x58c   : > { %v3361_v20 = vadd.f32 %v3360_v30, %v10581_v46  ;;  %v3430_v39 = vmax.f32 %v3357_v18, 0.0  ;;  %v8112_v18 = vld [vmem:[%s12007_s8 + $0xf0] ss:$28 sps:$4 sm:$0xff]   ;;  %v8120_v30 = vld [vmem:[%s12007_s8 + $0x164] ss:$28 sps:$4 sm:$0xff]  }
 0x58d   : > { %v3431_v41 = vmax.f32 %v3359_v24, 0.0  ;;  %v8115_v24 = vld [vmem:[%s12007_s8 + $0x128] ss:$28 sps:$4 sm:$0xff]  }
 0x58e   : > { %v3432_v10 = vmax.f32 %v3361_v20, 0.0  ;;  %v3597_v20 = vsub.s32 6, %v9791_v4 }
 0x58f   : > { %v10860_v38 = vpack.c.bf16 %v3431_v41, %v3429_v35  ;;  %v3569_v35 = vld [vmem:[%s12008_s9] sm:$0x7f] }
 0x590   : > { %v10862_v47 = vpack.c.bf16 %v3432_v10, %v3430_v39  ;;  %v3364_v15 = vpop.f32.mrb[124].mxu1  ;;  %v8118_v41 = vld [vmem:[%s12007_s8 + $0x160] ss:$28 sps:$4 sm:$0xff]   ;;  %v10942_v10 = vrot.slane %v3569_v35, %v9795_v5  ;;  %v8126_v5 = vld [vmem:[%s12007_s8 + $0x1d4] ss:$28 sps:$4 sm:$0xff]  }
 0x591   : > { %v3365_v33 = vadd.f32 %v3364_v15, %v10578_v55  ;;  %v3366_v27 = vpop.f32.mrb[125].mxu1  ;;  %v8123_v39 = vld [vmem:[%s12007_s8 + $0x19c] ss:$28 sps:$4 sm:$0xff]   ;;  %v10944_v15 = vrot.slane %v3569_v35, %v3597_v20 }
 0x592   : > { %v3367_v50 = vadd.f32 %v3366_v27, %v10581_v46  ;;  %v3368_v25 = vpop.f32.mrb[126].mxu1  ;;  %7269 = vmatprep.mubr.msk.bf16.mxu1 %vm2392_vm2, %v10862_v47  ;;  %7319 = vmatprep.mubr.msk.bf16.mxu0 %vm2392_vm2, %v10862_v47  ;;  %v8121_v27 = vld [vmem:[%s12007_s8 + $0x198] ss:$28 sps:$4 sm:$0xff]  }
 0x593   : > { %v3369_v14 = vadd.f32 %v3368_v25, %v10578_v55  ;;  %v3370_v22 = vpop.f32.mrb[127].mxu1  ;;  %4298 = vmatmul.mubr.bf16.gmra.mrb[184].mxu1 %v10860_v38  ;;  %4849 = vmatmul.mubr.bf16.gmra.mrb[120].mxu0 %v10860_v38  ;;  %v3433_v57 = vmax.f32 %v3365_v33, 0.0  ;;  %v8100_v55 = vld [vmem:[%s12007_s8 + $0x10] ss:$28 sps:$4 sm:$0xff]   ;;  %v10948_v33 = vrot.slane %v3569_v35, %v9808_v7 }
 0x594   : > { %v3371_v56 = vadd.f32 %v3370_v22, %v10581_v46  ;;  %v3434_v61 = vmax.f32 %v3367_v50, 0.0  ;;  %v8105_v46 = vld [vmem:[%s12007_s8 + $0x4c] ss:$28 sps:$4 sm:$0xff]  }
 0x595   : > { %v3435_v51 = vmax.f32 %v3369_v14, 0.0 }
 0x596   : > { %v3436_v62 = vmax.f32 %v3371_v56, 0.0 }
 0x597   : > { %v10874_v0 = vpack.c.bf16 %v3435_v51, %v3433_v57 }
 0x598   : > { %v10876_v13 = vpack.c.bf16 %v3436_v62, %v3434_v61 }
 0x59a   : > { %7270 = vmatprep.mubr.msk.bf16.mxu1 %vm2392_vm2, %v10876_v13  ;;  %7320 = vmatprep.mubr.msk.bf16.mxu0 %vm2392_vm2, %v10876_v13 }
 0x59b   : > { %4308 = vmatmul.mubr.bf16.gmra.mrb[188].mxu1 %v10874_v0  ;;  %4857 = vmatmul.mubr.bf16.gmra.mrb[124].mxu0 %v10874_v0 }
 0x59c   : > { %7272 = vmatprep.mubr.msk.bf16.mxu1 %vm2392_vm2, %v10589_v52 }
 0x5a3   : > { %4351 = vmatmul.mubr.bf16.vlgmr.msra.gmra.mrb[192].mxu1 %v10587_v44 }
 0x5a4   : > { %7273 = vmatprep.mubr.msk.bf16.mxu1 %vm2392_vm2, %v10615_v2  ;;  %4512 = vmatpush1.bf16.msra.mxu1 %v8100_v55 }
 0x5a5   : > { %4513 = vmatprep.subr.bf16.mxu1 %v8105_v46 }
 0x5a8   : > { %4514 = vmatpush1.bf16.msra.mxu1 %v8103_v17 }
 0x5a9   : > { %4515 = vmatprep.subr.bf16.mxu1 %v8108_v40 }
 0x5ab   : > { %4361 = vmatmul.mubr.bf16.gmra.mrb[196].mxu1 %v10613_v63 }
 0x5ac   : > { %7274 = vmatprep.mubr.msk.bf16.mxu1 %vm2392_vm2, %v10641_v54  ;;  %4516 = vmatpush1.bf16.msra.mxu1 %v8106_v49 }
 0x5ad   : > { %4517 = vmatprep.subr.bf16.mxu1 %v8111_v23  ;;  %v8124_v23 = vld [vmem:[%s12007_s8 + $0x1d0] ss:$28 sps:$4 sm:$0xff]  }
 0x5b0   : > { %4518 = vmatpush1.bf16.msra.mxu1 %v8109_v11 }
 0x5b1   : > { %4519 = vmatprep.subr.bf16.mxu1 %v8114_v34 }
 0x5b3   : > { %4371 = vmatmul.mubr.bf16.gmra.mrb[200].mxu1 %v10639_v43 }
 0x5b4   : > { %7275 = vmatprep.mubr.msk.bf16.mxu1 %vm2392_vm2, %v10667_v12  ;;  %4520 = vmatpush1.bf16.msra.mxu1 %v8112_v18  ;;  %v8129_v18 = vld [vmem:[%s12007_s8 + $0x20c] ss:$28 sps:$4 sm:$0xff]  }
 0x5b5   : > { %4521 = vmatprep.subr.bf16.mxu1 %v8117_v29 }
 0x5b8   : > { %4522 = vmatpush1.bf16.msra.mxu1 %v8115_v24 }
 0x5b9   : > { %4523 = vmatprep.subr.bf16.mxu1 %v8120_v30 }
 0x5bb   : > { %4381 = vmatmul.mubr.bf16.gmra.mrb[204].mxu1 %v10665_v59 }
 0x5bc   : > { %7276 = vmatprep.mubr.msk.bf16.mxu1 %vm2392_vm2, %v10693_v1  ;;  %4524 = vmatpush1.bf16.msra.mxu1 %v8118_v41 }
 0x5bd   : > { %v4159_v50 = vpop.f32.mrb[128].mxu1  ;;  %v4738_v25 = vpop.f32.mrb[64].mxu0  ;;  %4525 = vmatprep.subr.bf16.mxu1 %v8123_v39 }
 0x5be   : > { %v4160_v14 = vadd.f32 %v4159_v50, %v10942_v10  ;;  %v4739_v7 = vadd.f32 %v4738_v25, %v10944_v15  ;;  %v4161_v22 = vpop.f32.mrb[129].mxu1  ;;  %v4740_v56 = vpop.f32.mrb[65].mxu0  ;;  %v8127_v50 = vld [vmem:[%s12007_s8 + $0x208] ss:$28 sps:$4 sm:$0xff]  }
 0x5bf   : > { %v4162_v57 = vadd.f32 %v4161_v22, %v10948_v33  ;;  %v4163_v51 = vpop.f32.mrb[130].mxu1  ;;  %v4741_v61 = vpop.f32.mrb[66].mxu0 }
 0x5c0   : > { %v4865_v62 = vsub.f32 0.0, %v4160_v14  ;;  %v4871_v55 = vsub.f32 0.0, %v4739_v7  ;;  %v4164_v46 = vadd.f32 %v4163_v51, %v10942_v10  ;;  %v4742_v17 = vadd.f32 %v4741_v61, %v10944_v15  ;;  %v4165_v40 = vpop.f32.mrb[131].mxu1  ;;  %v4743_v49 = vpop.f32.mrb[67].mxu0  ;;  %4526 = vmatpush1.bf16.msra.mxu1 %v8121_v27  ;;  %v8132_v7 = vld [vmem:[%s12007_s8 + $0x244] ss:$28 sps:$4 sm:$0xff]  }
 0x5c1   : > { %v4866_v11 = vsub.f32 0.0, %v4162_v57  ;;  %v4166_v34 = vadd.f32 %v4165_v40, %v10948_v33  ;;  %4527 = vmatprep.subr.bf16.mxu1 %v8126_v5 }
 0x5c2   : > { %v5089_v29 = vmul.f32 1.442695, %v4865_v62  ;;  %v5101_v24 = vmul.f32 1.442695, %v4871_v55  ;;  %v4872_v30 = vsub.f32 0.0, %v4164_v46  ;;  %v4878_v20 = vsub.f32 0.0, %v4742_v17 }
 0x5c3   : > { %v5091_v35 = vmul.f32 1.442695, %v4866_v11  ;;  %v4873_v41 = vsub.f32 0.0, %v4166_v34  ;;  %4391 = vmatmul.mubr.bf16.gmra.mrb[208].mxu1 %v10691_v3  ;;  %v8130_v11 = vld [vmem:[%s12007_s8 + $0x240] ss:$28 sps:$4 sm:$0xff]  }
 0x5c4   : > { %8202 = vpow2.f32 %v5089_v29  ;;  %v5103_v39 = vmul.f32 1.442695, %v4872_v30  ;;  %v5115_v27 = vmul.f32 1.442695, %v4878_v20  ;;  %7277 = vmatprep.mubr.msk.bf16.mxu1 %vm2392_vm2, %v10719_v36  ;;  %4528 = vmatpush1.bf16.msra.mxu1 %v8124_v23  ;;  %v8135_v29 = vld [vmem:[%s12007_s8 + $0x27c] ss:$28 sps:$4 sm:$0xff]  }
 0x5c5   : > { %8204 = vpow2.f32 %v5101_v24  ;;  %v5105_v25 = vmul.f32 1.442695, %v4873_v41  ;;  %v4169_v5 = vpop.f32.mrb[132].mxu1  ;;  %v4746_v14 = vpop.f32.mrb[68].mxu0  ;;  %4529 = vmatprep.subr.bf16.mxu1 %v8129_v18 }
 0x5c6   : > { %8206 = vpow2.f32 %v5091_v35  ;;  %v4170_v22 = vadd.f32 %v4169_v5, %v10942_v10  ;;  %v4747_v56 = vadd.f32 %v4746_v14, %v10944_v15  ;;  %v4171_v57 = vpop.f32.mrb[133].mxu1  ;;  %v4748_v51 = vpop.f32.mrb[69].mxu0  ;;  %v3567_v35 = vld [vmem:[%s12007_s8 + $0x2b0] sm:$0xff] }
 0x5c7   : > { %8208 = vpow2.f32 %v5103_v39  ;;  %v4172_v61 = vadd.f32 %v4171_v57, %v10948_v33  ;;  %v4173_v62 = vpop.f32.mrb[134].mxu1  ;;  %v4749_v55 = vpop.f32.mrb[70].mxu0 }
 0x5c8   : > { %8210 = vpow2.f32 %v5115_v27  ;;  %v4879_v46 = vsub.f32 0.0, %v4170_v22  ;;  %v4885_v17 = vsub.f32 0.0, %v4747_v56  ;;  %v4174_v40 = vadd.f32 %v4173_v62, %v10942_v10  ;;  %v4175_v49 = vpop.f32.mrb[135].mxu1  ;;  %v4751_v23 = vpop.f32.mrb[71].mxu0  ;;  %4530 = vmatpush1.bf16.msra.mxu1 %v8127_v50 }
 0x5c9   : > { %8212 = vpow2.f32 %v5105_v25  ;;  %v4880_v34 = vsub.f32 0.0, %v4172_v61  ;;  %v4750_v18 = vadd.f32 %v4749_v55, %v10944_v15  ;;  %4531 = vmatprep.subr.bf16.mxu1 %v8132_v7  ;;  %v4176_v27 = vadd.f32 %v4175_v49, %v10948_v33  ;;  %v8133_v25 = vld [vmem:[%s12007_s8 + $0x278] ss:$28 sps:$4 sm:$0xff]  }
 0x5ca   : > { %v5117_v24 = vmul.f32 1.442695, %v4879_v46  ;;  %v5129_v30 = vmul.f32 1.442695, %v4885_v17  ;;  %v4886_v20 = vsub.f32 0.0, %v4174_v40  ;;  %v7252_v22 = vcombine.high %v3567_v35, %v3567_v35 }
 0x5cb   : > { %v5119_v41 = vmul.f32 1.442695, %v4880_v34  ;;  %v4892_v39 = vsub.f32 0.0, %v4750_v18  ;;  %4401 = vmatmul.mubr.bf16.gmra.mrb[212].mxu1 %v10717_v26  ;;  %v7251_v56 = vcombine.low %v3567_v35, %v3567_v35  ;;  %v4887_v17 = vsub.f32 0.0, %v4176_v27 }
 0x5cc   : > { %8214 = vpow2.f32 %v5117_v24  ;;  %v5131_v50 = vmul.f32 1.442695, %v4886_v20  ;;  %7278 = vmatprep.mubr.msk.bf16.mxu1 %vm2392_vm2, %v10742_v53  ;;  %4532 = vmatpush1.bf16.msra.mxu1 %v8130_v11 }
 0x5cd   : > { %8216 = vpow2.f32 %v5129_v30  ;;  %v5143_v5 = vmul.f32 1.442695, %v4892_v39  ;;  %v4179_v14 = vpop.f32.mrb[136].mxu1  ;;  %v4754_v7 = vpop.f32.mrb[72].mxu0  ;;  %4533 = vmatprep.subr.bf16.mxu1 %v8135_v29  ;;  %v4117_v35 = vsel %vm2441_vm1, %v7251_v56, 0 }
 0x5ce   : > { %v8203_v57 = vpop.eup %8202  ;;  %8218 = vpow2.f32 %v5119_v41  ;;  %v4180_v51 = vadd.f32 %v4179_v14, %v10942_v10  ;;  %v4181_v61 = vpop.f32.mrb[137].mxu1  ;;  %v4755_v20 = vadd.f32 %v4754_v7, %v10944_v15  ;;  %v5133_v14 = vmul.f32 1.442695, %v4887_v17 }
 0x5cf   : > { %v4756_v62 = vpop.f32.mrb[73].mxu0  ;;  %v8205_v55 = vpop.eup %8204  ;;  %v5537_v46 = vadd.f32 1.0, %v8203_v57  ;;  %8220 = vpow2.f32 %v5131_v50  ;;  %v4182_v27 = vadd.f32 %v4181_v61, %v10948_v33 }
 0x5d0   : > { %v4183_v40 = vpop.f32.mrb[138].mxu1  ;;  %v4757_v49 = vpop.f32.mrb[74].mxu0  ;;  %v5543_v11 = vadd.f32 1.0, %v8205_v55  ;;  %8222 = vpow2.f32 %v5143_v5  ;;  %v4893_v34 = vsub.f32 0.0, %v4180_v51  ;;  %4534 = vmatpush1.bf16.msra.mxu1 %v8133_v25  ;;  %v4899_v56 = vsub.f32 0.0, %v4755_v20 }
 0x5d1   : > { %v8207_v23 = vpop.eup %8206  ;;  %v4185_v18 = vpop.f32.mrb[139].mxu1  ;;  %8224 = vrcp.f32 %v5537_v46  ;;  %7288 = vmatprep.subr.msk.bf16.mxu1 %vm2441_vm1, %v7252_v22  ;;  %v4184_v25 = vadd.f32 %v4183_v40, %v10942_v10  ;;  %v4758_v22 = vadd.f32 %v4757_v49, %v10944_v15  ;;  %v4894_v46 = vsub.f32 0.0, %v4182_v27 }
 0x5d2   : > { %v4759_v29 = vpop.f32.mrb[75].mxu0  ;;  %v8209_v24 = vpop.eup %8208  ;;  %v5538_v30 = vadd.f32 1.0, %v8207_v23  ;;  %8226 = vrcp.f32 %v5543_v11  ;;  %v5145_v7 = vmul.f32 1.442695, %v4893_v34  ;;  %v4186_v51 = vadd.f32 %v4185_v18, %v10948_v33 }
 0x5d3   : > { %v8211_v41 = vpop.eup %8210  ;;  %v5544_v39 = vadd.f32 1.0, %v8209_v24  ;;  %4411 = vmatmul.mubr.bf16.gmra.mrb[216].mxu1 %v10740_v28  ;;  %v4900_v18 = vsub.f32 0.0, %v4184_v25  ;;  %v4906_v20 = vsub.f32 0.0, %v4758_v22  ;;  %v5157_v27 = vmul.f32 1.442695, %v4899_v56 }
 0x5d4   : > { %v8213_v50 = vpop.eup %8212  ;;  %8228 = vrcp.f32 %v5538_v30  ;;  %v5550_v5 = vadd.f32 1.0, %v8211_v41  ;;  %7279 = vmatprep.mubr.msk.bf16.mxu1 %vm2392_vm2, %v10761_v45  ;;  %4536 = vmatpush1.bf16.msra.mxu1 %v4117_v35 }
 0x5d5   : > { %8230 = vrcp.f32 %v5544_v39  ;;  %v5545_v57 = vadd.f32 1.0, %v8213_v50  ;;  %v4189_v61 = vpop.f32.mrb[140].mxu1  ;;  %v4762_v62 = vpop.f32.mrb[76].mxu0  ;;  %v4901_v50 = vsub.f32 0.0, %v4186_v51  ;;  %v5159_v22 = vmul.f32 1.442695, %v4900_v18 }
 0x5d6   : > { %8232 = vrcp.f32 %v5550_v5  ;;  %v8215_v55 = vpop.eup %8214  ;;  %v4191_v17 = vpop.f32.mrb[141].mxu1  ;;  %v4190_v49 = vadd.f32 %v4189_v61, %v10942_v10  ;;  %v4763_v61 = vadd.f32 %v4762_v62, %v10944_v15  ;;  %v5171_v56 = vmul.f32 1.442695, %v4906_v20 }
 0x5d7   : > { %8234 = vrcp.f32 %v5545_v57  ;;  %v4764_v40 = vpop.f32.mrb[77].mxu0  ;;  %v8217_v23 = vpop.eup %8216  ;;  %v5551_v11 = vadd.f32 1.0, %v8215_v55  ;;  %v5147_v55 = vmul.f32 1.442695, %v4894_v46  ;;  %v4192_v25 = vadd.f32 %v4191_v17, %v10948_v33 }
 0x5d8   : > { %8236 = vpow2.f32 %v5133_v14  ;;  %v4193_v34 = vpop.f32.mrb[142].mxu1  ;;  %v4765_v29 = vpop.f32.mrb[78].mxu0  ;;  %v5557_v30 = vadd.f32 1.0, %v8217_v23  ;;  %v4907_v23 = vsub.f32 0.0, %v4190_v49  ;;  %v5161_v17 = vmul.f32 1.442695, %v4901_v50 }
 0x5d9   : > { %v8219_v24 = vpop.eup %8218  ;;  %8238 = vpow2.f32 %v5145_v7  ;;  %v4195_v35 = vpop.f32.mrb[143].mxu1  ;;  %v4194_v51 = vadd.f32 %v4193_v34, %v10942_v10  ;;  %v4913_v18 = vsub.f32 0.0, %v4763_v61  ;;  %v4908_v50 = vsub.f32 0.0, %v4192_v25 }
 0x5da   : > { %v8221_v41 = vpop.eup %8220  ;;  %8240 = vrcp.f32 %v5551_v11  ;;  %v5552_v39 = vadd.f32 1.0, %v8219_v24  ;;  %v4767_v5 = vpop.f32.mrb[79].mxu0  ;;  %v4766_v11 = vadd.f32 %v4765_v29, %v10944_v15  ;;  %v4196_v20 = vadd.f32 %v4195_v35, %v10948_v33 }
 0x5db   : > { %v8223_v57 = vpop.eup %8222  ;;  %8242 = vrcp.f32 %v5557_v30  ;;  %v5558_v14 = vadd.f32 1.0, %v8221_v41  ;;  %4421 = vmatmul.mubr.bf16.gmra.mrb[220].mxu1 %v10759_v32  ;;  %v4914_v35 = vsub.f32 0.0, %v4194_v51 }
 0x5dc   : > { %v8225_v40 = vpop.eup %8224  ;;  %8244 = vrcp.f32 %v5552_v39  ;;  %v5564_v4 = vadd.f32 1.0, %v8223_v57  ;;  %7280 = vmatprep.mubr.msk.bf16.mxu1 %vm2392_vm2, %v10778_v31 }
 0x5dd   : > { %v8227_v7 = vpop.eup %8226  ;;  %8246 = vrcp.f32 %v5558_v14  ;;  %v4199_v49 = vpop.f32.mrb[144].mxu1 }
 0x5de   : > { %v8229_v62 = vpop.eup %8228  ;;  %v7454_v46 = vpack.c.bf16 %v8227_v7, %v8227_v7  ;;  %8248 = vrcp.f32 %v5564_v4  ;;  %v4770_v24 = vpop.f32.mrb[80].mxu0  ;;  %v5173_v4 = vmul.f32 1.442695, %v4907_v23 }
 0x5df   : > { %v8231_v30 = vpop.eup %8230  ;;  %v7451_v41 = vpack.c.bf16 %v8229_v62, %v8225_v40  ;;  %8250 = vpow2.f32 %v5157_v27  ;;  %v11026_v34 = vpop.f32.mrb[145].mxu1 }
 0x5e0   : > { %v4772_v39 = vpop.f32.mrb[81].mxu0  ;;  %v8233_v5 = vpop.eup %8232  ;;  %6758 = vst.msk [vmem:[%s11019_s14 + $0x18] sm:$0xf] %vm6757_vm6, %v7454_v46  ;;  %8252 = vpow2.f32 %v5147_v55  ;;  %v4920_v55 = vsub.f32 0.0, %v4766_v11  ;;  %v5185_v46 = vmul.f32 1.442695, %v4913_v18 }
 0x5e1   : > { %v11030_v29 = vpop.f32.mrb[146].mxu1  ;;  %v11032_v57 = vpop.f32.mrb[82].mxu0  ;;  %6754 = vst [vmem:[%s11019_s14] sm:$0xff] %v7451_v41  ;;  %v7458_v27 = vpack.c.bf16 %v8233_v5, %v8233_v5  ;;  %8254 = vpow2.f32 %v5159_v22  ;;  %v4915_v39 = vsub.f32 0.0, %v4196_v20  ;;  %v5175_v22 = vmul.f32 1.442695, %v4908_v50 }
 0x5e2   : > { %v8235_v14 = vpop.eup %8234  ;;  %v11035_v61 = vpop.f32.mrb[147].mxu1  ;;  %8256 = vpow2.f32 %v5171_v56  ;;  %v5187_v5 = vmul.f32 1.442695, %v4914_v35 }
 0x5e3   : > { %v4775_v40 = vpop.f32.mrb[83].mxu0  ;;  %v8237_v7 = vpop.eup %8236  ;;  %v7455_v62 = vpack.c.bf16 %v8235_v14, %v8231_v30  ;;  %6762 = vst.msk [vmem:[%s11019_s14 + $0x34] sm:$0xf] %vm6757_vm6, %v7458_v27  ;;  %8258 = vpow2.f32 %v5161_v17  ;;  %4431 = vmatmul.mubr.bf16.gmra.mrb[224].mxu1 %v10776_v48  ;;  %v5199_v17 = vmul.f32 1.442695, %v4920_v55  ;;  %v4200_v30 = vadd.f32 %v4199_v49, %v10942_v10 }
 0x5e4   : > { %v8239_v23 = vpop.eup %8238  ;;  %v5559_v25 = vadd.f32 1.0, %v8237_v7  ;;  %8260 = vpow2.f32 %v5173_v4  ;;  %7281 = vmatprep.mubr.msk.bf16.mxu1 %vm2392_vm2, %v10792_v21  ;;  %v5189_v14 = vmul.f32 1.442695, %v4915_v39  ;;  %v4771_v27 = vadd.f32 %v4770_v24, %v10944_v15 }
 0x5e5   : > { %v8241_v31 = vpop.eup %8240  ;;  %6759 = vst [vmem:[%s11019_s14 + $0x1c] sm:$0xff] %v7455_v62  ;;  %v5565_v41 = vadd.f32 1.0, %v8239_v23  ;;  %v4209_v18 = vpop.f32.mrb[148].mxu1  ;;  %v4921_v39 = vsub.f32 0.0, %v4200_v30 }
 0x5e6   : > { %v8243_v51 = vpop.eup %8242  ;;  %8262 = vrcp.f32 %v5559_v25  ;;  %v11044_v20 = vpop.f32.mrb[84].mxu0 }
 0x5e7   : > { %v8245_v56 = vpop.eup %8244  ;;  %v7462_v11 = vpack.c.bf16 %v8243_v51, %v8243_v51  ;;  %8264 = vrcp.f32 %v5565_v41  ;;  %v11049_v35 = vpop.f32.mrb[149].mxu1  ;;  %v4202_v41 = vadd.f32 %v11026_v34, %v10948_v33 }
 0x5e8   : > { %v11046_v4 = vpop.eup %8246  ;;  %v7459_v50 = vpack.c.bf16 %v8245_v56, %v8241_v31  ;;  %8266 = vpow2.f32 %v5185_v46  ;;  %v4780_v40 = vpop.f32.mrb[85].mxu0  ;;  %v4927_v56 = vsub.f32 0.0, %v4771_v27 }
 0x5e9   : > { %v8249_v7 = vpop.eup %8248  ;;  %6766 = vst.msk [vmem:[%s11019_s14 + $0x50] sm:$0xf] %vm6757_vm6, %v7462_v11  ;;  %8268 = vpow2.f32 %v5175_v22  ;;  %v11053_v49 = vpop.f32.mrb[150].mxu1 }
 0x5ea   : > { %v11055_v62 = vpop.f32.mrb[86].mxu0  ;;  %v8251_v55 = vpop.eup %8250  ;;  %6763 = vst [vmem:[%s11019_s14 + $0x38] sm:$0xff] %v7459_v50  ;;  %v7466_v23 = vpack.c.bf16 %v8249_v7, %v8249_v7  ;;  %8270 = vpow2.f32 %v5187_v5  ;;  %v4204_v5 = vadd.f32 %v11030_v29, %v10942_v10  ;;  %v5201_v7 = vmul.f32 1.442695, %v4921_v39 }
 0x5eb   : > { %v11058_v31 = vpop.f32.mrb[151].mxu1  ;;  %v4783_v25 = vpop.f32.mrb[87].mxu0  ;;  %v5571_v46 = vadd.f32 1.0, %v8251_v55  ;;  %8272 = vpow2.f32 %v5199_v17  ;;  %4441 = vmatmul.mubr.bf16.gmra.mrb[228].mxu1 %v10790_v19 }
 0x5ec   : > { %v8253_v24 = vpop.eup %8252  ;;  %6770 = vst.msk [vmem:[%s11019_s14 + $0x6c] sm:$0xf] %vm6757_vm6, %v7466_v23  ;;  %8274 = vpow2.f32 %v5189_v14  ;;  %7282 = vmatprep.mubr.msk.bf16.mxu1 %vm2392_vm2, %v10806_v9  ;;  %v4922_v14 = vsub.f32 0.0, %v4202_v41  ;;  %v5213_v25 = vmul.f32 1.442695, %v4927_v56  ;;  %v4928_v41 = vsub.f32 0.0, %v4204_v5 }
 0x5ed   : > { %v8255_v51 = vpop.eup %8254  ;;  %v5566_v22 = vadd.f32 1.0, %v8253_v24  ;;  %8276 = vrcp.f32 %v5571_v46  ;;  %v11069_v27 = vpop.f32.mrb[152].mxu1  ;;  %v4774_v24 = vadd.f32 %v11032_v57, %v10944_v15  ;;  %v4210_v57 = vadd.f32 %v4209_v18, %v10942_v10 }
 0x5ee   : > { %v8257_v11 = vpop.eup %8256  ;;  %v5572_v50 = vadd.f32 1.0, %v8255_v51  ;;  %v11071_v55 = vpop.f32.mrb[88].mxu0  ;;  %v5215_v21 = vmul.f32 1.442695, %v4928_v41 }
 0x5ef   : > { %v8259_v40 = vpop.eup %8258  ;;  %8278 = vrcp.f32 %v5566_v22  ;;  %v5578_v17 = vadd.f32 1.0, %v8257_v11  ;;  %v11075_v46 = vpop.f32.mrb[153].mxu1  ;;  %v4206_v11 = vadd.f32 %v11035_v61, %v10948_v33 }
 0x5f0   : > { %v8261_v34 = vpop.eup %8260  ;;  %8280 = vrcp.f32 %v5572_v50  ;;  %v5573_v30 = vadd.f32 1.0, %v8259_v40  ;;  %v4788_v51 = vpop.f32.mrb[89].mxu0 }
 0x5f1   : > { %v8263_v23 = vpop.eup %8262  ;;  %8282 = vrcp.f32 %v5578_v17  ;;  %v5579_v29 = vadd.f32 1.0, %v8261_v34  ;;  %v11082_v50 = vpop.f32.mrb[154].mxu1  ;;  %v4929_v18 = vsub.f32 0.0, %v4206_v11 }
 0x5f2   : > { %v11077_v22 = vpop.eup %8264  ;;  %v7463_v39 = vpack.c.bf16 %v8263_v23, %v11046_v4  ;;  %8284 = vrcp.f32 %v5573_v30  ;;  %v11084_v40 = vpop.f32.mrb[90].mxu0  ;;  %v4779_v4 = vadd.f32 %v11044_v20, %v10944_v15  ;;  %v5203_v30 = vmul.f32 1.442695, %v4922_v14 }
 0x5f3   : > { %v8267_v56 = vpop.eup %8266  ;;  %8286 = vrcp.f32 %v5579_v29  ;;  %v11087_v17 = vpop.f32.mrb[155].mxu1  ;;  %v4934_v23 = vsub.f32 0.0, %v4774_v24  ;;  %4451 = vmatmul.mubr.bf16.gmra.mrb[232].mxu1 %v10804_v16 }
 0x5f4   : > { %v4791_v34 = vpop.f32.mrb[91].mxu0  ;;  %v8269_v51 = vpop.eup %8268  ;;  %6767 = vst [vmem:[%s11019_s14 + $0x54] sm:$0xff] %v7463_v39  ;;  %v5585_v9 = vadd.f32 1.0, %v8267_v56  ;;  %8288 = vpow2.f32 %v5201_v7  ;;  %v4935_v56 = vsub.f32 0.0, %v4210_v57  ;;  %v4212_v7 = vadd.f32 %v11049_v35, %v10948_v33  ;;  %7283 = vmatprep.mubr.msk.bf16.mxu1 %vm2392_vm2, %v10820_v8 }
 0x5f5   : > { %v8271_v5 = vpop.eup %8270  ;;  %v5580_v61 = vadd.f32 1.0, %v8269_v51  ;;  %8290 = vpow2.f32 %v5213_v25  ;;  %v4941_v25 = vsub.f32 0.0, %v4779_v4  ;;  %v11099_v24 = vpop.f32.mrb[156].mxu1  ;;  %v5227_v57 = vmul.f32 1.442695, %v4934_v23 }
 0x5f6   : > { %v8273_v19 = vpop.eup %8272  ;;  %8292 = vrcp.f32 %v5585_v9  ;;  %v5586_v29 = vadd.f32 1.0, %v8271_v5  ;;  %v4214_v9 = vadd.f32 %v11053_v49, %v10942_v10  ;;  %v11101_v41 = vpop.f32.mrb[92].mxu0  ;;  %v4782_v35 = vadd.f32 %v11055_v62, %v10944_v15 }
 0x5f7   : > { %v8275_v34 = vpop.eup %8274  ;;  %8294 = vrcp.f32 %v5580_v61  ;;  %v5592_v39 = vadd.f32 1.0, %v8273_v19  ;;  %v11105_v51 = vpop.f32.mrb[157].mxu1  ;;  %v5217_v49 = vmul.f32 1.442695, %v4929_v18  ;;  %v5229_v62 = vmul.f32 1.442695, %v4935_v56 }
 0x5f8   : > { %v8277_v20 = vpop.eup %8276  ;;  %8296 = vrcp.f32 %v5586_v29  ;;  %v5587_v14 = vadd.f32 1.0, %v8275_v34  ;;  %v4796_v5 = vpop.f32.mrb[93].mxu0  ;;  %v4216_v29 = vadd.f32 %v11058_v31, %v10948_v33  ;;  %v4942_v8 = vsub.f32 0.0, %v4214_v9 }
 0x5f9   : > { %v8279_v19 = vpop.eup %8278  ;;  %v7470_v11 = vpack.c.bf16 %v8277_v20, %v8277_v20  ;;  %8298 = vrcp.f32 %v5592_v39  ;;  %v11110_v34 = vpop.f32.mrb[158].mxu1  ;;  %v4936_v39 = vsub.f32 0.0, %v4212_v7  ;;  %v4220_v5 = vadd.f32 %v11069_v27, %v10942_v10 }
 0x5fa   : > { %v8281_v61 = vpop.eup %8280  ;;  %v7467_v4 = vpack.c.bf16 %v8279_v19, %v11077_v22  ;;  %8300 = vrcp.f32 %v5587_v14  ;;  %v11112_v20 = vpop.f32.mrb[94].mxu0  ;;  %v5241_v19 = vmul.f32 1.442695, %v4941_v25  ;;  %v4943_v7 = vsub.f32 0.0, %v4216_v29 }
 0x5fb   : > { %v8283_v23 = vpop.eup %8282  ;;  %6774 = vst.msk [vmem:[%s11019_s14 + $0x88] sm:$0xf] %vm6757_vm6, %v7470_v11  ;;  %8302 = vpow2.f32 %v5203_v30  ;;  %v11118_v22 = vpop.f32.mrb[159].mxu1  ;;  %v4948_v30 = vsub.f32 0.0, %v4782_v35  ;;  %4461 = vmatmul.mubr.bf16.gmra.mrb[236].mxu1 %v10818_v37  ;;  %v5243_v9 = vmul.f32 1.442695, %v4942_v8 }
 0x5fc   : > { %v4799_v18 = vpop.f32.mrb[95].mxu0  ;;  %v8285_v14 = vpop.eup %8284  ;;  %6771 = vst [vmem:[%s11019_s14 + $0x70] sm:$0xff] %v7467_v4  ;;  %v7474_v31 = vpack.c.bf16 %v8283_v23, %v8283_v23  ;;  %8304 = vpow2.f32 %v5215_v21  ;;  %v5231_v4 = vmul.f32 1.442695, %v4936_v39  ;;  %v4949_v23 = vsub.f32 0.0, %v4220_v5  ;;  %7284 = vmatprep.mubr.msk.bf16.mxu1 %vm2392_vm2, %v10834_v58 }
 0x5fd   : > { %v8287_v16 = vpop.eup %8286  ;;  %v7471_v48 = vpack.c.bf16 %v8285_v14, %v8281_v61  ;;  %8306 = vpow2.f32 %v5227_v57  ;;  %v5255_v61 = vmul.f32 1.442695, %v4948_v30  ;;  %v4222_v39 = vadd.f32 %v11075_v46, %v10948_v33 }
 0x5fe   : > { %v8289_v56 = vpop.eup %8288  ;;  %6778 = vst.msk [vmem:[%s11019_s14 + $0xa4] sm:$0xf] %vm6757_vm6, %v7474_v31  ;;  %8308 = vpow2.f32 %v5217_v49  ;;  %v5257_v8 = vmul.f32 1.442695, %v4949_v23  ;;  %v4790_v23 = vadd.f32 %v11084_v40, %v10944_v15  ;;  %v4230_v40 = vadd.f32 %v11099_v24, %v10942_v10 }
 0x5ff   : > { %v8291_v27 = vpop.eup %8290  ;;  %6775 = vst [vmem:[%s11019_s14 + $0x8c] sm:$0xff] %v7471_v48  ;;  %v5593_v11 = vadd.f32 1.0, %v8289_v56  ;;  %8310 = vpow2.f32 %v5229_v62  ;;  %v4787_v48 = vadd.f32 %v11071_v55, %v10944_v15  ;;  %v5245_v62 = vmul.f32 1.442695, %v4943_v7 }
 0x600   : > { %v8293_v21 = vpop.eup %8292  ;;  %v5599_v25 = vadd.f32 1.0, %v8291_v27  ;;  %8312 = vpow2.f32 %v5241_v19  ;;  %v4950_v46 = vsub.f32 0.0, %v4222_v39  ;;  %v4224_v27 = vadd.f32 %v11082_v50, %v10942_v10 }
 0x601   : > { %v8295_v57 = vpop.eup %8294  ;;  %v7478_v35 = vpack.c.bf16 %v8293_v21, %v8293_v21  ;;  %8314 = vrcp.f32 %v5593_v11  ;;  %v4955_v30 = vsub.f32 0.0, %v4787_v48  ;;  %v4962_v39 = vsub.f32 0.0, %v4790_v23 }
 0x602   : > { %v8297_v49 = vpop.eup %8296  ;;  %v7475_v29 = vpack.c.bf16 %v8295_v57, %v8287_v16  ;;  %8316 = vrcp.f32 %v5599_v25 }
 0x603   : > { %v8299_v5 = vpop.eup %8298  ;;  %6782 = vst.msk [vmem:[%s11019_s14 + $0xc0] sm:$0xf] %vm6757_vm6, %v7478_v35  ;;  %8318 = vpow2.f32 %v5231_v4  ;;  %4471 = vmatmul.mubr.bf16.gmra.mrb[240].mxu1 %v10832_v42  ;;  %v5269_v35 = vmul.f32 1.442695, %v4955_v30 }
 0x604   : > { %v8301_v18 = vpop.eup %8300  ;;  %6779 = vst [vmem:[%s11019_s14 + $0xa8] sm:$0xff] %v7475_v29  ;;  %v7482_v14 = vpack.c.bf16 %v8299_v5, %v8299_v5  ;;  %8320 = vpow2.f32 %v5243_v9  ;;  %7285 = vmatprep.mubr.msk.bf16.mxu1 %vm2392_vm2, %v10848_v6  ;;  %v4226_v29 = vadd.f32 %v11087_v17, %v10948_v33 }
 0x605   : > { %v8303_v31 = vpop.eup %8302  ;;  %v7479_v55 = vpack.c.bf16 %v8301_v18, %v8297_v49  ;;  %8322 = vpow2.f32 %v5255_v61  ;;  %v5259_v61 = vmul.f32 1.442695, %v4950_v46  ;;  %v4956_v49 = vsub.f32 0.0, %v4224_v27 }
 0x606   : > { %v8305_v16 = vpop.eup %8304  ;;  %6786 = vst.msk [vmem:[%s11019_s14 + $0xdc] sm:$0xf] %vm6757_vm6, %v7482_v14  ;;  %v5594_v19 = vadd.f32 1.0, %v8303_v31  ;;  %8324 = vpow2.f32 %v5245_v62  ;;  %v4795_v18 = vadd.f32 %v11101_v41, %v10944_v15  ;;  %v5283_v46 = vmul.f32 1.442695, %v4962_v39 }
 0x607   : > { %v8307_v56 = vpop.eup %8306  ;;  %6783 = vst [vmem:[%s11019_s14 + $0xc4] sm:$0xff] %v7479_v55  ;;  %v5600_v7 = vadd.f32 1.0, %v8305_v16  ;;  %8326 = vpow2.f32 %v5257_v8  ;;  %v4232_v55 = vadd.f32 %v11105_v51, %v10948_v33  ;;  %v5271_v24 = vmul.f32 1.442695, %v4956_v49 }
 0x608   : > { %v8309_v11 = vpop.eup %8308  ;;  %8328 = vrcp.f32 %v5594_v19  ;;  %v5606_v4 = vadd.f32 1.0, %v8307_v56  ;;  %v4957_v19 = vsub.f32 0.0, %v4226_v29  ;;  %v4963_v56 = vsub.f32 0.0, %v4230_v40 }
 0x609   : > { %v8311_v21 = vpop.eup %8310  ;;  %8330 = vrcp.f32 %v5600_v7  ;;  %v5601_v25 = vadd.f32 1.0, %v8309_v11  ;;  %v4969_v27 = vsub.f32 0.0, %v4795_v18  ;;  %v4234_v11 = vadd.f32 %v11110_v34, %v10942_v10 }
 0x60a   : > { %v8313_v9 = vpop.eup %8312  ;;  %8332 = vrcp.f32 %v5606_v4  ;;  %v5607_v57 = vadd.f32 1.0, %v8311_v21  ;;  %v4964_v21 = vsub.f32 0.0, %v4232_v55  ;;  %v5285_v49 = vmul.f32 1.442695, %v4963_v56 }
 0x60b   : > { %v8315_v48 = vpop.eup %8314  ;;  %8334 = vrcp.f32 %v5601_v25  ;;  %v5613_v50 = vadd.f32 1.0, %v8313_v9  ;;  %4481 = vmatmul.mubr.bf16.gmra.mrb[244].mxu1 %v10846_v60  ;;  %v4798_v25 = vadd.f32 %v11112_v20, %v10944_v15  ;;  %v4970_v39 = vsub.f32 0.0, %v4234_v11 }
 0x60c   : > { %v8317_v62 = vpop.eup %8316  ;;  %8336 = vrcp.f32 %v5607_v57  ;;  %7286 = vmatprep.mubr.msk.bf16.mxu1 %vm2392_vm2, %v10862_v47 }
 0x60d   : > { %v8319_v5 = vpop.eup %8318  ;;  %v7486_v8 = vpack.c.bf16 %v8317_v62, %v8317_v62  ;;  %8338 = vrcp.f32 %v5613_v50  ;;  %v5297_v62 = vmul.f32 1.442695, %v4969_v27 }
 0x60e   : > { %v8321_v14 = vpop.eup %8320  ;;  %v5608_v31 = vadd.f32 1.0, %v8319_v5  ;;  %8340 = vpow2.f32 %v5269_v35  ;;  %v5273_v35 = vmul.f32 1.442695, %v4957_v19  ;;  %v4976_v5 = vsub.f32 0.0, %v4798_v25 }
 0x60f   : > { %v8323_v17 = vpop.eup %8322  ;;  %6790 = vst.msk [vmem:[%s11019_s14 + $0xf8] sm:$0xf] %vm6757_vm6, %v7486_v8  ;;  %v5614_v16 = vadd.f32 1.0, %v8321_v14  ;;  %8342 = vpow2.f32 %v5259_v61  ;;  %v4236_v61 = vadd.f32 %v11118_v22, %v10948_v33 }
 0x610   : > { %v8325_v30 = vpop.eup %8324  ;;  %8344 = vrcp.f32 %v5608_v31  ;;  %v5620_v41 = vadd.f32 1.0, %v8323_v17  ;;  %v5299_v17 = vmul.f32 1.442695, %v4970_v39  ;;  %v5311_v19 = vmul.f32 1.442695, %v4976_v5 }
 0x611   : > { %v8327_v7 = vpop.eup %8326  ;;  %8346 = vrcp.f32 %v5614_v16  ;;  %v5615_v51 = vadd.f32 1.0, %v8325_v30  ;;  %v4971_v8 = vsub.f32 0.0, %v4236_v61 }
 0x612   : > { %v8329_v4 = vpop.eup %8328  ;;  %8348 = vrcp.f32 %v5620_v41  ;;  %v5621_v23 = vadd.f32 1.0, %v8327_v7 }
 0x613   : > { %v8331_v9 = vpop.eup %8330  ;;  %v7483_v57 = vpack.c.bf16 %v8329_v4, %v8315_v48  ;;  %8350 = vrcp.f32 %v5615_v51  ;;  %v5287_v48 = vmul.f32 1.442695, %v4964_v21  ;;  %4491 = vmatmul.mubr.bf16.gmra.mrb[248].mxu1 %v10860_v38 }
 0x614   : > { %v8333_v50 = vpop.eup %8332  ;;  %8352 = vrcp.f32 %v5621_v23  ;;  %7287 = vmatprep.mubr.msk.bf16.mxu1 %vm2392_vm2, %v10876_v13 }
 0x615   : > { %v8335_v29 = vpop.eup %8334  ;;  %6787 = vst [vmem:[%s11019_s14 + $0xe0] sm:$0xff] %v7483_v57  ;;  %v7490_v34 = vpack.c.bf16 %v8333_v50, %v8333_v50  ;;  %8354 = vpow2.f32 %v5271_v24 }
 0x616   : > { %v8337_v40 = vpop.eup %8336  ;;  %v7487_v20 = vpack.c.bf16 %v8335_v29, %v8331_v9  ;;  %8356 = vpow2.f32 %v5283_v46  ;;  %v5301_v46 = vmul.f32 1.442695, %v4971_v8 }
 0x617   : > { %v8339_v22 = vpop.eup %8338  ;;  %6794 = vst.msk [vmem:[%s11019_s14 + $0x114] sm:$0xf] %vm6757_vm6, %v7490_v34  ;;  %8358 = vpow2.f32 %v5273_v35 }
 0x618   : > { %v8341_v18 = vpop.eup %8340  ;;  %6791 = vst [vmem:[%s11019_s14 + $0xfc] sm:$0xff] %v7487_v20  ;;  %v7494_v14 = vpack.c.bf16 %v8339_v22, %v8339_v22  ;;  %8360 = vpow2.f32 %v5285_v49 }
 0x619   : > { %v8343_v31 = vpop.eup %8342  ;;  %v5627_v55 = vadd.f32 1.0, %v8341_v18  ;;  %8362 = vpow2.f32 %v5297_v62 }
 0x61a   : > { %v8345_v16 = vpop.eup %8344  ;;  %6798 = vst.msk [vmem:[%s11019_s14 + $0x130] sm:$0xf] %vm6757_vm6, %v7494_v14  ;;  %v5622_v24 = vadd.f32 1.0, %v8343_v31  ;;  %8364 = vpow2.f32 %v5287_v48 }
 0x61b   : > { %v8347_v30 = vpop.eup %8346  ;;  %v7491_v41 = vpack.c.bf16 %v8345_v16, %v8337_v40  ;;  %8366 = vrcp.f32 %v5627_v55  ;;  %4501 = vmatmul.mubr.bf16.gmra.mrb[252].mxu1 %v10874_v0 }
 0x61c   : > { %v8349_v56 = vpop.eup %8348  ;;  %8368 = vrcp.f32 %v5622_v24  ;;  %7289 = vmatprep.mubr.msk.bf16.mxu1 %vm2392_vm2, %v10589_v52 }
 0x61d   : > { %v8351_v7 = vpop.eup %8350  ;;  %6795 = vst [vmem:[%s11019_s14 + $0x118] sm:$0xff] %v7491_v41  ;;  %v7498_v51 = vpack.c.bf16 %v8349_v56, %v8349_v56  ;;  %8370 = vpow2.f32 %v5299_v17 }
 0x61e   : > { %v8353_v27 = vpop.eup %8352  ;;  %v7495_v11 = vpack.c.bf16 %v8351_v7, %v8347_v30  ;;  %8372 = vpow2.f32 %v5311_v19 }
 0x61f   : > { %v8355_v4 = vpop.eup %8354  ;;  %6802 = vst.msk [vmem:[%s11019_s14 + $0x14c] sm:$0xf] %vm6757_vm6, %v7498_v51  ;;  %8374 = vpow2.f32 %v5301_v46 }
 0x620   : > { %v8357_v23 = vpop.eup %8356  ;;  %6799 = vst [vmem:[%s11019_s14 + $0x134] sm:$0xff] %v7495_v11  ;;  %v5628_v21 = vadd.f32 1.0, %v8355_v4 }
 0x621   : > { %v8359_v25 = vpop.eup %8358  ;;  %v5634_v9 = vadd.f32 1.0, %v8357_v23 }
 0x622   : > { %v8361_v57 = vpop.eup %8360  ;;  %8376 = vrcp.f32 %v5628_v21  ;;  %v5629_v35 = vadd.f32 1.0, %v8359_v25 }
 0x623   : > { %v8363_v61 = vpop.eup %8362  ;;  %8378 = vrcp.f32 %v5634_v9  ;;  %v5635_v50 = vadd.f32 1.0, %v8361_v57  ;;  %4544 = vmatmul.mubr.bf16.vlgmr.msra.gmra.mrb[0].mxu1 %v10587_v44 }
 0x624   : > { %v8365_v49 = vpop.eup %8364  ;;  %8380 = vrcp.f32 %v5629_v35  ;;  %v5641_v29 = vadd.f32 1.0, %v8363_v61  ;;  %7290 = vmatprep.mubr.msk.bf16.mxu1 %vm2392_vm2, %v10615_v2 }
 0x625   : > { %v8367_v34 = vpop.eup %8366  ;;  %8382 = vrcp.f32 %v5635_v50  ;;  %v5636_v62 = vadd.f32 1.0, %v8365_v49 }
 0x626   : > { %v8369_v52 = vpop.eup %8368  ;;  %v7502_v39 = vpack.c.bf16 %v8367_v34, %v8367_v34  ;;  %8384 = vrcp.f32 %v5641_v29 }
 0x627   : > { %v8371_v40 = vpop.eup %8370  ;;  %v7499_v20 = vpack.c.bf16 %v8369_v52, %v8353_v27  ;;  %8386 = vrcp.f32 %v5636_v62 }
 0x628   : > { %v8373_v48 = vpop.eup %8372  ;;  %6806 = vst.msk [vmem:[%s11019_s14 + $0x168] sm:$0xf] %vm6757_vm6, %v7502_v39  ;;  %v5642_v5 = vadd.f32 1.0, %v8371_v40 }
 0x629   : > { %v8375_v22 = vpop.eup %8374  ;;  %6803 = vst [vmem:[%s11019_s14 + $0x150] sm:$0xff] %v7499_v20  ;;  %v5648_v8 = vadd.f32 1.0, %v8373_v48 }
 0x62a   : > { %8388 = vrcp.f32 %v5642_v5  ;;  %v5643_v18 = vadd.f32 1.0, %v8375_v22 }
 0x62b   : > { %8390 = vrcp.f32 %v5648_v8  ;;  %4554 = vmatmul.mubr.bf16.gmra.mrb[4].mxu1 %v10613_v63 }
 0x62c   : > { %v8377_v44 = vpop.eup %8376  ;;  %8392 = vrcp.f32 %v5643_v18  ;;  %7291 = vmatprep.mubr.msk.bf16.mxu1 %vm2392_vm2, %v10641_v54 }
 0x62d   : > { %v8379_v14 = vpop.eup %8378 }
 0x62e   : > { %v8381_v31 = vpop.eup %8380  ;;  %v7506_v55 = vpack.c.bf16 %v8379_v14, %v8379_v14 }
 0x62f   : > { %v8383_v2 = vpop.eup %8382  ;;  %v7503_v17 = vpack.c.bf16 %v8381_v31, %v8377_v44 }
 0x630   : > { %v8385_v16 = vpop.eup %8384  ;;  %6810 = vst.msk [vmem:[%s11019_s14 + $0x184] sm:$0xf] %vm6757_vm6, %v7506_v55 }
 0x631   : > { %v8387_v24 = vpop.eup %8386  ;;  %6807 = vst [vmem:[%s11019_s14 + $0x16c] sm:$0xff] %v7503_v17  ;;  %v7510_v19 = vpack.c.bf16 %v8385_v16, %v8385_v16 }
 0x632   : > { %v7507_v30 = vpack.c.bf16 %v8387_v24, %v8383_v2 }
 0x633   : > { %6814 = vst.msk [vmem:[%s11019_s14 + $0x1a0] sm:$0xf] %vm6757_vm6, %v7510_v19  ;;  %4564 = vmatmul.mubr.bf16.gmra.mrb[8].mxu1 %v10639_v43 }
 0x634   : > { %v8389_v41 = vpop.eup %8388  ;;  %6811 = vst [vmem:[%s11019_s14 + $0x188] sm:$0xff] %v7507_v30  ;;  %7292 = vmatprep.mubr.msk.bf16.mxu1 %vm2392_vm2, %v10667_v12 }
 0x635   : > { %v8391_v46 = vpop.eup %8390 }
 0x636   : > { %v8393_v63 = vpop.eup %8392  ;;  %v7514_v56 = vpack.c.bf16 %v8391_v46, %v8391_v46  ;;  %v4239_v54 = vpop.f32.mrb[160].mxu1 }
 0x637   : > { %v7511_v7 = vpack.c.bf16 %v8393_v63, %v8389_v41  ;;  %v4802_v51 = vpop.f32.mrb[96].mxu0  ;;  %v4240_v27 = vadd.f32 %v4239_v54, %v10942_v10  ;;  %v4241_v4 = vpop.f32.mrb[161].mxu1 }
 0x638   : > { %6818 = vst.msk [vmem:[%s11019_s14 + $0x1bc] sm:$0xf] %vm6757_vm6, %v7514_v56  ;;  %v4803_v11 = vadd.f32 %v4802_v51, %v10944_v15  ;;  %v4804_v23 = vpop.f32.mrb[97].mxu0  ;;  %v4242_v21 = vadd.f32 %v4241_v4, %v10948_v33  ;;  %v4243_v25 = vpop.f32.mrb[162].mxu1 }
 0x639   : > { %6815 = vst [vmem:[%s11019_s14 + $0x1a4] sm:$0xff] %v7511_v7  ;;  %v4805_v9 = vpop.f32.mrb[98].mxu0  ;;  %v4977_v43 = vsub.f32 0.0, %v4240_v27  ;;  %v4244_v35 = vadd.f32 %v4243_v25, %v10942_v10  ;;  %v4245_v61 = vpop.f32.mrb[163].mxu1 }
 0x63a   : > { %v4983_v57 = vsub.f32 0.0, %v4803_v11  ;;  %v4806_v12 = vadd.f32 %v4805_v9, %v10944_v15  ;;  %v4807_v50 = vpop.f32.mrb[99].mxu0  ;;  %v4978_v49 = vsub.f32 0.0, %v4242_v21  ;;  %v4246_v29 = vadd.f32 %v4245_v61, %v10948_v33 }
 0x63b   : > { %v5313_v34 = vmul.f32 1.442695, %v4977_v43  ;;  %v4984_v52 = vsub.f32 0.0, %v4244_v35  ;;  %4574 = vmatmul.mubr.bf16.gmra.mrb[12].mxu1 %v10665_v59 }
 0x63c   : > { %v5325_v62 = vmul.f32 1.442695, %v4983_v57  ;;  %v4990_v39 = vsub.f32 0.0, %v4806_v12  ;;  %v5315_v40 = vmul.f32 1.442695, %v4978_v49  ;;  %v4985_v20 = vsub.f32 0.0, %v4246_v29  ;;  %7293 = vmatprep.mubr.msk.bf16.mxu1 %vm2392_vm2, %v10693_v1 }
 0x63d   : > { %8394 = vpow2.f32 %v5313_v34  ;;  %v5327_v48 = vmul.f32 1.442695, %v4984_v52 }
 0x63e   : > { %v5339_v5 = vmul.f32 1.442695, %v4990_v39  ;;  %8396 = vpow2.f32 %v5325_v62  ;;  %v5329_v22 = vmul.f32 1.442695, %v4985_v20  ;;  %v4249_v8 = vpop.f32.mrb[164].mxu1  ;;  %v4810_v18 = vpop.f32.mrb[100].mxu0 }
 0x63f   : > { %8398 = vpow2.f32 %v5315_v40  ;;  %v4250_v44 = vadd.f32 %v4249_v8, %v10942_v10  ;;  %v4811_v14 = vadd.f32 %v4810_v18, %v10944_v15  ;;  %v4251_v31 = vpop.f32.mrb[165].mxu1  ;;  %v4812_v55 = vpop.f32.mrb[101].mxu0 }
 0x640   : > { %8400 = vpow2.f32 %v5327_v48  ;;  %v4252_v59 = vadd.f32 %v4251_v31, %v10948_v33  ;;  %v4253_v2 = vpop.f32.mrb[166].mxu1  ;;  %v4813_v17 = vpop.f32.mrb[102].mxu0 }
 0x641   : > { %8402 = vpow2.f32 %v5339_v5  ;;  %v4991_v1 = vsub.f32 0.0, %v4250_v44  ;;  %v4997_v16 = vsub.f32 0.0, %v4811_v14  ;;  %v4254_v24 = vadd.f32 %v4253_v2, %v10942_v10  ;;  %v4255_v19 = vpop.f32.mrb[167].mxu1  ;;  %v4815_v30 = vpop.f32.mrb[103].mxu0 }
 0x642   : > { %8404 = vpow2.f32 %v5329_v22  ;;  %v4992_v41 = vsub.f32 0.0, %v4252_v59  ;;  %v4814_v46 = vadd.f32 %v4813_v17, %v10944_v15  ;;  %v4256_v27 = vadd.f32 %v4255_v19, %v10948_v33 }
 0x643   : > { %v5341_v63 = vmul.f32 1.442695, %v4991_v1  ;;  %v5353_v56 = vmul.f32 1.442695, %v4997_v16  ;;  %v4998_v7 = vsub.f32 0.0, %v4254_v24  ;;  %4584 = vmatmul.mubr.bf16.gmra.mrb[16].mxu1 %v10691_v3 }
 0x644   : > { %v5343_v54 = vmul.f32 1.442695, %v4992_v41  ;;  %v5004_v51 = vsub.f32 0.0, %v4814_v46  ;;  %7294 = vmatprep.mubr.msk.bf16.mxu1 %vm2392_vm2, %v10719_v36  ;;  %v4999_v12 = vsub.f32 0.0, %v4256_v27 }
 0x645   : > { %8406 = vpow2.f32 %v5341_v63  ;;  %v5355_v11 = vmul.f32 1.442695, %v4998_v7 }
 0x646   : > { %8408 = vpow2.f32 %v5353_v56  ;;  %v5367_v4 = vmul.f32 1.442695, %v5004_v51  ;;  %v4259_v23 = vpop.f32.mrb[168].mxu1  ;;  %v4818_v21 = vpop.f32.mrb[104].mxu0  ;;  %v5357_v18 = vmul.f32 1.442695, %v4999_v12 }
 0x647   : > { %v8395_v25 = vpop.eup %8394  ;;  %8410 = vpow2.f32 %v5343_v54  ;;  %v4260_v9 = vadd.f32 %v4259_v23, %v10942_v10  ;;  %v4261_v43 = vpop.f32.mrb[169].mxu1  ;;  %v4819_v40 = vadd.f32 %v4818_v21, %v10944_v15 }
 0x648   : > { %v4820_v57 = vpop.f32.mrb[105].mxu0  ;;  %v8397_v3 = vpop.eup %8396  ;;  %v5649_v35 = vadd.f32 1.0, %v8395_v25  ;;  %8412 = vpow2.f32 %v5355_v11  ;;  %v4262_v5 = vadd.f32 %v4261_v43, %v10948_v33 }
 0x649   : > { %v4263_v61 = vpop.f32.mrb[170].mxu1  ;;  %v4821_v50 = vpop.f32.mrb[106].mxu0  ;;  %v5655_v36 = vadd.f32 1.0, %v8397_v3  ;;  %8414 = vpow2.f32 %v5367_v4  ;;  %v5005_v29 = vsub.f32 0.0, %v4260_v9  ;;  %v5011_v59 = vsub.f32 0.0, %v4819_v40 }
 0x64a   : > { %v8399_v49 = vpop.eup %8398  ;;  %v4265_v34 = vpop.f32.mrb[171].mxu1  ;;  %8416 = vrcp.f32 %v5649_v35  ;;  %v4264_v44 = vadd.f32 %v4263_v61, %v10942_v10  ;;  %v4822_v55 = vadd.f32 %v4821_v50, %v10944_v15  ;;  %v5006_v16 = vsub.f32 0.0, %v4262_v5 }
 0x64b   : > { %v4823_v62 = vpop.f32.mrb[107].mxu0  ;;  %v8401_v52 = vpop.eup %8400  ;;  %v5650_v39 = vadd.f32 1.0, %v8399_v49  ;;  %8418 = vrcp.f32 %v5655_v36  ;;  %4594 = vmatmul.mubr.bf16.gmra.mrb[20].mxu1 %v10717_v26  ;;  %v5369_v31 = vmul.f32 1.442695, %v5005_v29  ;;  %v4266_v2 = vadd.f32 %v4265_v34, %v10948_v33 }
 0x64c   : > { %v8403_v20 = vpop.eup %8402  ;;  %v5656_v48 = vadd.f32 1.0, %v8401_v52  ;;  %7295 = vmatprep.mubr.msk.bf16.mxu1 %vm2392_vm2, %v10742_v53  ;;  %v5012_v54 = vsub.f32 0.0, %v4264_v44  ;;  %v5018_v51 = vsub.f32 0.0, %v4822_v55  ;;  %v5381_v23 = vmul.f32 1.442695, %v5011_v59 }
 0x64d   : > { %v8405_v22 = vpop.eup %8404  ;;  %8420 = vrcp.f32 %v5650_v39  ;;  %v5662_v8 = vadd.f32 1.0, %v8403_v20  ;;  %v5013_v21 = vsub.f32 0.0, %v4266_v2  ;;  %v5371_v57 = vmul.f32 1.442695, %v5006_v16 }
 0x64e   : > { %8422 = vrcp.f32 %v5656_v48  ;;  %v5657_v14 = vadd.f32 1.0, %v8405_v22  ;;  %v4269_v17 = vpop.f32.mrb[172].mxu1  ;;  %v4826_v26 = vpop.f32.mrb[108].mxu0  ;;  %v5383_v36 = vmul.f32 1.442695, %v5012_v54 }
 0x64f   : > { %8424 = vrcp.f32 %v5662_v8  ;;  %v8407_v1 = vpop.eup %8406  ;;  %v4271_v24 = vpop.f32.mrb[173].mxu1  ;;  %v4270_v53 = vadd.f32 %v4269_v17, %v10942_v10  ;;  %v4827_v3 = vadd.f32 %v4826_v26, %v10944_v15  ;;  %v5395_v29 = vmul.f32 1.442695, %v5018_v51  ;;  %v12028_v51 = vld [vmem:[#allocation4_spill] sm:$0xff] }
 0x650   : > { %8426 = vrcp.f32 %v5657_v14  ;;  %v4828_v19 = vpop.f32.mrb[109].mxu0  ;;  %v8409_v30 = vpop.eup %8408  ;;  %v5663_v41 = vadd.f32 1.0, %v8407_v1  ;;  %v4272_v50 = vadd.f32 %v4271_v24, %v10948_v33 }
 0x651   : > { %8428 = vpow2.f32 %v5357_v18  ;;  %v4273_v46 = vpop.f32.mrb[174].mxu1  ;;  %v4829_v63 = vpop.f32.mrb[110].mxu0  ;;  %v5669_v7 = vadd.f32 1.0, %v8409_v30  ;;  %v5019_v61 = vsub.f32 0.0, %v4270_v53 }
 0x652   : > { %v8411_v56 = vpop.eup %8410  ;;  %8430 = vpow2.f32 %v5369_v31  ;;  %v4275_v27 = vpop.f32.mrb[175].mxu1  ;;  %v4274_v34 = vadd.f32 %v4273_v46, %v10942_v10  ;;  %v4830_v39 = vadd.f32 %v4829_v63, %v10944_v15  ;;  %v5020_v31 = vsub.f32 0.0, %v4272_v50 }
 0x653   : > { %v8413_v11 = vpop.eup %8412  ;;  %8432 = vrcp.f32 %v5663_v41  ;;  %v5664_v4 = vadd.f32 1.0, %v8411_v56  ;;  %v4831_v25 = vpop.f32.mrb[111].mxu0  ;;  %4604 = vmatmul.mubr.bf16.gmra.mrb[24].mxu1 %v10740_v28  ;;  %v5385_v28 = vmul.f32 1.442695, %v5013_v21  ;;  %v4276_v22 = vadd.f32 %v4275_v27, %v10948_v33 }
 0x654   : > { %v8415_v9 = vpop.eup %8414  ;;  %8434 = vrcp.f32 %v5669_v7  ;;  %v5670_v43 = vadd.f32 1.0, %v8413_v11  ;;  %7296 = vmatprep.mubr.msk.bf16.mxu1 %vm2392_vm2, %v10761_v45  ;;  %v5025_v45 = vsub.f32 0.0, %v4827_v3  ;;  %v5397_v14 = vmul.f32 1.442695, %v5019_v61 }
 0x655   : > { %v8417_v35 = vpop.eup %8416  ;;  %8436 = vrcp.f32 %v5664_v4  ;;  %v5676_v12 = vadd.f32 1.0, %v8415_v9  ;;  %v5026_v26 = vsub.f32 0.0, %v4274_v34  ;;  %v5032_v30 = vsub.f32 0.0, %v4830_v39 }
 0x656   : > { %v8419_v49 = vpop.eup %8418  ;;  %8438 = vrcp.f32 %v5670_v43  ;;  %v4279_v40 = vpop.f32.mrb[176].mxu1  ;;  %v5409_v46 = vmul.f32 1.442695, %v5025_v45  ;;  %v5027_v63 = vsub.f32 0.0, %v4276_v22  ;;  %v5399_v54 = vmul.f32 1.442695, %v5020_v31 }
 0x657   : > { %v8421_v62 = vpop.eup %8420  ;;  %v7518_v52 = vpack.c.bf16 %v8419_v49, %v8419_v49  ;;  %8440 = vrcp.f32 %v5676_v12  ;;  %v4834_v20 = vpop.f32.mrb[112].mxu0  ;;  %v5411_v11 = vmul.f32 1.442695, %v5026_v26  ;;  %v5423_v21 = vmul.f32 1.442695, %v5032_v30  ;;  %v12029_v22 = vld [vmem:[#allocation3_spill] sm:$0xff] }
 0x658   : > { %v8423_v48 = vpop.eup %8422  ;;  %v7515_v5 = vpack.c.bf16 %v8421_v62, %v8417_v35  ;;  %8442 = vpow2.f32 %v5381_v23  ;;  %v11236_v8 = vpop.f32.mrb[177].mxu1  ;;  %v4280_v25 = vadd.f32 %v4279_v40, %v10942_v10  ;;  %v5413_v3 = vmul.f32 1.442695, %v5027_v63  ;;  %v12030_v31 = vld [vmem:[#allocation6_spill] sm:$0xff] }
 0x659   : > { %v4836_v18 = vpop.f32.mrb[113].mxu0  ;;  %v8425_v44 = vpop.eup %8424  ;;  %6822 = vst.msk [vmem:[%s11019_s14 + $0x1d8] sm:$0xf] %vm6757_vm6, %v7518_v52  ;;  %8444 = vpow2.f32 %v5371_v57  ;;  %v4835_v35 = vadd.f32 %v4834_v20, %v10944_v15  ;;  %v4282_v20 = vadd.f32 %v11236_v8, %v10948_v33 }
 0x65a   : > { %v11240_v55 = vpop.f32.mrb[178].mxu1  ;;  %v11242_v59 = vpop.f32.mrb[114].mxu0  ;;  %6819 = vst [vmem:[%s11019_s14 + $0x1c0] sm:$0xff] %v7515_v5  ;;  %v7522_v17 = vpack.c.bf16 %v8425_v44, %v8425_v44  ;;  %8446 = vpow2.f32 %v5383_v36  ;;  %v5033_v40 = vsub.f32 0.0, %v4280_v25 }
 0x65b   : > { %v8427_v2 = vpop.eup %8426  ;;  %v11245_v1 = vpop.f32.mrb[179].mxu1  ;;  %8448 = vpow2.f32 %v5395_v29  ;;  %4614 = vmatmul.mubr.bf16.gmra.mrb[28].mxu1 %v10759_v32  ;;  %v5039_v45 = vsub.f32 0.0, %v4835_v35 }
 0x65c   : > { %v4839_v16 = vpop.f32.mrb[115].mxu0  ;;  %v8429_v24 = vpop.eup %8428  ;;  %v7519_v19 = vpack.c.bf16 %v8427_v2, %v8423_v48  ;;  %6826 = vst.msk [vmem:[%s11019_s14 + $0x1f4] sm:$0xf] %vm6757_vm6, %v7522_v17  ;;  %8450 = vpow2.f32 %v5385_v28  ;;  %7297 = vmatprep.mubr.msk.bf16.mxu1 %vm2392_vm2, %v12028_v51 }
 0x65d   : > { %v8431_v41 = vpop.eup %8430  ;;  %v5671_v53 = vadd.f32 1.0, %v8429_v24  ;;  %8452 = vpow2.f32 %v5397_v14  ;;  %v4284_v14 = vadd.f32 %v11240_v55, %v10942_v10  ;;  %v5425_v16 = vmul.f32 1.442695, %v5033_v40 }
 0x65e   : > { %v8433_v56 = vpop.eup %8432  ;;  %6823 = vst [vmem:[%s11019_s14 + $0x1dc] sm:$0xff] %v7519_v19  ;;  %v5677_v7 = vadd.f32 1.0, %v8431_v41  ;;  %v4289_v32 = vpop.f32.mrb[180].mxu1  ;;  %v5034_v24 = vsub.f32 0.0, %v4282_v20  ;;  %v4838_v55 = vadd.f32 %v11242_v59, %v10944_v15 }
 0x65f   : > { %v8435_v27 = vpop.eup %8434  ;;  %8454 = vrcp.f32 %v5671_v53  ;;  %v11254_v9 = vpop.f32.mrb[116].mxu0  ;;  %v5040_v51 = vsub.f32 0.0, %v4284_v14  ;;  %v4290_v59 = vadd.f32 %v4289_v32, %v10942_v10 }
 0x660   : > { %v8437_v4 = vpop.eup %8436  ;;  %v7526_v23 = vpack.c.bf16 %v8435_v27, %v8435_v27  ;;  %8456 = vrcp.f32 %v5677_v7  ;;  %v11259_v12 = vpop.f32.mrb[181].mxu1  ;;  %v4286_v27 = vadd.f32 %v11245_v1, %v10948_v33 }
 0x661   : > { %v11256_v43 = vpop.eup %8438  ;;  %v7523_v57 = vpack.c.bf16 %v8437_v4, %v8433_v56  ;;  %8458 = vpow2.f32 %v5409_v46  ;;  %v4844_v61 = vpop.f32.mrb[117].mxu0  ;;  %v5437_v46 = vmul.f32 1.442695, %v5039_v45 }
 0x662   : > { %v8441_v50 = vpop.eup %8440  ;;  %6830 = vst.msk [vmem:[%s11019_s14 + $0x210] sm:$0xf] %vm6757_vm6, %v7526_v23  ;;  %8460 = vpow2.f32 %v5399_v54  ;;  %v11263_v49 = vpop.f32.mrb[182].mxu1  ;;  %v5427_v61 = vmul.f32 1.442695, %v5034_v24 }
 0x663   : > { %v11265_v36 = vpop.f32.mrb[118].mxu0  ;;  %v8443_v29 = vpop.eup %8442  ;;  %6827 = vst [vmem:[%s11019_s14 + $0x1f8] sm:$0xff] %v7523_v57  ;;  %v7530_v34 = vpack.c.bf16 %v8441_v50, %v8441_v50  ;;  %8462 = vpow2.f32 %v5411_v11  ;;  %4624 = vmatmul.mubr.bf16.gmra.mrb[32].mxu1 %v12029_v22  ;;  %v5046_v50 = vsub.f32 0.0, %v4838_v55 }
 0x664   : > { %v11268_v62 = vpop.f32.mrb[183].mxu1  ;;  %v4847_v52 = vpop.f32.mrb[119].mxu0  ;;  %v5683_v39 = vadd.f32 1.0, %v8443_v29  ;;  %8464 = vpow2.f32 %v5423_v21  ;;  %7298 = vmatprep.mubr.msk.bf16.mxu1 %vm2392_vm2, %v12030_v31  ;;  %v12031_v29 = vld [vmem:[#allocation5_spill] sm:$0xff] }
 0x665   : > { %v8445_v28 = vpop.eup %8444  ;;  %6834 = vst.msk [vmem:[%s11019_s14 + $0x22c] sm:$0xf] %vm6757_vm6, %v7530_v34  ;;  %8466 = vpow2.f32 %v5413_v3  ;;  %v5439_v52 = vmul.f32 1.442695, %v5040_v51 }
 0x666   : > { %v8447_v48 = vpop.eup %8446  ;;  %v5678_v5 = vadd.f32 1.0, %v8445_v28  ;;  %8468 = vrcp.f32 %v5683_v39  ;;  %v11279_v19 = vpop.f32.mrb[184].mxu1  ;;  %v5041_v28 = vsub.f32 0.0, %v4286_v27  ;;  %v12032_v39 = vld [vmem:[#allocation8_spill] sm:$0xff] }
 0x667   : > { %v8449_v18 = vpop.eup %8448  ;;  %v5684_v44 = vadd.f32 1.0, %v8447_v48  ;;  %v11281_v30 = vpop.f32.mrb[120].mxu0  ;;  %v5047_v48 = vsub.f32 0.0, %v4290_v59 }
 0x668   : > { %v8451_v2 = vpop.eup %8450  ;;  %8470 = vrcp.f32 %v5678_v5  ;;  %v5690_v8 = vadd.f32 1.0, %v8449_v18  ;;  %v11285_v63 = vpop.f32.mrb[185].mxu1  ;;  %v4294_v18 = vadd.f32 %v11263_v49, %v10942_v10  ;;  %v5441_v49 = vmul.f32 1.442695, %v5041_v28 }
 0x669   : > { %v8453_v17 = vpop.eup %8452  ;;  %8472 = vrcp.f32 %v5684_v44  ;;  %v5685_v26 = vadd.f32 1.0, %v8451_v2  ;;  %v4852_v56 = vpop.f32.mrb[121].mxu0 }
 0x66a   : > { %v8455_v41 = vpop.eup %8454  ;;  %8474 = vrcp.f32 %v5690_v8  ;;  %v5691_v53 = vadd.f32 1.0, %v8453_v17  ;;  %v11292_v11 = vpop.f32.mrb[186].mxu1  ;;  %v5451_v8 = vmul.f32 1.442695, %v5046_v50  ;;  %v4846_v17 = vadd.f32 %v11265_v36, %v10944_v15 }
 0x66b   : > { %v11287_v7 = vpop.eup %8456  ;;  %v7527_v54 = vpack.c.bf16 %v8455_v41, %v11256_v43  ;;  %8476 = vrcp.f32 %v5685_v26  ;;  %v11294_v4 = vpop.f32.mrb[122].mxu0  ;;  %v4843_v43 = vadd.f32 %v11254_v9, %v10944_v15  ;;  %4634 = vmatmul.mubr.bf16.gmra.mrb[36].mxu1 %v12031_v29  ;;  %v4292_v9 = vadd.f32 %v11259_v12, %v10948_v33 }
 0x66c   : > { %v8459_v23 = vpop.eup %8458  ;;  %8478 = vrcp.f32 %v5691_v53  ;;  %v11297_v21 = vpop.f32.mrb[187].mxu1  ;;  %7299 = vmatprep.mubr.msk.bf16.mxu1 %vm2392_vm2, %v12032_v39  ;;  %v4296_v41 = vadd.f32 %v11268_v62, %v10948_v33  ;;  %v5453_v36 = vmul.f32 1.442695, %v5047_v48  ;;  %v5054_v59 = vsub.f32 0.0, %v4294_v18 }
 0x66d   : > { %v4855_v25 = vpop.f32.mrb[123].mxu0  ;;  %v8461_v57 = vpop.eup %8460  ;;  %6831 = vst [vmem:[%s11019_s14 + $0x214] sm:$0xff] %v7527_v54  ;;  %v5697_v3 = vadd.f32 1.0, %v8459_v23  ;;  %8480 = vpow2.f32 %v5425_v16  ;;  %v5053_v22 = vsub.f32 0.0, %v4843_v43  ;;  %v5048_v56 = vsub.f32 0.0, %v4292_v9  ;;  %v12033_v43 = vld [vmem:[#allocation7_spill] sm:$0xff] }
 0x66e   : > { %v8463_v35 = vpop.eup %8462  ;;  %v5692_v1 = vadd.f32 1.0, %v8461_v57  ;;  %8482 = vpow2.f32 %v5437_v46  ;;  %v11309_v44 = vpop.f32.mrb[188].mxu1  ;;  %v4300_v54 = vadd.f32 %v11279_v19, %v10942_v10  ;;  %v5055_v19 = vsub.f32 0.0, %v4296_v41 }
 0x66f   : > { %v8465_v34 = vpop.eup %8464  ;;  %8484 = vrcp.f32 %v5697_v3  ;;  %v5698_v32 = vadd.f32 1.0, %v8463_v35  ;;  %v11311_v14 = vpop.f32.mrb[124].mxu0  ;;  %v5465_v23 = vmul.f32 1.442695, %v5053_v22  ;;  %v5060_v3 = vsub.f32 0.0, %v4846_v17 }
 0x670   : > { %v8467_v40 = vpop.eup %8466  ;;  %8486 = vrcp.f32 %v5692_v1  ;;  %v5704_v20 = vadd.f32 1.0, %v8465_v34  ;;  %v11315_v12 = vpop.f32.mrb[189].mxu1  ;;  %v12034_v1 = vld [vmem:[#allocation9_spill] sm:$0xff]  ;;  %v5455_v29 = vmul.f32 1.442695, %v5048_v56  ;;  %v5061_v34 = vsub.f32 0.0, %v4300_v54 }
 0x671   : > { %v8469_v5 = vpop.eup %8468  ;;  %8488 = vrcp.f32 %v5698_v32  ;;  %v5699_v45 = vadd.f32 1.0, %v8467_v40  ;;  %v4860_v26 = vpop.f32.mrb[125].mxu0  ;;  %v5467_v28 = vmul.f32 1.442695, %v5054_v59  ;;  %v5479_v48 = vmul.f32 1.442695, %v5060_v3 }
 0x672   : > { %v8471_v31 = vpop.eup %8470  ;;  %v7534_v2 = vpack.c.bf16 %v8469_v5, %v8469_v5  ;;  %8490 = vrcp.f32 %v5704_v20  ;;  %v11320_v53 = vpop.f32.mrb[190].mxu1  ;;  %v4851_v9 = vadd.f32 %v11281_v30, %v10944_v15  ;;  %v5469_v18 = vmul.f32 1.442695, %v5055_v19 }
 0x673   : > { %v8473_v16 = vpop.eup %8472  ;;  %v7531_v24 = vpack.c.bf16 %v8471_v31, %v11287_v7  ;;  %8492 = vrcp.f32 %v5699_v45  ;;  %v11322_v46 = vpop.f32.mrb[126].mxu0  ;;  %4644 = vmatmul.mubr.bf16.gmra.mrb[40].mxu1 %v12033_v43  ;;  %v4302_v31 = vadd.f32 %v11285_v63, %v10948_v33  ;;  %v5481_v17 = vmul.f32 1.442695, %v5061_v34 }
 0x674   : > { %v8475_v55 = vpop.eup %8474  ;;  %6838 = vst.msk [vmem:[%s11019_s14 + $0x248] sm:$0xf] %vm6757_vm6, %v7534_v2  ;;  %8494 = vpow2.f32 %v5427_v61  ;;  %v11328_v7 = vpop.f32.mrb[191].mxu1  ;;  %7300 = vmatprep.mubr.msk.bf16.mxu1 %vm2392_vm2, %v12034_v1 }
 0x675   : > { %v4863_v51 = vpop.f32.mrb[127].mxu0  ;;  %v8477_v27 = vpop.eup %8476  ;;  %6835 = vst [vmem:[%s11019_s14 + $0x230] sm:$0xff] %v7531_v24  ;;  %v7538_v62 = vpack.c.bf16 %v8475_v55, %v8475_v55  ;;  %8496 = vpow2.f32 %v5439_v52  ;;  %v5067_v55 = vsub.f32 0.0, %v4851_v9 }
 0x676   : > { %v8479_v25 = vpop.eup %8478  ;;  %v7535_v57 = vpack.c.bf16 %v8477_v27, %v8473_v16  ;;  %8498 = vpow2.f32 %v5451_v8  ;;  %v11337_v39 = vpop.f32.mrb[192].mxu1  ;;  %v4304_v51 = vadd.f32 %v11292_v11, %v10942_v10 }
 0x677   : > { %v8481_v35 = vpop.eup %8480  ;;  %6842 = vst.msk [vmem:[%s11019_s14 + $0x264] sm:$0xf] %vm6757_vm6, %v7538_v62  ;;  %8500 = vpow2.f32 %v5441_v49  ;;  %v11341_v5 = vpop.f32.mrb[193].mxu1  ;;  %v12035_v62 = vld [vmem:[#allocation2_spill] sm:$0xff]  ;;  %v5493_v19 = vmul.f32 1.442695, %v5067_v55 }
 0x678   : > { %v8483_v61 = vpop.eup %8482  ;;  %6839 = vst [vmem:[%s11019_s14 + $0x24c] sm:$0xff] %v7535_v57  ;;  %v5705_v50 = vadd.f32 1.0, %v8481_v35  ;;  %8502 = vpow2.f32 %v5453_v36  ;;  %v11345_v2 = vpop.f32.mrb[194].mxu1  ;;  %v5062_v36 = vsub.f32 0.0, %v4302_v31  ;;  %v3585_v3 = vsub.s32 3, %v12035_v62 }
 0x679   : > { %v8485_v32 = vpop.eup %8484  ;;  %v5711_v52 = vadd.f32 1.0, %v8483_v61  ;;  %8504 = vpow2.f32 %v5465_v23  ;;  %v11349_v26 = vpop.f32.mrb[195].mxu1  ;;  %v3581_v23 = vsub.s32 2, %v12035_v62  ;;  %v5068_v34 = vsub.f32 0.0, %v4304_v51 }
 0x67a   : > { %v8487_v40 = vpop.eup %8486  ;;  %v7542_v20 = vpack.c.bf16 %v8485_v32, %v8485_v32  ;;  %8506 = vrcp.f32 %v5705_v50  ;;  %v5483_v1 = vmul.f32 1.442695, %v5062_v36  ;;  %v4306_v32 = vadd.f32 %v11297_v21, %v10948_v33 }
 0x67b   : > { %v8489_v45 = vpop.eup %8488  ;;  %v7539_v22 = vpack.c.bf16 %v8487_v40, %v8479_v25  ;;  %8508 = vrcp.f32 %v5711_v52  ;;  %4654 = vmatmul.mubr.bf16.gmra.mrb[44].mxu1 %v10818_v37  ;;  %v4859_v40 = vadd.f32 %v11311_v14, %v10944_v15 }
 0x67c   : > { %v8491_v8 = vpop.eup %8490  ;;  %6846 = vst.msk [vmem:[%s11019_s14 + $0x280] sm:$0xf] %vm6757_vm6, %v7542_v20  ;;  %8510 = vpow2.f32 %v5455_v29  ;;  %7301 = vmatprep.mubr.msk.bf16.mxu1 %vm2392_vm2, %v10834_v58  ;;  %v4854_v58 = vadd.f32 %v11294_v4, %v10944_v15 }
 0x67d   : > { %v8493_v30 = vpop.eup %8492  ;;  %6843 = vst [vmem:[%s11019_s14 + $0x268] sm:$0xff] %v7539_v22  ;;  %v7546_v16 = vpack.c.bf16 %v8491_v8, %v8491_v8  ;;  %8512 = vpow2.f32 %v5467_v28  ;;  %v4310_v28 = vadd.f32 %v11309_v44, %v10942_v10  ;;  %v4312_v44 = vadd.f32 %v11315_v12, %v10948_v33 }
 0x67e   : > { %v8495_v24 = vpop.eup %8494  ;;  %v7543_v49 = vpack.c.bf16 %v8493_v30, %v8489_v45  ;;  %8514 = vpow2.f32 %v5479_v48  ;;  %v11361_v59 = vpop.f32.mrb[196].mxu1  ;;  %v5074_v9 = vsub.f32 0.0, %v4854_v58  ;;  %v9098_v45 = vld [vmem:[%s12008_s9] sm:$0x7f]  ;;  %v5069_v30 = vsub.f32 0.0, %v4306_v32 }
 0x67f   : > { %v8497_v63 = vpop.eup %8496  ;;  %6850 = vst.msk [vmem:[%s11019_s14 + $0x29c] sm:$0xf] %vm6757_vm6, %v7546_v16  ;;  %v5706_v41 = vadd.f32 1.0, %v8495_v24  ;;  %8516 = vpow2.f32 %v5469_v18  ;;  %v11366_v43 = vpop.f32.mrb[197].mxu1  ;;  %v11381_v21 = vrot.slane %v9098_v45, %v3581_v23  ;;  %v11386_v31 = vrot.slane %v9098_v45, %v3585_v3 }
 0x680   : > { %v8499_v56 = vpop.eup %8498  ;;  %6847 = vst [vmem:[%s11019_s14 + $0x284] sm:$0xff] %v7543_v49  ;;  %v5712_v54 = vadd.f32 1.0, %v8497_v63  ;;  %8518 = vpow2.f32 %v5481_v17  ;;  %v11368_v61 = vpop.f32.mrb[198].mxu1  ;;  %v5495_v17 = vmul.f32 1.442695, %v5068_v34  ;;  %v5075_v24 = vsub.f32 0.0, %v4310_v28 }
 0x681   : > { %v8501_v27 = vpop.eup %8500  ;;  %8520 = vrcp.f32 %v5706_v41  ;;  %v5718_v37 = vadd.f32 1.0, %v8499_v56  ;;  %v11372_v52 = vpop.f32.mrb[199].mxu1  ;;  %v5081_v49 = vsub.f32 0.0, %v4859_v40  ;;  %v5507_v55 = vmul.f32 1.442695, %v5074_v9 }
 0x682   : > { %v8503_v25 = vpop.eup %8502  ;;  %8522 = vrcp.f32 %v5712_v54  ;;  %v5713_v57 = vadd.f32 1.0, %v8501_v27  ;;  %v5076_v51 = vsub.f32 0.0, %v4312_v44  ;;  %v4862_v27 = vadd.f32 %v11322_v46, %v10944_v15 }
 0x683   : > { %v8505_v35 = vpop.eup %8504  ;;  %8524 = vrcp.f32 %v5718_v37  ;;  %v5719_v11 = vadd.f32 1.0, %v8503_v25  ;;  %4664 = vmatmul.mubr.bf16.gmra.mrb[48].mxu1 %v10832_v42  ;;  %v4316_v58 = vadd.f32 %v11328_v7, %v10948_v33  ;;  %v5509_v3 = vmul.f32 1.442695, %v5075_v24 }
 0x684   : > { %v8507_v50 = vpop.eup %8506  ;;  %8526 = vrcp.f32 %v5713_v57  ;;  %v5725_v29 = vadd.f32 1.0, %v8505_v35  ;;  %7302 = vmatprep.mubr.msk.bf16.mxu1 %vm2392_vm2, %v10848_v6  ;;  %v4314_v6 = vadd.f32 %v11320_v53, %v10942_v10  ;;  %v5497_v57 = vmul.f32 1.442695, %v5069_v30 }
 0x685   : > { %v8509_v4 = vpop.eup %8508  ;;  %8528 = vrcp.f32 %v5719_v11  ;;  %v5521_v35 = vmul.f32 1.442695, %v5081_v49  ;;  %v4353_v11 = vadd.f32 %v11337_v39, %v11381_v21  ;;  %v5083_v34 = vsub.f32 0.0, %v4316_v58 }
 0x686   : > { %v8511_v20 = vpop.eup %8510  ;;  %v7550_v48 = vpack.c.bf16 %v8509_v4, %v8509_v4  ;;  %8530 = vrcp.f32 %v5725_v29  ;;  %v11392_v63 = vpop.f32.mrb[200].mxu1  ;;  %v5088_v29 = vsub.f32 0.0, %v4862_v27  ;;  %v4363_v58 = vadd.f32 %v11361_v59, %v11381_v21 }
 0x687   : > { %v8513_v22 = vpop.eup %8512  ;;  %v5720_v18 = vadd.f32 1.0, %v8511_v20  ;;  %8532 = vpow2.f32 %v5493_v19  ;;  %v11396_v36 = vpop.f32.mrb[201].mxu1  ;;  %v5082_v19 = vsub.f32 0.0, %v4314_v6 }
 0x688   : > { %v8515_v14 = vpop.eup %8514  ;;  %6854 = vst.msk [vmem:[%s11019_s14 + $0x2b8] sm:$0xf] %vm6757_vm6, %v7550_v48  ;;  %v5726_v8 = vadd.f32 1.0, %v8513_v22  ;;  %8534 = vpow2.f32 %v5483_v1  ;;  %v11400_v37 = vpop.f32.mrb[202].mxu1  ;;  %v4355_v1 = vadd.f32 %v11341_v5, %v11386_v31  ;;  %v4867_v5 = vsub.f32 0.0, %v4353_v11 }
 0x689   : > { %v8517_v16 = vpop.eup %8516  ;;  %8536 = vrcp.f32 %v5720_v18  ;;  %v5732_v42 = vadd.f32 1.0, %v8515_v14  ;;  %v11404_v10 = vpop.f32.mrb[203].mxu1  ;;  %v5523_v20 = vmul.f32 1.442695, %v5082_v19  ;;  %v5535_v22 = vmul.f32 1.442695, %v5088_v29 }
 0x68a   : > { %v8519_v12 = vpop.eup %8518  ;;  %8538 = vrcp.f32 %v5726_v8  ;;  %v5727_v41 = vadd.f32 1.0, %v8517_v16  ;;  %v4868_v48 = vsub.f32 0.0, %v4355_v1  ;;  %v5525_v8 = vmul.f32 1.442695, %v5083_v34 }
 0x68b   : > { %v8521_v56 = vpop.eup %8520  ;;  %8540 = vrcp.f32 %v5732_v42  ;;  %v5733_v54 = vadd.f32 1.0, %v8519_v12  ;;  %4674 = vmatmul.mubr.bf16.gmra.mrb[52].mxu1 %v10846_v60  ;;  %v5093_v16 = vmul.f32 1.442695, %v4867_v5  ;;  %v4357_v42 = vadd.f32 %v11345_v2, %v11381_v21 }
 0x68c   : > { %v8523_v23 = vpop.eup %8522  ;;  %v7547_v25 = vpack.c.bf16 %v8521_v56, %v8507_v50  ;;  %8542 = vrcp.f32 %v5727_v41  ;;  %v5511_v50 = vmul.f32 1.442695, %v5076_v51  ;;  %7303 = vmatprep.mubr.msk.bf16.mxu1 %vm2392_vm2, %v10862_v47  ;;  %v5095_v12 = vmul.f32 1.442695, %v4868_v48 }
 0x68d   : > { %v8525_v53 = vpop.eup %8524  ;;  %8544 = vrcp.f32 %v5733_v54  ;;  %v4359_v41 = vadd.f32 %v11349_v26, %v11386_v31  ;;  %v4874_v51 = vsub.f32 0.0, %v4357_v42  ;;  %v4365_v11 = vadd.f32 %v11366_v43, %v11386_v31 }
 0x68e   : > { %v8527_v15 = vpop.eup %8526  ;;  %6851 = vst [vmem:[%s11019_s14 + $0x2a0] sm:$0xff] %v7547_v25  ;;  %v7554_v46 = vpack.c.bf16 %v8525_v53, %v8525_v53  ;;  %8546 = vpow2.f32 %v5495_v17  ;;  %v11417_v60 = vpop.f32.mrb[204].mxu1  ;;  %v4369_v29 = vadd.f32 %v11372_v52, %v11386_v31  ;;  %v4881_v34 = vsub.f32 0.0, %v4363_v58 }
 0x68f   : > { %v8529_v33 = vpop.eup %8528  ;;  %v7551_v7 = vpack.c.bf16 %v8527_v15, %v8523_v23  ;;  %8548 = vpow2.f32 %v5507_v55  ;;  %v11419_v9 = vpop.f32.mrb[205].mxu1  ;;  %v5107_v1 = vmul.f32 1.442695, %v4874_v51  ;;  %v4882_v5 = vsub.f32 0.0, %v4365_v11 }
 0x690   : > { %v8531_v39 = vpop.eup %8530  ;;  %6858 = vst.msk [vmem:[%s11019_s14 + $0x2d4] sm:$0xf] %vm6757_vm6, %v7554_v46  ;;  %8550 = vpow2.f32 %v5497_v57  ;;  %v11423_v18 = vpop.f32.mrb[206].mxu1  ;;  %v4383_v51 = vadd.f32 %v11417_v60, %v11381_v21 }
 0x691   : > { %v8533_v32 = vpop.eup %8532  ;;  %6855 = vst [vmem:[%s11019_s14 + $0x2bc] sm:$0xff] %v7551_v7  ;;  %v7558_v4 = vpack.c.bf16 %v8531_v39, %v8531_v39  ;;  %8552 = vpow2.f32 %v5509_v3  ;;  %v11425_v17 = vpop.f32.mrb[207].mxu1  ;;  %v5123_v42 = vmul.f32 1.442695, %v4882_v5  ;;  %v4387_v58 = vadd.f32 %v11423_v18, %v11381_v21 }
 0x692   : > { %v8535_v28 = vpop.eup %8534  ;;  %v5739_v40 = vadd.f32 1.0, %v8533_v32  ;;  %8554 = vpow2.f32 %v5521_v35  ;;  %v4373_v32 = vadd.f32 %v11392_v63, %v11381_v21  ;;  %v4889_v63 = vsub.f32 0.0, %v4369_v29 }
 0x693   : > { %v8537_v47 = vpop.eup %8536  ;;  %6862 = vst.msk [vmem:[%s11019_s14 + $0x2f0] sm:$0xf] %vm6757_vm6, %v7558_v4  ;;  %v5734_v45 = vadd.f32 1.0, %v8535_v28  ;;  %8556 = vpow2.f32 %v5511_v50  ;;  %4684 = vmatmul.mubr.bf16.gmra.mrb[56].mxu1 %v10860_v38  ;;  %v4875_v38 = vsub.f32 0.0, %v4359_v41 }
 0x694   : > { %v8539_v44 = vpop.eup %8538  ;;  %v7555_v14 = vpack.c.bf16 %v8537_v47, %v8529_v33  ;;  %8558 = vrcp.f32 %v5739_v40  ;;  %7304 = vmatprep.mubr.msk.bf16.mxu1 %vm2392_vm2, %v10876_v13  ;;  %v4367_v33 = vadd.f32 %v11368_v61, %v11381_v21 }
 0x695   : > { %v8541_v30 = vpop.eup %8540  ;;  %8560 = vrcp.f32 %v5734_v45  ;;  %v5109_v50 = vmul.f32 1.442695, %v4875_v38  ;;  %v4385_v38 = vadd.f32 %v11419_v9, %v11386_v31  ;;  %v4909_v9 = vsub.f32 0.0, %v4383_v51 }
 0x696   : > { %v8543_v24 = vpop.eup %8542  ;;  %6859 = vst [vmem:[%s11019_s14 + $0x2d8] sm:$0xff] %v7555_v14  ;;  %v7562_v49 = vpack.c.bf16 %v8541_v30, %v8541_v30  ;;  %8562 = vpow2.f32 %v5523_v20  ;;  %v11438_v27 = vpop.f32.mrb[208].mxu1  ;;  %v4888_v47 = vsub.f32 0.0, %v4367_v33  ;;  %v5121_v14 = vmul.f32 1.442695, %v4881_v34 }
 0x697   : > { %v8545_v55 = vpop.eup %8544  ;;  %v7559_v6 = vpack.c.bf16 %v8543_v24, %v8539_v44  ;;  %8564 = vpow2.f32 %v5535_v22  ;;  %v11440_v25 = vpop.f32.mrb[209].mxu1  ;;  %v4377_v24 = vadd.f32 %v11400_v37, %v11381_v21  ;;  %v4910_v18 = vsub.f32 0.0, %v4385_v38 }
 0x698   : > { %v8547_v56 = vpop.eup %8546  ;;  %6866 = vst.msk [vmem:[%s11019_s14 + $0x30c] sm:$0xf] %vm6757_vm6, %v7562_v49  ;;  %8566 = vpow2.f32 %v5525_v8  ;;  %v11444_v53 = vpop.f32.mrb[210].mxu1  ;;  %v4895_v8 = vsub.f32 0.0, %v4373_v32 }
 0x699   : > { %v8549_v2 = vpop.eup %8548  ;;  %6863 = vst [vmem:[%s11019_s14 + $0x2f4] sm:$0xff] %v7559_v6  ;;  %v5740_v54 = vadd.f32 1.0, %v8547_v56  ;;  %8568 = vpow2.f32 %v5093_v16  ;;  %v11448_v15 = vpop.f32.mrb[211].mxu1  ;;  %v4379_v6 = vadd.f32 %v11404_v10, %v11386_v31  ;;  %v4902_v10 = vsub.f32 0.0, %v4377_v24 }
 0x69a   : > { %v8551_v26 = vpop.eup %8550  ;;  %v5746_v23 = vadd.f32 1.0, %v8549_v2  ;;  %8570 = vpow2.f32 %v5095_v12  ;;  %v5135_v2 = vmul.f32 1.442695, %v4888_v47  ;;  %v5149_v37 = vmul.f32 1.442695, %v4895_v8 }
 0x69b   : > { %v8553_v57 = vpop.eup %8552  ;;  %8572 = vrcp.f32 %v5740_v54  ;;  %v5741_v13 = vadd.f32 1.0, %v8551_v26  ;;  %4694 = vmatmul.mubr.bf16.gmra.mrb[60].mxu1 %v10874_v0  ;;  %v4375_v0 = vadd.f32 %v11396_v36, %v11386_v31  ;;  %v5137_v54 = vmul.f32 1.442695, %v4889_v63 }
 0x69c   : > { %v8555_v3 = vpop.eup %8554  ;;  %8574 = vrcp.f32 %v5746_v23  ;;  %v5747_v35 = vadd.f32 1.0, %v8553_v57 }
 0x69d   : > { %v8557_v46 = vpop.eup %8556  ;;  %8576 = vrcp.f32 %v5741_v13  ;;  %v5753_v19 = vadd.f32 1.0, %v8555_v3 }
 0x69e   : > { %v8559_v7 = vpop.eup %8558  ;;  %8578 = vrcp.f32 %v5747_v35  ;;  %v5748_v59 = vadd.f32 1.0, %v8557_v46  ;;  %v11461_v52 = vpop.f32.mrb[212].mxu1  ;;  %v4903_v35 = vsub.f32 0.0, %v4379_v6 }
 0x69f   : > { %v8561_v43 = vpop.eup %8560  ;;  %v7566_v39 = vpack.c.bf16 %v8559_v7, %v8559_v7  ;;  %8580 = vrcp.f32 %v5753_v19  ;;  %v11464_v45 = vpop.f32.mrb[213].mxu1 }
 0x6a0   : > { %v8563_v4 = vpop.eup %8562  ;;  %v7563_v61 = vpack.c.bf16 %v8561_v43, %v8545_v55  ;;  %8582 = vrcp.f32 %v5748_v59  ;;  %v11466_v30 = vpop.f32.mrb[214].mxu1  ;;  %v4896_v55 = vsub.f32 0.0, %v4375_v0  ;;  %v5163_v43 = vmul.f32 1.442695, %v4902_v10 }
 0x6a1   : > { %v8565_v28 = vpop.eup %8564  ;;  %6870 = vst.msk [vmem:[%s11019_s14 + $0x328] sm:$0xf] %vm6757_vm6, %v7566_v39  ;;  %v5754_v40 = vadd.f32 1.0, %v8563_v4  ;;  %8584 = vpow2.f32 %v5107_v1  ;;  %v11470_v49 = vpop.f32.mrb[215].mxu1  ;;  %v4916_v39 = vsub.f32 0.0, %v4387_v58 }
 0x6a2   : > { %v8567_v20 = vpop.eup %8566  ;;  %6867 = vst [vmem:[%s11019_s14 + $0x310] sm:$0xff] %v7563_v61  ;;  %v5760_v48 = vadd.f32 1.0, %v8565_v28  ;;  %8586 = vpow2.f32 %v5109_v50  ;;  %v5151_v60 = vmul.f32 1.442695, %v4896_v55  ;;  %v5165_v61 = vmul.f32 1.442695, %v4903_v35 }
 0x6a3   : > { %v8569_v22 = vpop.eup %8568  ;;  %8588 = vrcp.f32 %v5754_v40  ;;  %v5755_v44 = vadd.f32 1.0, %v8567_v20  ;;  %v5177_v28 = vmul.f32 1.442695, %v4909_v9  ;;  %v5179_v20 = vmul.f32 1.442695, %v4910_v18 }
 0x6a4   : > { %v8571_v16 = vpop.eup %8570  ;;  %8590 = vrcp.f32 %v5760_v48  ;;  %v5539_v36 = vadd.f32 1.0, %v8569_v22  ;;  %v4389_v48 = vadd.f32 %v11425_v17, %v11386_v31  ;;  %v5191_v22 = vmul.f32 1.442695, %v4916_v39 }
 0x6a5   : > { %v8573_v12 = vpop.eup %8572  ;;  %8592 = vrcp.f32 %v5755_v44  ;;  %v5540_v41 = vadd.f32 1.0, %v8571_v16  ;;  %v4393_v44 = vadd.f32 %v11438_v27, %v11381_v21  ;;  %v4395_v27 = vadd.f32 %v11440_v25, %v11386_v31 }
 0x6a6   : > { %v8575_v56 = vpop.eup %8574  ;;  %8594 = vrcp.f32 %v5539_v36  ;;  %v11482_v11 = vpop.f32.mrb[216].mxu1 }
 0x6a7   : > { %v8577_v26 = vpop.eup %8576  ;;  %v7570_v23 = vpack.c.bf16 %v8575_v56, %v8575_v56  ;;  %8596 = vrcp.f32 %v5540_v41  ;;  %v11485_v1 = vpop.f32.mrb[217].mxu1  ;;  %v4923_v56 = vsub.f32 0.0, %v4393_v44  ;;  %v4413_v44 = vadd.f32 %v11482_v11, %v11381_v21 }
 0x6a8   : > { %v8579_v57 = vpop.eup %8578  ;;  %v7567_v13 = vpack.c.bf16 %v8577_v26, %v8573_v12  ;;  %8598 = vpow2.f32 %v5121_v14  ;;  %v11487_v59 = vpop.f32.mrb[218].mxu1  ;;  %v4917_v12 = vsub.f32 0.0, %v4389_v48  ;;  %v4397_v26 = vadd.f32 %v11444_v53, %v11381_v21 }
 0x6a9   : > { %v8581_v3 = vpop.eup %8580  ;;  %6874 = vst.msk [vmem:[%s11019_s14 + $0x344] sm:$0xf] %vm6757_vm6, %v7570_v23  ;;  %8600 = vpow2.f32 %v5123_v42  ;;  %v11491_v34 = vpop.f32.mrb[219].mxu1  ;;  %v4403_v53 = vadd.f32 %v11461_v52, %v11381_v21 }
 0x6aa   : > { %v8583_v46 = vpop.eup %8582  ;;  %6871 = vst [vmem:[%s11019_s14 + $0x32c] sm:$0xff] %v7567_v13  ;;  %v7574_v19 = vpack.c.bf16 %v8581_v3, %v8581_v3  ;;  %8602 = vpow2.f32 %v5135_v2  ;;  %v4924_v13 = vsub.f32 0.0, %v4395_v27  ;;  %v5205_v3 = vmul.f32 1.442695, %v4923_v56 }
 0x6ab   : > { %v8585_v33 = vpop.eup %8584  ;;  %v7571_v7 = vpack.c.bf16 %v8583_v46, %v8579_v57  ;;  %8604 = vpow2.f32 %v5137_v54  ;;  %v5193_v57 = vmul.f32 1.442695, %v4917_v12  ;;  %v4930_v46 = vsub.f32 0.0, %v4397_v26 }
 0x6ac   : > { %v8587_v50 = vpop.eup %8586  ;;  %6878 = vst.msk [vmem:[%s11019_s14 + $0x360] sm:$0xf] %vm6757_vm6, %v7574_v19  ;;  %v5546_v29 = vadd.f32 1.0, %v8585_v33  ;;  %8606 = vpow2.f32 %v5149_v37  ;;  %v4419_v56 = vadd.f32 %v11491_v34, %v11386_v31 }
 0x6ad   : > { %v8589_v32 = vpop.eup %8588  ;;  %6875 = vst [vmem:[%s11019_s14 + $0x348] sm:$0xff] %v7571_v7  ;;  %v5547_v4 = vadd.f32 1.0, %v8587_v50  ;;  %8608 = vpow2.f32 %v5151_v60  ;;  %v4399_v60 = vadd.f32 %v11448_v15, %v11386_v31  ;;  %v4405_v7 = vadd.f32 %v11464_v45, %v11386_v31 }
 0x6ae   : > { %v8591_v5 = vpop.eup %8590  ;;  %8610 = vrcp.f32 %v5546_v29  ;;  %v11500_v8 = vpop.f32.mrb[220].mxu1  ;;  %v4407_v15 = vadd.f32 %v11466_v30, %v11381_v21  ;;  %v4409_v30 = vadd.f32 %v11470_v49, %v11386_v31  ;;  %v4417_v49 = vadd.f32 %v11487_v59, %v11381_v21 }
 0x6af   : > { %v8593_v40 = vpop.eup %8592  ;;  %v7578_v0 = vpack.c.bf16 %v8591_v5, %v8591_v5  ;;  %8612 = vrcp.f32 %v5547_v4  ;;  %v11503_v42 = vpop.f32.mrb[221].mxu1  ;;  %v4931_v4 = vsub.f32 0.0, %v4399_v60  ;;  %v4938_v48 = vsub.f32 0.0, %v4405_v7 }
 0x6b0   : > { %v8595_v47 = vpop.eup %8594  ;;  %v7575_v63 = vpack.c.bf16 %v8593_v40, %v8589_v32  ;;  %8614 = vpow2.f32 %v5163_v43  ;;  %v11507_v41 = vpop.f32.mrb[222].mxu1  ;;  %v5207_v32 = vmul.f32 1.442695, %v4924_v13  ;;  %v4937_v40 = vsub.f32 0.0, %v4403_v53 }
 0x6b1   : > { %v8597_v14 = vpop.eup %8596  ;;  %6882 = vst.msk [vmem:[%s11019_s14 + $0x37c] sm:$0xf] %vm6757_vm6, %v7578_v0  ;;  %8616 = vpow2.f32 %v5165_v61  ;;  %v11510_v2 = vpop.f32.mrb[223].mxu1  ;;  %v4945_v11 = vsub.f32 0.0, %v4409_v30  ;;  %v4958_v34 = vsub.f32 0.0, %v4417_v49  ;;  %v4959_v60 = vsub.f32 0.0, %v4419_v56 }
 0x6b2   : > { %v8599_v16 = vpop.eup %8598  ;;  %6879 = vst [vmem:[%s11019_s14 + $0x364] sm:$0xff] %v7575_v63  ;;  %v7452_v36 = vpack.c.bf16 %v8597_v14, %v8595_v47  ;;  %8618 = vpow2.f32 %v5177_v28  ;;  %v5219_v28 = vmul.f32 1.442695, %v4930_v46  ;;  %v5233_v12 = vmul.f32 1.442695, %v4937_v40 }
 0x6b3   : > { %v8601_v17 = vpop.eup %8600  ;;  %v5553_v24 = vadd.f32 1.0, %v8599_v16  ;;  %8620 = vpow2.f32 %v5179_v20  ;;  %v5221_v16 = vmul.f32 1.442695, %v4931_v4  ;;  %v4425_v4 = vadd.f32 %v11503_v42, %v11386_v31 }
 0x6b4   : > { %v8603_v55 = vpop.eup %8602  ;;  %6755 = vst [vmem:[%s11019_s14 + $0x8] sm:$0xff] %v7452_v36  ;;  %v5554_v6 = vadd.f32 1.0, %v8601_v17  ;;  %8622 = vpow2.f32 %v5191_v22  ;;  %v4944_v22 = vsub.f32 0.0, %v4407_v15  ;;  %v4415_v36 = vadd.f32 %v11485_v1, %v11386_v31 }
 0x6b5   : > { %v8605_v54 = vpop.eup %8604  ;;  %8624 = vrcp.f32 %v5553_v24  ;;  %v5560_v51 = vadd.f32 1.0, %v8603_v55  ;;  %v4423_v15 = vadd.f32 %v11500_v8, %v11381_v21  ;;  %v4427_v42 = vadd.f32 %v11507_v41, %v11381_v21 }
 0x6b6   : > { %v8607_v23 = vpop.eup %8606  ;;  %8626 = vrcp.f32 %v5554_v6  ;;  %v5561_v37 = vadd.f32 1.0, %v8605_v54  ;;  %v11518_v19 = vpop.f32.mrb[224].mxu1  ;;  %v5235_v6 = vmul.f32 1.442695, %v4938_v48  ;;  %v5247_v26 = vmul.f32 1.442695, %v4944_v22 }
 0x6b7   : > { %v8609_v38 = vpop.eup %8608  ;;  %8628 = vrcp.f32 %v5560_v51  ;;  %v5567_v25 = vadd.f32 1.0, %v8607_v23  ;;  %v11522_v18 = vpop.f32.mrb[225].mxu1  ;;  %v4951_v23 = vsub.f32 0.0, %v4413_v44  ;;  %v4965_v30 = vsub.f32 0.0, %v4423_v15 }
 0x6b8   : > { %v8611_v10 = vpop.eup %8610  ;;  %8630 = vrcp.f32 %v5561_v37  ;;  %v5568_v58 = vadd.f32 1.0, %v8609_v38  ;;  %v11526_v43 = vpop.f32.mrb[226].mxu1  ;;  %v4952_v38 = vsub.f32 0.0, %v4415_v36  ;;  %v4966_v22 = vsub.f32 0.0, %v4425_v4 }
 0x6b9   : > { %v8613_v35 = vpop.eup %8612  ;;  %8632 = vrcp.f32 %v5567_v25  ;;  %v11529_v61 = vpop.f32.mrb[227].mxu1  ;;  %v5261_v53 = vmul.f32 1.442695, %v4951_v23  ;;  %v5289_v49 = vmul.f32 1.442695, %v4965_v30 }
 0x6ba   : > { %v8615_v9 = vpop.eup %8614  ;;  %v7456_v33 = vpack.c.bf16 %v8613_v35, %v8611_v10  ;;  %8634 = vrcp.f32 %v5568_v58  ;;  %v5291_v56 = vmul.f32 1.442695, %v4966_v22 }
 0x6bb   : > { %v8617_v50 = vpop.eup %8616  ;;  %v5574_v29 = vadd.f32 1.0, %v8615_v9  ;;  %8636 = vpow2.f32 %v5193_v57 }
 0x6bc   : > { %v8619_v39 = vpop.eup %8618  ;;  %6760 = vst [vmem:[%s11019_s14 + $0x24] sm:$0xff] %v7456_v33  ;;  %v5575_v52 = vadd.f32 1.0, %v8617_v50  ;;  %8638 = vpow2.f32 %v5205_v3  ;;  %v5249_v3 = vmul.f32 1.442695, %v4945_v11  ;;  %v5263_v33 = vmul.f32 1.442695, %v4952_v38 }
 0x6bd   : > { %v8621_v5 = vpop.eup %8620  ;;  %8640 = vrcp.f32 %v5574_v29  ;;  %v5581_v45 = vadd.f32 1.0, %v8619_v39  ;;  %v5275_v29 = vmul.f32 1.442695, %v4958_v34 }
 0x6be   : > { %v8623_v0 = vpop.eup %8622  ;;  %8642 = vrcp.f32 %v5575_v52  ;;  %v5582_v20 = vadd.f32 1.0, %v8621_v5  ;;  %v11539_v27 = vpop.f32.mrb[228].mxu1 }
 0x6bf   : > { %v8625_v47 = vpop.eup %8624  ;;  %8644 = vrcp.f32 %v5581_v45  ;;  %v5588_v63 = vadd.f32 1.0, %v8623_v0  ;;  %v11543_v54 = vpop.f32.mrb[229].mxu1 }
 0x6c0   : > { %v8627_v14 = vpop.eup %8626  ;;  %8646 = vrcp.f32 %v5582_v20  ;;  %v11546_v37 = vpop.f32.mrb[230].mxu1 }
 0x6c1   : > { %v8629_v17 = vpop.eup %8628  ;;  %v7460_v24 = vpack.c.bf16 %v8627_v14, %v8625_v47  ;;  %8648 = vrcp.f32 %v5588_v63  ;;  %v11548_v25 = vpop.f32.mrb[231].mxu1 }
 0x6c2   : > { %v8631_v55 = vpop.eup %8630  ;;  %8650 = vpow2.f32 %v5207_v32  ;;  %v5277_v32 = vmul.f32 1.442695, %v4959_v60 }
 0x6c3   : > { %v8633_v1 = vpop.eup %8632  ;;  %6764 = vst [vmem:[%s11019_s14 + $0x40] sm:$0xff] %v7460_v24  ;;  %v7464_v51 = vpack.c.bf16 %v8631_v55, %v8629_v17  ;;  %8652 = vpow2.f32 %v5219_v28  ;;  %v4429_v17 = vadd.f32 %v11510_v2, %v11386_v31  ;;  %v4972_v55 = vsub.f32 0.0, %v4427_v42 }
 0x6c4   : > { %v8635_v59 = vpop.eup %8634  ;;  %8654 = vpow2.f32 %v5221_v16  ;;  %v4435_v2 = vadd.f32 %v11522_v18, %v11386_v31 }
 0x6c5   : > { %v8637_v57 = vpop.eup %8636  ;;  %6768 = vst [vmem:[%s11019_s14 + $0x5c] sm:$0xff] %v7464_v51  ;;  %v7468_v13 = vpack.c.bf16 %v8635_v59, %v8633_v1  ;;  %8656 = vpow2.f32 %v5233_v12  ;;  %v4433_v1 = vadd.f32 %v11518_v19, %v11381_v21  ;;  %v4437_v59 = vadd.f32 %v11526_v43, %v11381_v21 }
 0x6c6   : > { %v8639_v10 = vpop.eup %8638  ;;  %v5589_v58 = vadd.f32 1.0, %v8637_v57  ;;  %8658 = vpow2.f32 %v5235_v6  ;;  %v11554_v39 = vpop.f32.mrb[232].mxu1  ;;  %v5303_v18 = vmul.f32 1.442695, %v4972_v55 }
 0x6c7   : > { %v8641_v35 = vpop.eup %8640  ;;  %6772 = vst [vmem:[%s11019_s14 + $0x78] sm:$0xff] %v7468_v13  ;;  %v5595_v46 = vadd.f32 1.0, %v8639_v10  ;;  %8660 = vpow2.f32 %v5247_v26  ;;  %v11558_v5 = vpop.f32.mrb[233].mxu1  ;;  %v4973_v13 = vsub.f32 0.0, %v4429_v17 }
 0x6c8   : > { %v8643_v9 = vpop.eup %8642  ;;  %8662 = vrcp.f32 %v5589_v58  ;;  %v11561_v40 = vpop.f32.mrb[234].mxu1  ;;  %v4439_v58 = vadd.f32 %v11529_v61, %v11386_v31 }
 0x6c9   : > { %v8645_v7 = vpop.eup %8644  ;;  %v7472_v50 = vpack.c.bf16 %v8643_v9, %v8641_v35  ;;  %8664 = vrcp.f32 %v5595_v46  ;;  %v11563_v8 = vpop.f32.mrb[235].mxu1  ;;  %v4979_v35 = vsub.f32 0.0, %v4433_v1  ;;  %v4986_v9 = vsub.f32 0.0, %v4437_v59 }
 0x6ca   : > { %v8647_v52 = vpop.eup %8646  ;;  %8666 = vpow2.f32 %v5249_v3 }
 0x6cb   : > { %v8649_v45 = vpop.eup %8648  ;;  %6776 = vst [vmem:[%s11019_s14 + $0x94] sm:$0xff] %v7472_v50  ;;  %v7476_v28 = vpack.c.bf16 %v8647_v52, %v8645_v7  ;;  %8668 = vpow2.f32 %v5261_v53  ;;  %v4980_v53 = vsub.f32 0.0, %v4435_v2  ;;  %v5305_v50 = vmul.f32 1.442695, %v4973_v13 }
 0x6cc   : > { %v8651_v0 = vpop.eup %8650  ;;  %8670 = vpow2.f32 %v5263_v33  ;;  %v4987_v52 = vsub.f32 0.0, %v4439_v58  ;;  %v5331_v42 = vmul.f32 1.442695, %v4986_v9 }
 0x6cd   : > { %v8653_v20 = vpop.eup %8652  ;;  %6780 = vst [vmem:[%s11019_s14 + $0xb0] sm:$0xff] %v7476_v28  ;;  %v5596_v48 = vadd.f32 1.0, %v8651_v0  ;;  %8672 = vpow2.f32 %v5275_v29  ;;  %v4443_v29 = vadd.f32 %v11539_v27, %v11381_v21  ;;  %v5317_v0 = vmul.f32 1.442695, %v4979_v35 }
 0x6ce   : > { %v8655_v47 = vpop.eup %8654  ;;  %v5602_v63 = vadd.f32 1.0, %v8653_v20  ;;  %8674 = vpow2.f32 %v5277_v32  ;;  %v11570_v6 = vpop.f32.mrb[236].mxu1  ;;  %v4445_v32 = vadd.f32 %v11543_v54, %v11386_v31  ;;  %v4447_v20 = vadd.f32 %v11546_v37, %v11381_v21 }
 0x6cf   : > { %v8657_v44 = vpop.eup %8656  ;;  %8676 = vrcp.f32 %v5596_v48  ;;  %v5603_v14 = vadd.f32 1.0, %v8655_v47  ;;  %v11574_v51 = vpop.f32.mrb[237].mxu1  ;;  %v5319_v30 = vmul.f32 1.442695, %v4980_v53  ;;  %v4449_v47 = vadd.f32 %v11548_v25, %v11386_v31 }
 0x6d0   : > { %v8659_v16 = vpop.eup %8658  ;;  %8678 = vrcp.f32 %v5602_v63  ;;  %v5609_v36 = vadd.f32 1.0, %v8657_v44  ;;  %v11580_v38 = vpop.f32.mrb[238].mxu1  ;;  %v4993_v44 = vsub.f32 0.0, %v4443_v29  ;;  %v4453_v37 = vadd.f32 %v11554_v39, %v11381_v21 }
 0x6d1   : > { %v8661_v24 = vpop.eup %8660  ;;  %8680 = vrcp.f32 %v5603_v14  ;;  %v5610_v12 = vadd.f32 1.0, %v8659_v16  ;;  %v11582_v34 = vpop.f32.mrb[239].mxu1  ;;  %v4994_v17 = vsub.f32 0.0, %v4445_v32  ;;  %v5001_v55 = vsub.f32 0.0, %v4449_v47 }
 0x6d2   : > { %v8663_v41 = vpop.eup %8662  ;;  %8682 = vrcp.f32 %v5609_v36  ;;  %v5616_v11 = vadd.f32 1.0, %v8661_v24  ;;  %v5333_v36 = vmul.f32 1.442695, %v4987_v52  ;;  %v5007_v39 = vsub.f32 0.0, %v4453_v37 }
 0x6d3   : > { %v8665_v26 = vpop.eup %8664  ;;  %v7480_v23 = vpack.c.bf16 %v8663_v41, %v8649_v45  ;;  %8684 = vrcp.f32 %v5610_v12  ;;  %v5000_v12 = vsub.f32 0.0, %v4447_v20  ;;  %v5361_v58 = vmul.f32 1.442695, %v5001_v55 }
 0x6d4   : > { %v8667_v57 = vpop.eup %8666  ;;  %8686 = vrcp.f32 %v5616_v11  ;;  %v4469_v55 = vadd.f32 %v11582_v34, %v11386_v31 }
 0x6d5   : > { %v8669_v10 = vpop.eup %8668  ;;  %6784 = vst [vmem:[%s11019_s14 + $0xcc] sm:$0xff] %v7480_v23  ;;  %v5617_v19 = vadd.f32 1.0, %v8667_v57  ;;  %8688 = vpow2.f32 %v5289_v49  ;;  %v5347_v23 = vmul.f32 1.442695, %v4994_v17  ;;  %v5359_v13 = vmul.f32 1.442695, %v5000_v12 }
 0x6d6   : > { %v8671_v3 = vpop.eup %8670  ;;  %v5623_v60 = vadd.f32 1.0, %v8669_v10  ;;  %8690 = vpow2.f32 %v5291_v56  ;;  %v11591_v4 = vpop.f32.mrb[240].mxu1  ;;  %v5345_v56 = vmul.f32 1.442695, %v4993_v44 }
 0x6d7   : > { %v8673_v43 = vpop.eup %8672  ;;  %8692 = vrcp.f32 %v5617_v19  ;;  %v5624_v46 = vadd.f32 1.0, %v8671_v3  ;;  %v11595_v48 = vpop.f32.mrb[241].mxu1  ;;  %v4455_v3 = vadd.f32 %v11558_v5, %v11386_v31 }
 0x6d8   : > { %v8675_v33 = vpop.eup %8674  ;;  %8694 = vrcp.f32 %v5623_v60  ;;  %v5630_v7 = vadd.f32 1.0, %v8673_v43  ;;  %v11599_v54 = vpop.f32.mrb[242].mxu1  ;;  %v5373_v43 = vmul.f32 1.442695, %v5007_v39 }
 0x6d9   : > { %v8677_v15 = vpop.eup %8676  ;;  %8696 = vrcp.f32 %v5624_v46  ;;  %v5631_v61 = vadd.f32 1.0, %v8675_v33  ;;  %v11604_v14 = vpop.f32.mrb[243].mxu1  ;;  %v4457_v46 = vadd.f32 %v11561_v40, %v11381_v21  ;;  %v5008_v29 = vsub.f32 0.0, %v4455_v3 }
 0x6da   : > { %v8679_v45 = vpop.eup %8678  ;;  %v7484_v28 = vpack.c.bf16 %v8677_v15, %v8665_v26  ;;  %8698 = vrcp.f32 %v5630_v7  ;;  %v4459_v15 = vadd.f32 %v11563_v8, %v11386_v31 }
 0x6db   : > { %v8681_v27 = vpop.eup %8680  ;;  %8700 = vrcp.f32 %v5631_v61  ;;  %v5014_v40 = vsub.f32 0.0, %v4457_v46  ;;  %v5375_v47 = vmul.f32 1.442695, %v5008_v29  ;;  %v4477_v46 = vadd.f32 %v11599_v54, %v11381_v21 }
 0x6dc   : > { %v8683_v63 = vpop.eup %8682  ;;  %6788 = vst [vmem:[%s11019_s14 + $0xe8] sm:$0xff] %v7484_v28  ;;  %v7488_v22 = vpack.c.bf16 %v8681_v27, %v8679_v45  ;;  %8702 = vpow2.f32 %v5303_v18  ;;  %v4463_v28 = vadd.f32 %v11570_v6, %v11381_v21  ;;  %v4465_v6 = vadd.f32 %v11574_v51, %v11386_v31 }
 0x6dd   : > { %v8685_v16 = vpop.eup %8684  ;;  %8704 = vpow2.f32 %v5305_v50  ;;  %v4473_v51 = vadd.f32 %v11591_v4, %v11381_v21  ;;  %v4475_v4 = vadd.f32 %v11595_v48, %v11386_v31 }
 0x6de   : > { %v8687_v24 = vpop.eup %8686  ;;  %6792 = vst [vmem:[%s11019_s14 + $0x104] sm:$0xff] %v7488_v22  ;;  %v7492_v25 = vpack.c.bf16 %v8685_v16, %v8683_v63  ;;  %8706 = vpow2.f32 %v5317_v0  ;;  %v11608_v2 = vpop.f32.mrb[244].mxu1  ;;  %v5015_v63 = vsub.f32 0.0, %v4459_v15  ;;  %v5387_v16 = vmul.f32 1.442695, %v5014_v40 }
 0x6df   : > { %v8689_v49 = vpop.eup %8688  ;;  %8708 = vpow2.f32 %v5319_v30  ;;  %v11610_v10 = vpop.f32.mrb[245].mxu1  ;;  %v5036_v40 = vsub.f32 0.0, %v4475_v4 }
 0x6e0   : > { %v8691_v41 = vpop.eup %8690  ;;  %6796 = vst [vmem:[%s11019_s14 + $0x120] sm:$0xff] %v7492_v25  ;;  %v5637_v11 = vadd.f32 1.0, %v8689_v49  ;;  %8710 = vpow2.f32 %v5331_v42  ;;  %v11614_v60 = vpop.f32.mrb[246].mxu1  ;;  %v4467_v25 = vadd.f32 %v11580_v38, %v11381_v21 }
 0x6e1   : > { %v8693_v1 = vpop.eup %8692  ;;  %v5638_v26 = vadd.f32 1.0, %v8691_v41  ;;  %8712 = vpow2.f32 %v5333_v36  ;;  %v11619_v53 = vpop.f32.mrb[247].mxu1 }
 0x6e2   : > { %v8695_v59 = vpop.eup %8694  ;;  %v7496_v57 = vpack.c.bf16 %v8693_v1, %v8687_v24  ;;  %8714 = vrcp.f32 %v5637_v11  ;;  %v5021_v24 = vsub.f32 0.0, %v4463_v28  ;;  %v5389_v1 = vmul.f32 1.442695, %v5015_v63 }
 0x6e3   : > { %v8697_v19 = vpop.eup %8696  ;;  %8716 = vrcp.f32 %v5638_v26  ;;  %v5022_v26 = vsub.f32 0.0, %v4465_v6 }
 0x6e4   : > { %v8699_v18 = vpop.eup %8698  ;;  %6800 = vst [vmem:[%s11019_s14 + $0x13c] sm:$0xff] %v7496_v57  ;;  %v7500_v35 = vpack.c.bf16 %v8697_v19, %v8695_v59  ;;  %8718 = vpow2.f32 %v5345_v56  ;;  %v5401_v59 = vmul.f32 1.442695, %v5021_v24  ;;  %v5028_v57 = vsub.f32 0.0, %v4467_v25 }
 0x6e5   : > { %v8701_v9 = vpop.eup %8700  ;;  %8720 = vpow2.f32 %v5347_v23 }
 0x6e6   : > { %v8703_v33 = vpop.eup %8702  ;;  %6804 = vst [vmem:[%s11019_s14 + $0x158] sm:$0xff] %v7500_v35  ;;  %v7504_v7 = vpack.c.bf16 %v8701_v9, %v8699_v18  ;;  %8722 = vpow2.f32 %v5359_v13  ;;  %v11627_v0 = vpop.f32.mrb[248].mxu1  ;;  %v5415_v15 = vmul.f32 1.442695, %v5028_v57 }
 0x6e7   : > { %v8705_v5 = vpop.eup %8704  ;;  %v5644_v50 = vadd.f32 1.0, %v8703_v33  ;;  %8724 = vpow2.f32 %v5361_v58  ;;  %v11629_v30 = vpop.f32.mrb[249].mxu1  ;;  %v5029_v58 = vsub.f32 0.0, %v4469_v55 }
 0x6e8   : > { %v8707_v61 = vpop.eup %8706  ;;  %6808 = vst [vmem:[%s11019_s14 + $0x174] sm:$0xff] %v7504_v7  ;;  %v5645_v52 = vadd.f32 1.0, %v8705_v5  ;;  %8726 = vpow2.f32 %v5373_v43  ;;  %v11631_v22 = vpop.f32.mrb[250].mxu1  ;;  %v5035_v43 = vsub.f32 0.0, %v4473_v51  ;;  %v5403_v7 = vmul.f32 1.442695, %v5022_v26 }
 0x6e9   : > { %v8709_v32 = vpop.eup %8708  ;;  %8728 = vrcp.f32 %v5644_v50  ;;  %v5651_v45 = vadd.f32 1.0, %v8707_v61  ;;  %v11635_v36 = vpop.f32.mrb[251].mxu1  ;;  %v4479_v5 = vadd.f32 %v11604_v14, %v11386_v31  ;;  %v4483_v61 = vadd.f32 %v11608_v2, %v11381_v21 }
 0x6ea   : > { %v8711_v20 = vpop.eup %8710  ;;  %8730 = vrcp.f32 %v5645_v52  ;;  %v5652_v27 = vadd.f32 1.0, %v8709_v32  ;;  %v5417_v52 = vmul.f32 1.442695, %v5029_v58  ;;  %v4485_v32 = vadd.f32 %v11610_v10, %v11386_v31 }
 0x6eb   : > { %v8713_v42 = vpop.eup %8712  ;;  %8732 = vrcp.f32 %v5651_v45  ;;  %v5658_v8 = vadd.f32 1.0, %v8711_v20  ;;  %v5429_v28 = vmul.f32 1.442695, %v5035_v43  ;;  %v5042_v20 = vsub.f32 0.0, %v4477_v46 }
 0x6ec   : > { %v8715_v44 = vpop.eup %8714  ;;  %8734 = vrcp.f32 %v5652_v27  ;;  %v5659_v37 = vadd.f32 1.0, %v8713_v42  ;;  %v5043_v42 = vsub.f32 0.0, %v4479_v5  ;;  %v5431_v10 = vmul.f32 1.442695, %v5036_v40 }
 0x6ed   : > { %v8717_v17 = vpop.eup %8716  ;;  %8736 = vrcp.f32 %v5658_v8  ;;  %v5443_v25 = vmul.f32 1.442695, %v5042_v20  ;;  %v4497_v20 = vadd.f32 %v11631_v22, %v11381_v21 }
 0x6ee   : > { %v8719_v12 = vpop.eup %8718  ;;  %v7508_v49 = vpack.c.bf16 %v8717_v17, %v8715_v44  ;;  %8738 = vrcp.f32 %v5659_v37  ;;  %v11644_v13 = vpop.f32.mrb[252].mxu1  ;;  %v5445_v55 = vmul.f32 1.442695, %v5043_v42 }
 0x6ef   : > { %v8721_v41 = vpop.eup %8720  ;;  %v5665_v11 = vadd.f32 1.0, %v8719_v12  ;;  %8740 = vpow2.f32 %v5375_v47  ;;  %v11648_v3 = vpop.f32.mrb[253].mxu1  ;;  %v5049_v47 = vsub.f32 0.0, %v4483_v61  ;;  %v3593_v61 = vsub.s32 5, %v12035_v62 }
 0x6f0   : > { %v8723_v56 = vpop.eup %8722  ;;  %6812 = vst [vmem:[%s11019_s14 + $0x190] sm:$0xff] %v7508_v49  ;;  %v5666_v39 = vadd.f32 1.0, %v8721_v41  ;;  %8742 = vpow2.f32 %v5387_v16  ;;  %v11652_v9 = vpop.f32.mrb[254].mxu1  ;;  %v5050_v16 = vsub.f32 0.0, %v4485_v32  ;;  %v4487_v41 = vadd.f32 %v11614_v60, %v11381_v21 }
 0x6f1   : > { %v8725_v23 = vpop.eup %8724  ;;  %8744 = vrcp.f32 %v5665_v11  ;;  %v5672_v38 = vadd.f32 1.0, %v8723_v56  ;;  %v11656_v50 = vpop.f32.mrb[255].mxu1 }
 0x6f2   : > { %v8727_v34 = vpop.eup %8726  ;;  %8746 = vrcp.f32 %v5666_v39  ;;  %v5673_v19 = vadd.f32 1.0, %v8725_v23  ;;  %v5457_v39 = vmul.f32 1.442695, %v5049_v47  ;;  %v5459_v23 = vmul.f32 1.442695, %v5050_v16 }
 0x6f3   : > { %v8729_v18 = vpop.eup %8728  ;;  %8748 = vrcp.f32 %v5672_v38  ;;  %v5679_v35 = vadd.f32 1.0, %v8727_v34  ;;  %v9099_v47 = vld [vmem:[%s12008_s9] sm:$0x7f] }
 0x6f4   : > { %v8731_v33 = vpop.eup %8730  ;;  %8750 = vrcp.f32 %v5673_v19  ;;  %v5056_v19 = vsub.f32 0.0, %v4487_v41 }
 0x6f5   : > { %v8733_v48 = vpop.eup %8732  ;;  %v7512_v29 = vpack.c.bf16 %v8731_v33, %v8729_v18  ;;  %8752 = vrcp.f32 %v5679_v35 }
 0x6f6   : > { %v8735_v54 = vpop.eup %8734  ;;  %8754 = vpow2.f32 %v5389_v1  ;;  %v11664_v63 = vpop.f32.mrb[0].mxu1  ;;  %v4489_v1 = vadd.f32 %v11619_v53, %v11386_v31  ;;  %v4493_v53 = vadd.f32 %v11627_v0, %v11381_v21  ;;  %v5471_v40 = vmul.f32 1.442695, %v5056_v19 }
 0x6f7   : > { %v8737_v45 = vpop.eup %8736  ;;  %6816 = vst [vmem:[%s11019_s14 + $0x1ac] sm:$0xff] %v7512_v29  ;;  %v7516_v14 = vpack.c.bf16 %v8735_v54, %v8733_v48  ;;  %8756 = vpow2.f32 %v5401_v59  ;;  %v11666_v6 = vpop.f32.mrb[1].mxu1 }
 0x6f8   : > { %v8739_v27 = vpop.eup %8738  ;;  %8758 = vpow2.f32 %v5403_v7  ;;  %v11669_v12 = vpop.f32.mrb[2].mxu1  ;;  %v5057_v58 = vsub.f32 0.0, %v4489_v1  ;;  %v3589_v7 = vsub.s32 4, %v12035_v62  ;;  %v4499_v62 = vadd.f32 %v11635_v36, %v11386_v31 }
 0x6f9   : > { %v8741_v8 = vpop.eup %8740  ;;  %6820 = vst [vmem:[%s11019_s14 + $0x1c8] sm:$0xff] %v7516_v14  ;;  %v7520_v2 = vpack.c.bf16 %v8739_v27, %v8737_v45  ;;  %8760 = vpow2.f32 %v5415_v15  ;;  %v11673_v11 = vpop.f32.mrb[3].mxu1  ;;  %v4495_v15 = vadd.f32 %v11629_v30, %v11386_v31  ;;  %v4503_v30 = vadd.f32 %v11644_v13, %v11381_v21 }
 0x6fa   : > { %v8743_v44 = vpop.eup %8742  ;;  %v5680_v37 = vadd.f32 1.0, %v8741_v8  ;;  %8762 = vpow2.f32 %v5417_v52  ;;  %v5473_v32 = vmul.f32 1.442695, %v5057_v58  ;;  %v11707_v36 = vrot.slane %v9099_v47, %v3593_v61 }
 0x6fb   : > { %v8745_v17 = vpop.eup %8744  ;;  %6824 = vst [vmem:[%s11019_s14 + $0x1e4] sm:$0xff] %v7520_v2  ;;  %v5686_v24 = vadd.f32 1.0, %v8743_v44  ;;  %8764 = vpow2.f32 %v5429_v28  ;;  %v5063_v28 = vsub.f32 0.0, %v4493_v53  ;;  %v5064_v2 = vsub.f32 0.0, %v4495_v15 }
 0x6fc   : > { %v8747_v49 = vpop.eup %8746  ;;  %8766 = vrcp.f32 %v5680_v37  ;;  %v11702_v44 = vrot.slane %v9099_v47, %v3589_v7 }
 0x6fd   : > { %v8749_v51 = vpop.eup %8748  ;;  %v7524_v56 = vpack.c.bf16 %v8747_v49, %v8745_v17  ;;  %8768 = vrcp.f32 %v5686_v24  ;;  %v5485_v24 = vmul.f32 1.442695, %v5063_v28 }
 0x6fe   : > { %v8751_v26 = vpop.eup %8750  ;;  %8770 = vpow2.f32 %v5431_v10  ;;  %v11679_v4 = vpop.f32.mrb[4].mxu1  ;;  %v4505_v10 = vadd.f32 %v11648_v3, %v11386_v31 }
 0x6ff   : > { %v8753_v38 = vpop.eup %8752  ;;  %6828 = vst [vmem:[%s11019_s14 + $0x200] sm:$0xff] %v7524_v56  ;;  %v7528_v59 = vpack.c.bf16 %v8751_v26, %v8749_v51  ;;  %8772 = vpow2.f32 %v5443_v25  ;;  %v11683_v43 = vpop.f32.mrb[5].mxu1  ;;  %v5070_v25 = vsub.f32 0.0, %v4497_v20  ;;  %v5071_v51 = vsub.f32 0.0, %v4499_v62 }
 0x700   : > { %v8755_v57 = vpop.eup %8754  ;;  %8774 = vpow2.f32 %v5445_v55  ;;  %v11686_v5 = vpop.f32.mrb[6].mxu1  ;;  %v5077_v56 = vsub.f32 0.0, %v4503_v30  ;;  %v5487_v26 = vmul.f32 1.442695, %v5064_v2 }
 0x701   : > { %v8757_v60 = vpop.eup %8756  ;;  %6832 = vst [vmem:[%s11019_s14 + $0x21c] sm:$0xff] %v7528_v59  ;;  %v5687_v34 = vadd.f32 1.0, %v8755_v57  ;;  %8776 = vpow2.f32 %v5457_v39  ;;  %v11691_v54 = vpop.f32.mrb[7].mxu1 }
 0x702   : > { %v8759_v18 = vpop.eup %8758  ;;  %v5693_v35 = vadd.f32 1.0, %v8757_v60  ;;  %8778 = vpow2.f32 %v5459_v23  ;;  %v4507_v23 = vadd.f32 %v11652_v9, %v11381_v21  ;;  %v5078_v60 = vsub.f32 0.0, %v4505_v10 }
 0x703   : > { %v8761_v46 = vpop.eup %8760  ;;  %8780 = vrcp.f32 %v5687_v34  ;;  %v5694_v33 = vadd.f32 1.0, %v8759_v18  ;;  %v4509_v34 = vadd.f32 %v11656_v50, %v11386_v31  ;;  %v5499_v18 = vmul.f32 1.442695, %v5070_v25 }
 0x704   : > { %v8763_v48 = vpop.eup %8762  ;;  %8782 = vrcp.f32 %v5693_v35  ;;  %v5700_v29 = vadd.f32 1.0, %v8761_v46  ;;  %v4546_v35 = vadd.f32 %v11664_v63, %v11702_v44  ;;  %v5501_v21 = vmul.f32 1.442695, %v5071_v51 }
 0x705   : > { %v8765_v0 = vpop.eup %8764  ;;  %8784 = vrcp.f32 %v5694_v33  ;;  %v5701_v52 = vadd.f32 1.0, %v8763_v48  ;;  %v5513_v9 = vmul.f32 1.442695, %v5077_v56  ;;  %v4548_v46 = vadd.f32 %v11666_v6, %v11707_v36 }
 0x706   : > { %v8767_v45 = vpop.eup %8766  ;;  %8786 = vrcp.f32 %v5700_v29  ;;  %v5707_v14 = vadd.f32 1.0, %v8765_v0  ;;  %v11709_v16 = vpop.f32.mrb[8].mxu1  ;;  %v5084_v31 = vsub.f32 0.0, %v4507_v23  ;;  %v4550_v50 = vadd.f32 %v11669_v12, %v11702_v44 }
 0x707   : > { %v8769_v27 = vpop.eup %8768  ;;  %v7532_v42 = vpack.c.bf16 %v8767_v45, %v8753_v38  ;;  %8788 = vrcp.f32 %v5701_v52  ;;  %v11711_v49 = vpop.f32.mrb[9].mxu1  ;;  %v5515_v63 = vmul.f32 1.442695, %v5078_v60  ;;  %v5085_v29 = vsub.f32 0.0, %v4509_v34 }
 0x708   : > { %v8771_v8 = vpop.eup %8770  ;;  %8790 = vrcp.f32 %v5707_v14  ;;  %v11713_v39 = vpop.f32.mrb[10].mxu1  ;;  %v4869_v6 = vsub.f32 0.0, %v4546_v35  ;;  %v5527_v28 = vmul.f32 1.442695, %v5084_v31  ;;  %v4876_v20 = vsub.f32 0.0, %v4550_v50 }
 0x709   : > { %v8773_v37 = vpop.eup %8772  ;;  %6836 = vst [vmem:[%s11019_s14 + $0x238] sm:$0xff] %v7532_v42  ;;  %v5708_v22 = vadd.f32 1.0, %v8771_v8  ;;  %8792 = vpow2.f32 %v5471_v40  ;;  %v11717_v38 = vpop.f32.mrb[11].mxu1  ;;  %v5529_v30 = vmul.f32 1.442695, %v5085_v29  ;;  %v4552_v10 = vadd.f32 %v11673_v11, %v11707_v36 }
 0x70a   : > { %v8775_v13 = vpop.eup %8774  ;;  %v5714_v17 = vadd.f32 1.0, %v8773_v37  ;;  %8794 = vpow2.f32 %v5473_v32  ;;  %v4870_v32 = vsub.f32 0.0, %v4548_v46  ;;  %v5097_v47 = vmul.f32 1.442695, %v4869_v6 }
 0x70b   : > { %v8777_v55 = vpop.eup %8776  ;;  %8796 = vrcp.f32 %v5708_v22  ;;  %v5715_v41 = vadd.f32 1.0, %v8775_v13  ;;  %v4556_v25 = vadd.f32 %v11679_v4, %v11702_v44  ;;  %v4558_v23 = vadd.f32 %v11683_v43, %v11707_v36 }
 0x70c   : > { %v8779_v1 = vpop.eup %8778  ;;  %8798 = vrcp.f32 %v5714_v17  ;;  %v5721_v3 = vadd.f32 1.0, %v8777_v55  ;;  %v5099_v22 = vmul.f32 1.442695, %v4870_v32  ;;  %v4562_v50 = vadd.f32 %v11691_v54, %v11707_v36 }
 0x70d   : > { %v8781_v59 = vpop.eup %8780  ;;  %8800 = vrcp.f32 %v5715_v41  ;;  %v5722_v57 = vadd.f32 1.0, %v8779_v1  ;;  %v4883_v60 = vsub.f32 0.0, %v4556_v25  ;;  %v4884_v46 = vsub.f32 0.0, %v4558_v23 }
 0x70e   : > { %v8783_v19 = vpop.eup %8782  ;;  %v7536_v58 = vpack.c.bf16 %v8781_v59, %v8769_v27  ;;  %8802 = vrcp.f32 %v5721_v3  ;;  %v11728_v15 = vpop.f32.mrb[12].mxu1  ;;  %v4568_v6 = vadd.f32 %v11711_v49, %v11707_v36  ;;  %v4570_v54 = vadd.f32 %v11713_v39, %v11702_v44 }
 0x70f   : > { %v8785_v53 = vpop.eup %8784  ;;  %8804 = vrcp.f32 %v5722_v57  ;;  %v11731_v52 = vpop.f32.mrb[13].mxu1  ;;  %v5125_v31 = vmul.f32 1.442695, %v4883_v60  ;;  %v4572_v39 = vadd.f32 %v11717_v38, %v11707_v36 }
 0x710   : > { %v8787_v33 = vpop.eup %8786  ;;  %6840 = vst [vmem:[%s11019_s14 + $0x254] sm:$0xff] %v7536_v58  ;;  %v7540_v7 = vpack.c.bf16 %v8785_v53, %v8783_v19  ;;  %8806 = vpow2.f32 %v5485_v24  ;;  %v11733_v45 = vpop.f32.mrb[14].mxu1  ;;  %v5111_v24 = vmul.f32 1.442695, %v4876_v20  ;;  %v5127_v20 = vmul.f32 1.442695, %v4884_v46 }
 0x711   : > { %v8789_v48 = vpop.eup %8788  ;;  %8808 = vpow2.f32 %v5487_v26  ;;  %v11736_v27 = vpop.f32.mrb[15].mxu1  ;;  %v4877_v26 = vsub.f32 0.0, %v4552_v10  ;;  %v4580_v38 = vadd.f32 %v11733_v45, %v11702_v44 }
 0x712   : > { %v8791_v61 = vpop.eup %8790  ;;  %6844 = vst [vmem:[%s11019_s14 + $0x270] sm:$0xff] %v7540_v7  ;;  %v7544_v0 = vpack.c.bf16 %v8789_v48, %v8787_v33  ;;  %8810 = vpow2.f32 %v5499_v18  ;;  %v4560_v18 = vadd.f32 %v11686_v5, %v11702_v44  ;;  %v4566_v5 = vadd.f32 %v11709_v16, %v11702_v44 }
 0x713   : > { %v8793_v40 = vpop.eup %8792  ;;  %8812 = vpow2.f32 %v5501_v21 }
 0x714   : > { %v8795_v12 = vpop.eup %8794  ;;  %6848 = vst [vmem:[%s11019_s14 + $0x28c] sm:$0xff] %v7544_v0  ;;  %v5728_v14 = vadd.f32 1.0, %v8793_v40  ;;  %8814 = vpow2.f32 %v5513_v9  ;;  %v5113_v9 = vmul.f32 1.442695, %v4877_v26 }
 0x715   : > { %v8797_v42 = vpop.eup %8796  ;;  %v5729_v62 = vadd.f32 1.0, %v8795_v12  ;;  %8816 = vpow2.f32 %v5515_v63  ;;  %v4890_v63 = vsub.f32 0.0, %v4560_v18 }
 0x716   : > { %v8799_v8 = vpop.eup %8798  ;;  %v7548_v2 = vpack.c.bf16 %v8797_v42, %v8791_v61  ;;  %8818 = vrcp.f32 %v5728_v14  ;;  %v11743_v41 = vpop.f32.mrb[16].mxu1  ;;  %v4891_v42 = vsub.f32 0.0, %v4562_v50 }
 0x717   : > { %v8801_v37 = vpop.eup %8800  ;;  %8820 = vrcp.f32 %v5729_v62  ;;  %v11746_v1 = vpop.f32.mrb[17].mxu1 }
 0x718   : > { %v8803_v13 = vpop.eup %8802  ;;  %6852 = vst [vmem:[%s11019_s14 + $0x2a8] sm:$0xff] %v7548_v2  ;;  %v7552_v17 = vpack.c.bf16 %v8801_v37, %v8799_v8  ;;  %8822 = vpow2.f32 %v5527_v28  ;;  %v11750_v59 = vpop.f32.mrb[18].mxu1  ;;  %v5139_v8 = vmul.f32 1.442695, %v4890_v63  ;;  %v4897_v2 = vsub.f32 0.0, %v4566_v5 }
 0x719   : > { %v8805_v55 = vpop.eup %8804  ;;  %8824 = vpow2.f32 %v5529_v30  ;;  %v11753_v34 = vpop.f32.mrb[19].mxu1 }
 0x71a   : > { %v8807_v51 = vpop.eup %8806  ;;  %6856 = vst [vmem:[%s11019_s14 + $0x2c4] sm:$0xff] %v7552_v17  ;;  %v7556_v56 = vpack.c.bf16 %v8805_v55, %v8803_v13  ;;  %8826 = vpow2.f32 %v5097_v47  ;;  %v4904_v17 = vsub.f32 0.0, %v4570_v54  ;;  %v5141_v55 = vmul.f32 1.442695, %v4891_v42 }
 0x71b   : > { %v8809_v11 = vpop.eup %8808  ;;  %v5735_v3 = vadd.f32 1.0, %v8807_v51  ;;  %8828 = vpow2.f32 %v5099_v22  ;;  %v4898_v22 = vsub.f32 0.0, %v4568_v6  ;;  %v4578_v51 = vadd.f32 %v11731_v52, %v11707_v36 }
 0x71c   : > { %v8811_v4 = vpop.eup %8810  ;;  %6860 = vst [vmem:[%s11019_s14 + $0x2e0] sm:$0xff] %v7556_v56  ;;  %v5736_v57 = vadd.f32 1.0, %v8809_v11  ;;  %8830 = vpow2.f32 %v5111_v24  ;;  %v4576_v24 = vadd.f32 %v11728_v15, %v11702_v44  ;;  %v4905_v15 = vsub.f32 0.0, %v4572_v39 }
 0x71d   : > { %v8813_v19 = vpop.eup %8812  ;;  %8832 = vrcp.f32 %v5735_v3  ;;  %v5742_v58 = vadd.f32 1.0, %v8811_v4  ;;  %v5153_v3 = vmul.f32 1.442695, %v4897_v2  ;;  %v5155_v4 = vmul.f32 1.442695, %v4898_v22 }
 0x71e   : > { %v8815_v35 = vpop.eup %8814  ;;  %8834 = vrcp.f32 %v5736_v57  ;;  %v5743_v53 = vadd.f32 1.0, %v8813_v19  ;;  %v11761_v29 = vpop.f32.mrb[20].mxu1  ;;  %v4582_v57 = vadd.f32 %v11736_v27, %v11707_v36  ;;  %v4911_v18 = vsub.f32 0.0, %v4576_v24 }
 0x71f   : > { %v8817_v21 = vpop.eup %8816  ;;  %8836 = vrcp.f32 %v5742_v58  ;;  %v5749_v43 = vadd.f32 1.0, %v8815_v35  ;;  %v11765_v40 = vpop.f32.mrb[21].mxu1  ;;  %v5167_v58 = vmul.f32 1.442695, %v4904_v17  ;;  %v4918_v27 = vsub.f32 0.0, %v4580_v38 }
 0x720   : > { %v8819_v33 = vpop.eup %8818  ;;  %8838 = vrcp.f32 %v5743_v53  ;;  %v5750_v7 = vadd.f32 1.0, %v8817_v21  ;;  %v11769_v14 = vpop.f32.mrb[22].mxu1  ;;  %v4912_v53 = vsub.f32 0.0, %v4578_v51  ;;  %v5181_v63 = vmul.f32 1.442695, %v4911_v18 }
 0x721   : > { %v8821_v48 = vpop.eup %8820  ;;  %8840 = vrcp.f32 %v5749_v43  ;;  %v11772_v62 = vpop.f32.mrb[23].mxu1  ;;  %v4592_v51 = vadd.f32 %v11753_v34, %v11707_v36  ;;  %v4598_v34 = vadd.f32 %v11765_v40, %v11707_v36  ;;  %v4600_v18 = vadd.f32 %v11769_v14, %v11702_v44 }
 0x722   : > { %v8823_v61 = vpop.eup %8822  ;;  %v7560_v0 = vpack.c.bf16 %v8821_v48, %v8819_v33  ;;  %8842 = vrcp.f32 %v5750_v7  ;;  %v5169_v7 = vmul.f32 1.442695, %v4905_v15 }
 0x723   : > { %v8825_v32 = vpop.eup %8824  ;;  %v5756_v12 = vadd.f32 1.0, %v8823_v61  ;;  %8844 = vpow2.f32 %v5113_v9  ;;  %v5183_v61 = vmul.f32 1.442695, %v4912_v53 }
 0x724   : > { %v8827_v28 = vpop.eup %8826  ;;  %6864 = vst [vmem:[%s11019_s14 + $0x2fc] sm:$0xff] %v7560_v0  ;;  %v5757_v16 = vadd.f32 1.0, %v8825_v32  ;;  %8846 = vpow2.f32 %v5125_v31  ;;  %v4919_v31 = vsub.f32 0.0, %v4582_v57  ;;  %v5195_v32 = vmul.f32 1.442695, %v4918_v27 }
 0x725   : > { %v8829_v30 = vpop.eup %8828  ;;  %8848 = vrcp.f32 %v5756_v12  ;;  %v5541_v49 = vadd.f32 1.0, %v8827_v28  ;;  %v4586_v12 = vadd.f32 %v11743_v41, %v11702_v44  ;;  %v4596_v57 = vadd.f32 %v11761_v29, %v11702_v44 }
 0x726   : > { %v8831_v47 = vpop.eup %8830  ;;  %8850 = vrcp.f32 %v5757_v16  ;;  %v5542_v37 = vadd.f32 1.0, %v8829_v30  ;;  %v11782_v26 = vpop.f32.mrb[24].mxu1  ;;  %v5197_v16 = vmul.f32 1.442695, %v4919_v31 }
 0x727   : > { %v8833_v10 = vpop.eup %8832  ;;  %8852 = vrcp.f32 %v5541_v49  ;;  %v5548_v13 = vadd.f32 1.0, %v8831_v47  ;;  %v11786_v60 = vpop.f32.mrb[25].mxu1  ;;  %v4925_v22 = vsub.f32 0.0, %v4586_v12  ;;  %v4939_v31 = vsub.f32 0.0, %v4596_v57 }
 0x728   : > { %v8835_v25 = vpop.eup %8834  ;;  %8854 = vrcp.f32 %v5542_v37  ;;  %v11789_v35 = vpop.f32.mrb[26].mxu1 }
 0x729   : > { %v8837_v56 = vpop.eup %8836  ;;  %v7564_v11 = vpack.c.bf16 %v8835_v25, %v8833_v10  ;;  %8856 = vrcp.f32 %v5548_v13  ;;  %v11791_v21 = vpop.f32.mrb[27].mxu1 }
 0x72a   : > { %v8839_v23 = vpop.eup %8838  ;;  %8858 = vpow2.f32 %v5127_v20  ;;  %v4588_v20 = vadd.f32 %v11746_v1, %v11707_v36  ;;  %v4590_v1 = vadd.f32 %v11750_v59, %v11702_v44 }
 0x72b   : > { %v8841_v52 = vpop.eup %8840  ;;  %6868 = vst [vmem:[%s11019_s14 + $0x318] sm:$0xff] %v7564_v11  ;;  %v7568_v19 = vpack.c.bf16 %v8839_v23, %v8837_v56  ;;  %8860 = vpow2.f32 %v5139_v8 }
 0x72c   : > { %v8843_v45 = vpop.eup %8842  ;;  %8862 = vpow2.f32 %v5141_v55  ;;  %v4926_v13 = vsub.f32 0.0, %v4588_v20  ;;  %v4932_v38 = vsub.f32 0.0, %v4590_v1  ;;  %v4612_v1 = vadd.f32 %v11791_v21, %v11707_v36 }
 0x72d   : > { %v8845_v43 = vpop.eup %8844  ;;  %6872 = vst [vmem:[%s11019_s14 + $0x334] sm:$0xff] %v7568_v19  ;;  %v7572_v9 = vpack.c.bf16 %v8843_v45, %v8841_v52  ;;  %8864 = vpow2.f32 %v5153_v3  ;;  %v5209_v3 = vmul.f32 1.442695, %v4925_v22 }
 0x72e   : > { %v8847_v46 = vpop.eup %8846  ;;  %v5549_v33 = vadd.f32 1.0, %v8845_v43  ;;  %8866 = vpow2.f32 %v5155_v4  ;;  %v11797_v54 = vpop.f32.mrb[28].mxu1  ;;  %v5211_v15 = vmul.f32 1.442695, %v4926_v13  ;;  %v4933_v43 = vsub.f32 0.0, %v4592_v51 }
 0x72f   : > { %v8849_v50 = vpop.eup %8848  ;;  %6876 = vst [vmem:[%s11019_s14 + $0x350] sm:$0xff] %v7572_v9  ;;  %v5555_v48 = vadd.f32 1.0, %v8847_v46  ;;  %8868 = vpow2.f32 %v5167_v58  ;;  %v11801_v42 = vpop.f32.mrb[29].mxu1  ;;  %v4602_v46 = vadd.f32 %v11772_v62, %v11707_v36  ;;  %v5223_v40 = vmul.f32 1.442695, %v4932_v38 }
 0x730   : > { %v8851_v5 = vpop.eup %8850  ;;  %8870 = vrcp.f32 %v5549_v33  ;;  %v11804_v8 = vpop.f32.mrb[30].mxu1 }
 0x731   : > { %v8853_v0 = vpop.eup %8852  ;;  %v7576_v6 = vpack.c.bf16 %v8851_v5, %v8849_v50  ;;  %8872 = vrcp.f32 %v5555_v48  ;;  %v11806_v41 = vpop.f32.mrb[31].mxu1  ;;  %v4940_v48 = vsub.f32 0.0, %v4598_v34  ;;  %v4947_v12 = vsub.f32 0.0, %v4602_v46 }
 0x732   : > { %v8855_v28 = vpop.eup %8854  ;;  %8874 = vpow2.f32 %v5169_v7  ;;  %v4618_v46 = vadd.f32 %v11801_v42, %v11707_v36 }
 0x733   : > { %v8857_v30 = vpop.eup %8856  ;;  %6880 = vst [vmem:[%s11019_s14 + $0x36c] sm:$0xff] %v7576_v6  ;;  %v7453_v49 = vpack.c.bf16 %v8855_v28, %v8853_v0  ;;  %8876 = vpow2.f32 %v5181_v63  ;;  %v4946_v63 = vsub.f32 0.0, %v4600_v18  ;;  %v5225_v0 = vmul.f32 1.442695, %v4933_v43 }
 0x734   : > { %v8859_v2 = vpop.eup %8858  ;;  %8878 = vpow2.f32 %v5183_v61  ;;  %v4606_v6 = vadd.f32 %v11782_v26, %v11702_v44  ;;  %v4608_v28 = vadd.f32 %v11786_v60, %v11707_v36 }
 0x735   : > { %v8861_v47 = vpop.eup %8860  ;;  %6756 = vst [vmem:[%s11019_s14 + $0x10] sm:$0xff] %v7453_v49  ;;  %v5556_v37 = vadd.f32 1.0, %v8859_v2  ;;  %8880 = vpow2.f32 %v5195_v32  ;;  %v5237_v49 = vmul.f32 1.442695, %v4939_v31  ;;  %v4610_v2 = vadd.f32 %v11789_v35, %v11702_v44 }
 0x736   : > { %v8863_v39 = vpop.eup %8862  ;;  %v5562_v10 = vadd.f32 1.0, %v8861_v47  ;;  %8882 = vpow2.f32 %v5197_v16  ;;  %v11813_v23 = vpop.f32.mrb[32].mxu1  ;;  %v5251_v22 = vmul.f32 1.442695, %v4946_v63  ;;  %v4953_v13 = vsub.f32 0.0, %v4606_v6 }
 0x737   : > { %v8865_v17 = vpop.eup %8864  ;;  %8884 = vrcp.f32 %v5556_v37  ;;  %v5563_v24 = vadd.f32 1.0, %v8863_v39  ;;  %v11817_v52 = vpop.f32.mrb[33].mxu1  ;;  %v5239_v37 = vmul.f32 1.442695, %v4940_v48  ;;  %v4616_v35 = vadd.f32 %v11797_v54, %v11702_v44 }
 0x738   : > { %v8867_v25 = vpop.eup %8866  ;;  %8886 = vrcp.f32 %v5562_v10  ;;  %v5569_v55 = vadd.f32 1.0, %v8865_v17  ;;  %v11823_v45 = vpop.f32.mrb[34].mxu1  ;;  %v4622_v6 = vadd.f32 %v11806_v41, %v11707_v36 }
 0x739   : > { %v8869_v56 = vpop.eup %8868  ;;  %8888 = vrcp.f32 %v5563_v24  ;;  %v5570_v11 = vadd.f32 1.0, %v8867_v25  ;;  %v11825_v9 = vpop.f32.mrb[35].mxu1  ;;  %v5253_v25 = vmul.f32 1.442695, %v4947_v12  ;;  %v4967_v54 = vsub.f32 0.0, %v4616_v35 }
 0x73a   : > { %v8871_v59 = vpop.eup %8870  ;;  %8890 = vrcp.f32 %v5569_v55  ;;  %v5576_v4 = vadd.f32 1.0, %v8869_v56  ;;  %v4954_v55 = vsub.f32 0.0, %v4608_v28  ;;  %v4960_v56 = vsub.f32 0.0, %v4610_v2 }
 0x73b   : > { %v8873_v19 = vpop.eup %8872  ;;  %v7457_v58 = vpack.c.bf16 %v8871_v59, %v8857_v30  ;;  %8892 = vrcp.f32 %v5570_v11  ;;  %v5293_v31 = vmul.f32 1.442695, %v4967_v54 }
 0x73c   : > { %v8875_v53 = vpop.eup %8874  ;;  %8894 = vrcp.f32 %v5576_v4  ;;  %v5265_v4 = vmul.f32 1.442695, %v4953_v13 }
 0x73d   : > { %v8877_v27 = vpop.eup %8876  ;;  %6761 = vst [vmem:[%s11019_s14 + $0x2c] sm:$0xff] %v7457_v58  ;;  %v5577_v29 = vadd.f32 1.0, %v8875_v53  ;;  %8896 = vpow2.f32 %v5209_v3  ;;  %v4961_v3 = vsub.f32 0.0, %v4612_v1  ;;  %v5279_v53 = vmul.f32 1.442695, %v4960_v56 }
 0x73e   : > { %v8879_v33 = vpop.eup %8878  ;;  %v5583_v7 = vadd.f32 1.0, %v8877_v27  ;;  %8898 = vpow2.f32 %v5211_v15  ;;  %v11834_v16 = vpop.f32.mrb[36].mxu1  ;;  %v4975_v1 = vsub.f32 0.0, %v4622_v6 }
 0x73f   : > { %v8881_v14 = vpop.eup %8880  ;;  %8900 = vrcp.f32 %v5577_v29  ;;  %v5584_v50 = vadd.f32 1.0, %v8879_v33  ;;  %v11838_v47 = vpop.f32.mrb[37].mxu1  ;;  %v5281_v29 = vmul.f32 1.442695, %v4961_v3 }
 0x740   : > { %v8883_v5 = vpop.eup %8882  ;;  %8902 = vrcp.f32 %v5583_v7  ;;  %v5590_v61 = vadd.f32 1.0, %v8881_v14  ;;  %v11842_v60 = vpop.f32.mrb[38].mxu1  ;;  %v4620_v14 = vadd.f32 %v11804_v8, %v11702_v44  ;;  %v5309_v54 = vmul.f32 1.442695, %v4975_v1 }
 0x741   : > { %v8885_v32 = vpop.eup %8884  ;;  %8904 = vrcp.f32 %v5584_v50  ;;  %v5591_v62 = vadd.f32 1.0, %v8883_v5  ;;  %v11847_v17 = vpop.f32.mrb[39].mxu1 }
 0x742   : > { %v8887_v20 = vpop.eup %8886  ;;  %v7461_v30 = vpack.c.bf16 %v8885_v32, %v8873_v19  ;;  %8906 = vrcp.f32 %v5590_v61  ;;  %v5267_v19 = vmul.f32 1.442695, %v4954_v55  ;;  %v4974_v8 = vsub.f32 0.0, %v4620_v14 }
 0x743   : > { %v8889_v26 = vpop.eup %8888  ;;  %8908 = vrcp.f32 %v5591_v62 }
 0x744   : > { %v8891_v39 = vpop.eup %8890  ;;  %6765 = vst [vmem:[%s11019_s14 + $0x48] sm:$0xff] %v7461_v30  ;;  %v7465_v10 = vpack.c.bf16 %v8889_v26, %v8887_v20  ;;  %8910 = vpow2.f32 %v5223_v40  ;;  %v4626_v20 = vadd.f32 %v11813_v23, %v11702_v44  ;;  %v5307_v35 = vmul.f32 1.442695, %v4974_v8 }
 0x745   : > { %v8893_v24 = vpop.eup %8892  ;;  %8912 = vpow2.f32 %v5225_v0  ;;  %v4968_v0 = vsub.f32 0.0, %v4618_v46  ;;  %v4628_v23 = vadd.f32 %v11817_v52, %v11707_v36  ;;  %v4636_v52 = vadd.f32 %v11834_v16, %v11702_v44 }
 0x746   : > { %v8895_v51 = vpop.eup %8894  ;;  %6769 = vst [vmem:[%s11019_s14 + $0x64] sm:$0xff] %v7465_v10  ;;  %v7469_v21 = vpack.c.bf16 %v8893_v24, %v8891_v39  ;;  %8914 = vpow2.f32 %v5237_v49  ;;  %v11851_v58 = vpop.f32.mrb[40].mxu1  ;;  %v4981_v55 = vsub.f32 0.0, %v4626_v20  ;;  %v4638_v16 = vadd.f32 %v11838_v47, %v11707_v36 }
 0x747   : > { %v8897_v11 = vpop.eup %8896  ;;  %8916 = vpow2.f32 %v5239_v37  ;;  %v11853_v43 = vpop.f32.mrb[41].mxu1  ;;  %v4646_v6 = vadd.f32 %v11851_v58, %v11702_v44 }
 0x748   : > { %v8899_v38 = vpop.eup %8898  ;;  %6773 = vst [vmem:[%s11019_s14 + $0x80] sm:$0xff] %v7469_v21  ;;  %v5597_v59 = vadd.f32 1.0, %v8897_v11  ;;  %8918 = vpow2.f32 %v5251_v22  ;;  %v11857_v33 = vpop.f32.mrb[42].mxu1  ;;  %v5295_v22 = vmul.f32 1.442695, %v4968_v0  ;;  %v4632_v11 = vadd.f32 %v11825_v9, %v11707_v36 }
 0x749   : > { %v8901_v15 = vpop.eup %8900  ;;  %v5598_v57 = vadd.f32 1.0, %v8899_v38  ;;  %8920 = vpow2.f32 %v5253_v25  ;;  %v11862_v50 = vpop.f32.mrb[43].mxu1  ;;  %v4648_v8 = vadd.f32 %v11853_v43, %v11707_v36 }
 0x74a   : > { %v8903_v34 = vpop.eup %8902  ;;  %v7473_v18 = vpack.c.bf16 %v8901_v15, %v8895_v51  ;;  %8922 = vrcp.f32 %v5597_v59  ;;  %v4630_v51 = vadd.f32 %v11823_v45, %v11702_v44  ;;  %v4982_v15 = vsub.f32 0.0, %v4628_v23 }
 0x74b   : > { %v8905_v27 = vpop.eup %8904  ;;  %8924 = vrcp.f32 %v5598_v57 }
 0x74c   : > { %v8907_v7 = vpop.eup %8906  ;;  %6777 = vst [vmem:[%s11019_s14 + $0x9c] sm:$0xff] %v7473_v18  ;;  %v7477_v40 = vpack.c.bf16 %v8905_v27, %v8903_v34  ;;  %8926 = vpow2.f32 %v5265_v4  ;;  %v4988_v34 = vsub.f32 0.0, %v4630_v51  ;;  %v4989_v27 = vsub.f32 0.0, %v4632_v11 }
 0x74d   : > { %v8909_v48 = vpop.eup %8908  ;;  %8928 = vpow2.f32 %v5267_v19  ;;  %v5321_v19 = vmul.f32 1.442695, %v4981_v55  ;;  %v4650_v11 = vadd.f32 %v11857_v33, %v11702_v44 }
 0x74e   : > { %v8911_v63 = vpop.eup %8910  ;;  %6781 = vst [vmem:[%s11019_s14 + $0xb8] sm:$0xff] %v7477_v40  ;;  %v7481_v5 = vpack.c.bf16 %v8909_v48, %v8907_v7  ;;  %8930 = vpow2.f32 %v5279_v53  ;;  %v11870_v30 = vpop.f32.mrb[44].mxu1  ;;  %v4995_v40 = vsub.f32 0.0, %v4636_v52  ;;  %v5335_v0 = vmul.f32 1.442695, %v4988_v34 }
 0x74f   : > { %v8913_v42 = vpop.eup %8912  ;;  %v5604_v61 = vadd.f32 1.0, %v8911_v63  ;;  %8932 = vpow2.f32 %v5281_v29  ;;  %v11872_v26 = vpop.f32.mrb[45].mxu1  ;;  %v5323_v63 = vmul.f32 1.442695, %v4982_v15 }
 0x750   : > { %v8915_v32 = vpop.eup %8914  ;;  %6785 = vst [vmem:[%s11019_s14 + $0xd4] sm:$0xff] %v7481_v5  ;;  %v5605_v62 = vadd.f32 1.0, %v8913_v42  ;;  %8934 = vpow2.f32 %v5293_v31  ;;  %v11874_v39 = vpop.f32.mrb[46].mxu1  ;;  %v4640_v31 = vadd.f32 %v11842_v60, %v11702_v44  ;;  %v4642_v5 = vadd.f32 %v11847_v17, %v11707_v36 }
 0x751   : > { %v8917_v12 = vpop.eup %8916  ;;  %8936 = vrcp.f32 %v5604_v61  ;;  %v5611_v28 = vadd.f32 1.0, %v8915_v32  ;;  %v11878_v24 = vpop.f32.mrb[47].mxu1  ;;  %v5337_v32 = vmul.f32 1.442695, %v4989_v27 }
 0x752   : > { %v8919_v49 = vpop.eup %8918  ;;  %8938 = vrcp.f32 %v5605_v62  ;;  %v5612_v2 = vadd.f32 1.0, %v8917_v12  ;;  %v4996_v62 = vsub.f32 0.0, %v4638_v16  ;;  %v5002_v20 = vsub.f32 0.0, %v4640_v31 }
 0x753   : > { %v8921_v37 = vpop.eup %8920  ;;  %8940 = vrcp.f32 %v5611_v28  ;;  %v5618_v41 = vadd.f32 1.0, %v8919_v49  ;;  %v5349_v28 = vmul.f32 1.442695, %v4995_v40 }
 0x754   : > { %v8923_v10 = vpop.eup %8922  ;;  %8942 = vrcp.f32 %v5612_v2  ;;  %v5619_v13 = vadd.f32 1.0, %v8921_v37  ;;  %v5003_v2 = vsub.f32 0.0, %v4642_v5  ;;  %v5351_v43 = vmul.f32 1.442695, %v4996_v62 }
 0x755   : > { %v8925_v25 = vpop.eup %8924  ;;  %8944 = vrcp.f32 %v5618_v41  ;;  %v5009_v41 = vsub.f32 0.0, %v4646_v6  ;;  %v5363_v55 = vmul.f32 1.442695, %v5002_v20 }
 0x756   : > { %v8927_v21 = vpop.eup %8926  ;;  %v7485_v56 = vpack.c.bf16 %v8925_v25, %v8923_v10  ;;  %8946 = vrcp.f32 %v5619_v13  ;;  %v11887_v18 = vpop.f32.mrb[48].mxu1  ;;  %v5010_v13 = vsub.f32 0.0, %v4648_v8 }
 0x757   : > { %v8929_v3 = vpop.eup %8928  ;;  %v5625_v38 = vadd.f32 1.0, %v8927_v21  ;;  %8948 = vpow2.f32 %v5295_v22  ;;  %v11891_v29 = vpop.f32.mrb[49].mxu1  ;;  %v4666_v20 = vadd.f32 %v11887_v18, %v11702_v44 }
 0x758   : > { %v8931_v59 = vpop.eup %8930  ;;  %6789 = vst [vmem:[%s11019_s14 + $0xf0] sm:$0xff] %v7485_v56  ;;  %v5626_v4 = vadd.f32 1.0, %v8929_v3  ;;  %8950 = vpow2.f32 %v5307_v35  ;;  %v11895_v14 = vpop.f32.mrb[50].mxu1  ;;  %v5365_v56 = vmul.f32 1.442695, %v5003_v2 }
 0x759   : > { %v8933_v57 = vpop.eup %8932  ;;  %8952 = vrcp.f32 %v5625_v38  ;;  %v5632_v45 = vadd.f32 1.0, %v8931_v59  ;;  %v11899_v42 = vpop.f32.mrb[51].mxu1  ;;  %v5377_v59 = vmul.f32 1.442695, %v5009_v41  ;;  %v5379_v15 = vmul.f32 1.442695, %v5010_v13 }
 0x75a   : > { %v8935_v9 = vpop.eup %8934  ;;  %8954 = vrcp.f32 %v5626_v4  ;;  %v5633_v53 = vadd.f32 1.0, %v8933_v57  ;;  %v4652_v4 = vadd.f32 %v11862_v50, %v11707_v36  ;;  %v4656_v50 = vadd.f32 %v11870_v30, %v11702_v44 }
 0x75b   : > { %v8937_v46 = vpop.eup %8936  ;;  %8956 = vrcp.f32 %v5632_v45  ;;  %v5639_v7 = vadd.f32 1.0, %v8935_v9  ;;  %v5016_v9 = vsub.f32 0.0, %v4650_v11  ;;  %v4668_v41 = vadd.f32 %v11891_v29, %v11707_v36 }
 0x75c   : > { %v8939_v48 = vpop.eup %8938  ;;  %8958 = vrcp.f32 %v5633_v53  ;;  %v5017_v53 = vsub.f32 0.0, %v4652_v4  ;;  %v5023_v8 = vsub.f32 0.0, %v4656_v50 }
 0x75d   : > { %v8941_v47 = vpop.eup %8940  ;;  %v7489_v61 = vpack.c.bf16 %v8939_v48, %v8937_v46  ;;  %8960 = vrcp.f32 %v5639_v7 }
 0x75e   : > { %v8943_v60 = vpop.eup %8942  ;;  %8962 = vpow2.f32 %v5309_v54  ;;  %v11907_v22 = vpop.f32.mrb[52].mxu1  ;;  %v5393_v30 = vmul.f32 1.442695, %v5017_v53 }
 0x75f   : > { %v8945_v12 = vpop.eup %8944  ;;  %6793 = vst [vmem:[%s11019_s14 + $0x10c] sm:$0xff] %v7489_v61  ;;  %v7493_v17 = vpack.c.bf16 %v8943_v60, %v8941_v47  ;;  %8964 = vpow2.f32 %v5321_v19  ;;  %v11909_v35 = vpop.f32.mrb[53].mxu1  ;;  %v4658_v47 = vadd.f32 %v11872_v26, %v11707_v36  ;;  %v5391_v60 = vmul.f32 1.442695, %v5016_v9 }
 0x760   : > { %v8947_v49 = vpop.eup %8946  ;;  %8966 = vpow2.f32 %v5323_v63  ;;  %v11912_v51 = vpop.f32.mrb[54].mxu1  ;;  %v4662_v26 = vadd.f32 %v11878_v24, %v11707_v36  ;;  %v4678_v53 = vadd.f32 %v11909_v35, %v11707_v36 }
 0x761   : > { %v8949_v37 = vpop.eup %8948  ;;  %6797 = vst [vmem:[%s11019_s14 + $0x128] sm:$0xff] %v7493_v17  ;;  %v7497_v58 = vpack.c.bf16 %v8947_v49, %v8945_v12  ;;  %8968 = vpow2.f32 %v5335_v0  ;;  %v11916_v3 = vpop.f32.mrb[55].mxu1  ;;  %v4660_v12 = vadd.f32 %v11874_v39, %v11702_v44  ;;  %v5024_v2 = vsub.f32 0.0, %v4658_v47 }
 0x762   : > { %v8951_v1 = vpop.eup %8950  ;;  %v5640_v10 = vadd.f32 1.0, %v8949_v37  ;;  %8970 = vpow2.f32 %v5337_v32  ;;  %v4680_v50 = vadd.f32 %v11912_v51, %v11702_v44  ;;  %v5052_v35 = vsub.f32 0.0, %v4678_v53 }
 0x763   : > { %v8953_v23 = vpop.eup %8952  ;;  %6801 = vst [vmem:[%s11019_s14 + $0x144] sm:$0xff] %v7497_v58  ;;  %v5646_v25 = vadd.f32 1.0, %v8951_v1  ;;  %8972 = vpow2.f32 %v5349_v28  ;;  %v5030_v24 = vsub.f32 0.0, %v4660_v12  ;;  %v5407_v29 = vmul.f32 1.442695, %v5024_v2 }
 0x764   : > { %v8955_v21 = vpop.eup %8954  ;;  %8974 = vrcp.f32 %v5640_v10 }
 0x765   : > { %v8957_v38 = vpop.eup %8956  ;;  %v7501_v52 = vpack.c.bf16 %v8955_v21, %v8953_v23  ;;  %8976 = vrcp.f32 %v5646_v25  ;;  %v5031_v25 = vsub.f32 0.0, %v4662_v26 }
 0x766   : > { %v8959_v54 = vpop.eup %8958  ;;  %8978 = vpow2.f32 %v5351_v43  ;;  %v11922_v27 = vpop.f32.mrb[56].mxu1  ;;  %v5405_v43 = vmul.f32 1.442695, %v5023_v8 }
 0x767   : > { %v8961_v57 = vpop.eup %8960  ;;  %6805 = vst [vmem:[%s11019_s14 + $0x160] sm:$0xff] %v7501_v52  ;;  %v7505_v45 = vpack.c.bf16 %v8959_v54, %v8957_v38  ;;  %8980 = vpow2.f32 %v5363_v55  ;;  %v11926_v7 = vpop.f32.mrb[57].mxu1  ;;  %v5037_v55 = vsub.f32 0.0, %v4666_v20  ;;  %v4670_v38 = vadd.f32 %v11895_v14, %v11702_v44 }
 0x768   : > { %v8963_v19 = vpop.eup %8962  ;;  %8982 = vpow2.f32 %v5365_v56  ;;  %v11928_v48 = vpop.f32.mrb[58].mxu1  ;;  %v5038_v54 = vsub.f32 0.0, %v4668_v41  ;;  %v5421_v14 = vmul.f32 1.442695, %v5031_v25  ;;  %v5463_v20 = vmul.f32 1.442695, %v5052_v35 }
 0x769   : > { %v8965_v33 = vpop.eup %8964  ;;  %6809 = vst [vmem:[%s11019_s14 + $0x17c] sm:$0xff] %v7505_v45  ;;  %v5647_v34 = vadd.f32 1.0, %v8963_v19  ;;  %8984 = vpow2.f32 %v5377_v59  ;;  %v11932_v61 = vpop.f32.mrb[59].mxu1  ;;  %v5419_v19 = vmul.f32 1.442695, %v5030_v24  ;;  %v4686_v41 = vadd.f32 %v11922_v27, %v11702_v44 }
 0x76a   : > { %v8967_v16 = vpop.eup %8966  ;;  %v5653_v46 = vadd.f32 1.0, %v8965_v33  ;;  %8986 = vpow2.f32 %v5379_v15  ;;  %v4672_v15 = vadd.f32 %v11899_v42, %v11707_v36  ;;  %v4676_v33 = vadd.f32 %v11907_v22, %v11702_v44 }
 0x76b   : > { %v8969_v40 = vpop.eup %8968  ;;  %8988 = vrcp.f32 %v5647_v34  ;;  %v5654_v31 = vadd.f32 1.0, %v8967_v16  ;;  %v5433_v9 = vmul.f32 1.442695, %v5037_v55  ;;  %v5044_v42 = vsub.f32 0.0, %v4670_v38 }
 0x76c   : > { %v8971_v63 = vpop.eup %8970  ;;  %8990 = vrcp.f32 %v5653_v46  ;;  %v5660_v5 = vadd.f32 1.0, %v8969_v40  ;;  %v5435_v22 = vmul.f32 1.442695, %v5038_v54  ;;  %v5051_v47 = vsub.f32 0.0, %v4676_v33 }
 0x76d   : > { %v8973_v0 = vpop.eup %8972  ;;  %8992 = vrcp.f32 %v5654_v31  ;;  %v5661_v6 = vadd.f32 1.0, %v8971_v63  ;;  %v5045_v31 = vsub.f32 0.0, %v4672_v15  ;;  %v5065_v55 = vsub.f32 0.0, %v4686_v41 }
 0x76e   : > { %v8975_v32 = vpop.eup %8974  ;;  %8994 = vrcp.f32 %v5660_v5  ;;  %v5667_v62 = vadd.f32 1.0, %v8973_v0  ;;  %v11943_v39 = vpop.f32.mrb[60].mxu1  ;;  %v4688_v27 = vadd.f32 %v11926_v7, %v11707_v36  ;;  %v4690_v15 = vadd.f32 %v11928_v48, %v11702_v44 }
 0x76f   : > { %v8977_v17 = vpop.eup %8976  ;;  %v7509_v28 = vpack.c.bf16 %v8975_v32, %v8961_v57  ;;  %8996 = vrcp.f32 %v5661_v6  ;;  %v11945_v13 = vpop.f32.mrb[61].mxu1  ;;  %v5058_v32 = vsub.f32 0.0, %v4680_v50  ;;  %v5449_v8 = vmul.f32 1.442695, %v5045_v31 }
 0x770   : > { %v8979_v49 = vpop.eup %8978  ;;  %8998 = vrcp.f32 %v5667_v62  ;;  %v11947_v21 = vpop.f32.mrb[62].mxu1  ;;  %v4692_v33 = vadd.f32 %v11932_v61, %v11707_v36  ;;  %v5066_v7 = vsub.f32 0.0, %v4688_v27  ;;  %v4698_v48 = vadd.f32 %v11945_v13, %v11707_v36 }
 0x771   : > { %v8981_v37 = vpop.eup %8980  ;;  %6813 = vst [vmem:[%s11019_s14 + $0x198] sm:$0xff] %v7509_v28  ;;  %v5668_v58 = vadd.f32 1.0, %v8979_v49  ;;  %9000 = vpow2.f32 %v5391_v60  ;;  %v11951_v52 = vpop.f32.mrb[63].mxu1  ;;  %v5461_v28 = vmul.f32 1.442695, %v5051_v47  ;;  %v4682_v49 = vadd.f32 %v11916_v3, %v11707_v36 }
 0x772   : > { %v8983_v1 = vpop.eup %8982  ;;  %v5674_v10 = vadd.f32 1.0, %v8981_v37  ;;  %9002 = vpow2.f32 %v5393_v30  ;;  %v5447_v30 = vmul.f32 1.442695, %v5044_v42  ;;  %v5072_v42 = vsub.f32 0.0, %v4690_v15 }
 0x773   : > { %v8985_v18 = vpop.eup %8984  ;;  %9004 = vrcp.f32 %v5668_v58  ;;  %v5675_v23 = vadd.f32 1.0, %v8983_v1  ;;  %v5475_v58 = vmul.f32 1.442695, %v5058_v32  ;;  %v4700_v50 = vadd.f32 %v11947_v21, %v11702_v44 }
 0x774   : > { %v8987_v56 = vpop.eup %8986  ;;  %9006 = vrcp.f32 %v5674_v10  ;;  %v5681_v11 = vadd.f32 1.0, %v8985_v18  ;;  %v4702_v35 = vadd.f32 %v11951_v52, %v11707_v36  ;;  %v5503_v21 = vmul.f32 1.442695, %v5072_v42 }
 0x775   : > { %v8989_v59 = vpop.eup %8988  ;;  %9008 = vrcp.f32 %v5675_v23  ;;  %v5682_v4 = vadd.f32 1.0, %v8987_v56  ;;  %v5059_v23 = vsub.f32 0.0, %v4682_v49 }
 0x776   : > { %v8991_v57 = vpop.eup %8990  ;;  %v7513_v45 = vpack.c.bf16 %v8989_v59, %v8977_v17  ;;  %9010 = vrcp.f32 %v5681_v11 }
 0x777   : > { %v8993_v34 = vpop.eup %8992  ;;  %9012 = vrcp.f32 %v5682_v4  ;;  %v5477_v54 = vmul.f32 1.442695, %v5059_v23 }
 0x778   : > { %v8995_v16 = vpop.eup %8994  ;;  %6817 = vst [vmem:[%s11019_s14 + $0x1b4] sm:$0xff] %v7513_v45  ;;  %v7517_v46 = vpack.c.bf16 %v8993_v34, %v8991_v57  ;;  %9014 = vpow2.f32 %v5405_v43 }
 0x779   : > { %v8997_v40 = vpop.eup %8996  ;;  %9016 = vpow2.f32 %v5407_v29 }
 0x77a   : > { %v8999_v63 = vpop.eup %8998  ;;  %6821 = vst [vmem:[%s11019_s14 + $0x1d0] sm:$0xff] %v7517_v46  ;;  %v7521_v5 = vpack.c.bf16 %v8997_v40, %v8995_v16  ;;  %9018 = vpow2.f32 %v5419_v19  ;;  %v5489_v19 = vmul.f32 1.442695, %v5065_v55 }
 0x77b   : > { %v9001_v0 = vpop.eup %9000  ;;  %9020 = vpow2.f32 %v5421_v14  ;;  %v4696_v14 = vadd.f32 %v11943_v39, %v11702_v44 }
 0x77c   : > { %v9003_v6 = vpop.eup %9002  ;;  %6825 = vst [vmem:[%s11019_s14 + $0x1ec] sm:$0xff] %v7521_v5  ;;  %v5688_v60 = vadd.f32 1.0, %v9001_v0  ;;  %9022 = vpow2.f32 %v5433_v9  ;;  %v5080_v0 = vsub.f32 0.0, %v4698_v48 }
 0x77d   : > { %v9005_v51 = vpop.eup %9004  ;;  %v5689_v62 = vadd.f32 1.0, %v9003_v6  ;;  %9024 = vpow2.f32 %v5435_v22  ;;  %v5073_v22 = vsub.f32 0.0, %v4692_v33  ;;  %v5079_v5 = vsub.f32 0.0, %v4696_v14 }
 0x77e   : > { %v9007_v12 = vpop.eup %9006  ;;  %v7525_v17 = vpack.c.bf16 %v9005_v51, %v8999_v63  ;;  %9026 = vrcp.f32 %v5688_v60  ;;  %v5491_v63 = vmul.f32 1.442695, %v5066_v7  ;;  %v5086_v60 = vsub.f32 0.0, %v4700_v50 }
 0x77f   : > { %v9009_v26 = vpop.eup %9008  ;;  %9028 = vrcp.f32 %v5689_v62  ;;  %v5505_v32 = vmul.f32 1.442695, %v5073_v22 }
 0x780   : > { %v9011_v2 = vpop.eup %9010  ;;  %6829 = vst [vmem:[%s11019_s14 + $0x208] sm:$0xff] %v7525_v17  ;;  %v7529_v37 = vpack.c.bf16 %v9009_v26, %v9007_v12  ;;  %9030 = vpow2.f32 %v5447_v30  ;;  %v5519_v17 = vmul.f32 1.442695, %v5080_v0  ;;  %v5531_v52 = vmul.f32 1.442695, %v5086_v60 }
 0x781   : > { %v9013_v1 = vpop.eup %9012  ;;  %9032 = vpow2.f32 %v5449_v8  ;;  %v5517_v8 = vmul.f32 1.442695, %v5079_v5 }
 0x782   : > { %v9015_v10 = vpop.eup %9014  ;;  %6833 = vst [vmem:[%s11019_s14 + $0x224] sm:$0xff] %v7529_v37  ;;  %v7533_v43 = vpack.c.bf16 %v9013_v1, %v9011_v2  ;;  %9034 = vpow2.f32 %v5461_v28  ;;  %v5087_v28 = vsub.f32 0.0, %v4702_v35 }
 0x783   : > { %v9017_v24 = vpop.eup %9016  ;;  %v5695_v18 = vadd.f32 1.0, %v9015_v10  ;;  %9036 = vpow2.f32 %v5463_v20 }
 0x784   : > { %v9019_v3 = vpop.eup %9018  ;;  %6837 = vst [vmem:[%s11019_s14 + $0x240] sm:$0xff] %v7533_v43  ;;  %v5696_v25 = vadd.f32 1.0, %v9017_v24  ;;  %9038 = vpow2.f32 %v5475_v58  ;;  %v5533_v41 = vmul.f32 1.442695, %v5087_v28 }
 0x785   : > { %v9021_v56 = vpop.eup %9020  ;;  %9040 = vrcp.f32 %v5695_v18  ;;  %v5702_v11 = vadd.f32 1.0, %v9019_v3 }
 0x786   : > { %v9023_v29 = vpop.eup %9022  ;;  %9042 = vrcp.f32 %v5696_v25  ;;  %v5703_v38 = vadd.f32 1.0, %v9021_v56 }
 0x787   : > { %v9025_v59 = vpop.eup %9024  ;;  %9044 = vrcp.f32 %v5702_v11  ;;  %v5709_v4 = vadd.f32 1.0, %v9023_v29 }
 0x788   : > { %v9027_v57 = vpop.eup %9026  ;;  %9046 = vrcp.f32 %v5703_v38  ;;  %v5710_v45 = vadd.f32 1.0, %v9025_v59 }
 0x789   : > { %v9029_v34 = vpop.eup %9028  ;;  %9048 = vrcp.f32 %v5709_v4 }
 0x78a   : > { %v9031_v9 = vpop.eup %9030  ;;  %v7537_v53 = vpack.c.bf16 %v9029_v34, %v9027_v57  ;;  %9050 = vrcp.f32 %v5710_v45 }
 0x78b   : > { %v9033_v16 = vpop.eup %9032  ;;  %v5716_v46 = vadd.f32 1.0, %v9031_v9  ;;  %9052 = vpow2.f32 %v5477_v54 }
 0x78c   : > { %v9035_v61 = vpop.eup %9034  ;;  %6841 = vst [vmem:[%s11019_s14 + $0x25c] sm:$0xff] %v7537_v53  ;;  %v5717_v40 = vadd.f32 1.0, %v9033_v16  ;;  %9054 = vpow2.f32 %v5489_v19 }
 0x78d   : > { %v9037_v31 = vpop.eup %9036  ;;  %9056 = vrcp.f32 %v5716_v46  ;;  %v5723_v39 = vadd.f32 1.0, %v9035_v61 }
 0x78e   : > { %v9039_v47 = vpop.eup %9038  ;;  %9058 = vrcp.f32 %v5717_v40  ;;  %v5724_v13 = vadd.f32 1.0, %v9037_v31 }
 0x78f   : > { %v9041_v6 = vpop.eup %9040  ;;  %9060 = vrcp.f32 %v5723_v39  ;;  %v5730_v44 = vadd.f32 1.0, %v9039_v47 }
 0x790   : > { %v9043_v30 = vpop.eup %9042  ;;  %9062 = vrcp.f32 %v5724_v13 }
 0x791   : > { %v9045_v51 = vpop.eup %9044  ;;  %v7541_v62 = vpack.c.bf16 %v9043_v30, %v9041_v6  ;;  %9064 = vrcp.f32 %v5730_v44 }
 0x792   : > { %v9047_v12 = vpop.eup %9046  ;;  %9066 = vpow2.f32 %v5491_v63 }
 0x793   : > { %v9049_v26 = vpop.eup %9048  ;;  %6845 = vst [vmem:[%s11019_s14 + $0x278] sm:$0xff] %v7541_v62  ;;  %v7545_v36 = vpack.c.bf16 %v9047_v12, %v9045_v51  ;;  %9068 = vpow2.f32 %v5503_v21 }
 0x794   : > { %v9051_v20 = vpop.eup %9050  ;;  %9070 = vpow2.f32 %v5505_v32 }
 0x795   : > { %v9053_v49 = vpop.eup %9052  ;;  %6849 = vst [vmem:[%s11019_s14 + $0x294] sm:$0xff] %v7545_v36  ;;  %v7549_v2 = vpack.c.bf16 %v9051_v20, %v9049_v26  ;;  %9072 = vpow2.f32 %v5517_v8 }
 0x796   : > { %v9055_v37 = vpop.eup %9054  ;;  %v5731_v58 = vadd.f32 1.0, %v9053_v49  ;;  %9074 = vpow2.f32 %v5519_v17 }
 0x797   : > { %v9057_v1 = vpop.eup %9056  ;;  %6853 = vst [vmem:[%s11019_s14 + $0x2b0] sm:$0xff] %v7549_v2  ;;  %9076 = vpow2.f32 %v5531_v52  ;;  %v5737_v18 = vadd.f32 1.0, %v9055_v37 }
 0x798   : > { %v9059_v10 = vpop.eup %9058  ;;  %9078 = vrcp.f32 %v5731_v58 }
 0x799   : > { %v9061_v43 = vpop.eup %9060  ;;  %v7553_v24 = vpack.c.bf16 %v9059_v10, %v9057_v1  ;;  %9080 = vpow2.f32 %v5533_v41 }
 0x79a   : > { %v9063_v23 = vpop.eup %9062  ;;  %9082 = vrcp.f32 %v5737_v18 }
 0x79b   : > { %v9065_v3 = vpop.eup %9064  ;;  %6857 = vst [vmem:[%s11019_s14 + $0x2cc] sm:$0xff] %v7553_v24  ;;  %v7557_v25 = vpack.c.bf16 %v9063_v23, %v9061_v43 }
 0x79c   : > { %v9067_v55 = vpop.eup %9066 }
 0x79d   : > { %v9069_v56 = vpop.eup %9068  ;;  %6861 = vst [vmem:[%s11019_s14 + $0x2e8] sm:$0xff] %v7557_v25  ;;  %v5738_v11 = vadd.f32 1.0, %v9067_v55 }
 0x79e   : > { %v9071_v27 = vpop.eup %9070  ;;  %v5744_v29 = vadd.f32 1.0, %v9069_v56 }
 0x79f   : > { %v9073_v38 = vpop.eup %9072  ;;  %9084 = vrcp.f32 %v5738_v11  ;;  %v5745_v59 = vadd.f32 1.0, %v9071_v27 }
 0x7a0   : > { %v9075_v4 = vpop.eup %9074  ;;  %9086 = vrcp.f32 %v5744_v29  ;;  %v5751_v54 = vadd.f32 1.0, %v9073_v38 }
 0x7a1   : > { %v9077_v15 = vpop.eup %9076  ;;  %9088 = vrcp.f32 %v5745_v59  ;;  %v5752_v57 = vadd.f32 1.0, %v9075_v4 }
 0x7a2   : > { %v9079_v45 = vpop.eup %9078  ;;  %9090 = vrcp.f32 %v5751_v54  ;;  %v5758_v19 = vadd.f32 1.0, %v9077_v15 }
 0x7a3   : > { %v7561_v33 = vpack.c.bf16 %v9079_v45, %v9065_v3  ;;  %9092 = vrcp.f32 %v5752_v57  ;;  %v9081_v34 = vpop.eup %9080 }
 0x7a4   : > { %9094 = vrcp.f32 %v5758_v19  ;;  %v5759_v7 = vadd.f32 1.0, %v9081_v34  ;;  %v9083_v14 = vpop.eup %9082 }
 0x7a5   : > { %6865 = vst [vmem:[%s11019_s14 + $0x304] sm:$0xff] %v7561_v33 }
 0x7a6   : > { %9096 = vrcp.f32 %v5759_v7 }
 0x7a9   : > { %v9085_v9 = vpop.eup %9084 }
 0x7aa   : > { %v9087_v53 = vpop.eup %9086  ;;  %v7565_v48 = vpack.c.bf16 %v9085_v9, %v9083_v14 }
 0x7ab   : > { %v9089_v16 = vpop.eup %9088 }
 0x7ac   : > { %v9091_v46 = vpop.eup %9090  ;;  %6869 = vst [vmem:[%s11019_s14 + $0x320] sm:$0xff] %v7565_v48  ;;  %v7569_v42 = vpack.c.bf16 %v9089_v16, %v9087_v53 }
 0x7ad   : > { %v9093_v50 = vpop.eup %9092 }
 0x7ae   : > { %6873 = vst [vmem:[%s11019_s14 + $0x33c] sm:$0xff] %v7569_v42  ;;  %v7573_v61 = vpack.c.bf16 %v9093_v50, %v9091_v46  ;;  %v9095_v40 = vpop.eup %9094 }
 0x7b0   : > { %6877 = vst [vmem:[%s11019_s14 + $0x358] sm:$0xff] %v7573_v61  ;;  %v9097_v22 = vpop.eup %9096 }
 0x7b1   : > { %v7577_v31 = vpack.c.bf16 %v9097_v22, %v9095_v40 }
 0x7b3   : > { %6881 = vst [vmem:[%s11019_s14 + $0x374] sm:$0xff] %v7577_v31 }
 0x7b4 PF: > { %s22_s17 = sadd.s32 1, %s9106_s17  }
 0x7b5   : > { %p19_p4 = scmp.ge.s32.totalorder %s22_s17, 4  }
 0x7b7   :  { %21 = sbr.rel (!%p19_p4) target bundleno = 1 (0x1), region = 105 }

</bundles_post_ra>
